<compile_context>
chip_gen: v7x
topology: tpu7x:2x2x1
jax: 0.10.0
libtpu: 0.0.40
codegen_flags: <defaults>
</compile_context>

<pallas_src>
import functools

import jax
import jax.numpy as jnp
from jax import lax
from jax.experimental import pallas as pl
from jax.experimental.pallas import tpu as pltpu

EPS = 1e-5
LANE = 128

# ---- static geometry (input length pinned to 1000 by fc1 = 8*14 features) --
L_IN = 1000
WINP = 512                       # merged layer-1 window (covers K<=300 + 127)
NTILES = 8                       # ceil(901 / 128) output tiles per branch
LXPAD = (NTILES - 1) * LANE + WINP          # 1408 = 11 * 128
L1_LOUT = (901, 801, 701)
L1_LEN = sum(L1_LOUT)            # 2403
L2_POOL = 599                    # conv2 (k=8,s=2) -> 1198, maxpool -> 599
P2_HALF = 640                    # lane-padded pooled width (5 * 128)
Z3_W = 568                       # stride-1 conv3 width computed in-kernel
L3_POOL = 71                     # conv3 (k=32,s=4) -> 142, maxpool -> 71
Z4_W = 56                        # stride-1 conv4 width computed in-kernel
L4_POOL = 14                     # conv4 (k=16,s=2) -> 28, maxpool -> 14


def bn_affine(gamma, beta, mean, var):
    scale = gamma / jnp.sqrt(var + EPS)
    shift = beta - mean * scale
    return scale, shift


# ----------------------------------------------------------------------------
# One-time weight preparation (hoisted out of the per-forward path).
# ----------------------------------------------------------------------------
def prepare_params(p, out_channel):
    cin = p["c11_w"].shape[1]
    s1, t1 = bn_affine(p["bn1_g"], p["bn1_b"], p["bn1_m"], p["bn1_v"])
    s2, t2 = bn_affine(p["bn2_g"], p["bn2_b"], p["bn2_m"], p["bn2_v"])
    s3, t3 = bn_affine(p["bn3_g"], p["bn3_b"], p["bn3_m"], p["bn3_v"])
    s4, t4 = bn_affine(p["bn4_g"], p["bn4_b"], p["bn4_m"], p["bn4_v"])
    s5, t5 = bn_affine(p["bn5_g"], p["bn5_b"], p["bn5_m"], p["bn5_v"])

    # Layer 1: merged banded-Toeplitz weight for the three branches.
    # Row index = ci*WINP + m (window offset), column = branch*128 + p.
    blocks, biases = [], []
    for (nw, nb), K in zip((("c11_w", "c11_b"), ("c12_w", "c12_b"),
                            ("c13_w", "c13_b")), (100, 200, 300)):
        w = p[nw][0].astype(jnp.float32) * s1[0]                 # (cin, K)
        m = jnp.arange(WINP)[:, None]
        q = jnp.arange(LANE)[None, :]
        k = m - q
        valid = (k >= 0) & (k < K)
        blocks.append(jnp.where(valid[None], w[:, jnp.clip(k, 0, K - 1)], 0.0))
        biases.append(p[nb][0] * s1[0] + t1[0])
    wt1 = jnp.concatenate(blocks, axis=-1).reshape(cin * WINP, 3 * LANE)
    b1 = jnp.repeat(jnp.stack(biases), LANE)[None, :]            # (1, 384)

    # conv2 (Cin=1) with bn2 folded; bias pre-broadcast to full lane width.
    w2 = p["c2_w"][:, 0, :] * s2[:, None]                        # (8, 8)
    b2 = jnp.tile((p["c2_b"] * s2 + t2)[:, None], (1, P2_HALF))  # (8, 640)

    # conv3 with bn3 folded; per-tap (k, cout, cin) stack + subsample matrix.
    w3 = jnp.transpose(p["c3_w"] * s3[:, None, None], (2, 0, 1))  # (32, 8, 8)
    b3 = jnp.tile((p["c3_b"] * s3 + t3)[:, None], (1, LANE))
    u3 = jnp.arange(L3_POOL)
    sel3 = (jnp.zeros((Z3_W, 2 * LANE), jnp.float32)
            .at[8 * u3, u3].set(1.0)
            .at[8 * u3 + 4, LANE + u3].set(1.0))

    # conv4 with bn4 folded.
    w4 = jnp.transpose(p["c4_w"] * s4[:, None, None], (2, 0, 1))  # (16, 8, 8)
    b4 = jnp.tile((p["c4_b"] * s4 + t4)[:, None], (1, LANE))
    u4 = jnp.arange(L4_POOL)
    sel4 = (jnp.zeros((Z4_W, 2 * LANE), jnp.float32)
            .at[4 * u4, u4].set(1.0)
            .at[4 * u4 + 2, LANE + u4].set(1.0))

    # fc1 (+bn5 folded) split per input channel (flatten is channel-major),
    # fc2, everything zero-padded to 128 lanes.
    w1f = (p["fc1_w"] * s5[:, None]).T.reshape(8, L4_POOL, 112)
    w1 = jnp.zeros((8, LANE, LANE), jnp.float32).at[:, :L4_POOL, :112].set(w1f)
    bb1 = jnp.zeros((1, LANE), jnp.float32).at[0, :112].set(p["fc1_b"] * s5 + t5)
    wf2 = jnp.zeros((LANE, LANE), jnp.float32).at[:112, :out_channel].set(
        p["fc2_w"].T)
    bf2 = jnp.zeros((1, LANE), jnp.float32).at[0, :out_channel].set(p["fc2_b"])

    return dict(
        wt1=wt1.astype(jnp.bfloat16), b1=b1.astype(jnp.float32),
        w2=w2.astype(jnp.float32), b2=b2.astype(jnp.float32),
        w3=w3.astype(jnp.float32), b3=b3.astype(jnp.float32),
        sel3=sel3.astype(jnp.float32),
        w4=w4.astype(jnp.float32), b4=b4.astype(jnp.float32),
        sel4=sel4.astype(jnp.float32),
        w1=w1, bb1=bb1, wf2=wf2, bf2=bf2,
    )


# ----------------------------------------------------------------------------
# Kernel 1: merged layer-1 Toeplitz matmul (+bn1+sigmoid), tiled output.
# ----------------------------------------------------------------------------
def _l1_kernel(xw_ref, wt_ref, b_ref, o_ref):
    acc = jnp.dot(xw_ref[0], wt_ref[...], preferred_element_type=jnp.float32)
    o_ref[0] = jax.nn.sigmoid(acc + b_ref[...])


# ----------------------------------------------------------------------------
# Kernel 2: fused conv2/conv3/conv4 (+BN+sigmoid+maxpool) + fc1+bn5+sig + fc2.
# ----------------------------------------------------------------------------
def _tail_kernel(p2_ref, w2_ref, b2_ref, w3_ref, sel3_ref, b3_ref,
                 w4_ref, sel4_ref, b4_ref, w1_ref, b1_ref, wf2_ref, bf2_ref,
                 o_ref, h2_scr, h3_scr):
    # conv2 + bn2 + sigmoid + maxpool(2,2): even/odd patch halves share the
    # folded bias, so max-before-sigmoid is exact (sigmoid is monotone).
    acc2 = jnp.dot(w2_ref[...], p2_ref[0], preferred_element_type=jnp.float32)
    h2_scr[...] = jax.nn.sigmoid(
        jnp.maximum(acc2[:, :P2_HALF], acc2[:, P2_HALF:]) + b2_ref[...])

    # conv3: stride-1 banded conv (contiguous lane slices of the scratch) then
    # stride-8 even/odd subsample via a 0/1 selection matmul.
    z3 = jnp.zeros((8, Z3_W), jnp.float32)
    for k in range(32):
        z3 = z3 + jnp.dot(w3_ref[k], h2_scr[:, k:k + Z3_W],
                          preferred_element_type=jnp.float32)
    sub3 = jnp.dot(z3, sel3_ref[...], preferred_element_type=jnp.float32)
    h3_scr[...] = jax.nn.sigmoid(
        jnp.maximum(sub3[:, :LANE], sub3[:, LANE:]) + b3_ref[...])

    # conv4: same scheme with a stride-4 subsample.
    z4 = jnp.zeros((8, Z4_W), jnp.float32)
    for k in range(16):
        z4 = z4 + jnp.dot(w4_ref[k], h3_scr[:, k:k + Z4_W],
                          preferred_element_type=jnp.float32)
    sub4 = jnp.dot(z4, sel4_ref[...], preferred_element_type=jnp.float32)
    h4 = jax.nn.sigmoid(
        jnp.maximum(sub4[:, :LANE], sub4[:, LANE:]) + b4_ref[...])   # (8, 128)

    # flatten(C=8, L=14) + fc1(+bn5) + sigmoid as 8 per-channel matmuls
    # (weight rows >= 14 are zero, so the padded lanes of h4 never contribute).
    a1 = jnp.zeros((1, LANE), jnp.float32)
    for c in range(8):
        a1 = a1 + jnp.dot(h4[c:c + 1, :], w1_ref[c],
                          preferred_element_type=jnp.float32)
    h5 = jax.nn.sigmoid(a1 + b1_ref[...])

    # fc2
    o_ref[0] = jnp.dot(h5, wf2_ref[...],
                       preferred_element_type=jnp.float32) + bf2_ref[...]


# ----------------------------------------------------------------------------
# Forward pass
# ----------------------------------------------------------------------------
def mccnn_forward(x, prep, out_channel):
    B, cin, L = x.shape
    assert L == L_IN, "fc1 (8*14 features) pins the input length to 1000"

    # Layer-1 window matrix: 128-aligned overlapping windows built with plain
    # reshapes/slices (no gathers, no in-kernel sub-vreg copies).
    xp = jnp.pad(x.astype(jnp.float32), ((0, 0), (0, 0), (0, LXPAD - L)))
    ch = xp.reshape(B, cin, LXPAD // LANE, LANE)
    xw = jnp.stack([ch[:, :, j:j + NTILES, :] for j in range(WINP // LANE)],
                   axis=3)                               # (B, cin, 8, 4, 128)
    xw = xw.transpose(0, 2, 1, 3, 4).reshape(B, NTILES, cin * WINP)
    xw = xw.astype(jnp.bfloat16)

    y = pl.pallas_call(
        _l1_kernel,
        out_shape=jax.ShapeDtypeStruct((B, NTILES, 3 * LANE), jnp.float32),
        grid=(B,),
        in_specs=[
            pl.BlockSpec((1, NTILES, cin * WINP), lambda b: (b, 0, 0)),
            pl.BlockSpec((cin * WINP, 3 * LANE), lambda b: (0, 0)),
            pl.BlockSpec((1, 3 * LANE), lambda b: (0, 0)),
        ],
        out_specs=pl.BlockSpec((1, NTILES, 3 * LANE), lambda b: (b, 0, 0)),
        compiler_params=pltpu.CompilerParams(
            dimension_semantics=("parallel",)),
    )(xw, prep["wt1"], prep["b1"])

    # Un-tile the (8, 3*128) blocks into the concatenated 2403-long line.
    y3 = y.reshape(B, NTILES, 3, LANE).transpose(0, 2, 1, 3)
    y3 = y3.reshape(B, 3, NTILES * LANE)
    h1 = jnp.concatenate([y3[:, 0, :L1_LOUT[0]],
                          y3[:, 1, :L1_LOUT[1]],
                          y3[:, 2, :L1_LOUT[2]]], axis=-1)       # (B, 2403)

    # conv2 even/odd patch matrices via strided lax.slice (affine indices).
    h1p = jnp.pad(h1, ((0, 0), (0, 2432 - L1_LEN)))

    def stack_patches(off):
        rows = [lax.slice(h1p, (0, off + k), (B, off + k + 4 * L2_POOL),
                          (1, 4)) for k in range(8)]
        pt = jnp.stack(rows, axis=1)                             # (B, 8, 599)
        return jnp.pad(pt, ((0, 0), (0, 0), (0, P2_HALF - L2_POOL)))

    p2 = jnp.concatenate([stack_patches(0), stack_patches(2)], axis=-1)

    out = pl.pallas_call(
        _tail_kernel,
        out_shape=jax.ShapeDtypeStruct((B, 1, LANE), jnp.float32),
        grid=(B,),
        in_specs=[
            pl.BlockSpec((1, 8, 2 * P2_HALF), lambda b: (b, 0, 0)),
            pl.BlockSpec((8, 8), lambda b: (0, 0)),
            pl.BlockSpec((8, P2_HALF), lambda b: (0, 0)),
            pl.BlockSpec((32, 8, 8), lambda b: (0, 0, 0)),
            pl.BlockSpec((Z3_W, 2 * LANE), lambda b: (0, 0)),
            pl.BlockSpec((8, LANE), lambda b: (0, 0)),
            pl.BlockSpec((16, 8, 8), lambda b: (0, 0, 0)),
            pl.BlockSpec((Z4_W, 2 * LANE), lambda b: (0, 0)),
            pl.BlockSpec((8, LANE), lambda b: (0, 0)),
            pl.BlockSpec((8, LANE, LANE), lambda b: (0, 0, 0)),
            pl.BlockSpec((1, LANE), lambda b: (0, 0)),
            pl.BlockSpec((LANE, LANE), lambda b: (0, 0)),
            pl.BlockSpec((1, LANE), lambda b: (0, 0)),
        ],
        out_specs=pl.BlockSpec((1, 1, LANE), lambda b: (b, 0, 0)),
        scratch_shapes=[pltpu.VMEM((8, P2_HALF), jnp.float32),
                        pltpu.VMEM((8, LANE), jnp.float32)],
        compiler_params=pltpu.CompilerParams(
            dimension_semantics=("parallel",)),
    )(p2, prep["w2"], prep["b2"], prep["w3"], prep["sel3"], prep["b3"],
      prep["w4"], prep["sel4"], prep["b4"], prep["w1"], prep["bb1"],
      prep["wf2"], prep["bf2"])

    return out[:, 0, :out_channel]


# ----------------------------------------------------------------------------
# Parameter init (matches the PyTorch module's layer sizes / init style)
# ----------------------------------------------------------------------------
def init_params(key, in_channel, out_channel):
    ks = jax.random.split(key, 16)

    def xavier_conv(k, cout, cin, ksz):
        std = (2.0 / (cin * ksz + cout * ksz)) ** 0.5
        return std * jax.random.normal(k, (cout, cin, ksz), jnp.float32)

    def uniform_bias(k, n, fan_in):
        bound = 1.0 / (fan_in ** 0.5)
        return jax.random.uniform(k, (n,), jnp.float32, -bound, bound)

    def bn_params(c):
        return (jnp.ones((c,), jnp.float32), jnp.zeros((c,), jnp.float32),
                jnp.zeros((c,), jnp.float32), jnp.ones((c,), jnp.float32))

    p = {}
    p["c11_w"] = xavier_conv(ks[0], 1, in_channel, 100)
    p["c11_b"] = uniform_bias(ks[1], 1, in_channel * 100)
    p["c12_w"] = xavier_conv(ks[2], 1, in_channel, 200)
    p["c12_b"] = uniform_bias(ks[3], 1, in_channel * 200)
    p["c13_w"] = xavier_conv(ks[4], 1, in_channel, 300)
    p["c13_b"] = uniform_bias(ks[5], 1, in_channel * 300)
    p["c2_w"] = xavier_conv(ks[6], 8, 1, 8)
    p["c2_b"] = uniform_bias(ks[7], 8, 1 * 8)
    p["c3_w"] = xavier_conv(ks[8], 8, 8, 32)
    p["c3_b"] = uniform_bias(ks[9], 8, 8 * 32)
    p["c4_w"] = xavier_conv(ks[10], 8, 8, 16)
    p["c4_b"] = uniform_bias(ks[11], 8, 8 * 16)
    p["fc1_w"] = (1.0 / (112 ** 0.5)) * jax.random.normal(
        ks[12], (112, 112), jnp.float32)
    p["fc1_b"] = uniform_bias(ks[13], 112, 112)
    p["fc2_w"] = (1.0 / (112 ** 0.5)) * jax.random.normal(
        ks[14], (out_channel, 112), jnp.float32)
    p["fc2_b"] = uniform_bias(ks[15], out_channel, 112)
    (p["bn1_g"], p["bn1_b"], p["bn1_m"], p["bn1_v"]) = bn_params(1)
    (p["bn2_g"], p["bn2_b"], p["bn2_m"], p["bn2_v"]) = bn_params(8)
    (p["bn3_g"], p["bn3_b"], p["bn3_m"], p["bn3_v"]) = bn_params(8)
    (p["bn4_g"], p["bn4_b"], p["bn4_m"], p["bn4_v"]) = bn_params(8)
    (p["bn5_g"], p["bn5_b"], p["bn5_m"], p["bn5_v"]) = bn_params(112)
    return p


# ----------------------------------------------------------------------------
# Pure-JAX reference (for correctness check)
# ----------------------------------------------------------------------------
def _ref_conv1d(x, w, b, stride):
    out = lax.conv_general_dilated(
        x, w, (stride,), "VALID", dimension_numbers=("NCH", "OIH", "NCH"))
    return out + b[None, :, None]


def ref_forward(x, p):
    def bn(h, g, b_, m, v):
        return (h - m[None, :, None]) / jnp.sqrt(v[None, :, None] + EPS) * g[
            None, :, None] + b_[None, :, None]

    def mp(h):
        B, C, L = h.shape
        return h[:, :, : (L // 2) * 2].reshape(B, C, L // 2, 2).max(-1)

    sig = jax.nn.sigmoid
    h = jnp.concatenate(
        [
            _ref_conv1d(x, p["c11_w"], p["c11_b"], 1),
            _ref_conv1d(x, p["c12_w"], p["c12_b"], 1),
            _ref_conv1d(x, p["c13_w"], p["c13_b"], 1),
        ],
        axis=-1,
    )
    h = sig(bn(h, p["bn1_g"], p["bn1_b"], p["bn1_m"], p["bn1_v"]))
    h = mp(sig(bn(_ref_conv1d(h, p["c2_w"], p["c2_b"], 2),
                  p["bn2_g"], p["bn2_b"], p["bn2_m"], p["bn2_v"])))
    h = mp(sig(bn(_ref_conv1d(h, p["c3_w"], p["c3_b"], 4),
                  p["bn3_g"], p["bn3_b"], p["bn3_m"], p["bn3_v"])))
    h = mp(sig(bn(_ref_conv1d(h, p["c4_w"], p["c4_b"], 2),
                  p["bn4_g"], p["bn4_b"], p["bn4_m"], p["bn4_v"])))
    h = h.reshape(h.shape[0], -1)
    h = h @ p["fc1_w"].T + p["fc1_b"]
    h = sig((h - p["bn5_m"]) / jnp.sqrt(p["bn5_v"] + EPS) * p["bn5_g"]
            + p["bn5_b"])
    return h @ p["fc2_w"].T + p["fc2_b"]


# ----------------------------------------------------------------------------
if __name__ == "__main__":
    # fc1 expects 8*14 features -> with kernels 100/200/300, the strided convs
    # and the three maxpools this pins the input length to L = 1000.
    batch, in_channel, out_channel, length = 2, 4, 5, 1000

    key = jax.random.PRNGKey(0)
    k_param, k_x = jax.random.split(key)
    params = init_params(k_param, in_channel, out_channel)
    x = jax.random.normal(k_x, (batch, in_channel, length), jnp.float32)

    # One-time weight prep (outside the jitted per-forward path).
    prep = prepare_params(params, out_channel)

    fwd = jax.jit(functools.partial(mccnn_forward, out_channel=out_channel))
    out = jax.block_until_ready(fwd(x, prep))
    assert out.shape == (batch, out_channel), out.shape

    ref = jax.block_until_ready(ref_forward(x, params))
    err = float(jnp.max(jnp.abs(out - ref)))
    assert jnp.allclose(out, ref, atol=5e-2, rtol=5e-2), (
        "max abs err = %g" % err)

    print("KERNEL_OK")
</pallas_src>

<mosaic_0001>
module attributes {stable_mosaic.version = 11 : i64} {
  func.func @_l1_kernel(%arg0: i32, %arg1: memref<1x8x2048xbf16, #tpu.memory_space<vmem>>, %arg2: memref<2048x384xbf16, #tpu.memory_space<vmem>>, %arg3: memref<1x384xf32, #tpu.memory_space<vmem>>, %arg4: memref<1x8x384xf32, #tpu.memory_space<vmem>>) attributes {dimension_semantics = [#tpu.dimension_semantics<parallel>], iteration_bounds = array<i64: 2>, scalar_prefetch = 0 : i64, scratch_operands = 0 : i64, tpu.core_type = #tpu.core_type<tc>, window_params = [{transform_indices = @transform_0, window_bounds = array<i64: 1, 8, 2048>}, {pipeline_mode = #tpu.pipeline_mode<synchronous>, transform_indices = @transform_1, window_bounds = array<i64: 2048, 384>}, {pipeline_mode = #tpu.pipeline_mode<synchronous>, transform_indices = @transform_2, window_bounds = array<i64: 1, 384>}, {transform_indices = @transform_3, window_bounds = array<i64: 1, 8, 384>}]} {
    %c0 = arith.constant 0 : index
    %c0_0 = arith.constant 0 : index
    %c0_1 = arith.constant 0 : index
    %0 = vector.load %arg1[%c0, %c0_0, %c0_1] : memref<1x8x2048xbf16, #tpu.memory_space<vmem>>, vector<1x8x2048xbf16>
    %1 = vector.shape_cast %0 : vector<1x8x2048xbf16> to vector<8x2048xbf16>
    %c0_2 = arith.constant 0 : index
    %c0_3 = arith.constant 0 : index
    %2 = vector.load %arg2[%c0_2, %c0_3] : memref<2048x384xbf16, #tpu.memory_space<vmem>>, vector<2048x384xbf16>
    %cst = arith.constant dense<0.000000e+00> : vector<8x384xf32>
    %3 = tpu.matmul %1, %2, %cst {dimension_numbers = #tpu.dot_dimension_numbers<[1], [0], [0], [1], [0, 0, 1, 1], [], []>} : vector<8x2048xbf16>, vector<2048x384xbf16>, vector<8x384xf32> -> vector<8x384xf32>
    %c0_4 = arith.constant 0 : index
    %c0_5 = arith.constant 0 : index
    %4 = vector.load %arg3[%c0_4, %c0_5] : memref<1x384xf32, #tpu.memory_space<vmem>>, vector<1x384xf32>
    %5 = vector.broadcast %4 : vector<1x384xf32> to vector<8x384xf32>
    %6 = arith.addf %3, %5 : vector<8x384xf32>
    %7 = arith.negf %6 : vector<8x384xf32>
    %8 = math.exp %7 : vector<8x384xf32>
    %cst_6 = arith.constant 1.000000e+00 : f32
    %9 = vector.broadcast %cst_6 : f32 to vector<8x384xf32>
    %10 = arith.addf %9, %8 : vector<8x384xf32>
    %11 = arith.divf %9, %10 : vector<8x384xf32>
    %c0_7 = arith.constant 0 : index
    %c0_8 = arith.constant 0 : index
    %c0_9 = arith.constant 0 : index
    %12 = vector.load %arg4[%c0_7, %c0_8, %c0_9] : memref<1x8x384xf32, #tpu.memory_space<vmem>>, vector<1x8x384xf32>
    %13 = vector.shape_cast %12 : vector<1x8x384xf32> to vector<8x384xf32>
    %14 = vector.shape_cast %11 : vector<8x384xf32> to vector<1x8x384xf32>
    tpu.vector_store %arg4[%c0_7, %c0_8, %c0_9], %14 {strides = array<i32>} : memref<1x8x384xf32, #tpu.memory_space<vmem>>, vector<1x8x384xf32>,
    return
  }
  func.func @transform_0(%arg0: i32) -> (i32, i32, i32) {
    %c0_i32 = arith.constant 0 : i32
    %c0_i32_0 = arith.constant 0 : i32
    %c0_i32_1 = arith.constant 0 : i32
    return %arg0, %c0_i32, %c0_i32_0 : i32, i32, i32
  }
  func.func @transform_1(%arg0: i32) -> (i32, i32) {
    %c0_i32 = arith.constant 0 : i32
    %c0_i32_0 = arith.constant 0 : i32
    %c0_i32_1 = arith.constant 0 : i32
    return %c0_i32, %c0_i32_0 : i32, i32
  }
  func.func @transform_2(%arg0: i32) -> (i32, i32) {
    %c0_i32 = arith.constant 0 : i32
    %c0_i32_0 = arith.constant 0 : i32
    %c0_i32_1 = arith.constant 0 : i32
    return %c0_i32, %c0_i32_0 : i32, i32
  }
  func.func @transform_3(%arg0: i32) -> (i32, i32, i32) {
    %c0_i32 = arith.constant 0 : i32
    %c0_i32_0 = arith.constant 0 : i32
    %c0_i32_1 = arith.constant 0 : i32
    return %arg0, %c0_i32, %c0_i32_0 : i32, i32, i32
  }
}

module attributes {stable_mosaic.version = 11 : i64} {
  func.func @_tail_kernel(%arg0: i32, %arg1: memref<1x8x1280xf32, #tpu.memory_space<vmem>>, %arg2: memref<8x8xf32, #tpu.memory_space<vmem>>, %arg3: memref<8x640xf32, #tpu.memory_space<vmem>>, %arg4: memref<32x8x8xf32, #tpu.memory_space<vmem>>, %arg5: memref<568x256xf32, #tpu.memory_space<vmem>>, %arg6: memref<8x128xf32, #tpu.memory_space<vmem>>, %arg7: memref<16x8x8xf32, #tpu.memory_space<vmem>>, %arg8: memref<56x256xf32, #tpu.memory_space<vmem>>, %arg9: memref<8x128xf32, #tpu.memory_space<vmem>>, %arg10: memref<8x128x128xf32, #tpu.memory_space<vmem>>, %arg11: memref<1x128xf32, #tpu.memory_space<vmem>>, %arg12: memref<128x128xf32, #tpu.memory_space<vmem>>, %arg13: memref<1x128xf32, #tpu.memory_space<vmem>>, %arg14: memref<1x1x128xf32, #tpu.memory_space<vmem>>, %arg15: memref<8x640xf32, #tpu.memory_space<vmem>>, %arg16: memref<8x128xf32, #tpu.memory_space<vmem>>) attributes {dimension_semantics = [#tpu.dimension_semantics<parallel>], iteration_bounds = array<i64: 2>, scalar_prefetch = 0 : i64, scratch_operands = 2 : i64, tpu.core_type = #tpu.core_type<tc>, window_params = [{transform_indices = @transform_0, window_bounds = array<i64: 1, 8, 1280>}, {pipeline_mode = #tpu.pipeline_mode<synchronous>, transform_indices = @transform_1, window_bounds = array<i64: 8, 8>}, {pipeline_mode = #tpu.pipeline_mode<synchronous>, transform_indices = @transform_2, window_bounds = array<i64: 8, 640>}, {pipeline_mode = #tpu.pipeline_mode<synchronous>, transform_indices = @transform_3, window_bounds = array<i64: 32, 8, 8>}, {pipeline_mode = #tpu.pipeline_mode<synchronous>, transform_indices = @transform_4, window_bounds = array<i64: 568, 256>}, {pipeline_mode = #tpu.pipeline_mode<synchronous>, transform_indices = @transform_5, window_bounds = array<i64: 8, 128>}, {pipeline_mode = #tpu.pipeline_mode<synchronous>, transform_indices = @transform_6, window_bounds = array<i64: 16, 8, 8>}, {pipeline_mode = #tpu.pipeline_mode<synchronous>, transform_indices = @transform_7, window_bounds = array<i64: 56, 256>}, {pipeline_mode = #tpu.pipeline_mode<synchronous>, transform_indices = @transform_8, window_bounds = array<i64: 8, 128>}, {pipeline_mode = #tpu.pipeline_mode<synchronous>, transform_indices = @transform_9, window_bounds = array<i64: 8, 128, 128>}, {pipeline_mode = #tpu.pipeline_mode<synchronous>, transform_indices = @transform_10, window_bounds = array<i64: 1, 128>}, {pipeline_mode = #tpu.pipeline_mode<synchronous>, transform_indices = @transform_11, window_bounds = array<i64: 128, 128>}, {pipeline_mode = #tpu.pipeline_mode<synchronous>, transform_indices = @transform_12, window_bounds = array<i64: 1, 128>}, {transform_indices = @transform_13, window_bounds = array<i64: 1, 1, 128>}]} {
    %c0 = arith.constant 0 : index
    %c0_0 = arith.constant 0 : index
    %0 = vector.load %arg2[%c0, %c0_0] : memref<8x8xf32, #tpu.memory_space<vmem>>, vector<8x8xf32>
    %c0_1 = arith.constant 0 : index
    %c0_2 = arith.constant 0 : index
    %c0_3 = arith.constant 0 : index
    %1 = vector.load %arg1[%c0_1, %c0_2, %c0_3] : memref<1x8x1280xf32, #tpu.memory_space<vmem>>, vector<1x8x1280xf32>
    %2 = vector.shape_cast %1 : vector<1x8x1280xf32> to vector<8x1280xf32>
    %cst = arith.constant dense<0.000000e+00> : vector<8x1280xf32>
    %3 = tpu.matmul %0, %2, %cst {dimension_numbers = #tpu.dot_dimension_numbers<[1], [0], [0], [1], [0, 0, 1, 1], [], []>} : vector<8x8xf32>, vector<8x1280xf32>, vector<8x1280xf32> -> vector<8x1280xf32>
    %4 = vector.extract_strided_slice %3 {offsets = [0, 0], sizes = [8, 640], strides = [1, 1]} : vector<8x1280xf32> to vector<8x640xf32>
    %5 = vector.extract_strided_slice %3 {offsets = [0, 640], sizes = [8, 640], strides = [1, 1]} : vector<8x1280xf32> to vector<8x640xf32>
    %6 = arith.maximumf %4, %5 : vector<8x640xf32>
    %c0_4 = arith.constant 0 : index
    %c0_5 = arith.constant 0 : index
    %7 = vector.load %arg3[%c0_4, %c0_5] : memref<8x640xf32, #tpu.memory_space<vmem>>, vector<8x640xf32>
    %8 = arith.addf %6, %7 : vector<8x640xf32>
    %9 = arith.negf %8 : vector<8x640xf32>
    %10 = math.exp %9 : vector<8x640xf32>
    %cst_6 = arith.constant 1.000000e+00 : f32
    %11 = vector.broadcast %cst_6 : f32 to vector<8x640xf32>
    %12 = arith.addf %11, %10 : vector<8x640xf32>
    %13 = arith.divf %11, %12 : vector<8x640xf32>
    %c0_7 = arith.constant 0 : index
    %c0_8 = arith.constant 0 : index
    %14 = vector.load %arg15[%c0_7, %c0_8] : memref<8x640xf32, #tpu.memory_space<vmem>>, vector<8x640xf32>
    tpu.vector_store %arg15[%c0_7, %c0_8], %13 {strides = array<i32>} : memref<8x640xf32, #tpu.memory_space<vmem>>, vector<8x640xf32>,
    %cst_9 = arith.constant 0.000000e+00 : f32
    %15 = vector.broadcast %cst_9 : f32 to vector<8x568xf32>
    %c0_10 = arith.constant 0 : index
    %c0_11 = arith.constant 0 : index
    %c0_12 = arith.constant 0 : index
    %16 = vector.load %arg4[%c0_10, %c0_11, %c0_12] : memref<32x8x8xf32, #tpu.memory_space<vmem>>, vector<1x8x8xf32>
    %17 = vector.shape_cast %16 : vector<1x8x8xf32> to vector<8x8xf32>
    %c0_13 = arith.constant 0 : index
    %c0_14 = arith.constant 0 : index
    %18 = vector.load %arg15[%c0_13, %c0_14] : memref<8x640xf32, #tpu.memory_space<vmem>>, vector<8x568xf32>
    %cst_15 = arith.constant dense<0.000000e+00> : vector<8x568xf32>
    %19 = tpu.matmul %17, %18, %cst_15 {dimension_numbers = #tpu.dot_dimension_numbers<[1], [0], [0], [1], [0, 0, 1, 1], [], []>} : vector<8x8xf32>, vector<8x568xf32>, vector<8x568xf32> -> vector<8x568xf32>
    %20 = arith.addf %15, %19 : vector<8x568xf32>
    %c1 = arith.constant 1 : index
    %c0_16 = arith.constant 0 : index
    %c0_17 = arith.constant 0 : index
    %21 = vector.load %arg4[%c1, %c0_16, %c0_17] : memref<32x8x8xf32, #tpu.memory_space<vmem>>, vector<1x8x8xf32>
    %22 = vector.shape_cast %21 : vector<1x8x8xf32> to vector<8x8xf32>
    %c0_18 = arith.constant 0 : index
    %c1_19 = arith.constant 1 : index
    %23 = vector.load %arg15[%c0_18, %c1_19] : memref<8x640xf32, #tpu.memory_space<vmem>>, vector<8x568xf32>
    %cst_20 = arith.constant dense<0.000000e+00> : vector<8x568xf32>
    %24 = tpu.matmul %22, %23, %cst_20 {dimension_numbers = #tpu.dot_dimension_numbers<[1], [0], [0], [1], [0, 0, 1, 1], [], []>} : vector<8x8xf32>, vector<8x568xf32>, vector<8x568xf32> -> vector<8x568xf32>
    %25 = arith.addf %20, %24 : vector<8x568xf32>
    %c2 = arith.constant 2 : index
    %c0_21 = arith.constant 0 : index
    %c0_22 = arith.constant 0 : index
    %26 = vector.load %arg4[%c2, %c0_21, %c0_22] : memref<32x8x8xf32, #tpu.memory_space<vmem>>, vector<1x8x8xf32>
    %27 = vector.shape_cast %26 : vector<1x8x8xf32> to vector<8x8xf32>
    %c0_23 = arith.constant 0 : index
    %c2_24 = arith.constant 2 : index
    %28 = vector.load %arg15[%c0_23, %c2_24] : memref<8x640xf32, #tpu.memory_space<vmem>>, vector<8x568xf32>
    %cst_25 = arith.constant dense<0.000000e+00> : vector<8x568xf32>
    %29 = tpu.matmul %27, %28, %cst_25 {dimension_numbers = #tpu.dot_dimension_numbers<[1], [0], [0], [1], [0, 0, 1, 1], [], []>} : vector<8x8xf32>, vector<8x568xf32>, vector<8x568xf32> -> vector<8x568xf32>
    %30 = arith.addf %25, %29 : vector<8x568xf32>
    %c3 = arith.constant 3 : index
    %c0_26 = arith.constant 0 : index
    %c0_27 = arith.constant 0 : index
    %31 = vector.load %arg4[%c3, %c0_26, %c0_27] : memref<32x8x8xf32, #tpu.memory_space<vmem>>, vector<1x8x8xf32>
    %32 = vector.shape_cast %31 : vector<1x8x8xf32> to vector<8x8xf32>
    %c0_28 = arith.constant 0 : index
    %c3_29 = arith.constant 3 : index
    %33 = vector.load %arg15[%c0_28, %c3_29] : memref<8x640xf32, #tpu.memory_space<vmem>>, vector<8x568xf32>
    %cst_30 = arith.constant dense<0.000000e+00> : vector<8x568xf32>
    %34 = tpu.matmul %32, %33, %cst_30 {dimension_numbers = #tpu.dot_dimension_numbers<[1], [0], [0], [1], [0, 0, 1, 1], [], []>} : vector<8x8xf32>, vector<8x568xf32>, vector<8x568xf32> -> vector<8x568xf32>
    %35 = arith.addf %30, %34 : vector<8x568xf32>
    %c4 = arith.constant 4 : index
    %c0_31 = arith.constant 0 : index
    %c0_32 = arith.constant 0 : index
    %36 = vector.load %arg4[%c4, %c0_31, %c0_32] : memref<32x8x8xf32, #tpu.memory_space<vmem>>, vector<1x8x8xf32>
    %37 = vector.shape_cast %36 : vector<1x8x8xf32> to vector<8x8xf32>
    %c0_33 = arith.constant 0 : index
    %c4_34 = arith.constant 4 : index
    %38 = vector.load %arg15[%c0_33, %c4_34] : memref<8x640xf32, #tpu.memory_space<vmem>>, vector<8x568xf32>
    %cst_35 = arith.constant dense<0.000000e+00> : vector<8x568xf32>
    %39 = tpu.matmul %37, %38, %cst_35 {dimension_numbers = #tpu.dot_dimension_numbers<[1], [0], [0], [1], [0, 0, 1, 1], [], []>} : vector<8x8xf32>, vector<8x568xf32>, vector<8x568xf32> -> vector<8x568xf32>
    %40 = arith.addf %35, %39 : vector<8x568xf32>
    %c5 = arith.constant 5 : index
    %c0_36 = arith.constant 0 : index
    %c0_37 = arith.constant 0 : index
    %41 = vector.load %arg4[%c5, %c0_36, %c0_37] : memref<32x8x8xf32, #tpu.memory_space<vmem>>, vector<1x8x8xf32>
    %42 = vector.shape_cast %41 : vector<1x8x8xf32> to vector<8x8xf32>
    %c0_38 = arith.constant 0 : index
    %c5_39 = arith.constant 5 : index
    %43 = vector.load %arg15[%c0_38, %c5_39] : memref<8x640xf32, #tpu.memory_space<vmem>>, vector<8x568xf32>
    %cst_40 = arith.constant dense<0.000000e+00> : vector<8x568xf32>
    %44 = tpu.matmul %42, %43, %cst_40 {dimension_numbers = #tpu.dot_dimension_numbers<[1], [0], [0], [1], [0, 0, 1, 1], [], []>} : vector<8x8xf32>, vector<8x568xf32>, vector<8x568xf32> -> vector<8x568xf32>
    %45 = arith.addf %40, %44 : vector<8x568xf32>
    %c6 = arith.constant 6 : index
    %c0_41 = arith.constant 0 : index
    %c0_42 = arith.constant 0 : index
    %46 = vector.load %arg4[%c6, %c0_41, %c0_42] : memref<32x8x8xf32, #tpu.memory_space<vmem>>, vector<1x8x8xf32>
    %47 = vector.shape_cast %46 : vector<1x8x8xf32> to vector<8x8xf32>
    %c0_43 = arith.constant 0 : index
    %c6_44 = arith.constant 6 : index
    %48 = vector.load %arg15[%c0_43, %c6_44] : memref<8x640xf32, #tpu.memory_space<vmem>>, vector<8x568xf32>
    %cst_45 = arith.constant dense<0.000000e+00> : vector<8x568xf32>
    %49 = tpu.matmul %47, %48, %cst_45 {dimension_numbers = #tpu.dot_dimension_numbers<[1], [0], [0], [1], [0, 0, 1, 1], [], []>} : vector<8x8xf32>, vector<8x568xf32>, vector<8x568xf32> -> vector<8x568xf32>
    %50 = arith.addf %45, %49 : vector<8x568xf32>
    %c7 = arith.constant 7 : index
    %c0_46 = arith.constant 0 : index
    %c0_47 = arith.constant 0 : index
    %51 = vector.load %arg4[%c7, %c0_46, %c0_47] : memref<32x8x8xf32, #tpu.memory_space<vmem>>, vector<1x8x8xf32>
    %52 = vector.shape_cast %51 : vector<1x8x8xf32> to vector<8x8xf32>
    %c0_48 = arith.constant 0 : index
    %c7_49 = arith.constant 7 : index
    %53 = vector.load %arg15[%c0_48, %c7_49] : memref<8x640xf32, #tpu.memory_space<vmem>>, vector<8x568xf32>
    %cst_50 = arith.constant dense<0.000000e+00> : vector<8x568xf32>
    %54 = tpu.matmul %52, %53, %cst_50 {dimension_numbers = #tpu.dot_dimension_numbers<[1], [0], [0], [1], [0, 0, 1, 1], [], []>} : vector<8x8xf32>, vector<8x568xf32>, vector<8x568xf32> -> vector<8x568xf32>
    %55 = arith.addf %50, %54 : vector<8x568xf32>
    %c8 = arith.constant 8 : index
    %c0_51 = arith.constant 0 : index
    %c0_52 = arith.constant 0 : index
    %56 = vector.load %arg4[%c8, %c0_51, %c0_52] : memref<32x8x8xf32, #tpu.memory_space<vmem>>, vector<1x8x8xf32>
    %57 = vector.shape_cast %56 : vector<1x8x8xf32> to vector<8x8xf32>
    %c0_53 = arith.constant 0 : index
    %c8_54 = arith.constant 8 : index
    %58 = vector.load %arg15[%c0_53, %c8_54] : memref<8x640xf32, #tpu.memory_space<vmem>>, vector<8x568xf32>
    %cst_55 = arith.constant dense<0.000000e+00> : vector<8x568xf32>
    %59 = tpu.matmul %57, %58, %cst_55 {dimension_numbers = #tpu.dot_dimension_numbers<[1], [0], [0], [1], [0, 0, 1, 1], [], []>} : vector<8x8xf32>, vector<8x568xf32>, vector<8x568xf32> -> vector<8x568xf32>
    %60 = arith.addf %55, %59 : vector<8x568xf32>
    %c9 = arith.constant 9 : index
    %c0_56 = arith.constant 0 : index
    %c0_57 = arith.constant 0 : index
    %61 = vector.load %arg4[%c9, %c0_56, %c0_57] : memref<32x8x8xf32, #tpu.memory_space<vmem>>, vector<1x8x8xf32>
    %62 = vector.shape_cast %61 : vector<1x8x8xf32> to vector<8x8xf32>
    %c0_58 = arith.constant 0 : index
    %c9_59 = arith.constant 9 : index
    %63 = vector.load %arg15[%c0_58, %c9_59] : memref<8x640xf32, #tpu.memory_space<vmem>>, vector<8x568xf32>
    %cst_60 = arith.constant dense<0.000000e+00> : vector<8x568xf32>
    %64 = tpu.matmul %62, %63, %cst_60 {dimension_numbers = #tpu.dot_dimension_numbers<[1], [0], [0], [1], [0, 0, 1, 1], [], []>} : vector<8x8xf32>, vector<8x568xf32>, vector<8x568xf32> -> vector<8x568xf32>
    %65 = arith.addf %60, %64 : vector<8x568xf32>
    %c10 = arith.constant 10 : index
    %c0_61 = arith.constant 0 : index
    %c0_62 = arith.constant 0 : index
    %66 = vector.load %arg4[%c10, %c0_61, %c0_62] : memref<32x8x8xf32, #tpu.memory_space<vmem>>, vector<1x8x8xf32>
    %67 = vector.shape_cast %66 : vector<1x8x8xf32> to vector<8x8xf32>
    %c0_63 = arith.constant 0 : index
    %c10_64 = arith.constant 10 : index
    %68 = vector.load %arg15[%c0_63, %c10_64] : memref<8x640xf32, #tpu.memory_space<vmem>>, vector<8x568xf32>
    %cst_65 = arith.constant dense<0.000000e+00> : vector<8x568xf32>
    %69 = tpu.matmul %67, %68, %cst_65 {dimension_numbers = #tpu.dot_dimension_numbers<[1], [0], [0], [1], [0, 0, 1, 1], [], []>} : vector<8x8xf32>, vector<8x568xf32>, vector<8x568xf32> -> vector<8x568xf32>
    %70 = arith.addf %65, %69 : vector<8x568xf32>
    %c11 = arith.constant 11 : index
    %c0_66 = arith.constant 0 : index
    %c0_67 = arith.constant 0 : index
    %71 = vector.load %arg4[%c11, %c0_66, %c0_67] : memref<32x8x8xf32, #tpu.memory_space<vmem>>, vector<1x8x8xf32>
    %72 = vector.shape_cast %71 : vector<1x8x8xf32> to vector<8x8xf32>
    %c0_68 = arith.constant 0 : index
    %c11_69 = arith.constant 11 : index
    %73 = vector.load %arg15[%c0_68, %c11_69] : memref<8x640xf32, #tpu.memory_space<vmem>>, vector<8x568xf32>
    %cst_70 = arith.constant dense<0.000000e+00> : vector<8x568xf32>
    %74 = tpu.matmul %72, %73, %cst_70 {dimension_numbers = #tpu.dot_dimension_numbers<[1], [0], [0], [1], [0, 0, 1, 1], [], []>} : vector<8x8xf32>, vector<8x568xf32>, vector<8x568xf32> -> vector<8x568xf32>
    %75 = arith.addf %70, %74 : vector<8x568xf32>
    %c12 = arith.constant 12 : index
    %c0_71 = arith.constant 0 : index
    %c0_72 = arith.constant 0 : index
    %76 = vector.load %arg4[%c12, %c0_71, %c0_72] : memref<32x8x8xf32, #tpu.memory_space<vmem>>, vector<1x8x8xf32>
    %77 = vector.shape_cast %76 : vector<1x8x8xf32> to vector<8x8xf32>
    %c0_73 = arith.constant 0 : index
    %c12_74 = arith.constant 12 : index
    %78 = vector.load %arg15[%c0_73, %c12_74] : memref<8x640xf32, #tpu.memory_space<vmem>>, vector<8x568xf32>
    %cst_75 = arith.constant dense<0.000000e+00> : vector<8x568xf32>
    %79 = tpu.matmul %77, %78, %cst_75 {dimension_numbers = #tpu.dot_dimension_numbers<[1], [0], [0], [1], [0, 0, 1, 1], [], []>} : vector<8x8xf32>, vector<8x568xf32>, vector<8x568xf32> -> vector<8x568xf32>
    %80 = arith.addf %75, %79 : vector<8x568xf32>
    %c13 = arith.constant 13 : index
    %c0_76 = arith.constant 0 : index
    %c0_77 = arith.constant 0 : index
    %81 = vector.load %arg4[%c13, %c0_76, %c0_77] : memref<32x8x8xf32, #tpu.memory_space<vmem>>, vector<1x8x8xf32>
    %82 = vector.shape_cast %81 : vector<1x8x8xf32> to vector<8x8xf32>
    %c0_78 = arith.constant 0 : index
    %c13_79 = arith.constant 13 : index
    %83 = vector.load %arg15[%c0_78, %c13_79] : memref<8x640xf32, #tpu.memory_space<vmem>>, vector<8x568xf32>
    %cst_80 = arith.constant dense<0.000000e+00> : vector<8x568xf32>
    %84 = tpu.matmul %82, %83, %cst_80 {dimension_numbers = #tpu.dot_dimension_numbers<[1], [0], [0], [1], [0, 0, 1, 1], [], []>} : vector<8x8xf32>, vector<8x568xf32>, vector<8x568xf32> -> vector<8x568xf32>
    %85 = arith.addf %80, %84 : vector<8x568xf32>
    %c14 = arith.constant 14 : index
    %c0_81 = arith.constant 0 : index
    %c0_82 = arith.constant 0 : index
    %86 = vector.load %arg4[%c14, %c0_81, %c0_82] : memref<32x8x8xf32, #tpu.memory_space<vmem>>, vector<1x8x8xf32>
    %87 = vector.shape_cast %86 : vector<1x8x8xf32> to vector<8x8xf32>
    %c0_83 = arith.constant 0 : index
    %c14_84 = arith.constant 14 : index
    %88 = vector.load %arg15[%c0_83, %c14_84] : memref<8x640xf32, #tpu.memory_space<vmem>>, vector<8x568xf32>
    %cst_85 = arith.constant dense<0.000000e+00> : vector<8x568xf32>
    %89 = tpu.matmul %87, %88, %cst_85 {dimension_numbers = #tpu.dot_dimension_numbers<[1], [0], [0], [1], [0, 0, 1, 1], [], []>} : vector<8x8xf32>, vector<8x568xf32>, vector<8x568xf32> -> vector<8x568xf32>
    %90 = arith.addf %85, %89 : vector<8x568xf32>
    %c15 = arith.constant 15 : index
    %c0_86 = arith.constant 0 : index
    %c0_87 = arith.constant 0 : index
    %91 = vector.load %arg4[%c15, %c0_86, %c0_87] : memref<32x8x8xf32, #tpu.memory_space<vmem>>, vector<1x8x8xf32>
    %92 = vector.shape_cast %91 : vector<1x8x8xf32> to vector<8x8xf32>
    %c0_88 = arith.constant 0 : index
    %c15_89 = arith.constant 15 : index
    %93 = vector.load %arg15[%c0_88, %c15_89] : memref<8x640xf32, #tpu.memory_space<vmem>>, vector<8x568xf32>
    %cst_90 = arith.constant dense<0.000000e+00> : vector<8x568xf32>
    %94 = tpu.matmul %92, %93, %cst_90 {dimension_numbers = #tpu.dot_dimension_numbers<[1], [0], [0], [1], [0, 0, 1, 1], [], []>} : vector<8x8xf32>, vector<8x568xf32>, vector<8x568xf32> -> vector<8x568xf32>
    %95 = arith.addf %90, %94 : vector<8x568xf32>
    %c16 = arith.constant 16 : index
    %c0_91 = arith.constant 0 : index
    %c0_92 = arith.constant 0 : index
    %96 = vector.load %arg4[%c16, %c0_91, %c0_92] : memref<32x8x8xf32, #tpu.memory_space<vmem>>, vector<1x8x8xf32>
    %97 = vector.shape_cast %96 : vector<1x8x8xf32> to vector<8x8xf32>
    %c0_93 = arith.constant 0 : index
    %c16_94 = arith.constant 16 : index
    %98 = vector.load %arg15[%c0_93, %c16_94] : memref<8x640xf32, #tpu.memory_space<vmem>>, vector<8x568xf32>
    %cst_95 = arith.constant dense<0.000000e+00> : vector<8x568xf32>
    %99 = tpu.matmul %97, %98, %cst_95 {dimension_numbers = #tpu.dot_dimension_numbers<[1], [0], [0], [1], [0, 0, 1, 1], [], []>} : vector<8x8xf32>, vector<8x568xf32>, vector<8x568xf32> -> vector<8x568xf32>
    %100 = arith.addf %95, %99 : vector<8x568xf32>
    %c17 = arith.constant 17 : index
    %c0_96 = arith.constant 0 : index
    %c0_97 = arith.constant 0 : index
    %101 = vector.load %arg4[%c17, %c0_96, %c0_97] : memref<32x8x8xf32, #tpu.memory_space<vmem>>, vector<1x8x8xf32>
    %102 = vector.shape_cast %101 : vector<1x8x8xf32> to vector<8x8xf32>
    %c0_98 = arith.constant 0 : index
    %c17_99 = arith.constant 17 : index
    %103 = vector.load %arg15[%c0_98, %c17_99] : memref<8x640xf32, #tpu.memory_space<vmem>>, vector<8x568xf32>
    %cst_100 = arith.constant dense<0.000000e+00> : vector<8x568xf32>
    %104 = tpu.matmul %102, %103, %cst_100 {dimension_numbers = #tpu.dot_dimension_numbers<[1], [0], [0], [1], [0, 0, 1, 1], [], []>} : vector<8x8xf32>, vector<8x568xf32>, vector<8x568xf32> -> vector<8x568xf32>
    %105 = arith.addf %100, %104 : vector<8x568xf32>
    %c18 = arith.constant 18 : index
    %c0_101 = arith.constant 0 : index
    %c0_102 = arith.constant 0 : index
    %106 = vector.load %arg4[%c18, %c0_101, %c0_102] : memref<32x8x8xf32, #tpu.memory_space<vmem>>, vector<1x8x8xf32>
    %107 = vector.shape_cast %106 : vector<1x8x8xf32> to vector<8x8xf32>
    %c0_103 = arith.constant 0 : index
    %c18_104 = arith.constant 18 : index
    %108 = vector.load %arg15[%c0_103, %c18_104] : memref<8x640xf32, #tpu.memory_space<vmem>>, vector<8x568xf32>
    %cst_105 = arith.constant dense<0.000000e+00> : vector<8x568xf32>
    %109 = tpu.matmul %107, %108, %cst_105 {dimension_numbers = #tpu.dot_dimension_numbers<[1], [0], [0], [1], [0, 0, 1, 1], [], []>} : vector<8x8xf32>, vector<8x568xf32>, vector<8x568xf32> -> vector<8x568xf32>
    %110 = arith.addf %105, %109 : vector<8x568xf32>
    %c19 = arith.constant 19 : index
    %c0_106 = arith.constant 0 : index
    %c0_107 = arith.constant 0 : index
    %111 = vector.load %arg4[%c19, %c0_106, %c0_107] : memref<32x8x8xf32, #tpu.memory_space<vmem>>, vector<1x8x8xf32>
    %112 = vector.shape_cast %111 : vector<1x8x8xf32> to vector<8x8xf32>
    %c0_108 = arith.constant 0 : index
    %c19_109 = arith.constant 19 : index
    %113 = vector.load %arg15[%c0_108, %c19_109] : memref<8x640xf32, #tpu.memory_space<vmem>>, vector<8x568xf32>
    %cst_110 = arith.constant dense<0.000000e+00> : vector<8x568xf32>
    %114 = tpu.matmul %112, %113, %cst_110 {dimension_numbers = #tpu.dot_dimension_numbers<[1], [0], [0], [1], [0, 0, 1, 1], [], []>} : vector<8x8xf32>, vector<8x568xf32>, vector<8x568xf32> -> vector<8x568xf32>
    %115 = arith.addf %110, %114 : vector<8x568xf32>
    %c20 = arith.constant 20 : index
    %c0_111 = arith.constant 0 : index
    %c0_112 = arith.constant 0 : index
    %116 = vector.load %arg4[%c20, %c0_111, %c0_112] : memref<32x8x8xf32, #tpu.memory_space<vmem>>, vector<1x8x8xf32>
    %117 = vector.shape_cast %116 : vector<1x8x8xf32> to vector<8x8xf32>
    %c0_113 = arith.constant 0 : index
    %c20_114 = arith.constant 20 : index
    %118 = vector.load %arg15[%c0_113, %c20_114] : memref<8x640xf32, #tpu.memory_space<vmem>>, vector<8x568xf32>
    %cst_115 = arith.constant dense<0.000000e+00> : vector<8x568xf32>
    %119 = tpu.matmul %117, %118, %cst_115 {dimension_numbers = #tpu.dot_dimension_numbers<[1], [0], [0], [1], [0, 0, 1, 1], [], []>} : vector<8x8xf32>, vector<8x568xf32>, vector<8x568xf32> -> vector<8x568xf32>
    %120 = arith.addf %115, %119 : vector<8x568xf32>
    %c21 = arith.constant 21 : index
    %c0_116 = arith.constant 0 : index
    %c0_117 = arith.constant 0 : index
    %121 = vector.load %arg4[%c21, %c0_116, %c0_117] : memref<32x8x8xf32, #tpu.memory_space<vmem>>, vector<1x8x8xf32>
    %122 = vector.shape_cast %121 : vector<1x8x8xf32> to vector<8x8xf32>
    %c0_118 = arith.constant 0 : index
    %c21_119 = arith.constant 21 : index
    %123 = vector.load %arg15[%c0_118, %c21_119] : memref<8x640xf32, #tpu.memory_space<vmem>>, vector<8x568xf32>
    %cst_120 = arith.constant dense<0.000000e+00> : vector<8x568xf32>
    %124 = tpu.matmul %122, %123, %cst_120 {dimension_numbers = #tpu.dot_dimension_numbers<[1], [0], [0], [1], [0, 0, 1, 1], [], []>} : vector<8x8xf32>, vector<8x568xf32>, vector<8x568xf32> -> vector<8x568xf32>
    %125 = arith.addf %120, %124 : vector<8x568xf32>
    %c22 = arith.constant 22 : index
    %c0_121 = arith.constant 0 : index
    %c0_122 = arith.constant 0 : index
    %126 = vector.load %arg4[%c22, %c0_121, %c0_122] : memref<32x8x8xf32, #tpu.memory_space<vmem>>, vector<1x8x8xf32>
    %127 = vector.shape_cast %126 : vector<1x8x8xf32> to vector<8x8xf32>
    %c0_123 = arith.constant 0 : index
    %c22_124 = arith.constant 22 : index
    %128 = vector.load %arg15[%c0_123, %c22_124] : memref<8x640xf32, #tpu.memory_space<vmem>>, vector<8x568xf32>
    %cst_125 = arith.constant dense<0.000000e+00> : vector<8x568xf32>
    %129 = tpu.matmul %127, %128, %cst_125 {dimension_numbers = #tpu.dot_dimension_numbers<[1], [0], [0], [1], [0, 0, 1, 1], [], []>} : vector<8x8xf32>, vector<8x568xf32>, vector<8x568xf32> -> vector<8x568xf32>
    %130 = arith.addf %125, %129 : vector<8x568xf32>
    %c23 = arith.constant 23 : index
    %c0_126 = arith.constant 0 : index
    %c0_127 = arith.constant 0 : index
    %131 = vector.load %arg4[%c23, %c0_126, %c0_127] : memref<32x8x8xf32, #tpu.memory_space<vmem>>, vector<1x8x8xf32>
    %132 = vector.shape_cast %131 : vector<1x8x8xf32> to vector<8x8xf32>
    %c0_128 = arith.constant 0 : index
    %c23_129 = arith.constant 23 : index
    %133 = vector.load %arg15[%c0_128, %c23_129] : memref<8x640xf32, #tpu.memory_space<vmem>>, vector<8x568xf32>
    %cst_130 = arith.constant dense<0.000000e+00> : vector<8x568xf32>
    %134 = tpu.matmul %132, %133, %cst_130 {dimension_numbers = #tpu.dot_dimension_numbers<[1], [0], [0], [1], [0, 0, 1, 1], [], []>} : vector<8x8xf32>, vector<8x568xf32>, vector<8x568xf32> -> vector<8x568xf32>
    %135 = arith.addf %130, %134 : vector<8x568xf32>
    %c24 = arith.constant 24 : index
    %c0_131 = arith.constant 0 : index
    %c0_132 = arith.constant 0 : index
    %136 = vector.load %arg4[%c24, %c0_131, %c0_132] : memref<32x8x8xf32, #tpu.memory_space<vmem>>, vector<1x8x8xf32>
    %137 = vector.shape_cast %136 : vector<1x8x8xf32> to vector<8x8xf32>
    %c0_133 = arith.constant 0 : index
    %c24_134 = arith.constant 24 : index
    %138 = vector.load %arg15[%c0_133, %c24_134] : memref<8x640xf32, #tpu.memory_space<vmem>>, vector<8x568xf32>
    %cst_135 = arith.constant dense<0.000000e+00> : vector<8x568xf32>
    %139 = tpu.matmul %137, %138, %cst_135 {dimension_numbers = #tpu.dot_dimension_numbers<[1], [0], [0], [1], [0, 0, 1, 1], [], []>} : vector<8x8xf32>, vector<8x568xf32>, vector<8x568xf32> -> vector<8x568xf32>
    %140 = arith.addf %135, %139 : vector<8x568xf32>
    %c25 = arith.constant 25 : index
    %c0_136 = arith.constant 0 : index
    %c0_137 = arith.constant 0 : index
    %141 = vector.load %arg4[%c25, %c0_136, %c0_137] : memref<32x8x8xf32, #tpu.memory_space<vmem>>, vector<1x8x8xf32>
    %142 = vector.shape_cast %141 : vector<1x8x8xf32> to vector<8x8xf32>
    %c0_138 = arith.constant 0 : index
    %c25_139 = arith.constant 25 : index
    %143 = vector.load %arg15[%c0_138, %c25_139] : memref<8x640xf32, #tpu.memory_space<vmem>>, vector<8x568xf32>
    %cst_140 = arith.constant dense<0.000000e+00> : vector<8x568xf32>
    %144 = tpu.matmul %142, %143, %cst_140 {dimension_numbers = #tpu.dot_dimension_numbers<[1], [0], [0], [1], [0, 0, 1, 1], [], []>} : vector<8x8xf32>, vector<8x568xf32>, vector<8x568xf32> -> vector<8x568xf32>
    %145 = arith.addf %140, %144 : vector<8x568xf32>
    %c26 = arith.constant 26 : index
    %c0_141 = arith.constant 0 : index
    %c0_142 = arith.constant 0 : index
    %146 = vector.load %arg4[%c26, %c0_141, %c0_142] : memref<32x8x8xf32, #tpu.memory_space<vmem>>, vector<1x8x8xf32>
    %147 = vector.shape_cast %146 : vector<1x8x8xf32> to vector<8x8xf32>
    %c0_143 = arith.constant 0 : index
    %c26_144 = arith.constant 26 : index
    %148 = vector.load %arg15[%c0_143, %c26_144] : memref<8x640xf32, #tpu.memory_space<vmem>>, vector<8x568xf32>
    %cst_145 = arith.constant dense<0.000000e+00> : vector<8x568xf32>
    %149 = tpu.matmul %147, %148, %cst_145 {dimension_numbers = #tpu.dot_dimension_numbers<[1], [0], [0], [1], [0, 0, 1, 1], [], []>} : vector<8x8xf32>, vector<8x568xf32>, vector<8x568xf32> -> vector<8x568xf32>
    %150 = arith.addf %145, %149 : vector<8x568xf32>
    %c27 = arith.constant 27 : index
    %c0_146 = arith.constant 0 : index
    %c0_147 = arith.constant 0 : index
    %151 = vector.load %arg4[%c27, %c0_146, %c0_147] : memref<32x8x8xf32, #tpu.memory_space<vmem>>, vector<1x8x8xf32>
    %152 = vector.shape_cast %151 : vector<1x8x8xf32> to vector<8x8xf32>
    %c0_148 = arith.constant 0 : index
    %c27_149 = arith.constant 27 : index
    %153 = vector.load %arg15[%c0_148, %c27_149] : memref<8x640xf32, #tpu.memory_space<vmem>>, vector<8x568xf32>
    %cst_150 = arith.constant dense<0.000000e+00> : vector<8x568xf32>
    %154 = tpu.matmul %152, %153, %cst_150 {dimension_numbers = #tpu.dot_dimension_numbers<[1], [0], [0], [1], [0, 0, 1, 1], [], []>} : vector<8x8xf32>, vector<8x568xf32>, vector<8x568xf32> -> vector<8x568xf32>
    %155 = arith.addf %150, %154 : vector<8x568xf32>
    %c28 = arith.constant 28 : index
    %c0_151 = arith.constant 0 : index
    %c0_152 = arith.constant 0 : index
    %156 = vector.load %arg4[%c28, %c0_151, %c0_152] : memref<32x8x8xf32, #tpu.memory_space<vmem>>, vector<1x8x8xf32>
    %157 = vector.shape_cast %156 : vector<1x8x8xf32> to vector<8x8xf32>
    %c0_153 = arith.constant 0 : index
    %c28_154 = arith.constant 28 : index
    %158 = vector.load %arg15[%c0_153, %c28_154] : memref<8x640xf32, #tpu.memory_space<vmem>>, vector<8x568xf32>
    %cst_155 = arith.constant dense<0.000000e+00> : vector<8x568xf32>
    %159 = tpu.matmul %157, %158, %cst_155 {dimension_numbers = #tpu.dot_dimension_numbers<[1], [0], [0], [1], [0, 0, 1, 1], [], []>} : vector<8x8xf32>, vector<8x568xf32>, vector<8x568xf32> -> vector<8x568xf32>
    %160 = arith.addf %155, %159 : vector<8x568xf32>
    %c29 = arith.constant 29 : index
    %c0_156 = arith.constant 0 : index
    %c0_157 = arith.constant 0 : index
    %161 = vector.load %arg4[%c29, %c0_156, %c0_157] : memref<32x8x8xf32, #tpu.memory_space<vmem>>, vector<1x8x8xf32>
    %162 = vector.shape_cast %161 : vector<1x8x8xf32> to vector<8x8xf32>
    %c0_158 = arith.constant 0 : index
    %c29_159 = arith.constant 29 : index
    %163 = vector.load %arg15[%c0_158, %c29_159] : memref<8x640xf32, #tpu.memory_space<vmem>>, vector<8x568xf32>
    %cst_160 = arith.constant dense<0.000000e+00> : vector<8x568xf32>
    %164 = tpu.matmul %162, %163, %cst_160 {dimension_numbers = #tpu.dot_dimension_numbers<[1], [0], [0], [1], [0, 0, 1, 1], [], []>} : vector<8x8xf32>, vector<8x568xf32>, vector<8x568xf32> -> vector<8x568xf32>
    %165 = arith.addf %160, %164 : vector<8x568xf32>
    %c30 = arith.constant 30 : index
    %c0_161 = arith.constant 0 : index
    %c0_162 = arith.constant 0 : index
    %166 = vector.load %arg4[%c30, %c0_161, %c0_162] : memref<32x8x8xf32, #tpu.memory_space<vmem>>, vector<1x8x8xf32>
    %167 = vector.shape_cast %166 : vector<1x8x8xf32> to vector<8x8xf32>
    %c0_163 = arith.constant 0 : index
    %c30_164 = arith.constant 30 : index
    %168 = vector.load %arg15[%c0_163, %c30_164] : memref<8x640xf32, #tpu.memory_space<vmem>>, vector<8x568xf32>
    %cst_165 = arith.constant dense<0.000000e+00> : vector<8x568xf32>
    %169 = tpu.matmul %167, %168, %cst_165 {dimension_numbers = #tpu.dot_dimension_numbers<[1], [0], [0], [1], [0, 0, 1, 1], [], []>} : vector<8x8xf32>, vector<8x568xf32>, vector<8x568xf32> -> vector<8x568xf32>
    %170 = arith.addf %165, %169 : vector<8x568xf32>
    %c31 = arith.constant 31 : index
    %c0_166 = arith.constant 0 : index
    %c0_167 = arith.constant 0 : index
    %171 = vector.load %arg4[%c31, %c0_166, %c0_167] : memref<32x8x8xf32, #tpu.memory_space<vmem>>, vector<1x8x8xf32>
    %172 = vector.shape_cast %171 : vector<1x8x8xf32> to vector<8x8xf32>
    %c0_168 = arith.constant 0 : index
    %c31_169 = arith.constant 31 : index
    %173 = vector.load %arg15[%c0_168, %c31_169] : memref<8x640xf32, #tpu.memory_space<vmem>>, vector<8x568xf32>
    %cst_170 = arith.constant dense<0.000000e+00> : vector<8x568xf32>
    %174 = tpu.matmul %172, %173, %cst_170 {dimension_numbers = #tpu.dot_dimension_numbers<[1], [0], [0], [1], [0, 0, 1, 1], [], []>} : vector<8x8xf32>, vector<8x568xf32>, vector<8x568xf32> -> vector<8x568xf32>
    %175 = arith.addf %170, %174 : vector<8x568xf32>
    %c0_171 = arith.constant 0 : index
    %c0_172 = arith.constant 0 : index
    %176 = vector.load %arg5[%c0_171, %c0_172] : memref<568x256xf32, #tpu.memory_space<vmem>>, vector<568x256xf32>
    %cst_173 = arith.constant dense<0.000000e+00> : vector<8x256xf32>
    %177 = tpu.matmul %175, %176, %cst_173 {dimension_numbers = #tpu.dot_dimension_numbers<[1], [0], [0], [1], [0, 0, 1, 1], [], []>} : vector<8x568xf32>, vector<568x256xf32>, vector<8x256xf32> -> vector<8x256xf32>
    %178 = vector.extract_strided_slice %177 {offsets = [0, 0], sizes = [8, 128], strides = [1, 1]} : vector<8x256xf32> to vector<8x128xf32>
    %179 = vector.extract_strided_slice %177 {offsets = [0, 128], sizes = [8, 128], strides = [1, 1]} : vector<8x256xf32> to vector<8x128xf32>
    %180 = arith.maximumf %178, %179 : vector<8x128xf32>
    %c0_174 = arith.constant 0 : index
    %c0_175 = arith.constant 0 : index
    %181 = vector.load %arg6[%c0_174, %c0_175] : memref<8x128xf32, #tpu.memory_space<vmem>>, vector<8x128xf32>
    %182 = arith.addf %180, %181 : vector<8x128xf32>
    %183 = arith.negf %182 : vector<8x128xf32>
    %184 = math.exp %183 : vector<8x128xf32>
    %cst_176 = arith.constant 1.000000e+00 : f32
    %185 = vector.broadcast %cst_176 : f32 to vector<8x128xf32>
    %186 = arith.addf %185, %184 : vector<8x128xf32>
    %187 = arith.divf %185, %186 : vector<8x128xf32>
    %c0_177 = arith.constant 0 : index
    %c0_178 = arith.constant 0 : index
    %188 = vector.load %arg16[%c0_177, %c0_178] : memref<8x128xf32, #tpu.memory_space<vmem>>, vector<8x128xf32>
    tpu.vector_store %arg16[%c0_177, %c0_178], %187 {strides = array<i32>} : memref<8x128xf32, #tpu.memory_space<vmem>>, vector<8x128xf32>,
    %cst_179 = arith.constant 0.000000e+00 : f32
    %189 = vector.broadcast %cst_179 : f32 to vector<8x56xf32>
    %c0_180 = arith.constant 0 : index
    %c0_181 = arith.constant 0 : index
    %c0_182 = arith.constant 0 : index
    %190 = vector.load %arg7[%c0_180, %c0_181, %c0_182] : memref<16x8x8xf32, #tpu.memory_space<vmem>>, vector<1x8x8xf32>
    %191 = vector.shape_cast %190 : vector<1x8x8xf32> to vector<8x8xf32>
    %c0_183 = arith.constant 0 : index
    %c0_184 = arith.constant 0 : index
    %192 = vector.load %arg16[%c0_183, %c0_184] : memref<8x128xf32, #tpu.memory_space<vmem>>, vector<8x56xf32>
    %cst_185 = arith.constant dense<0.000000e+00> : vector<8x56xf32>
    %193 = tpu.matmul %191, %192, %cst_185 {dimension_numbers = #tpu.dot_dimension_numbers<[1], [0], [0], [1], [0, 0, 1, 1], [], []>} : vector<8x8xf32>, vector<8x56xf32>, vector<8x56xf32> -> vector<8x56xf32>
    %194 = arith.addf %189, %193 : vector<8x56xf32>
    %c1_186 = arith.constant 1 : index
    %c0_187 = arith.constant 0 : index
    %c0_188 = arith.constant 0 : index
    %195 = vector.load %arg7[%c1_186, %c0_187, %c0_188] : memref<16x8x8xf32, #tpu.memory_space<vmem>>, vector<1x8x8xf32>
    %196 = vector.shape_cast %195 : vector<1x8x8xf32> to vector<8x8xf32>
    %c0_189 = arith.constant 0 : index
    %c1_190 = arith.constant 1 : index
    %197 = vector.load %arg16[%c0_189, %c1_190] : memref<8x128xf32, #tpu.memory_space<vmem>>, vector<8x56xf32>
    %cst_191 = arith.constant dense<0.000000e+00> : vector<8x56xf32>
    %198 = tpu.matmul %196, %197, %cst_191 {dimension_numbers = #tpu.dot_dimension_numbers<[1], [0], [0], [1], [0, 0, 1, 1], [], []>} : vector<8x8xf32>, vector<8x56xf32>, vector<8x56xf32> -> vector<8x56xf32>
    %199 = arith.addf %194, %198 : vector<8x56xf32>
    %c2_192 = arith.constant 2 : index
    %c0_193 = arith.constant 0 : index
    %c0_194 = arith.constant 0 : index
    %200 = vector.load %arg7[%c2_192, %c0_193, %c0_194] : memref<16x8x8xf32, #tpu.memory_space<vmem>>, vector<1x8x8xf32>
    %201 = vector.shape_cast %200 : vector<1x8x8xf32> to vector<8x8xf32>
    %c0_195 = arith.constant 0 : index
    %c2_196 = arith.constant 2 : index
    %202 = vector.load %arg16[%c0_195, %c2_196] : memref<8x128xf32, #tpu.memory_space<vmem>>, vector<8x56xf32>
    %cst_197 = arith.constant dense<0.000000e+00> : vector<8x56xf32>
    %203 = tpu.matmul %201, %202, %cst_197 {dimension_numbers = #tpu.dot_dimension_numbers<[1], [0], [0], [1], [0, 0, 1, 1], [], []>} : vector<8x8xf32>, vector<8x56xf32>, vector<8x56xf32> -> vector<8x56xf32>
    %204 = arith.addf %199, %203 : vector<8x56xf32>
    %c3_198 = arith.constant 3 : index
    %c0_199 = arith.constant 0 : index
    %c0_200 = arith.constant 0 : index
    %205 = vector.load %arg7[%c3_198, %c0_199, %c0_200] : memref<16x8x8xf32, #tpu.memory_space<vmem>>, vector<1x8x8xf32>
    %206 = vector.shape_cast %205 : vector<1x8x8xf32> to vector<8x8xf32>
    %c0_201 = arith.constant 0 : index
    %c3_202 = arith.constant 3 : index
    %207 = vector.load %arg16[%c0_201, %c3_202] : memref<8x128xf32, #tpu.memory_space<vmem>>, vector<8x56xf32>
    %cst_203 = arith.constant dense<0.000000e+00> : vector<8x56xf32>
    %208 = tpu.matmul %206, %207, %cst_203 {dimension_numbers = #tpu.dot_dimension_numbers<[1], [0], [0], [1], [0, 0, 1, 1], [], []>} : vector<8x8xf32>, vector<8x56xf32>, vector<8x56xf32> -> vector<8x56xf32>
    %209 = arith.addf %204, %208 : vector<8x56xf32>
    %c4_204 = arith.constant 4 : index
    %c0_205 = arith.constant 0 : index
    %c0_206 = arith.constant 0 : index
    %210 = vector.load %arg7[%c4_204, %c0_205, %c0_206] : memref<16x8x8xf32, #tpu.memory_space<vmem>>, vector<1x8x8xf32>
    %211 = vector.shape_cast %210 : vector<1x8x8xf32> to vector<8x8xf32>
    %c0_207 = arith.constant 0 : index
    %c4_208 = arith.constant 4 : index
    %212 = vector.load %arg16[%c0_207, %c4_208] : memref<8x128xf32, #tpu.memory_space<vmem>>, vector<8x56xf32>
    %cst_209 = arith.constant dense<0.000000e+00> : vector<8x56xf32>
    %213 = tpu.matmul %211, %212, %cst_209 {dimension_numbers = #tpu.dot_dimension_numbers<[1], [0], [0], [1], [0, 0, 1, 1], [], []>} : vector<8x8xf32>, vector<8x56xf32>, vector<8x56xf32> -> vector<8x56xf32>
    %214 = arith.addf %209, %213 : vector<8x56xf32>
    %c5_210 = arith.constant 5 : index
    %c0_211 = arith.constant 0 : index
    %c0_212 = arith.constant 0 : index
    %215 = vector.load %arg7[%c5_210, %c0_211, %c0_212] : memref<16x8x8xf32, #tpu.memory_space<vmem>>, vector<1x8x8xf32>
    %216 = vector.shape_cast %215 : vector<1x8x8xf32> to vector<8x8xf32>
    %c0_213 = arith.constant 0 : index
    %c5_214 = arith.constant 5 : index
    %217 = vector.load %arg16[%c0_213, %c5_214] : memref<8x128xf32, #tpu.memory_space<vmem>>, vector<8x56xf32>
    %cst_215 = arith.constant dense<0.000000e+00> : vector<8x56xf32>
    %218 = tpu.matmul %216, %217, %cst_215 {dimension_numbers = #tpu.dot_dimension_numbers<[1], [0], [0], [1], [0, 0, 1, 1], [], []>} : vector<8x8xf32>, vector<8x56xf32>, vector<8x56xf32> -> vector<8x56xf32>
    %219 = arith.addf %214, %218 : vector<8x56xf32>
    %c6_216 = arith.constant 6 : index
    %c0_217 = arith.constant 0 : index
    %c0_218 = arith.constant 0 : index
    %220 = vector.load %arg7[%c6_216, %c0_217, %c0_218] : memref<16x8x8xf32, #tpu.memory_space<vmem>>, vector<1x8x8xf32>
    %221 = vector.shape_cast %220 : vector<1x8x8xf32> to vector<8x8xf32>
    %c0_219 = arith.constant 0 : index
    %c6_220 = arith.constant 6 : index
    %222 = vector.load %arg16[%c0_219, %c6_220] : memref<8x128xf32, #tpu.memory_space<vmem>>, vector<8x56xf32>
    %cst_221 = arith.constant dense<0.000000e+00> : vector<8x56xf32>
    %223 = tpu.matmul %221, %222, %cst_221 {dimension_numbers = #tpu.dot_dimension_numbers<[1], [0], [0], [1], [0, 0, 1, 1], [], []>} : vector<8x8xf32>, vector<8x56xf32>, vector<8x56xf32> -> vector<8x56xf32>
    %224 = arith.addf %219, %223 : vector<8x56xf32>
    %c7_222 = arith.constant 7 : index
    %c0_223 = arith.constant 0 : index
    %c0_224 = arith.constant 0 : index
    %225 = vector.load %arg7[%c7_222, %c0_223, %c0_224] : memref<16x8x8xf32, #tpu.memory_space<vmem>>, vector<1x8x8xf32>
    %226 = vector.shape_cast %225 : vector<1x8x8xf32> to vector<8x8xf32>
    %c0_225 = arith.constant 0 : index
    %c7_226 = arith.constant 7 : index
    %227 = vector.load %arg16[%c0_225, %c7_226] : memref<8x128xf32, #tpu.memory_space<vmem>>, vector<8x56xf32>
    %cst_227 = arith.constant dense<0.000000e+00> : vector<8x56xf32>
    %228 = tpu.matmul %226, %227, %cst_227 {dimension_numbers = #tpu.dot_dimension_numbers<[1], [0], [0], [1], [0, 0, 1, 1], [], []>} : vector<8x8xf32>, vector<8x56xf32>, vector<8x56xf32> -> vector<8x56xf32>
    %229 = arith.addf %224, %228 : vector<8x56xf32>
    %c8_228 = arith.constant 8 : index
    %c0_229 = arith.constant 0 : index
    %c0_230 = arith.constant 0 : index
    %230 = vector.load %arg7[%c8_228, %c0_229, %c0_230] : memref<16x8x8xf32, #tpu.memory_space<vmem>>, vector<1x8x8xf32>
    %231 = vector.shape_cast %230 : vector<1x8x8xf32> to vector<8x8xf32>
    %c0_231 = arith.constant 0 : index
    %c8_232 = arith.constant 8 : index
    %232 = vector.load %arg16[%c0_231, %c8_232] : memref<8x128xf32, #tpu.memory_space<vmem>>, vector<8x56xf32>
    %cst_233 = arith.constant dense<0.000000e+00> : vector<8x56xf32>
    %233 = tpu.matmul %231, %232, %cst_233 {dimension_numbers = #tpu.dot_dimension_numbers<[1], [0], [0], [1], [0, 0, 1, 1], [], []>} : vector<8x8xf32>, vector<8x56xf32>, vector<8x56xf32> -> vector<8x56xf32>
    %234 = arith.addf %229, %233 : vector<8x56xf32>
    %c9_234 = arith.constant 9 : index
    %c0_235 = arith.constant 0 : index
    %c0_236 = arith.constant 0 : index
    %235 = vector.load %arg7[%c9_234, %c0_235, %c0_236] : memref<16x8x8xf32, #tpu.memory_space<vmem>>, vector<1x8x8xf32>
    %236 = vector.shape_cast %235 : vector<1x8x8xf32> to vector<8x8xf32>
    %c0_237 = arith.constant 0 : index
    %c9_238 = arith.constant 9 : index
    %237 = vector.load %arg16[%c0_237, %c9_238] : memref<8x128xf32, #tpu.memory_space<vmem>>, vector<8x56xf32>
    %cst_239 = arith.constant dense<0.000000e+00> : vector<8x56xf32>
    %238 = tpu.matmul %236, %237, %cst_239 {dimension_numbers = #tpu.dot_dimension_numbers<[1], [0], [0], [1], [0, 0, 1, 1], [], []>} : vector<8x8xf32>, vector<8x56xf32>, vector<8x56xf32> -> vector<8x56xf32>
    %239 = arith.addf %234, %238 : vector<8x56xf32>
    %c10_240 = arith.constant 10 : index
    %c0_241 = arith.constant 0 : index
    %c0_242 = arith.constant 0 : index
    %240 = vector.load %arg7[%c10_240, %c0_241, %c0_242] : memref<16x8x8xf32, #tpu.memory_space<vmem>>, vector<1x8x8xf32>
    %241 = vector.shape_cast %240 : vector<1x8x8xf32> to vector<8x8xf32>
    %c0_243 = arith.constant 0 : index
    %c10_244 = arith.constant 10 : index
    %242 = vector.load %arg16[%c0_243, %c10_244] : memref<8x128xf32, #tpu.memory_space<vmem>>, vector<8x56xf32>
    %cst_245 = arith.constant dense<0.000000e+00> : vector<8x56xf32>
    %243 = tpu.matmul %241, %242, %cst_245 {dimension_numbers = #tpu.dot_dimension_numbers<[1], [0], [0], [1], [0, 0, 1, 1], [], []>} : vector<8x8xf32>, vector<8x56xf32>, vector<8x56xf32> -> vector<8x56xf32>
    %244 = arith.addf %239, %243 : vector<8x56xf32>
    %c11_246 = arith.constant 11 : index
    %c0_247 = arith.constant 0 : index
    %c0_248 = arith.constant 0 : index
    %245 = vector.load %arg7[%c11_246, %c0_247, %c0_248] : memref<16x8x8xf32, #tpu.memory_space<vmem>>, vector<1x8x8xf32>
    %246 = vector.shape_cast %245 : vector<1x8x8xf32> to vector<8x8xf32>
    %c0_249 = arith.constant 0 : index
    %c11_250 = arith.constant 11 : index
    %247 = vector.load %arg16[%c0_249, %c11_250] : memref<8x128xf32, #tpu.memory_space<vmem>>, vector<8x56xf32>
    %cst_251 = arith.constant dense<0.000000e+00> : vector<8x56xf32>
    %248 = tpu.matmul %246, %247, %cst_251 {dimension_numbers = #tpu.dot_dimension_numbers<[1], [0], [0], [1], [0, 0, 1, 1], [], []>} : vector<8x8xf32>, vector<8x56xf32>, vector<8x56xf32> -> vector<8x56xf32>
    %249 = arith.addf %244, %248 : vector<8x56xf32>
    %c12_252 = arith.constant 12 : index
    %c0_253 = arith.constant 0 : index
    %c0_254 = arith.constant 0 : index
    %250 = vector.load %arg7[%c12_252, %c0_253, %c0_254] : memref<16x8x8xf32, #tpu.memory_space<vmem>>, vector<1x8x8xf32>
    %251 = vector.shape_cast %250 : vector<1x8x8xf32> to vector<8x8xf32>
    %c0_255 = arith.constant 0 : index
    %c12_256 = arith.constant 12 : index
    %252 = vector.load %arg16[%c0_255, %c12_256] : memref<8x128xf32, #tpu.memory_space<vmem>>, vector<8x56xf32>
    %cst_257 = arith.constant dense<0.000000e+00> : vector<8x56xf32>
    %253 = tpu.matmul %251, %252, %cst_257 {dimension_numbers = #tpu.dot_dimension_numbers<[1], [0], [0], [1], [0, 0, 1, 1], [], []>} : vector<8x8xf32>, vector<8x56xf32>, vector<8x56xf32> -> vector<8x56xf32>
    %254 = arith.addf %249, %253 : vector<8x56xf32>
    %c13_258 = arith.constant 13 : index
    %c0_259 = arith.constant 0 : index
    %c0_260 = arith.constant 0 : index
    %255 = vector.load %arg7[%c13_258, %c0_259, %c0_260] : memref<16x8x8xf32, #tpu.memory_space<vmem>>, vector<1x8x8xf32>
    %256 = vector.shape_cast %255 : vector<1x8x8xf32> to vector<8x8xf32>
    %c0_261 = arith.constant 0 : index
    %c13_262 = arith.constant 13 : index
    %257 = vector.load %arg16[%c0_261, %c13_262] : memref<8x128xf32, #tpu.memory_space<vmem>>, vector<8x56xf32>
    %cst_263 = arith.constant dense<0.000000e+00> : vector<8x56xf32>
    %258 = tpu.matmul %256, %257, %cst_263 {dimension_numbers = #tpu.dot_dimension_numbers<[1], [0], [0], [1], [0, 0, 1, 1], [], []>} : vector<8x8xf32>, vector<8x56xf32>, vector<8x56xf32> -> vector<8x56xf32>
    %259 = arith.addf %254, %258 : vector<8x56xf32>
    %c14_264 = arith.constant 14 : index
    %c0_265 = arith.constant 0 : index
    %c0_266 = arith.constant 0 : index
    %260 = vector.load %arg7[%c14_264, %c0_265, %c0_266] : memref<16x8x8xf32, #tpu.memory_space<vmem>>, vector<1x8x8xf32>
    %261 = vector.shape_cast %260 : vector<1x8x8xf32> to vector<8x8xf32>
    %c0_267 = arith.constant 0 : index
    %c14_268 = arith.constant 14 : index
    %262 = vector.load %arg16[%c0_267, %c14_268] : memref<8x128xf32, #tpu.memory_space<vmem>>, vector<8x56xf32>
    %cst_269 = arith.constant dense<0.000000e+00> : vector<8x56xf32>
    %263 = tpu.matmul %261, %262, %cst_269 {dimension_numbers = #tpu.dot_dimension_numbers<[1], [0], [0], [1], [0, 0, 1, 1], [], []>} : vector<8x8xf32>, vector<8x56xf32>, vector<8x56xf32> -> vector<8x56xf32>
    %264 = arith.addf %259, %263 : vector<8x56xf32>
    %c15_270 = arith.constant 15 : index
    %c0_271 = arith.constant 0 : index
    %c0_272 = arith.constant 0 : index
    %265 = vector.load %arg7[%c15_270, %c0_271, %c0_272] : memref<16x8x8xf32, #tpu.memory_space<vmem>>, vector<1x8x8xf32>
    %266 = vector.shape_cast %265 : vector<1x8x8xf32> to vector<8x8xf32>
    %c0_273 = arith.constant 0 : index
    %c15_274 = arith.constant 15 : index
    %267 = vector.load %arg16[%c0_273, %c15_274] : memref<8x128xf32, #tpu.memory_space<vmem>>, vector<8x56xf32>
    %cst_275 = arith.constant dense<0.000000e+00> : vector<8x56xf32>
    %268 = tpu.matmul %266, %267, %cst_275 {dimension_numbers = #tpu.dot_dimension_numbers<[1], [0], [0], [1], [0, 0, 1, 1], [], []>} : vector<8x8xf32>, vector<8x56xf32>, vector<8x56xf32> -> vector<8x56xf32>
    %269 = arith.addf %264, %268 : vector<8x56xf32>
    %c0_276 = arith.constant 0 : index
    %c0_277 = arith.constant 0 : index
    %270 = vector.load %arg8[%c0_276, %c0_277] : memref<56x256xf32, #tpu.memory_space<vmem>>, vector<56x256xf32>
    %cst_278 = arith.constant dense<0.000000e+00> : vector<8x256xf32>
    %271 = tpu.matmul %269, %270, %cst_278 {dimension_numbers = #tpu.dot_dimension_numbers<[1], [0], [0], [1], [0, 0, 1, 1], [], []>} : vector<8x56xf32>, vector<56x256xf32>, vector<8x256xf32> -> vector<8x256xf32>
    %272 = vector.extract_strided_slice %271 {offsets = [0, 0], sizes = [8, 128], strides = [1, 1]} : vector<8x256xf32> to vector<8x128xf32>
    %273 = vector.extract_strided_slice %271 {offsets = [0, 128], sizes = [8, 128], strides = [1, 1]} : vector<8x256xf32> to vector<8x128xf32>
    %274 = arith.maximumf %272, %273 : vector<8x128xf32>
    %c0_279 = arith.constant 0 : index
    %c0_280 = arith.constant 0 : index
    %275 = vector.load %arg9[%c0_279, %c0_280] : memref<8x128xf32, #tpu.memory_space<vmem>>, vector<8x128xf32>
    %276 = arith.addf %274, %275 : vector<8x128xf32>
    %277 = arith.negf %276 : vector<8x128xf32>
    %278 = math.exp %277 : vector<8x128xf32>
    %cst_281 = arith.constant 1.000000e+00 : f32
    %279 = vector.broadcast %cst_281 : f32 to vector<8x128xf32>
    %280 = arith.addf %279, %278 : vector<8x128xf32>
    %281 = arith.divf %279, %280 : vector<8x128xf32>
    %cst_282 = arith.constant 0.000000e+00 : f32
    %282 = vector.broadcast %cst_282 : f32 to vector<1x128xf32>
    %283 = vector.extract_strided_slice %281 {offsets = [0, 0], sizes = [1, 128], strides = [1, 1]} : vector<8x128xf32> to vector<1x128xf32>
    %c0_283 = arith.constant 0 : index
    %c0_284 = arith.constant 0 : index
    %c0_285 = arith.constant 0 : index
    %284 = vector.load %arg10[%c0_283, %c0_284, %c0_285] : memref<8x128x128xf32, #tpu.memory_space<vmem>>, vector<1x128x128xf32>
    %285 = vector.shape_cast %284 : vector<1x128x128xf32> to vector<128x128xf32>
    %cst_286 = arith.constant dense<0.000000e+00> : vector<1x128xf32>
    %286 = tpu.matmul %283, %285, %cst_286 {dimension_numbers = #tpu.dot_dimension_numbers<[1], [0], [0], [1], [0, 0, 1, 1], [], []>} : vector<1x128xf32>, vector<128x128xf32>, vector<1x128xf32> -> vector<1x128xf32>
    %287 = arith.addf %282, %286 : vector<1x128xf32>
    %288 = vector.extract_strided_slice %281 {offsets = [1, 0], sizes = [1, 128], strides = [1, 1]} : vector<8x128xf32> to vector<1x128xf32>
    %c1_287 = arith.constant 1 : index
    %c0_288 = arith.constant 0 : index
    %c0_289 = arith.constant 0 : index
    %289 = vector.load %arg10[%c1_287, %c0_288, %c0_289] : memref<8x128x128xf32, #tpu.memory_space<vmem>>, vector<1x128x128xf32>
    %290 = vector.shape_cast %289 : vector<1x128x128xf32> to vector<128x128xf32>
    %cst_290 = arith.constant dense<0.000000e+00> : vector<1x128xf32>
    %291 = tpu.matmul %288, %290, %cst_290 {dimension_numbers = #tpu.dot_dimension_numbers<[1], [0], [0], [1], [0, 0, 1, 1], [], []>} : vector<1x128xf32>, vector<128x128xf32>, vector<1x128xf32> -> vector<1x128xf32>
    %292 = arith.addf %287, %291 : vector<1x128xf32>
    %293 = vector.extract_strided_slice %281 {offsets = [2, 0], sizes = [1, 128], strides = [1, 1]} : vector<8x128xf32> to vector<1x128xf32>
    %c2_291 = arith.constant 2 : index
    %c0_292 = arith.constant 0 : index
    %c0_293 = arith.constant 0 : index
    %294 = vector.load %arg10[%c2_291, %c0_292, %c0_293] : memref<8x128x128xf32, #tpu.memory_space<vmem>>, vector<1x128x128xf32>
    %295 = vector.shape_cast %294 : vector<1x128x128xf32> to vector<128x128xf32>
    %cst_294 = arith.constant dense<0.000000e+00> : vector<1x128xf32>
    %296 = tpu.matmul %293, %295, %cst_294 {dimension_numbers = #tpu.dot_dimension_numbers<[1], [0], [0], [1], [0, 0, 1, 1], [], []>} : vector<1x128xf32>, vector<128x128xf32>, vector<1x128xf32> -> vector<1x128xf32>
    %297 = arith.addf %292, %296 : vector<1x128xf32>
    %298 = vector.extract_strided_slice %281 {offsets = [3, 0], sizes = [1, 128], strides = [1, 1]} : vector<8x128xf32> to vector<1x128xf32>
    %c3_295 = arith.constant 3 : index
    %c0_296 = arith.constant 0 : index
    %c0_297 = arith.constant 0 : index
    %299 = vector.load %arg10[%c3_295, %c0_296, %c0_297] : memref<8x128x128xf32, #tpu.memory_space<vmem>>, vector<1x128x128xf32>
    %300 = vector.shape_cast %299 : vector<1x128x128xf32> to vector<128x128xf32>
    %cst_298 = arith.constant dense<0.000000e+00> : vector<1x128xf32>
    %301 = tpu.matmul %298, %300, %cst_298 {dimension_numbers = #tpu.dot_dimension_numbers<[1], [0], [0], [1], [0, 0, 1, 1], [], []>} : vector<1x128xf32>, vector<128x128xf32>, vector<1x128xf32> -> vector<1x128xf32>
    %302 = arith.addf %297, %301 : vector<1x128xf32>
    %303 = vector.extract_strided_slice %281 {offsets = [4, 0], sizes = [1, 128], strides = [1, 1]} : vector<8x128xf32> to vector<1x128xf32>
    %c4_299 = arith.constant 4 : index
    %c0_300 = arith.constant 0 : index
    %c0_301 = arith.constant 0 : index
    %304 = vector.load %arg10[%c4_299, %c0_300, %c0_301] : memref<8x128x128xf32, #tpu.memory_space<vmem>>, vector<1x128x128xf32>
    %305 = vector.shape_cast %304 : vector<1x128x128xf32> to vector<128x128xf32>
    %cst_302 = arith.constant dense<0.000000e+00> : vector<1x128xf32>
    %306 = tpu.matmul %303, %305, %cst_302 {dimension_numbers = #tpu.dot_dimension_numbers<[1], [0], [0], [1], [0, 0, 1, 1], [], []>} : vector<1x128xf32>, vector<128x128xf32>, vector<1x128xf32> -> vector<1x128xf32>
    %307 = arith.addf %302, %306 : vector<1x128xf32>
    %308 = vector.extract_strided_slice %281 {offsets = [5, 0], sizes = [1, 128], strides = [1, 1]} : vector<8x128xf32> to vector<1x128xf32>
    %c5_303 = arith.constant 5 : index
    %c0_304 = arith.constant 0 : index
    %c0_305 = arith.constant 0 : index
    %309 = vector.load %arg10[%c5_303, %c0_304, %c0_305] : memref<8x128x128xf32, #tpu.memory_space<vmem>>, vector<1x128x128xf32>
    %310 = vector.shape_cast %309 : vector<1x128x128xf32> to vector<128x128xf32>
    %cst_306 = arith.constant dense<0.000000e+00> : vector<1x128xf32>
    %311 = tpu.matmul %308, %310, %cst_306 {dimension_numbers = #tpu.dot_dimension_numbers<[1], [0], [0], [1], [0, 0, 1, 1], [], []>} : vector<1x128xf32>, vector<128x128xf32>, vector<1x128xf32> -> vector<1x128xf32>
    %312 = arith.addf %307, %311 : vector<1x128xf32>
    %313 = vector.extract_strided_slice %281 {offsets = [6, 0], sizes = [1, 128], strides = [1, 1]} : vector<8x128xf32> to vector<1x128xf32>
    %c6_307 = arith.constant 6 : index
    %c0_308 = arith.constant 0 : index
    %c0_309 = arith.constant 0 : index
    %314 = vector.load %arg10[%c6_307, %c0_308, %c0_309] : memref<8x128x128xf32, #tpu.memory_space<vmem>>, vector<1x128x128xf32>
    %315 = vector.shape_cast %314 : vector<1x128x128xf32> to vector<128x128xf32>
    %cst_310 = arith.constant dense<0.000000e+00> : vector<1x128xf32>
    %316 = tpu.matmul %313, %315, %cst_310 {dimension_numbers = #tpu.dot_dimension_numbers<[1], [0], [0], [1], [0, 0, 1, 1], [], []>} : vector<1x128xf32>, vector<128x128xf32>, vector<1x128xf32> -> vector<1x128xf32>
    %317 = arith.addf %312, %316 : vector<1x128xf32>
    %318 = vector.extract_strided_slice %281 {offsets = [7, 0], sizes = [1, 128], strides = [1, 1]} : vector<8x128xf32> to vector<1x128xf32>
    %c7_311 = arith.constant 7 : index
    %c0_312 = arith.constant 0 : index
    %c0_313 = arith.constant 0 : index
    %319 = vector.load %arg10[%c7_311, %c0_312, %c0_313] : memref<8x128x128xf32, #tpu.memory_space<vmem>>, vector<1x128x128xf32>
    %320 = vector.shape_cast %319 : vector<1x128x128xf32> to vector<128x128xf32>
    %cst_314 = arith.constant dense<0.000000e+00> : vector<1x128xf32>
    %321 = tpu.matmul %318, %320, %cst_314 {dimension_numbers = #tpu.dot_dimension_numbers<[1], [0], [0], [1], [0, 0, 1, 1], [], []>} : vector<1x128xf32>, vector<128x128xf32>, vector<1x128xf32> -> vector<1x128xf32>
    %322 = arith.addf %317, %321 : vector<1x128xf32>
    %c0_315 = arith.constant 0 : index
    %c0_316 = arith.constant 0 : index
    %323 = vector.load %arg11[%c0_315, %c0_316] : memref<1x128xf32, #tpu.memory_space<vmem>>, vector<1x128xf32>
    %324 = arith.addf %322, %323 : vector<1x128xf32>
    %325 = arith.negf %324 : vector<1x128xf32>
    %326 = math.exp %325 : vector<1x128xf32>
    %cst_317 = arith.constant 1.000000e+00 : f32
    %327 = vector.broadcast %cst_317 : f32 to vector<1x128xf32>
    %328 = arith.addf %327, %326 : vector<1x128xf32>
    %329 = arith.divf %327, %328 : vector<1x128xf32>
    %c0_318 = arith.constant 0 : index
    %c0_319 = arith.constant 0 : index
    %330 = vector.load %arg12[%c0_318, %c0_319] : memref<128x128xf32, #tpu.memory_space<vmem>>, vector<128x128xf32>
    %cst_320 = arith.constant dense<0.000000e+00> : vector<1x128xf32>
    %331 = tpu.matmul %329, %330, %cst_320 {dimension_numbers = #tpu.dot_dimension_numbers<[1], [0], [0], [1], [0, 0, 1, 1], [], []>} : vector<1x128xf32>, vector<128x128xf32>, vector<1x128xf32> -> vector<1x128xf32>
    %c0_321 = arith.constant 0 : index
    %c0_322 = arith.constant 0 : index
    %332 = vector.load %arg13[%c0_321, %c0_322] : memref<1x128xf32, #tpu.memory_space<vmem>>, vector<1x128xf32>
    %333 = arith.addf %331, %332 : vector<1x128xf32>
    %c0_323 = arith.constant 0 : index
    %c0_324 = arith.constant 0 : index
    %c0_325 = arith.constant 0 : index
    %334 = vector.load %arg14[%c0_323, %c0_324, %c0_325] : memref<1x1x128xf32, #tpu.memory_space<vmem>>, vector<1x1x128xf32>
    %335 = vector.shape_cast %334 : vector<1x1x128xf32> to vector<1x128xf32>
    %336 = vector.shape_cast %333 : vector<1x128xf32> to vector<1x1x128xf32>
    tpu.vector_store %arg14[%c0_323, %c0_324, %c0_325], %336 {strides = array<i32>} : memref<1x1x128xf32, #tpu.memory_space<vmem>>, vector<1x1x128xf32>,
    return
  }
  func.func @transform_0(%arg0: i32) -> (i32, i32, i32) {
    %c0_i32 = arith.constant 0 : i32
    %c0_i32_0 = arith.constant 0 : i32
    %c0_i32_1 = arith.constant 0 : i32
    return %arg0, %c0_i32, %c0_i32_0 : i32, i32, i32
  }
  func.func @transform_1(%arg0: i32) -> (i32, i32) {
    %c0_i32 = arith.constant 0 : i32
    %c0_i32_0 = arith.constant 0 : i32
    %c0_i32_1 = arith.constant 0 : i32
    return %c0_i32, %c0_i32_0 : i32, i32
  }
  func.func @transform_2(%arg0: i32) -> (i32, i32) {
    %c0_i32 = arith.constant 0 : i32
    %c0_i32_0 = arith.constant 0 : i32
    %c0_i32_1 = arith.constant 0 : i32
    return %c0_i32, %c0_i32_0 : i32, i32
  }
  func.func @transform_3(%arg0: i32) -> (i32, i32, i32) {
    %c0_i32 = arith.constant 0 : i32
    %c0_i32_0 = arith.constant 0 : i32
    %c0_i32_1 = arith.constant 0 : i32
    %c0_i32_2 = arith.constant 0 : i32
    return %c0_i32, %c0_i32_0, %c0_i32_1 : i32, i32, i32
  }
  func.func @transform_4(%arg0: i32) -> (i32, i32) {
    %c0_i32 = arith.constant 0 : i32
    %c0_i32_0 = arith.constant 0 : i32
    %c0_i32_1 = arith.constant 0 : i32
    return %c0_i32, %c0_i32_0 : i32, i32
  }
  func.func @transform_5(%arg0: i32) -> (i32, i32) {
    %c0_i32 = arith.constant 0 : i32
    %c0_i32_0 = arith.constant 0 : i32
    %c0_i32_1 = arith.constant 0 : i32
    return %c0_i32, %c0_i32_0 : i32, i32
  }
  func.func @transform_6(%arg0: i32) -> (i32, i32, i32) {
    %c0_i32 = arith.constant 0 : i32
    %c0_i32_0 = arith.constant 0 : i32
    %c0_i32_1 = arith.constant 0 : i32
    %c0_i32_2 = arith.constant 0 : i32
    return %c0_i32, %c0_i32_0, %c0_i32_1 : i32, i32, i32
  }
  func.func @transform_7(%arg0: i32) -> (i32, i32) {
    %c0_i32 = arith.constant 0 : i32
    %c0_i32_0 = arith.constant 0 : i32
    %c0_i32_1 = arith.constant 0 : i32
    return %c0_i32, %c0_i32_0 : i32, i32
  }
  func.func @transform_8(%arg0: i32) -> (i32, i32) {
    %c0_i32 = arith.constant 0 : i32
    %c0_i32_0 = arith.constant 0 : i32
    %c0_i32_1 = arith.constant 0 : i32
    return %c0_i32, %c0_i32_0 : i32, i32
  }
  func.func @transform_9(%arg0: i32) -> (i32, i32, i32) {
    %c0_i32 = arith.constant 0 : i32
    %c0_i32_0 = arith.constant 0 : i32
    %c0_i32_1 = arith.constant 0 : i32
    %c0_i32_2 = arith.constant 0 : i32
    return %c0_i32, %c0_i32_0, %c0_i32_1 : i32, i32, i32
  }
  func.func @transform_10(%arg0: i32) -> (i32, i32) {
    %c0_i32 = arith.constant 0 : i32
    %c0_i32_0 = arith.constant 0 : i32
    %c0_i32_1 = arith.constant 0 : i32
    return %c0_i32, %c0_i32_0 : i32, i32
  }
  func.func @transform_11(%arg0: i32) -> (i32, i32) {
    %c0_i32 = arith.constant 0 : i32
    %c0_i32_0 = arith.constant 0 : i32
    %c0_i32_1 = arith.constant 0 : i32
    return %c0_i32, %c0_i32_0 : i32, i32
  }
  func.func @transform_12(%arg0: i32) -> (i32, i32) {
    %c0_i32 = arith.constant 0 : i32
    %c0_i32_0 = arith.constant 0 : i32
    %c0_i32_1 = arith.constant 0 : i32
    return %c0_i32, %c0_i32_0 : i32, i32
  }
  func.func @transform_13(%arg0: i32) -> (i32, i32, i32) {
    %c0_i32 = arith.constant 0 : i32
    %c0_i32_0 = arith.constant 0 : i32
    %c0_i32_1 = arith.constant 0 : i32
    return %arg0, %c0_i32, %c0_i32_0 : i32, i32, i32
  }
}

</mosaic_0001>

<bundles_post_ra>
// kernel: mccnn_forward.2
= control target key start
LH: loop header
LB: loop body
LE: loop exit
PB: predicated region body
PF: predicated region fallthrough
CT: control target
= control target key end

     0   :  { %8 = vsyncpa [#allocation3], 0  ;;  %s5087_s0 = inlined_call_operand.vmem [shape: bf16[2,8,2048], index: 0, kind: input, shape index: {}]   ;;  %s5088_s1 = inlined_call_operand.hbm [shape: bf16[2048,384], index: 1, kind: input, shape index: {}]   ;;  %s5089_s2 = inlined_call_operand.hbm [shape: f32[1,384], index: 2, kind: input, shape index: {}]   ;;  %s5090_s3 = inlined_call_operand.vmem [shape: f32[2,8,384], index: 3, kind: output, shape index: {}]  }
   0x1   :  { %9 = vsyncpa [#allocation5], 0  ;;  %s4877_s12 = smov 0  }
   0x2 LB: > { %s4883_s13 = sadd.s32 4294967295, %s4851_s12   ;;  %p3589_p0 = scmp.ge.s32.totalorder %s4851_s12, 1  ;;  %s4851_s12 = sphi %s4877_s12, %s15_s12  }
   0x3   : > { %p114_p1 = scmp.lt.s32.totalorder %s4851_s12, 3  ;;  %s4853_s14 = smov [#allocation2]  }
   0x4   : > { %s126_s15 = sshll.u32 %s4853_s14, 4  ;;  %p5091_p3 = scmp.eq.s32.totalorder %s4883_s13, 0  ;;  %s127_s15 = int_to_ptr.vmem [resolvable:$true] %s126_s15 }
   0x5   : > { %p4887_p2 = pnand %p3589_p0, %p114_p1  ;;  %s4854_s17 = smov [#allocation4]  }
   0x6   : > { %s140_s18 = sshll.u32 %s4854_s17, 4  ;;  %s4781_s22 = scalar_lea.hbm %s5088_s1, 49152  ;;  %s4900_s18 = int_to_ptr.vmem [resolvable:$true] %s140_s18 }
   0x7   : > { %s5093_s16 = scalar_select %p4887_p2, 1, 0 }
   0x8   : > { %p4218_p4 = pneg %p4887_p2  ;;  %p4782_p6 = scmp.ne.s32.totalorder %s5088_s1, %s4781_s22 }
   0x9   : > { %p4788_p10 = scmp.lt.u32.totalorder %s4781_s22, %s5088_s1 }
   0xa   : > { %p4896_p5 = pnand %p5091_p3, %p4218_p4 }
   0xc   : > { %p4783_p7 = pneg %p4896_p5 }
   0xe   : > { %p4784_p8 = pnand %p4783_p7, %p4782_p6 }
  0x10   : > { %p4785_p9 = pneg %p4784_p8 }
  0x12   : > { %p4790_p11 = pnand %p4788_p10, %p4785_p9 }
  0x14   : > { %4793 = shalt.err (!%p4790_p11)
}
  0x15   : > { %s4794_s27 = scalar_lea.vmem %s127_s15, 49152  ;;  %p4802_p1 = scmp.lt.s32.totalorder %s127_s15, %s127_s15 }
  0x16   : > { %p4795_p12 = scmp.ne.s32.totalorder %s127_s15, %s4794_s27  ;;  %p4803_p4 = scmp.lt.s32.totalorder %s4794_s27, %s4794_s27 }
  0x18   : > { %p4797_p13 = pnand %p4795_p12, %p4783_p7  ;;  %p4804_p3 = por %p4803_p4, %p4802_p1 }
  0x1a   : > { %p4798_p0 = pneg %p4797_p13 }
  0x1c   : > { %p4805_p2 = pnand %p4804_p3, %p4798_p0 }
  0x1e   : > { %4808 = shalt.err (!%p4805_p2)
}
  0x1f   : > { %s4855_s28 = smov 192   ;;  %s4856_s29 = smov 12  }
  0x20   : > { %4221 = dma.hbm_to_vmem [thread:$0]  (!%p4896_p5), %s5088_s1, 49152, %s127_s15, [#allocation3], %s4855_s28, %s4855_s28, %s4856_s29  }
  0x21   : > { %s4809_s7 = scalar_lea.hbm %s5089_s2, 48 }
  0x22   : > { %p4810_p6 = scmp.ne.s32.totalorder %s5089_s2, %s4809_s7  ;;  %p4816_p8 = scmp.lt.u32.totalorder %s4809_s7, %s5089_s2 }
  0x24   : > { %p4812_p2 = pnand %p4810_p6, %p4783_p7 }
  0x26   : > { %p4813_p3 = pneg %p4812_p2 }
  0x28   : > { %p4818_p9 = pnand %p4816_p8, %p4813_p3 }
  0x2a   : > { %4821 = shalt.err (!%p4818_p9)
}
  0x2b   : > { %s4822_s14 = scalar_lea.vmem %s4900_s18, 48  ;;  %s4829_s15 = scalar_lea.vmem %s4900_s18, 64 }
  0x2c   : > { %p4823_p10 = scmp.ne.s32.totalorder %s4900_s18, %s4822_s14  ;;  %p4830_p13 = scmp.lt.s32.totalorder %s4900_s18, %s4900_s18 }
  0x2d   : > { %p4831_p0 = scmp.lt.s32.totalorder %s4829_s15, %s4822_s14 }
  0x2e   : > { %p4825_p11 = pnand %p4823_p10, %p4783_p7 }
  0x2f   : > { %p4832_p1 = por %p4831_p0, %p4830_p13 }
  0x30   : > { %p4826_p12 = pneg %p4825_p11 }
  0x32   : > { %p4833_p4 = pnand %p4832_p1, %p4826_p12 }
  0x34   : > { %4836 = shalt.err (!%p4833_p4)
}
  0x35   : > { %4224 = dma.hbm_to_vmem [thread:$0]  (!%p4896_p5), %s5089_s2, 48, %s4900_s18, [#allocation5]  }
  0x36   : > { %p5095_p6 = scmp.ne.s32.totalorder %s5093_s16, 0 }
  0x37   : > { %p5096_p7 = scmp.eq.s32.totalorder (!%p5095_p6), %s4883_s13, 0 }
  0x38   : > { %161 = sbr.rel (%p5095_p6) target bundleno = 697 (0x2b9), region = 32 }
  0x3f   : > { %4842 = dma.done.wait (%p5096_p7), [#allocation3], 49152   ;;  %p5097_p2 = pmov %p5096_p7 }
  0x41   : > { %4844 = vsyncadd (%p5097_p2), [#allocation3], 4294918144  ;;  %p5098_p3 = pmov %p5097_p2 }
  0x42   : > { %p5099_p8 = pmov %p5097_p2 }
  0x43   : > { %4846 = dma.done.wait (%p5098_p3), [#allocation5], 48  }
  0x44   : > { %4848 = vsyncadd (%p5099_p8), [#allocation5], 4294967248  ;;  %v4241_v0 = vld [vmem:[#allocation2 + $0x4] ss:$12 sps:$4 sm:$0xff]   ;;  %v4245_v2 = vld [vmem:[#allocation2] ss:$12 sps:$4 sm:$0xff]  }
  0x45   : > { %v4243_v1 = vld [vmem:[#allocation2 + $0x304] ss:$12 sps:$4 sm:$0xff]   ;;  %2841 = vmatprep.subr.bf16.mxu1 %v4241_v0  ;;  %v4246_v3 = vld [vmem:[#allocation2 + $0x300] ss:$12 sps:$4 sm:$0xff]   ;;  %v4247_v4 = vld [vmem:[#allocation2 + $0x1c] ss:$12 sps:$4 sm:$0xff]  }
  0x46   : > { %2923 = vmatprep.subr.bf16.mxu0 %v4243_v1  ;;  %2842 = vmatpush1.bf16.msra.mxu1 %v4245_v2  ;;  %v4249_v5 = vld [vmem:[#allocation2 + $0x31c] ss:$12 sps:$4 sm:$0xff]   ;;  %v4251_v6 = vld [vmem:[#allocation2 + $0x18] ss:$12 sps:$4 sm:$0xff]   ;;  %v4253_v8 = vld [vmem:[#allocation2 + $0x34] ss:$12 sps:$4 sm:$0xff]  }
  0x47   : > { %2924 = vmatpush1.bf16.msra.mxu0 %v4246_v3  ;;  %2843 = vmatprep.subr.bf16.mxu1 %v4247_v4  ;;  %v4252_v7 = vld [vmem:[#allocation2 + $0x318] ss:$12 sps:$4 sm:$0xff]   ;;  %v4255_v9 = vld [vmem:[#allocation2 + $0x334] ss:$12 sps:$4 sm:$0xff]   ;;  %v4257_v10 = vld [vmem:[#allocation2 + $0x30] ss:$12 sps:$4 sm:$0xff]  }
  0x48   : > { %2925 = vmatprep.subr.bf16.mxu0 %v4249_v5  ;;  %v4258_v11 = vld [vmem:[#allocation2 + $0x330] ss:$12 sps:$4 sm:$0xff]   ;;  %v4259_v12 = vld [vmem:[#allocation2 + $0x4c] ss:$12 sps:$4 sm:$0xff]   ;;  %v4263_v14 = vld [vmem:[#allocation2 + $0x48] ss:$12 sps:$4 sm:$0xff]  }
  0x49   : > { %v4261_v13 = vld [vmem:[#allocation2 + $0x34c] ss:$12 sps:$4 sm:$0xff]   ;;  %v4264_v15 = vld [vmem:[#allocation2 + $0x348] ss:$12 sps:$4 sm:$0xff]   ;;  %v4265_v16 = vld [vmem:[#allocation2 + $0x64] ss:$12 sps:$4 sm:$0xff]  }
  0x4a   : > { %2844 = vmatpush1.bf16.msra.mxu1 %v4251_v6  ;;  %v4267_v17 = vld [vmem:[#allocation2 + $0x364] ss:$12 sps:$4 sm:$0xff]   ;;  %v4269_v18 = vld [vmem:[#allocation2 + $0x60] ss:$12 sps:$4 sm:$0xff]   ;;  %v4271_v20 = vld [vmem:[#allocation2 + $0x7c] ss:$12 sps:$4 sm:$0xff]  }
  0x4b   : > { %2926 = vmatpush1.bf16.msra.mxu0 %v4252_v7  ;;  %2845 = vmatprep.subr.bf16.mxu1 %v4253_v8  ;;  %v4270_v19 = vld [vmem:[#allocation2 + $0x360] ss:$12 sps:$4 sm:$0xff]   ;;  %v4273_v21 = vld [vmem:[#allocation2 + $0x37c] ss:$12 sps:$4 sm:$0xff]   ;;  %v4275_v22 = vld [vmem:[#allocation2 + $0x78] ss:$12 sps:$4 sm:$0xff]  }
  0x4c   : > { %2927 = vmatprep.subr.bf16.mxu0 %v4255_v9  ;;  %v4276_v23 = vld [vmem:[#allocation2 + $0x378] ss:$12 sps:$4 sm:$0xff]   ;;  %v4277_v24 = vld [vmem:[#allocation2 + $0x94] ss:$12 sps:$4 sm:$0xff]   ;;  %v4281_v26 = vld [vmem:[#allocation2 + $0x90] ss:$12 sps:$4 sm:$0xff]  }
  0x4d   : > { %v4279_v25 = vld [vmem:[#allocation2 + $0x394] ss:$12 sps:$4 sm:$0xff]   ;;  %v4282_v27 = vld [vmem:[#allocation2 + $0x390] ss:$12 sps:$4 sm:$0xff]   ;;  %v4283_v28 = vld [vmem:[#allocation2 + $0xac] ss:$12 sps:$4 sm:$0xff]  }
  0x4e   : > { %2846 = vmatpush1.bf16.msra.mxu1 %v4257_v10  ;;  %v4285_v29 = vld [vmem:[#allocation2 + $0x3ac] ss:$12 sps:$4 sm:$0xff]   ;;  %v4287_v30 = vld [vmem:[#allocation2 + $0xa8] ss:$12 sps:$4 sm:$0xff]   ;;  %v4289_v32 = vld [vmem:[#allocation2 + $0xc4] ss:$12 sps:$4 sm:$0xff]  }
  0x4f   : > { %2928 = vmatpush1.bf16.msra.mxu0 %v4258_v11  ;;  %2847 = vmatprep.subr.bf16.mxu1 %v4259_v12  ;;  %v4288_v31 = vld [vmem:[#allocation2 + $0x3a8] ss:$12 sps:$4 sm:$0xff]   ;;  %p189_p5 = scmp.lt.s32.totalorder %s4883_s13, 1  ;;  %v4291_v33 = vld [vmem:[#allocation2 + $0x3c4] ss:$12 sps:$4 sm:$0xff]  }
  0x50   : > { %2929 = vmatprep.subr.bf16.mxu0 %v4261_v13  ;;  %v4293_v34 = vld [vmem:[#allocation2 + $0xc0] ss:$12 sps:$4 sm:$0xff]   ;;  %v4295_v36 = vld [vmem:[#allocation2 + $0xdc] ss:$12 sps:$4 sm:$0xff]   ;;  %v4299_v38 = vld [vmem:[#allocation2 + $0xd8] ss:$12 sps:$4 sm:$0xff]  }
  0x51   : > { %v4294_v35 = vld [vmem:[#allocation2 + $0x3c0] ss:$12 sps:$4 sm:$0xff]   ;;  %s5101_s13 = smov (!%p189_p5, %s4883_s13), 1  ;;  %v4297_v37 = vld [vmem:[#allocation2 + $0x3dc] ss:$12 sps:$4 sm:$0xff]  }
  0x52   : > { %2848 = vmatpush1.bf16.msra.mxu1 %v4263_v14  ;;  %v4300_v39 = vld [vmem:[#allocation2 + $0x3d8] ss:$12 sps:$4 sm:$0xff]   ;;  %v4301_v40 = vld [vmem:[#allocation2 + $0xf4] ss:$12 sps:$4 sm:$0xff]   ;;  %s4004_s16 = sshll.u32 %s5101_s13, 6  ;;  %s4209_s22 = smul.u32 24, %s5101_s13 }
  0x53   : > { %2930 = vmatpush1.bf16.msra.mxu0 %v4264_v15  ;;  %2849 = vmatprep.subr.bf16.mxu1 %v4265_v16  ;;  %v4303_v41 = vld [vmem:[#allocation2 + $0x3f4] ss:$12 sps:$4 sm:$0xff]   ;;  %v4305_v42 = vld [vmem:[#allocation2 + $0xf0] ss:$12 sps:$4 sm:$0xff]   ;;  %s4968_s21 = scalar_lea.vmem %s5087_s0, %s4004_s16  ;;  %v4307_v44 = vld [vmem:[#allocation2 + $0x10c] ss:$12 sps:$4 sm:$0xff]  }
  0x54   : > { %2931 = vmatprep.subr.bf16.mxu0 %v4267_v17  ;;  %v4306_v43 = vld [vmem:[#allocation2 + $0x3f0] ss:$12 sps:$4 sm:$0xff]   ;;  %v4309_v45 = vld [vmem:[#allocation2 + $0x40c] ss:$12 sps:$4 sm:$0xff]   ;;  %v200_v46 = vld [vmem:[%s4968_s21] sm:$0xff]  ;;  %s198_s25 = scalar_lea.vmem %s5090_s3, %s4209_s22 }
  0x55   : > { %v4311_v47 = vld [vmem:[#allocation2 + $0x108] ss:$12 sps:$4 sm:$0xff]   ;;  %v4971_v48 = vcombine.high %v200_v46, %v200_v46  ;;  %v4313_v51 = vld [vmem:[#allocation2 + $0x124] ss:$12 sps:$4 sm:$0xff]   ;;  %v4317_v54 = vld [vmem:[#allocation2 + $0x120] ss:$12 sps:$4 sm:$0xff]   ;;  %v4978_v6 = vcombine.low %v200_v46, %v200_v46 }
  0x56   : > { %2850 = vmatpush1.bf16.msra.mxu1 %v4269_v18  ;;  %v4312_v49 = vld [vmem:[#allocation2 + $0x408] ss:$12 sps:$4 sm:$0xff]   ;;  %v4315_v52 = vld [vmem:[#allocation2 + $0x424] ss:$12 sps:$4 sm:$0xff]   ;;  %v4318_v55 = vld [vmem:[#allocation2 + $0x420] ss:$12 sps:$4 sm:$0xff]  }
  0x57   : > { %2932 = vmatpush1.bf16.msra.mxu0 %v4270_v19  ;;  %2851 = vmatprep.subr.bf16.mxu1 %v4271_v20  ;;  %v202_v50 = vld [vmem:[%s4968_s21 + $0x10] sm:$0xff]  ;;  %v4319_v56 = vld [vmem:[#allocation2 + $0x13c] ss:$12 sps:$4 sm:$0xff]   ;;  %v4323_v58 = vld [vmem:[#allocation2 + $0x138] ss:$12 sps:$4 sm:$0xff]  }
  0x58   : > { %2933 = vmatprep.subr.bf16.mxu0 %v4273_v21  ;;  %v4974_v53 = vcombine.high %v202_v50, %v202_v50  ;;  %2873 = vmatprep.mubr.bf16.mxu1 %v4971_v48  ;;  %v4321_v57 = vld [vmem:[#allocation2 + $0x43c] ss:$12 sps:$4 sm:$0xff]   ;;  %v4324_v59 = vld [vmem:[#allocation2 + $0x438] ss:$12 sps:$4 sm:$0xff]   ;;  %v4325_v60 = vld [vmem:[#allocation2 + $0x154] ss:$12 sps:$4 sm:$0xff]   ;;  %v4980_v7 = vcombine.low %v202_v50, %v202_v50 }
  0x59   : > { %v4327_v61 = vld [vmem:[#allocation2 + $0x454] ss:$12 sps:$4 sm:$0xff]   ;;  %v4329_v62 = vld [vmem:[#allocation2 + $0x150] ss:$12 sps:$4 sm:$0xff]   ;;  %v4331_v0 = vld [vmem:[#allocation2 + $0x16c] ss:$12 sps:$4 sm:$0xff]  }
  0x5a   : > { %2852 = vmatpush1.bf16.msra.mxu1 %v4275_v22  ;;  %2955 = vmatprep.mubr.bf16.mxu0 %v4974_v53  ;;  %v4330_v63 = vld [vmem:[#allocation2 + $0x450] ss:$12 sps:$4 sm:$0xff]   ;;  %v4333_v1 = vld [vmem:[#allocation2 + $0x46c] ss:$12 sps:$4 sm:$0xff]   ;;  %v4335_v2 = vld [vmem:[#allocation2 + $0x168] ss:$12 sps:$4 sm:$0xff]  }
  0x5b   : > { %2934 = vmatpush1.bf16.msra.mxu0 %v4276_v23  ;;  %2853 = vmatprep.subr.bf16.mxu1 %v4277_v24  ;;  %v4336_v3 = vld [vmem:[#allocation2 + $0x468] ss:$12 sps:$4 sm:$0xff]   ;;  %v4341_v4 = vld [vmem:[#allocation2 + $0x184] ss:$12 sps:$4 sm:$0xff]   ;;  %v4339_v8 = vld [vmem:[#allocation2 + $0x180] ss:$12 sps:$4 sm:$0xff]  }
  0x5c   : > { %2935 = vmatprep.subr.bf16.mxu0 %v4279_v25  ;;  %v4346_v5 = vld [vmem:[#allocation2 + $0x484] ss:$12 sps:$4 sm:$0xff]   ;;  %v4344_v9 = vld [vmem:[#allocation2 + $0x480] ss:$12 sps:$4 sm:$0xff]   ;;  %v4349_v10 = vld [vmem:[#allocation2 + $0x19c] ss:$12 sps:$4 sm:$0xff]  }
  0x5d   : > { %v4352_v11 = vld [vmem:[#allocation2 + $0x49c] ss:$12 sps:$4 sm:$0xff]   ;;  %v4347_v12 = vld [vmem:[#allocation2 + $0x198] ss:$12 sps:$4 sm:$0xff]   ;;  %v4355_v14 = vld [vmem:[#allocation2 + $0x1b4] ss:$12 sps:$4 sm:$0xff]  }
  0x5e   : > { %2854 = vmatpush1.bf16.msra.mxu1 %v4281_v26  ;;  %v4350_v13 = vld [vmem:[#allocation2 + $0x498] ss:$12 sps:$4 sm:$0xff]   ;;  %v4358_v15 = vld [vmem:[#allocation2 + $0x4b4] ss:$12 sps:$4 sm:$0xff]   ;;  %v4353_v16 = vld [vmem:[#allocation2 + $0x1b0] ss:$12 sps:$4 sm:$0xff]  }
  0x5f   : > { %2936 = vmatpush1.bf16.msra.mxu0 %v4282_v27  ;;  %2855 = vmatprep.subr.bf16.mxu1 %v4283_v28  ;;  %v4356_v17 = vld [vmem:[#allocation2 + $0x4b0] ss:$12 sps:$4 sm:$0xff]   ;;  %v4361_v18 = vld [vmem:[#allocation2 + $0x1cc] ss:$12 sps:$4 sm:$0xff]   ;;  %v4359_v20 = vld [vmem:[#allocation2 + $0x1c8] ss:$12 sps:$4 sm:$0xff]  }
  0x60   : > { %2937 = vmatprep.subr.bf16.mxu0 %v4285_v29  ;;  %v4364_v19 = vld [vmem:[#allocation2 + $0x4cc] ss:$12 sps:$4 sm:$0xff]   ;;  %v4362_v21 = vld [vmem:[#allocation2 + $0x4c8] ss:$12 sps:$4 sm:$0xff]   ;;  %v4367_v22 = vld [vmem:[#allocation2 + $0x1e4] ss:$12 sps:$4 sm:$0xff]  }
  0x61   : > { %v4370_v23 = vld [vmem:[#allocation2 + $0x4e4] ss:$12 sps:$4 sm:$0xff]   ;;  %v4365_v24 = vld [vmem:[#allocation2 + $0x1e0] ss:$12 sps:$4 sm:$0xff]   ;;  %v4373_v26 = vld [vmem:[#allocation2 + $0x1fc] ss:$12 sps:$4 sm:$0xff]  }
  0x62   : > { %2856 = vmatpush1.bf16.msra.mxu1 %v4287_v30  ;;  %v4368_v25 = vld [vmem:[#allocation2 + $0x4e0] ss:$12 sps:$4 sm:$0xff]   ;;  %v4376_v27 = vld [vmem:[#allocation2 + $0x4fc] ss:$12 sps:$4 sm:$0xff]   ;;  %v4371_v28 = vld [vmem:[#allocation2 + $0x1f8] ss:$12 sps:$4 sm:$0xff]  }
  0x63   : > { %2938 = vmatpush1.bf16.msra.mxu0 %v4288_v31  ;;  %2857 = vmatprep.subr.bf16.mxu1 %v4289_v32  ;;  %v4374_v29 = vld [vmem:[#allocation2 + $0x4f8] ss:$12 sps:$4 sm:$0xff]   ;;  %v4379_v30 = vld [vmem:[#allocation2 + $0x214] ss:$12 sps:$4 sm:$0xff]   ;;  %v4985_v32 = vld [vmem:[%s4968_s21 + $0x8] sm:$0xff] }
  0x64   : > { %2939 = vmatprep.subr.bf16.mxu0 %v4291_v33  ;;  %v4382_v31 = vld [vmem:[#allocation2 + $0x514] ss:$12 sps:$4 sm:$0xff]   ;;  %v4988_v33 = vld [vmem:[%s4968_s21 + $0x18] sm:$0xff] }
  0x65   : > { %v4397_v46 = vld [vmem:[#allocation2 + $0x25c] ss:$12 sps:$4 sm:$0xff]   ;;  %v4398_v50 = vld [vmem:[#allocation2 + $0x558] ss:$12 sps:$4 sm:$0xff]  }
  0x66   : > { %2858 = vmatpush1.bf16.msra.mxu1 %v4293_v34  ;;  %v4377_v34 = vld [vmem:[#allocation2 + $0x210] ss:$12 sps:$4 sm:$0xff]  }
  0x67   : > { %2940 = vmatpush1.bf16.msra.mxu0 %v4294_v35  ;;  %2859 = vmatprep.subr.bf16.mxu1 %v4295_v36  ;;  %v4380_v35 = vld [vmem:[#allocation2 + $0x510] ss:$12 sps:$4 sm:$0xff]   ;;  %v4992_v36 = vcombine.high %v4985_v32, %v4985_v32 }
  0x68   : > { %2941 = vmatprep.subr.bf16.mxu0 %v4297_v37  ;;  %v4996_v37 = vcombine.high %v4988_v33, %v4988_v33 }
  0x6a   : > { %2860 = vmatpush1.bf16.msra.mxu1 %v4299_v38  ;;  %v4385_v38 = vld [vmem:[#allocation2 + $0x22c] ss:$12 sps:$4 sm:$0xff]  }
  0x6b   : > { %2942 = vmatpush1.bf16.msra.mxu0 %v4300_v39  ;;  %2861 = vmatprep.subr.bf16.mxu1 %v4301_v40  ;;  %v4388_v39 = vld [vmem:[#allocation2 + $0x52c] ss:$12 sps:$4 sm:$0xff]   ;;  %v4383_v40 = vld [vmem:[#allocation2 + $0x228] ss:$12 sps:$4 sm:$0xff]  }
  0x6c   : > { %2943 = vmatprep.subr.bf16.mxu0 %v4303_v41  ;;  %v4386_v41 = vld [vmem:[#allocation2 + $0x528] ss:$12 sps:$4 sm:$0xff]  }
  0x6e   : > { %2862 = vmatpush1.bf16.msra.mxu1 %v4305_v42  ;;  %v4391_v42 = vld [vmem:[#allocation2 + $0x244] ss:$12 sps:$4 sm:$0xff]  }
  0x6f   : > { %2944 = vmatpush1.bf16.msra.mxu0 %v4306_v43  ;;  %2863 = vmatprep.subr.bf16.mxu1 %v4307_v44  ;;  %v4394_v43 = vld [vmem:[#allocation2 + $0x544] ss:$12 sps:$4 sm:$0xff]   ;;  %v4389_v44 = vld [vmem:[#allocation2 + $0x240] ss:$12 sps:$4 sm:$0xff]  }
  0x70   : > { %2945 = vmatprep.subr.bf16.mxu0 %v4309_v45  ;;  %v4392_v45 = vld [vmem:[#allocation2 + $0x540] ss:$12 sps:$4 sm:$0xff]  }
  0x72   : > { %2864 = vmatpush1.bf16.msra.mxu1 %v4311_v47  ;;  %v4400_v47 = vld [vmem:[#allocation2 + $0x55c] ss:$12 sps:$4 sm:$0xff]  }
  0x73   : > { %2946 = vmatpush1.bf16.msra.mxu0 %v4312_v49  ;;  %2865 = vmatprep.subr.bf16.mxu1 %v4313_v51  ;;  %v4395_v49 = vld [vmem:[#allocation2 + $0x258] ss:$12 sps:$4 sm:$0xff]   ;;  %v4403_v51 = vld [vmem:[#allocation2 + $0x274] ss:$12 sps:$4 sm:$0xff]  }
  0x74   : > { %2947 = vmatprep.subr.bf16.mxu0 %v4315_v52  ;;  %v4406_v52 = vld [vmem:[#allocation2 + $0x574] ss:$12 sps:$4 sm:$0xff]  }
  0x76   : > { %2866 = vmatpush1.bf16.msra.mxu1 %v4317_v54  ;;  %v4401_v54 = vld [vmem:[#allocation2 + $0x270] ss:$12 sps:$4 sm:$0xff]  }
  0x77   : > { %2948 = vmatpush1.bf16.msra.mxu0 %v4318_v55  ;;  %2867 = vmatprep.subr.bf16.mxu1 %v4319_v56  ;;  %v4404_v55 = vld [vmem:[#allocation2 + $0x570] ss:$12 sps:$4 sm:$0xff]   ;;  %v4409_v56 = vld [vmem:[#allocation2 + $0x28c] ss:$12 sps:$4 sm:$0xff]  }
  0x78   : > { %2949 = vmatprep.subr.bf16.mxu0 %v4321_v57  ;;  %v4412_v57 = vld [vmem:[#allocation2 + $0x58c] ss:$12 sps:$4 sm:$0xff]  }
  0x7a   : > { %2868 = vmatpush1.bf16.msra.mxu1 %v4323_v58  ;;  %v4407_v58 = vld [vmem:[#allocation2 + $0x288] ss:$12 sps:$4 sm:$0xff]  }
  0x7b   : > { %2950 = vmatpush1.bf16.msra.mxu0 %v4324_v59  ;;  %2869 = vmatprep.subr.bf16.mxu1 %v4325_v60  ;;  %v4410_v59 = vld [vmem:[#allocation2 + $0x588] ss:$12 sps:$4 sm:$0xff]   ;;  %v4415_v60 = vld [vmem:[#allocation2 + $0x2a4] ss:$12 sps:$4 sm:$0xff]  }
  0x7c   : > { %2951 = vmatprep.subr.bf16.mxu0 %v4327_v61  ;;  %v4418_v61 = vld [vmem:[#allocation2 + $0x5a4] ss:$12 sps:$4 sm:$0xff]  }
  0x7e   : > { %2870 = vmatpush1.bf16.msra.mxu1 %v4329_v62  ;;  %v4413_v62 = vld [vmem:[#allocation2 + $0x2a0] ss:$12 sps:$4 sm:$0xff]  }
  0x7f   : > { %2952 = vmatpush1.bf16.msra.mxu0 %v4330_v63  ;;  %2871 = vmatprep.subr.bf16.mxu1 %v4331_v0  ;;  %v4416_v63 = vld [vmem:[#allocation2 + $0x5a0] ss:$12 sps:$4 sm:$0xff]   ;;  %v4421_v0 = vld [vmem:[#allocation2 + $0x2bc] ss:$12 sps:$4 sm:$0xff]  }
  0x80   : > { %2953 = vmatprep.subr.bf16.mxu0 %v4333_v1  ;;  %v4424_v1 = vld [vmem:[#allocation2 + $0x5bc] ss:$12 sps:$4 sm:$0xff]  }
  0x82   : > { %2872 = vmatpush1.bf16.msra.mxu1 %v4335_v2  ;;  %v4419_v2 = vld [vmem:[#allocation2 + $0x2b8] ss:$12 sps:$4 sm:$0xff]  }
  0x83   : > { %2954 = vmatpush1.bf16.msra.mxu0 %v4336_v3  ;;  %2882 = vmatprep.subr.bf16.mxu1 %v4341_v4  ;;  %v4422_v3 = vld [vmem:[#allocation2 + $0x5b8] ss:$12 sps:$4 sm:$0xff]   ;;  %v4427_v4 = vld [vmem:[#allocation2 + $0x2d4] ss:$12 sps:$4 sm:$0xff]  }
  0x84   : > { %2964 = vmatprep.subr.bf16.mxu0 %v4346_v5  ;;  %v4430_v5 = vld [vmem:[#allocation2 + $0x5d4] ss:$12 sps:$4 sm:$0xff]  }
  0x85   : > { %2874 = vmatmul.mubr.bf16.vlgmr.msra.gmra.mrb[0].mxu1 %v4978_v6 }
  0x86   : > { %2956 = vmatmul.mubr.bf16.vlgmr.msra.gmra.mrb[0].mxu0 %v4980_v7  ;;  %2883 = vmatpush1.bf16.msra.mxu1 %v4339_v8  ;;  %v4425_v8 = vld [vmem:[#allocation2 + $0x2d0] ss:$12 sps:$4 sm:$0xff]  }
  0x87   : > { %2965 = vmatpush1.bf16.msra.mxu0 %v4344_v9  ;;  %2884 = vmatprep.subr.bf16.mxu1 %v4349_v10  ;;  %v4428_v9 = vld [vmem:[#allocation2 + $0x5d0] ss:$12 sps:$4 sm:$0xff]   ;;  %v4433_v10 = vld [vmem:[#allocation2 + $0x2ec] ss:$12 sps:$4 sm:$0xff]  }
  0x88   : > { %2966 = vmatprep.subr.bf16.mxu0 %v4352_v11  ;;  %2914 = vmatprep.mubr.bf16.mxu1 %v4992_v36  ;;  %v4436_v11 = vld [vmem:[#allocation2 + $0x5ec] ss:$12 sps:$4 sm:$0xff]  }
  0x89   : > { %2996 = vmatprep.mubr.bf16.mxu0 %v4996_v37 }
  0x8a   : > { %2885 = vmatpush1.bf16.msra.mxu1 %v4347_v12  ;;  %v4431_v12 = vld [vmem:[#allocation2 + $0x2e8] ss:$12 sps:$4 sm:$0xff]  }
  0x8b   : > { %2967 = vmatpush1.bf16.msra.mxu0 %v4350_v13  ;;  %2886 = vmatprep.subr.bf16.mxu1 %v4355_v14  ;;  %v4434_v13 = vld [vmem:[#allocation2 + $0x5e8] ss:$12 sps:$4 sm:$0xff]   ;;  %v4443_v14 = vld [vmem:[#allocation2 + $0x604] ss:$12 sps:$4 sm:$0xff]  }
  0x8c   : > { %2968 = vmatprep.subr.bf16.mxu0 %v4358_v15  ;;  %v4444_v15 = vld [vmem:[#allocation2 + $0xc8] ss:$12 sps:$4 sm:$0xff]  }
  0x8e   : > { %2887 = vmatpush1.bf16.msra.mxu1 %v4353_v16  ;;  %v5002_v16 = vcombine.low %v4985_v32, %v4985_v32  ;;  %v5012_v32 = vld [vmem:[%s4968_s21 + $0x20] sm:$0xff] }
  0x8f   : > { %2969 = vmatpush1.bf16.msra.mxu0 %v4356_v17  ;;  %2888 = vmatprep.subr.bf16.mxu1 %v4361_v18  ;;  %v5006_v17 = vcombine.low %v4988_v33, %v4988_v33  ;;  %v4441_v18 = vld [vmem:[#allocation2 + $0x600] ss:$12 sps:$4 sm:$0xff]   ;;  %v4463_v33 = vld [vmem:[#allocation2 + $0x664] ss:$12 sps:$4 sm:$0xff]  }
  0x90   : > { %2970 = vmatprep.subr.bf16.mxu0 %v4364_v19  ;;  %v4445_v19 = vld [vmem:[#allocation2 + $0x8] ss:$12 sps:$4 sm:$0xff]  }
  0x92   : > { %2889 = vmatpush1.bf16.msra.mxu1 %v4359_v20  ;;  %v4448_v20 = vld [vmem:[#allocation2 + $0x61c] ss:$12 sps:$4 sm:$0xff]  }
  0x93   : > { %2971 = vmatpush1.bf16.msra.mxu0 %v4362_v21  ;;  %2890 = vmatprep.subr.bf16.mxu1 %v4367_v22  ;;  %v4449_v21 = vld [vmem:[#allocation2 + $0xe0] ss:$12 sps:$4 sm:$0xff]   ;;  %v4446_v22 = vld [vmem:[#allocation2 + $0x618] ss:$12 sps:$4 sm:$0xff]  }
  0x94   : > { %2972 = vmatprep.subr.bf16.mxu0 %v4370_v23  ;;  %v4450_v23 = vld [vmem:[#allocation2 + $0x20] ss:$12 sps:$4 sm:$0xff]  }
  0x96   : > { %2891 = vmatpush1.bf16.msra.mxu1 %v4365_v24  ;;  %v4453_v24 = vld [vmem:[#allocation2 + $0x634] ss:$12 sps:$4 sm:$0xff]  }
  0x97   : > { %2973 = vmatpush1.bf16.msra.mxu0 %v4368_v25  ;;  %2892 = vmatprep.subr.bf16.mxu1 %v4373_v26  ;;  %v4454_v25 = vld [vmem:[#allocation2 + $0xf8] ss:$12 sps:$4 sm:$0xff]   ;;  %v4451_v26 = vld [vmem:[#allocation2 + $0x630] ss:$12 sps:$4 sm:$0xff]  }
  0x98   : > { %2974 = vmatprep.subr.bf16.mxu0 %v4376_v27  ;;  %v4455_v27 = vld [vmem:[#allocation2 + $0x38] ss:$12 sps:$4 sm:$0xff]  }
  0x9a   : > { %2893 = vmatpush1.bf16.msra.mxu1 %v4371_v28  ;;  %v4458_v28 = vld [vmem:[#allocation2 + $0x64c] ss:$12 sps:$4 sm:$0xff]  }
  0x9b   : > { %2975 = vmatpush1.bf16.msra.mxu0 %v4374_v29  ;;  %2894 = vmatprep.subr.bf16.mxu1 %v4379_v30  ;;  %v4459_v29 = vld [vmem:[#allocation2 + $0x110] ss:$12 sps:$4 sm:$0xff]   ;;  %v4456_v30 = vld [vmem:[#allocation2 + $0x648] ss:$12 sps:$4 sm:$0xff]  }
  0x9c   : > { %2976 = vmatprep.subr.bf16.mxu0 %v4382_v31  ;;  %v4460_v31 = vld [vmem:[#allocation2 + $0x50] ss:$12 sps:$4 sm:$0xff]  }
  0x9e   : > { %2895 = vmatpush1.bf16.msra.mxu1 %v4377_v34  ;;  %v4464_v34 = vld [vmem:[#allocation2 + $0x128] ss:$12 sps:$4 sm:$0xff]  }
  0x9f   : > { %2977 = vmatpush1.bf16.msra.mxu0 %v4380_v35  ;;  %2896 = vmatprep.subr.bf16.mxu1 %v4385_v38  ;;  %v4461_v35 = vld [vmem:[#allocation2 + $0x660] ss:$12 sps:$4 sm:$0xff]   ;;  %v4465_v38 = vld [vmem:[#allocation2 + $0x68] ss:$12 sps:$4 sm:$0xff]  }
  0xa0   : > { %2978 = vmatprep.subr.bf16.mxu0 %v4388_v39  ;;  %v4468_v39 = vld [vmem:[#allocation2 + $0x67c] ss:$12 sps:$4 sm:$0xff]  }
  0xa2   : > { %2897 = vmatpush1.bf16.msra.mxu1 %v4383_v40  ;;  %v4469_v40 = vld [vmem:[#allocation2 + $0x140] ss:$12 sps:$4 sm:$0xff]  }
  0xa3   : > { %2979 = vmatpush1.bf16.msra.mxu0 %v4386_v41  ;;  %2898 = vmatprep.subr.bf16.mxu1 %v4391_v42  ;;  %v4466_v41 = vld [vmem:[#allocation2 + $0x678] ss:$12 sps:$4 sm:$0xff]   ;;  %v4470_v42 = vld [vmem:[#allocation2 + $0x80] ss:$12 sps:$4 sm:$0xff]  }
  0xa4   : > { %2980 = vmatprep.subr.bf16.mxu0 %v4394_v43  ;;  %v4473_v43 = vld [vmem:[#allocation2 + $0x694] ss:$12 sps:$4 sm:$0xff]  }
  0xa6   : > { %2899 = vmatpush1.bf16.msra.mxu1 %v4389_v44  ;;  %v4474_v44 = vld [vmem:[#allocation2 + $0x158] ss:$12 sps:$4 sm:$0xff]  }
  0xa7   : > { %2981 = vmatpush1.bf16.msra.mxu0 %v4392_v45  ;;  %2900 = vmatprep.subr.bf16.mxu1 %v4397_v46  ;;  %v4471_v45 = vld [vmem:[#allocation2 + $0x690] ss:$12 sps:$4 sm:$0xff]   ;;  %v4475_v46 = vld [vmem:[#allocation2 + $0x98] ss:$12 sps:$4 sm:$0xff]  }
  0xa8   : > { %2982 = vmatprep.subr.bf16.mxu0 %v4400_v47  ;;  %v4478_v47 = vld [vmem:[#allocation2 + $0x6ac] ss:$12 sps:$4 sm:$0xff]  }
  0xaa   : > { %2901 = vmatpush1.bf16.msra.mxu1 %v4395_v49  ;;  %v4479_v49 = vld [vmem:[#allocation2 + $0x170] ss:$12 sps:$4 sm:$0xff]  }
  0xab   : > { %2983 = vmatpush1.bf16.msra.mxu0 %v4398_v50  ;;  %2902 = vmatprep.subr.bf16.mxu1 %v4403_v51  ;;  %v4476_v50 = vld [vmem:[#allocation2 + $0x6a8] ss:$12 sps:$4 sm:$0xff]   ;;  %v4480_v51 = vld [vmem:[#allocation2 + $0xb0] ss:$12 sps:$4 sm:$0xff]  }
  0xac   : > { %2984 = vmatprep.subr.bf16.mxu0 %v4406_v52  ;;  %v4483_v52 = vld [vmem:[#allocation2 + $0x6c4] ss:$12 sps:$4 sm:$0xff]  }
  0xae   : > { %2903 = vmatpush1.bf16.msra.mxu1 %v4401_v54  ;;  %v4484_v54 = vld [vmem:[#allocation2 + $0x248] ss:$12 sps:$4 sm:$0xff]  }
  0xaf   : > { %2985 = vmatpush1.bf16.msra.mxu0 %v4404_v55  ;;  %2904 = vmatprep.subr.bf16.mxu1 %v4409_v56  ;;  %v4481_v55 = vld [vmem:[#allocation2 + $0x6c0] ss:$12 sps:$4 sm:$0xff]   ;;  %v4485_v56 = vld [vmem:[#allocation2 + $0x188] ss:$12 sps:$4 sm:$0xff]  }
  0xb0   : > { %2986 = vmatprep.subr.bf16.mxu0 %v4412_v57  ;;  %v4488_v57 = vld [vmem:[#allocation2 + $0x6dc] ss:$12 sps:$4 sm:$0xff]  }
  0xb2   : > { %2905 = vmatpush1.bf16.msra.mxu1 %v4407_v58  ;;  %v4489_v58 = vld [vmem:[#allocation2 + $0x260] ss:$12 sps:$4 sm:$0xff]  }
  0xb3   : > { %2987 = vmatpush1.bf16.msra.mxu0 %v4410_v59  ;;  %2906 = vmatprep.subr.bf16.mxu1 %v4415_v60  ;;  %v4486_v59 = vld [vmem:[#allocation2 + $0x6d8] ss:$12 sps:$4 sm:$0xff]   ;;  %v4490_v60 = vld [vmem:[#allocation2 + $0x1a0] ss:$12 sps:$4 sm:$0xff]  }
  0xb4   : > { %2988 = vmatprep.subr.bf16.mxu0 %v4418_v61  ;;  %v4493_v61 = vld [vmem:[#allocation2 + $0x6f4] ss:$12 sps:$4 sm:$0xff]  }
  0xb6   : > { %2907 = vmatpush1.bf16.msra.mxu1 %v4413_v62  ;;  %v4494_v62 = vld [vmem:[#allocation2 + $0x278] ss:$12 sps:$4 sm:$0xff]  }
  0xb7   : > { %2989 = vmatpush1.bf16.msra.mxu0 %v4416_v63  ;;  %2908 = vmatprep.subr.bf16.mxu1 %v4421_v0  ;;  %v4491_v63 = vld [vmem:[#allocation2 + $0x6f0] ss:$12 sps:$4 sm:$0xff]   ;;  %v4495_v0 = vld [vmem:[#allocation2 + $0x1b8] ss:$12 sps:$4 sm:$0xff]  }
  0xb8   : > { %2990 = vmatprep.subr.bf16.mxu0 %v4424_v1  ;;  %v4498_v1 = vld [vmem:[#allocation2 + $0x70c] ss:$12 sps:$4 sm:$0xff]  }
  0xba   : > { %2909 = vmatpush1.bf16.msra.mxu1 %v4419_v2  ;;  %v4499_v2 = vld [vmem:[#allocation2 + $0x290] ss:$12 sps:$4 sm:$0xff]  }
  0xbb   : > { %2991 = vmatpush1.bf16.msra.mxu0 %v4422_v3  ;;  %2910 = vmatprep.subr.bf16.mxu1 %v4427_v4  ;;  %v4496_v3 = vld [vmem:[#allocation2 + $0x708] ss:$12 sps:$4 sm:$0xff]   ;;  %v4503_v4 = vld [vmem:[#allocation2 + $0x724] ss:$12 sps:$4 sm:$0xff]  }
  0xbc   : > { %2992 = vmatprep.subr.bf16.mxu0 %v4430_v5  ;;  %v4504_v5 = vld [vmem:[#allocation2 + $0x2a8] ss:$12 sps:$4 sm:$0xff]  }
  0xbe   : > { %2911 = vmatpush1.bf16.msra.mxu1 %v4425_v8  ;;  %v4501_v8 = vld [vmem:[#allocation2 + $0x720] ss:$12 sps:$4 sm:$0xff]  }
  0xbf   : > { %2993 = vmatpush1.bf16.msra.mxu0 %v4428_v9  ;;  %2912 = vmatprep.subr.bf16.mxu1 %v4433_v10  ;;  %v4505_v9 = vld [vmem:[#allocation2 + $0x1e8] ss:$12 sps:$4 sm:$0xff]   ;;  %v4509_v10 = vld [vmem:[#allocation2 + $0x2c0] ss:$12 sps:$4 sm:$0xff]  }
  0xc0   : > { %2994 = vmatprep.subr.bf16.mxu0 %v4436_v11  ;;  %v4506_v11 = vld [vmem:[#allocation2 + $0x738] ss:$12 sps:$4 sm:$0xff]  }
  0xc2   : > { %2913 = vmatpush1.bf16.msra.mxu1 %v4431_v12  ;;  %v4510_v12 = vld [vmem:[#allocation2 + $0x200] ss:$12 sps:$4 sm:$0xff]  }
  0xc3   : > { %2995 = vmatpush1.bf16.msra.mxu0 %v4434_v13  ;;  %4005 = vmatprep.subr.bf16.mxu1 %v4444_v15  ;;  %v4513_v13 = vld [vmem:[#allocation2 + $0x754] ss:$12 sps:$4 sm:$0xff]   ;;  %v4511_v15 = vld [vmem:[#allocation2 + $0x750] ss:$12 sps:$4 sm:$0xff]  }
  0xc4   : > { %3005 = vmatprep.subr.bf16.mxu0 %v4443_v14  ;;  %v4514_v14 = vld [vmem:[#allocation2 + $0x2d8] ss:$12 sps:$4 sm:$0xff]  }
  0xc5   : > { %2915 = vmatmul.mubr.bf16.vlgmr.msra.gmra.mrb[0].mxu1 %v5002_v16 }
  0xc6   : > { %2997 = vmatmul.mubr.bf16.vlgmr.msra.gmra.mrb[0].mxu0 %v5006_v17  ;;  %4006 = vmatpush3.bf16.msra.mxu1 %v4445_v19  ;;  %v4518_v19 = vld [vmem:[#allocation2 + $0x76c] ss:$12 sps:$4 sm:$0xff]  }
  0xc7   : > { %3006 = vmatpush1.bf16.msra.mxu0 %v4441_v18  ;;  %4007 = vmatprep.subr.bf16.mxu1 %v4449_v21  ;;  %v4515_v18 = vld [vmem:[#allocation2 + $0x218] ss:$12 sps:$4 sm:$0xff]   ;;  %v4516_v21 = vld [vmem:[#allocation2 + $0x768] ss:$12 sps:$4 sm:$0xff]  }
  0xc8   : > { %3007 = vmatprep.subr.bf16.mxu0 %v4448_v20  ;;  %3201 = vmatprep.mubr.bf16.mxu1 %v4971_v48  ;;  %v5016_v48 = vcombine.high %v5012_v32, %v5012_v32  ;;  %v4519_v20 = vld [vmem:[#allocation2 + $0x2f0] ss:$12 sps:$4 sm:$0xff]  }
  0xca   : > { %4008 = vmatpush3.bf16.msra.mxu1 %v4450_v23  ;;  %3037 = vmatprep.mubr.bf16.mxu0 %v5016_v48  ;;  %v4525_v23 = vld [vmem:[#allocation2 + $0x784] ss:$12 sps:$4 sm:$0xff]  }
  0xcb   : > { %3008 = vmatpush1.bf16.msra.mxu0 %v4446_v22  ;;  %4009 = vmatprep.subr.bf16.mxu1 %v4454_v25  ;;  %v4520_v22 = vld [vmem:[#allocation2 + $0x230] ss:$12 sps:$4 sm:$0xff]   ;;  %v5023_v25 = vcombine.low %v5012_v32, %v5012_v32  ;;  %v4532_v32 = vld [vmem:[#allocation2 + $0x320] ss:$12 sps:$4 sm:$0xff]  }
  0xcc   : > { %3009 = vmatprep.subr.bf16.mxu0 %v4453_v24  ;;  %v4526_v24 = vld [vmem:[#allocation2 + $0x3c8] ss:$12 sps:$4 sm:$0xff]  }
  0xce   : > { %4010 = vmatpush3.bf16.msra.mxu1 %v4455_v27  ;;  %v4527_v27 = vld [vmem:[#allocation2 + $0x308] ss:$12 sps:$4 sm:$0xff]  }
  0xcf   : > { %3010 = vmatpush1.bf16.msra.mxu0 %v4451_v26  ;;  %4011 = vmatprep.subr.bf16.mxu1 %v4459_v29  ;;  %v4523_v26 = vld [vmem:[#allocation2 + $0x780] ss:$12 sps:$4 sm:$0xff]  }
  0xd0   : > { %3011 = vmatprep.subr.bf16.mxu0 %v4458_v28  ;;  %v4530_v28 = vld [vmem:[#allocation2 + $0x79c] ss:$12 sps:$4 sm:$0xff]   ;;  %v4531_v29 = vld [vmem:[#allocation2 + $0x3e0] ss:$12 sps:$4 sm:$0xff]  }
  0xd2   : > { %4012 = vmatpush3.bf16.msra.mxu1 %v4460_v31  ;;  %v4528_v31 = vld [vmem:[#allocation2 + $0x798] ss:$12 sps:$4 sm:$0xff]  }
  0xd3   : > { %3012 = vmatpush1.bf16.msra.mxu0 %v4456_v30  ;;  %4013 = vmatprep.subr.bf16.mxu1 %v4464_v34  ;;  %v5026_v30 = vld [vmem:[%s4968_s21 + $0x28] sm:$0xff]  ;;  %v4535_v34 = vld [vmem:[#allocation2 + $0x7b4] ss:$12 sps:$4 sm:$0xff]  }
  0xd4   : > { %3013 = vmatprep.subr.bf16.mxu0 %v4463_v33  ;;  %v5030_v33 = vcombine.high %v5026_v30, %v5026_v30 }
  0xd6   : > { %4014 = vmatpush3.bf16.msra.mxu1 %v4465_v38  ;;  %v4533_v38 = vld [vmem:[#allocation2 + $0x7b0] ss:$12 sps:$4 sm:$0xff]  }
  0xd7   : > { %3014 = vmatpush1.bf16.msra.mxu0 %v4461_v35  ;;  %4015 = vmatprep.subr.bf16.mxu1 %v4469_v40  ;;  %v4536_v35 = vld [vmem:[#allocation2 + $0x3f8] ss:$12 sps:$4 sm:$0xff]   ;;  %v4541_v40 = vld [vmem:[#allocation2 + $0x410] ss:$12 sps:$4 sm:$0xff]  }
  0xd8   : > { %3015 = vmatprep.subr.bf16.mxu0 %v4468_v39  ;;  %v4537_v39 = vld [vmem:[#allocation2 + $0x338] ss:$12 sps:$4 sm:$0xff]  }
  0xda   : > { %4016 = vmatpush3.bf16.msra.mxu1 %v4470_v42  ;;  %v4542_v42 = vld [vmem:[#allocation2 + $0x350] ss:$12 sps:$4 sm:$0xff]  }
  0xdb   : > { %3016 = vmatpush1.bf16.msra.mxu0 %v4466_v41  ;;  %4017 = vmatprep.subr.bf16.mxu1 %v4474_v44  ;;  %v4538_v41 = vld [vmem:[#allocation2 + $0x7c8] ss:$12 sps:$4 sm:$0xff]  }
  0xdc   : > { %3017 = vmatprep.subr.bf16.mxu0 %v4473_v43  ;;  %v4545_v43 = vld [vmem:[#allocation2 + $0x7e4] ss:$12 sps:$4 sm:$0xff]   ;;  %v4546_v44 = vld [vmem:[#allocation2 + $0x428] ss:$12 sps:$4 sm:$0xff]  }
  0xde   : > { %4018 = vmatpush3.bf16.msra.mxu1 %v4475_v46  ;;  %v4550_v46 = vld [vmem:[#allocation2 + $0x7fc] ss:$12 sps:$4 sm:$0xff]  }
  0xdf   : > { %3018 = vmatpush1.bf16.msra.mxu0 %v4471_v45  ;;  %4019 = vmatprep.subr.bf16.mxu1 %v4479_v49  ;;  %v4543_v45 = vld [vmem:[#allocation2 + $0x7e0] ss:$12 sps:$4 sm:$0xff]   ;;  %v4548_v49 = vld [vmem:[#allocation2 + $0x7f8] ss:$12 sps:$4 sm:$0xff]  }
  0xe0   : > { %3019 = vmatprep.subr.bf16.mxu0 %v4478_v47  ;;  %v4551_v47 = vld [vmem:[#allocation2 + $0x440] ss:$12 sps:$4 sm:$0xff]  }
  0xe2   : > { %4020 = vmatpush3.bf16.msra.mxu1 %v4480_v51  ;;  %v4555_v51 = vld [vmem:[#allocation2 + $0x814] ss:$12 sps:$4 sm:$0xff]  }
  0xe3   : > { %3020 = vmatpush1.bf16.msra.mxu0 %v4476_v50  ;;  %4027 = vmatprep.subr.bf16.mxu1 %v4484_v54  ;;  %v4552_v50 = vld [vmem:[#allocation2 + $0x380] ss:$12 sps:$4 sm:$0xff]   ;;  %v4553_v54 = vld [vmem:[#allocation2 + $0x810] ss:$12 sps:$4 sm:$0xff]  }
  0xe4   : > { %3021 = vmatprep.subr.bf16.mxu0 %v4483_v52  ;;  %v4556_v52 = vld [vmem:[#allocation2 + $0x458] ss:$12 sps:$4 sm:$0xff]  }
  0xe5   : > { %3202 = vmatmul.mubr.bf16.vlgmr.msra.gmra.mrb[4].mxu1 %v4978_v6  ;;  %v4500_v6 = vld [vmem:[#allocation2 + $0x1d0] ss:$12 sps:$4 sm:$0xff]  }
  0xe6   : > { %4028 = vmatpush3.bf16.msra.mxu1 %v4485_v56  ;;  %3241 = vmatprep.mubr.bf16.mxu1 %v4992_v36  ;;  %v4508_v36 = vld [vmem:[#allocation2 + $0x73c] ss:$12 sps:$4 sm:$0xff]   ;;  %v4560_v56 = vld [vmem:[#allocation2 + $0x82c] ss:$12 sps:$4 sm:$0xff]  }
  0xe7   : > { %3022 = vmatpush1.bf16.msra.mxu0 %v4481_v55  ;;  %4029 = vmatprep.subr.bf16.mxu1 %v4489_v58  ;;  %v4557_v55 = vld [vmem:[#allocation2 + $0x398] ss:$12 sps:$4 sm:$0xff]   ;;  %v4558_v58 = vld [vmem:[#allocation2 + $0x828] ss:$12 sps:$4 sm:$0xff]  }
  0xe8   : > { %3023 = vmatprep.subr.bf16.mxu0 %v4488_v57  ;;  %v4561_v57 = vld [vmem:[#allocation2 + $0x470] ss:$12 sps:$4 sm:$0xff]  }
  0xea   : > { %4030 = vmatpush3.bf16.msra.mxu1 %v4490_v60  ;;  %v4565_v60 = vld [vmem:[#allocation2 + $0x844] ss:$12 sps:$4 sm:$0xff]  }
  0xeb   : > { %3024 = vmatpush1.bf16.msra.mxu0 %v4486_v59  ;;  %4031 = vmatprep.subr.bf16.mxu1 %v4494_v62  ;;  %v4562_v59 = vld [vmem:[#allocation2 + $0x3b0] ss:$12 sps:$4 sm:$0xff]   ;;  %v4563_v62 = vld [vmem:[#allocation2 + $0x840] ss:$12 sps:$4 sm:$0xff]  }
  0xec   : > { %3025 = vmatprep.subr.bf16.mxu0 %v4493_v61  ;;  %v4566_v61 = vld [vmem:[#allocation2 + $0x548] ss:$12 sps:$4 sm:$0xff]  }
  0xee   : > { %4032 = vmatpush3.bf16.msra.mxu1 %v4495_v0  ;;  %v4570_v0 = vld [vmem:[#allocation2 + $0x85c] ss:$12 sps:$4 sm:$0xff]  }
  0xef   : > { %3026 = vmatpush1.bf16.msra.mxu0 %v4491_v63  ;;  %4033 = vmatprep.subr.bf16.mxu1 %v4499_v2  ;;  %v4567_v63 = vld [vmem:[#allocation2 + $0x488] ss:$12 sps:$4 sm:$0xff]   ;;  %v4568_v2 = vld [vmem:[#allocation2 + $0x858] ss:$12 sps:$4 sm:$0xff]  }
  0xf0   : > { %3027 = vmatprep.subr.bf16.mxu0 %v4498_v1  ;;  %v4571_v1 = vld [vmem:[#allocation2 + $0x560] ss:$12 sps:$4 sm:$0xff]  }
  0xf2   : > { %4034 = vmatpush3.bf16.msra.mxu1 %v4500_v6  ;;  %v4575_v6 = vld [vmem:[#allocation2 + $0x874] ss:$12 sps:$4 sm:$0xff]  }
  0xf3   : > { %3028 = vmatpush1.bf16.msra.mxu0 %v4496_v3  ;;  %4035 = vmatprep.subr.bf16.mxu1 %v4504_v5  ;;  %v4572_v3 = vld [vmem:[#allocation2 + $0x4a0] ss:$12 sps:$4 sm:$0xff]   ;;  %v4573_v5 = vld [vmem:[#allocation2 + $0x870] ss:$12 sps:$4 sm:$0xff]  }
  0xf4   : > { %3029 = vmatprep.subr.bf16.mxu0 %v4503_v4  ;;  %v4576_v4 = vld [vmem:[#allocation2 + $0x578] ss:$12 sps:$4 sm:$0xff]  }
  0xf6   : > { %4036 = vmatpush3.bf16.msra.mxu1 %v4505_v9  ;;  %v4580_v9 = vld [vmem:[#allocation2 + $0x88c] ss:$12 sps:$4 sm:$0xff]  }
  0xf7   : > { %3030 = vmatpush1.bf16.msra.mxu0 %v4501_v8  ;;  %4037 = vmatprep.subr.bf16.mxu1 %v4509_v10  ;;  %v4577_v8 = vld [vmem:[#allocation2 + $0x4b8] ss:$12 sps:$4 sm:$0xff]   ;;  %v4578_v10 = vld [vmem:[#allocation2 + $0x888] ss:$12 sps:$4 sm:$0xff]  }
  0xf8   : > { %3031 = vmatprep.subr.bf16.mxu0 %v4508_v36  ;;  %v4581_v36 = vld [vmem:[#allocation2 + $0x590] ss:$12 sps:$4 sm:$0xff]  }
  0xfa   : > { %4038 = vmatpush3.bf16.msra.mxu1 %v4510_v12  ;;  %v4586_v12 = vld [vmem:[#allocation2 + $0x5a8] ss:$12 sps:$4 sm:$0xff]  }
  0xfb   : > { %3032 = vmatpush1.bf16.msra.mxu0 %v4506_v11  ;;  %4039 = vmatprep.subr.bf16.mxu1 %v4514_v14  ;;  %v4585_v11 = vld [vmem:[#allocation2 + $0x8a4] ss:$12 sps:$4 sm:$0xff]   ;;  %v4590_v14 = vld [vmem:[#allocation2 + $0x8bc] ss:$12 sps:$4 sm:$0xff]  }
  0xfc   : > { %3033 = vmatprep.subr.bf16.mxu0 %v4513_v13  ;;  %v4583_v13 = vld [vmem:[#allocation2 + $0x8a0] ss:$12 sps:$4 sm:$0xff]  }
  0xfe   : > { %4040 = vmatpush3.bf16.msra.mxu1 %v4515_v18  ;;  %v4588_v18 = vld [vmem:[#allocation2 + $0x8b8] ss:$12 sps:$4 sm:$0xff]  }
  0xff   : > { %3034 = vmatpush1.bf16.msra.mxu0 %v4511_v15  ;;  %4041 = vmatprep.subr.bf16.mxu1 %v4519_v20  ;;  %v4591_v15 = vld [vmem:[#allocation2 + $0x5c0] ss:$12 sps:$4 sm:$0xff]  }
 0x100   : > { %3035 = vmatprep.subr.bf16.mxu0 %v4518_v19  ;;  %v4592_v19 = vld [vmem:[#allocation2 + $0x500] ss:$12 sps:$4 sm:$0xff]  }
 0x101   : > { %v4595_v20 = vld [vmem:[#allocation2 + $0x8d4] ss:$12 sps:$4 sm:$0xff]  }
 0x102   : > { %4042 = vmatpush3.bf16.msra.mxu1 %v4520_v22  ;;  %v4593_v22 = vld [vmem:[#allocation2 + $0x8d0] ss:$12 sps:$4 sm:$0xff]  }
 0x103   : > { %3036 = vmatpush1.bf16.msra.mxu0 %v4516_v21  ;;  %4049 = vmatprep.subr.bf16.mxu1 %v4526_v24  ;;  %v4596_v21 = vld [vmem:[#allocation2 + $0x5d8] ss:$12 sps:$4 sm:$0xff]  }
 0x104   : > { %3046 = vmatprep.subr.bf16.mxu0 %v4525_v23  ;;  %v4597_v23 = vld [vmem:[#allocation2 + $0x518] ss:$12 sps:$4 sm:$0xff]  }
 0x105   : > { %3242 = vmatmul.mubr.bf16.vlgmr.msra.gmra.mrb[8].mxu1 %v5002_v16  ;;  %v4540_v16 = vld [vmem:[#allocation2 + $0x7cc] ss:$12 sps:$4 sm:$0xff]  }
 0x106   : > { %3038 = vmatmul.mubr.bf16.vlgmr.msra.gmra.mrb[0].mxu0 %v5023_v25  ;;  %4050 = vmatpush3.bf16.msra.mxu1 %v4527_v27  ;;  %v4600_v24 = vld [vmem:[#allocation2 + $0x8ec] ss:$12 sps:$4 sm:$0xff]   ;;  %v4598_v27 = vld [vmem:[#allocation2 + $0x8e8] ss:$12 sps:$4 sm:$0xff]  }
 0x107   : > { %3047 = vmatpush1.bf16.msra.mxu0 %v4523_v26  ;;  %4051 = vmatprep.subr.bf16.mxu1 %v4531_v29  ;;  %v4601_v26 = vld [vmem:[#allocation2 + $0x5f0] ss:$12 sps:$4 sm:$0xff]  }
 0x108   : > { %3048 = vmatprep.subr.bf16.mxu0 %v4530_v28  ;;  %3281 = vmatprep.mubr.bf16.mxu1 %v4974_v53  ;;  %v4547_v53 = vld [vmem:[#allocation2 + $0x368] ss:$12 sps:$4 sm:$0xff]   ;;  %v4602_v28 = vld [vmem:[#allocation2 + $0x530] ss:$12 sps:$4 sm:$0xff]  }
 0x109   : > { %3078 = vmatprep.mubr.bf16.mxu0 %v5030_v33  ;;  %v4607_v29 = vld [vmem:[#allocation2 + $0x904] ss:$12 sps:$4 sm:$0xff]  }
 0x10a   : > { %4052 = vmatpush3.bf16.msra.mxu1 %v4532_v32  ;;  %v4605_v32 = vld [vmem:[#allocation2 + $0x900] ss:$12 sps:$4 sm:$0xff]  }
 0x10b   : > { %3049 = vmatpush1.bf16.msra.mxu0 %v4528_v31  ;;  %4053 = vmatprep.subr.bf16.mxu1 %v4536_v35  ;;  %v4608_v31 = vld [vmem:[#allocation2 + $0x6c8] ss:$12 sps:$4 sm:$0xff]  }
 0x10c   : > { %3050 = vmatprep.subr.bf16.mxu0 %v4535_v34  ;;  %v5040_v34 = vcombine.low %v5026_v30, %v5026_v30  ;;  %v4609_v35 = vld [vmem:[#allocation2 + $0x608] ss:$12 sps:$4 sm:$0xff]   ;;  %v4614_v30 = vld [vmem:[#allocation2 + $0x620] ss:$12 sps:$4 sm:$0xff]  }
 0x10e   : > { %4054 = vmatpush3.bf16.msra.mxu1 %v4537_v39  ;;  %v4612_v39 = vld [vmem:[#allocation2 + $0x91c] ss:$12 sps:$4 sm:$0xff]  }
 0x10f   : > { %3051 = vmatpush1.bf16.msra.mxu0 %v4533_v38  ;;  %4055 = vmatprep.subr.bf16.mxu1 %v4541_v40  ;;  %v5043_v38 = vld [vmem:[%s4968_s21 + $0x30] sm:$0xff]  ;;  %v4610_v40 = vld [vmem:[#allocation2 + $0x918] ss:$12 sps:$4 sm:$0xff]  }
 0x110   : > { %3052 = vmatprep.subr.bf16.mxu0 %v4540_v16  ;;  %v4613_v16 = vld [vmem:[#allocation2 + $0x6e0] ss:$12 sps:$4 sm:$0xff]  }
 0x112   : > { %4056 = vmatpush3.bf16.msra.mxu1 %v4542_v42  ;;  %v4617_v42 = vld [vmem:[#allocation2 + $0x934] ss:$12 sps:$4 sm:$0xff]  }
 0x113   : > { %3053 = vmatpush1.bf16.msra.mxu0 %v4538_v41  ;;  %4057 = vmatprep.subr.bf16.mxu1 %v4546_v44  ;;  %v5047_v41 = vcombine.high %v5043_v38, %v5043_v38  ;;  %v4615_v44 = vld [vmem:[#allocation2 + $0x930] ss:$12 sps:$4 sm:$0xff]  }
 0x114   : > { %3054 = vmatprep.subr.bf16.mxu0 %v4545_v43  ;;  %v4618_v43 = vld [vmem:[#allocation2 + $0x6f8] ss:$12 sps:$4 sm:$0xff]  }
 0x116   : > { %4058 = vmatpush3.bf16.msra.mxu1 %v4547_v53  ;;  %v4623_v53 = vld [vmem:[#allocation2 + $0x710] ss:$12 sps:$4 sm:$0xff]  }
 0x117   : > { %3055 = vmatpush1.bf16.msra.mxu0 %v4543_v45  ;;  %4059 = vmatprep.subr.bf16.mxu1 %v4551_v47  ;;  %v4619_v45 = vld [vmem:[#allocation2 + $0x638] ss:$12 sps:$4 sm:$0xff]   ;;  %v4624_v47 = vld [vmem:[#allocation2 + $0x650] ss:$12 sps:$4 sm:$0xff]  }
 0x118   : > { %3056 = vmatprep.subr.bf16.mxu0 %v4550_v46  ;;  %v4620_v46 = vld [vmem:[#allocation2 + $0x948] ss:$12 sps:$4 sm:$0xff]  }
 0x11a   : > { %4060 = vmatpush3.bf16.msra.mxu1 %v4552_v50  ;;  %v4628_v50 = vld [vmem:[#allocation2 + $0x728] ss:$12 sps:$4 sm:$0xff]  }
 0x11b   : > { %3057 = vmatpush1.bf16.msra.mxu0 %v4548_v49  ;;  %4061 = vmatprep.subr.bf16.mxu1 %v4556_v52  ;;  %v4627_v49 = vld [vmem:[#allocation2 + $0x964] ss:$12 sps:$4 sm:$0xff]   ;;  %v4632_v52 = vld [vmem:[#allocation2 + $0x97c] ss:$12 sps:$4 sm:$0xff]  }
 0x11c   : > { %3058 = vmatprep.subr.bf16.mxu0 %v4555_v51  ;;  %v4625_v51 = vld [vmem:[#allocation2 + $0x960] ss:$12 sps:$4 sm:$0xff]  }
 0x11e   : > { %4062 = vmatpush3.bf16.msra.mxu1 %v4557_v55  ;;  %v4630_v55 = vld [vmem:[#allocation2 + $0x978] ss:$12 sps:$4 sm:$0xff]  }
 0x11f   : > { %3059 = vmatpush1.bf16.msra.mxu0 %v4553_v54  ;;  %4063 = vmatprep.subr.bf16.mxu1 %v4561_v57  ;;  %v4633_v54 = vld [vmem:[#allocation2 + $0x740] ss:$12 sps:$4 sm:$0xff]  }
 0x120   : > { %3060 = vmatprep.subr.bf16.mxu0 %v4560_v56  ;;  %v4634_v56 = vld [vmem:[#allocation2 + $0x680] ss:$12 sps:$4 sm:$0xff]  }
 0x121   : > { %v4637_v57 = vld [vmem:[#allocation2 + $0x994] ss:$12 sps:$4 sm:$0xff]  }
 0x122   : > { %4064 = vmatpush3.bf16.msra.mxu1 %v4562_v59  ;;  %v4635_v59 = vld [vmem:[#allocation2 + $0x990] ss:$12 sps:$4 sm:$0xff]  }
 0x123   : > { %3061 = vmatpush1.bf16.msra.mxu0 %v4558_v58  ;;  %4071 = vmatprep.subr.bf16.mxu1 %v4566_v61  ;;  %v4638_v58 = vld [vmem:[#allocation2 + $0x758] ss:$12 sps:$4 sm:$0xff]  }
 0x124   : > { %3062 = vmatprep.subr.bf16.mxu0 %v4565_v60  ;;  %v4639_v60 = vld [vmem:[#allocation2 + $0x698] ss:$12 sps:$4 sm:$0xff]  }
 0x125   : > { %3282 = vmatmul.mubr.bf16.vlgmr.msra.gmra.mrb[12].mxu1 %v4980_v7  ;;  %v4582_v7 = vld [vmem:[#allocation2 + $0x4d0] ss:$12 sps:$4 sm:$0xff]   ;;  %v4642_v61 = vld [vmem:[#allocation2 + $0x9ac] ss:$12 sps:$4 sm:$0xff]  }
 0x126   : > { %4072 = vmatpush3.bf16.msra.mxu1 %v4567_v63  ;;  %3321 = vmatprep.mubr.bf16.mxu1 %v4996_v37  ;;  %v4587_v37 = vld [vmem:[#allocation2 + $0x4e8] ss:$12 sps:$4 sm:$0xff]  }
 0x127   : > { %3063 = vmatpush1.bf16.msra.mxu0 %v4563_v62  ;;  %4073 = vmatprep.subr.bf16.mxu1 %v4571_v1  ;;  %v4643_v62 = vld [vmem:[#allocation2 + $0x770] ss:$12 sps:$4 sm:$0xff]   ;;  %v4640_v63 = vld [vmem:[#allocation2 + $0x9a8] ss:$12 sps:$4 sm:$0xff]  }
 0x128   : > { %3064 = vmatprep.subr.bf16.mxu0 %v4570_v0  ;;  %v4644_v0 = vld [vmem:[#allocation2 + $0x6b0] ss:$12 sps:$4 sm:$0xff]  }
 0x129   : > { %v4647_v1 = vld [vmem:[#allocation2 + $0x9c4] ss:$12 sps:$4 sm:$0xff]  }
 0x12a   : > { %4074 = vmatpush3.bf16.msra.mxu1 %v4572_v3  ;;  %v4645_v3 = vld [vmem:[#allocation2 + $0x9c0] ss:$12 sps:$4 sm:$0xff]  }
 0x12b   : > { %3065 = vmatpush1.bf16.msra.mxu0 %v4568_v2  ;;  %4075 = vmatprep.subr.bf16.mxu1 %v4576_v4  ;;  %v4648_v2 = vld [vmem:[#allocation2 + $0x848] ss:$12 sps:$4 sm:$0xff]  }
 0x12c   : > { %3066 = vmatprep.subr.bf16.mxu0 %v4575_v6  ;;  %v4649_v6 = vld [vmem:[#allocation2 + $0x788] ss:$12 sps:$4 sm:$0xff]  }
 0x12d   : > { %v4652_v4 = vld [vmem:[#allocation2 + $0x9dc] ss:$12 sps:$4 sm:$0xff]  }
 0x12e   : > { %4076 = vmatpush3.bf16.msra.mxu1 %v4577_v8  ;;  %v4650_v8 = vld [vmem:[#allocation2 + $0x9d8] ss:$12 sps:$4 sm:$0xff]  }
 0x12f   : > { %3067 = vmatpush1.bf16.msra.mxu0 %v4573_v5  ;;  %4077 = vmatprep.subr.bf16.mxu1 %v4581_v36  ;;  %v4653_v5 = vld [vmem:[#allocation2 + $0x860] ss:$12 sps:$4 sm:$0xff]  }
 0x130   : > { %3068 = vmatprep.subr.bf16.mxu0 %v4580_v9  ;;  %v4654_v9 = vld [vmem:[#allocation2 + $0x7a0] ss:$12 sps:$4 sm:$0xff]  }
 0x131   : > { %v4657_v36 = vld [vmem:[#allocation2 + $0x9f4] ss:$12 sps:$4 sm:$0xff]  }
 0x132   : > { %4078 = vmatpush3.bf16.msra.mxu1 %v4582_v7  ;;  %v4655_v7 = vld [vmem:[#allocation2 + $0x9f0] ss:$12 sps:$4 sm:$0xff]  }
 0x133   : > { %3069 = vmatpush1.bf16.msra.mxu0 %v4578_v10  ;;  %4079 = vmatprep.subr.bf16.mxu1 %v4586_v12  ;;  %v4658_v10 = vld [vmem:[#allocation2 + $0x878] ss:$12 sps:$4 sm:$0xff]  }
 0x134   : > { %3070 = vmatprep.subr.bf16.mxu0 %v4585_v11  ;;  %v4659_v11 = vld [vmem:[#allocation2 + $0x7b8] ss:$12 sps:$4 sm:$0xff]  }
 0x135   : > { %v4662_v12 = vld [vmem:[#allocation2 + $0xa0c] ss:$12 sps:$4 sm:$0xff]  }
 0x136   : > { %4080 = vmatpush3.bf16.msra.mxu1 %v4587_v37  ;;  %v4660_v37 = vld [vmem:[#allocation2 + $0xa08] ss:$12 sps:$4 sm:$0xff]  }
 0x137   : > { %3071 = vmatpush1.bf16.msra.mxu0 %v4583_v13  ;;  %4081 = vmatprep.subr.bf16.mxu1 %v4591_v15  ;;  %v4663_v13 = vld [vmem:[#allocation2 + $0x890] ss:$12 sps:$4 sm:$0xff]   ;;  %v4668_v15 = vld [vmem:[#allocation2 + $0x8a8] ss:$12 sps:$4 sm:$0xff]  }
 0x138   : > { %3072 = vmatprep.subr.bf16.mxu0 %v4590_v14  ;;  %v4667_v14 = vld [vmem:[#allocation2 + $0xa24] ss:$12 sps:$4 sm:$0xff]  }
 0x13a   : > { %4082 = vmatpush3.bf16.msra.mxu1 %v4592_v19  ;;  %v4672_v19 = vld [vmem:[#allocation2 + $0xa3c] ss:$12 sps:$4 sm:$0xff]  }
 0x13b   : > { %3073 = vmatpush1.bf16.msra.mxu0 %v4588_v18  ;;  %4083 = vmatprep.subr.bf16.mxu1 %v4596_v21  ;;  %v4665_v18 = vld [vmem:[#allocation2 + $0xa20] ss:$12 sps:$4 sm:$0xff]   ;;  %v4670_v21 = vld [vmem:[#allocation2 + $0xa38] ss:$12 sps:$4 sm:$0xff]  }
 0x13c   : > { %3074 = vmatprep.subr.bf16.mxu0 %v4595_v20  ;;  %v4673_v20 = vld [vmem:[#allocation2 + $0x8c0] ss:$12 sps:$4 sm:$0xff]  }
 0x13e   : > { %4084 = vmatpush3.bf16.msra.mxu1 %v4597_v23  ;;  %v4677_v23 = vld [vmem:[#allocation2 + $0xa54] ss:$12 sps:$4 sm:$0xff]  }
 0x13f   : > { %3075 = vmatpush1.bf16.msra.mxu0 %v4593_v22  ;;  %4085 = vmatprep.subr.bf16.mxu1 %v4601_v26  ;;  %v4674_v22 = vld [vmem:[#allocation2 + $0x800] ss:$12 sps:$4 sm:$0xff]   ;;  %v4675_v26 = vld [vmem:[#allocation2 + $0xa50] ss:$12 sps:$4 sm:$0xff]  }
 0x140   : > { %3076 = vmatprep.subr.bf16.mxu0 %v4600_v24  ;;  %v4678_v24 = vld [vmem:[#allocation2 + $0x8d8] ss:$12 sps:$4 sm:$0xff]  }
 0x142   : > { %4086 = vmatpush3.bf16.msra.mxu1 %v4602_v28  ;;  %v4682_v28 = vld [vmem:[#allocation2 + $0xa6c] ss:$12 sps:$4 sm:$0xff]  }
 0x143   : > { %3077 = vmatpush1.bf16.msra.mxu0 %v4598_v27  ;;  %4093 = vmatprep.subr.bf16.mxu1 %v4608_v31  ;;  %v4679_v27 = vld [vmem:[#allocation2 + $0x818] ss:$12 sps:$4 sm:$0xff]   ;;  %v4680_v31 = vld [vmem:[#allocation2 + $0xa68] ss:$12 sps:$4 sm:$0xff]  }
 0x144   : > { %3087 = vmatprep.subr.bf16.mxu0 %v4607_v29  ;;  %v4683_v29 = vld [vmem:[#allocation2 + $0x8f0] ss:$12 sps:$4 sm:$0xff]  }
 0x145   : > { %3322 = vmatmul.mubr.bf16.vlgmr.msra.gmra.mrb[16].mxu1 %v5006_v17  ;;  %v4622_v17 = vld [vmem:[#allocation2 + $0x94c] ss:$12 sps:$4 sm:$0xff]  }
 0x146   : > { %3079 = vmatmul.mubr.bf16.vlgmr.msra.gmra.mrb[0].mxu0 %v5040_v34  ;;  %4094 = vmatpush3.bf16.msra.mxu1 %v4609_v35  ;;  %v4689_v35 = vld [vmem:[#allocation2 + $0xa84] ss:$12 sps:$4 sm:$0xff]  }
 0x147   : > { %3088 = vmatpush1.bf16.msra.mxu0 %v4605_v32  ;;  %4095 = vmatprep.subr.bf16.mxu1 %v4613_v16  ;;  %v4684_v32 = vld [vmem:[#allocation2 + $0x830] ss:$12 sps:$4 sm:$0xff]   ;;  %v5057_v16 = vcombine.low %v5043_v38, %v5043_v38  ;;  %v4692_v38 = vld [vmem:[#allocation2 + $0xa98] ss:$12 sps:$4 sm:$0xff]  }
 0x148   : > { %3089 = vmatprep.subr.bf16.mxu0 %v4612_v39  ;;  %3361 = vmatprep.mubr.bf16.mxu1 %v5016_v48  ;;  %v4629_v48 = vld [vmem:[#allocation2 + $0x668] ss:$12 sps:$4 sm:$0xff]  }
 0x149   : > { %3119 = vmatprep.mubr.bf16.mxu0 %v5047_v41  ;;  %v4690_v39 = vld [vmem:[#allocation2 + $0x9c8] ss:$12 sps:$4 sm:$0xff]  }
 0x14a   : > { %4096 = vmatpush3.bf16.msra.mxu1 %v4614_v30  ;;  %v4687_v30 = vld [vmem:[#allocation2 + $0xa80] ss:$12 sps:$4 sm:$0xff]  }
 0x14b   : > { %3090 = vmatpush1.bf16.msra.mxu0 %v4610_v40  ;;  %4097 = vmatprep.subr.bf16.mxu1 %v4618_v43  ;;  %v5060_v40 = vld [vmem:[%s4968_s21 + $0x38] sm:$0xff] }
 0x14c   : > { %3091 = vmatprep.subr.bf16.mxu0 %v4617_v42  ;;  %v4691_v42 = vld [vmem:[#allocation2 + $0x908] ss:$12 sps:$4 sm:$0xff]  }
 0x14d   : > { %v4694_v43 = vld [vmem:[#allocation2 + $0xa9c] ss:$12 sps:$4 sm:$0xff]  }
 0x14e   : > { %4098 = vmatpush3.bf16.msra.mxu1 %v4619_v45  ;;  %v5064_v45 = vcombine.high %v5060_v40, %v5060_v40 }
 0x14f   : > { %3092 = vmatpush1.bf16.msra.mxu0 %v4615_v44  ;;  %4099 = vmatprep.subr.bf16.mxu1 %v4623_v53  ;;  %v4695_v44 = vld [vmem:[#allocation2 + $0x9e0] ss:$12 sps:$4 sm:$0xff]  }
 0x150   : > { %3093 = vmatprep.subr.bf16.mxu0 %v4622_v17  ;;  %v4696_v17 = vld [vmem:[#allocation2 + $0x920] ss:$12 sps:$4 sm:$0xff]  }
 0x151   : > { %v4699_v53 = vld [vmem:[#allocation2 + $0xab4] ss:$12 sps:$4 sm:$0xff]  }
 0x152   : > { %4100 = vmatpush3.bf16.msra.mxu1 %v4624_v47  ;;  %v4697_v47 = vld [vmem:[#allocation2 + $0xab0] ss:$12 sps:$4 sm:$0xff]  }
 0x153   : > { %3094 = vmatpush1.bf16.msra.mxu0 %v4620_v46  ;;  %4101 = vmatprep.subr.bf16.mxu1 %v4628_v50  ;;  %v4700_v46 = vld [vmem:[#allocation2 + $0x9f8] ss:$12 sps:$4 sm:$0xff]   ;;  %v4705_v50 = vld [vmem:[#allocation2 + $0xa10] ss:$12 sps:$4 sm:$0xff]  }
 0x154   : > { %3095 = vmatprep.subr.bf16.mxu0 %v4627_v49  ;;  %v4701_v49 = vld [vmem:[#allocation2 + $0x938] ss:$12 sps:$4 sm:$0xff]  }
 0x156   : > { %4102 = vmatpush3.bf16.msra.mxu1 %v4629_v48  ;;  %v4706_v48 = vld [vmem:[#allocation2 + $0x950] ss:$12 sps:$4 sm:$0xff]  }
 0x157   : > { %3096 = vmatpush1.bf16.msra.mxu0 %v4625_v51  ;;  %4103 = vmatprep.subr.bf16.mxu1 %v4633_v54  ;;  %v4702_v51 = vld [vmem:[#allocation2 + $0xac8] ss:$12 sps:$4 sm:$0xff]  }
 0x158   : > { %3097 = vmatprep.subr.bf16.mxu0 %v4632_v52  ;;  %v4709_v52 = vld [vmem:[#allocation2 + $0xae4] ss:$12 sps:$4 sm:$0xff]   ;;  %v4710_v54 = vld [vmem:[#allocation2 + $0xa28] ss:$12 sps:$4 sm:$0xff]  }
 0x15a   : > { %4104 = vmatpush3.bf16.msra.mxu1 %v4634_v56  ;;  %v4714_v56 = vld [vmem:[#allocation2 + $0xafc] ss:$12 sps:$4 sm:$0xff]  }
 0x15b   : > { %3098 = vmatpush1.bf16.msra.mxu0 %v4630_v55  ;;  %4105 = vmatprep.subr.bf16.mxu1 %v4638_v58  ;;  %v4711_v55 = vld [vmem:[#allocation2 + $0x968] ss:$12 sps:$4 sm:$0xff]   ;;  %v4712_v58 = vld [vmem:[#allocation2 + $0xaf8] ss:$12 sps:$4 sm:$0xff]  }
 0x15c   : > { %3099 = vmatprep.subr.bf16.mxu0 %v4637_v57  ;;  %v4715_v57 = vld [vmem:[#allocation2 + $0xa40] ss:$12 sps:$4 sm:$0xff]  }
 0x15e   : > { %4106 = vmatpush3.bf16.msra.mxu1 %v4639_v60  ;;  %v4719_v60 = vld [vmem:[#allocation2 + $0xb14] ss:$12 sps:$4 sm:$0xff]  }
 0x15f   : > { %3100 = vmatpush1.bf16.msra.mxu0 %v4635_v59  ;;  %4107 = vmatprep.subr.bf16.mxu1 %v4643_v62  ;;  %v4716_v59 = vld [vmem:[#allocation2 + $0x980] ss:$12 sps:$4 sm:$0xff]  }
 0x160   : > { %3101 = vmatprep.subr.bf16.mxu0 %v4642_v61  ;;  %v4720_v61 = vld [vmem:[#allocation2 + $0xa58] ss:$12 sps:$4 sm:$0xff]  }
 0x162   : > { %4108 = vmatpush3.bf16.msra.mxu1 %v4644_v0 }
 0x163   : > { %3102 = vmatpush1.bf16.msra.mxu0 %v4640_v63  ;;  %4115 = vmatprep.subr.bf16.mxu1 %v4648_v2  ;;  %v4721_v2 = vld [vmem:[#allocation2 + $0x998] ss:$12 sps:$4 sm:$0xff]  }
 0x164   : > { %3103 = vmatprep.subr.bf16.mxu0 %v4647_v1  ;;  %v4717_v1 = vld [vmem:[#allocation2 + $0xb10] ss:$12 sps:$4 sm:$0xff]  }
 0x165   : > { %3362 = vmatmul.mubr.bf16.vlgmr.msra.gmra.mrb[20].mxu1 %v5023_v25  ;;  %v4664_v25 = vld [vmem:[#allocation2 + $0x7d0] ss:$12 sps:$4 sm:$0xff]  }
 0x166   : > { %4116 = vmatpush3.bf16.msra.mxu1 %v4649_v6  ;;  %3401 = vmatprep.mubr.bf16.mxu1 %v5030_v33  ;;  %v4669_v33 = vld [vmem:[#allocation2 + $0x7e8] ss:$12 sps:$4 sm:$0xff]   ;;  %v4724_v6 = vld [vmem:[#allocation2 + $0xb2c] ss:$12 sps:$4 sm:$0xff]  }
 0x167   : > { %3104 = vmatpush1.bf16.msra.mxu0 %v4645_v3  ;;  %4117 = vmatprep.subr.bf16.mxu1 %v4653_v5  ;;  %v4722_v5 = vld [vmem:[#allocation2 + $0xb28] ss:$12 sps:$4 sm:$0xff]  }
 0x168   : > { %3105 = vmatprep.subr.bf16.mxu0 %v4652_v4  ;;  %v4725_v4 = vld [vmem:[#allocation2 + $0xa70] ss:$12 sps:$4 sm:$0xff]  }
 0x16a   : > { %4118 = vmatpush3.bf16.msra.mxu1 %v4654_v9  ;;  %v4729_v9 = vld [vmem:[#allocation2 + $0xb44] ss:$12 sps:$4 sm:$0xff]  }
 0x16b   : > { %3106 = vmatpush1.bf16.msra.mxu0 %v4650_v8  ;;  %4119 = vmatprep.subr.bf16.mxu1 %v4658_v10  ;;  %v4726_v8 = vld [vmem:[#allocation2 + $0x9b0] ss:$12 sps:$4 sm:$0xff]   ;;  %v4727_v10 = vld [vmem:[#allocation2 + $0xb40] ss:$12 sps:$4 sm:$0xff]  }
 0x16c   : > { %3107 = vmatprep.subr.bf16.mxu0 %v4657_v36  ;;  %v4730_v36 = vld [vmem:[#allocation2 + $0xb48] ss:$12 sps:$4 sm:$0xff]  }
 0x16e   : > { %4120 = vmatpush3.bf16.msra.mxu1 %v4659_v11  ;;  %v4734_v11 = vld [vmem:[#allocation2 + $0xb5c] ss:$12 sps:$4 sm:$0xff]  }
 0x16f   : > { %3108 = vmatpush1.bf16.msra.mxu0 %v4655_v7  ;;  %4121 = vmatprep.subr.bf16.mxu1 %v4663_v13  ;;  %v4731_v7 = vld [vmem:[#allocation2 + $0xa88] ss:$12 sps:$4 sm:$0xff]   ;;  %v4732_v13 = vld [vmem:[#allocation2 + $0xb58] ss:$12 sps:$4 sm:$0xff]  }
 0x170   : > { %3109 = vmatprep.subr.bf16.mxu0 %v4662_v12  ;;  %v4735_v12 = vld [vmem:[#allocation2 + $0xb60] ss:$12 sps:$4 sm:$0xff]  }
 0x172   : > { %4122 = vmatpush3.bf16.msra.mxu1 %v4664_v25  ;;  %v4739_v25 = vld [vmem:[#allocation2 + $0xb74] ss:$12 sps:$4 sm:$0xff]  }
 0x173   : > { %3110 = vmatpush1.bf16.msra.mxu0 %v4660_v37  ;;  %4123 = vmatprep.subr.bf16.mxu1 %v4668_v15  ;;  %v4736_v37 = vld [vmem:[#allocation2 + $0xaa0] ss:$12 sps:$4 sm:$0xff]   ;;  %v4737_v15 = vld [vmem:[#allocation2 + $0xb70] ss:$12 sps:$4 sm:$0xff]  }
 0x174   : > { %3111 = vmatprep.subr.bf16.mxu0 %v4667_v14  ;;  %v4740_v14 = vld [vmem:[#allocation2 + $0xb78] ss:$12 sps:$4 sm:$0xff]  }
 0x176   : > { %4124 = vmatpush3.bf16.msra.mxu1 %v4669_v33  ;;  %v4744_v33 = vld [vmem:[#allocation2 + $0xb8c] ss:$12 sps:$4 sm:$0xff]  }
 0x177   : > { %3112 = vmatpush1.bf16.msra.mxu0 %v4665_v18  ;;  %4125 = vmatprep.subr.bf16.mxu1 %v4673_v20  ;;  %v4741_v18 = vld [vmem:[#allocation2 + $0xab8] ss:$12 sps:$4 sm:$0xff]   ;;  %v4742_v20 = vld [vmem:[#allocation2 + $0xb88] ss:$12 sps:$4 sm:$0xff]  }
 0x178   : > { %3113 = vmatprep.subr.bf16.mxu0 %v4672_v19  ;;  %v4745_v19 = vld [vmem:[#allocation2 + $0xb90] ss:$12 sps:$4 sm:$0xff]  }
 0x17a   : > { %4126 = vmatpush3.bf16.msra.mxu1 %v4674_v22  ;;  %v4749_v22 = vld [vmem:[#allocation2 + $0xba4] ss:$12 sps:$4 sm:$0xff]  }
 0x17b   : > { %3114 = vmatpush1.bf16.msra.mxu0 %v4670_v21  ;;  %4127 = vmatprep.subr.bf16.mxu1 %v4678_v24  ;;  %v4746_v21 = vld [vmem:[#allocation2 + $0xad0] ss:$12 sps:$4 sm:$0xff]   ;;  %v4747_v24 = vld [vmem:[#allocation2 + $0xba0] ss:$12 sps:$4 sm:$0xff]  }
 0x17c   : > { %3115 = vmatprep.subr.bf16.mxu0 %v4677_v23  ;;  %v4750_v23 = vld [vmem:[#allocation2 + $0xba8] ss:$12 sps:$4 sm:$0xff]  }
 0x17e   : > { %4128 = vmatpush3.bf16.msra.mxu1 %v4679_v27  ;;  %v4754_v27 = vld [vmem:[#allocation2 + $0xbbc] ss:$12 sps:$4 sm:$0xff]  }
 0x17f   : > { %3116 = vmatpush1.bf16.msra.mxu0 %v4675_v26  ;;  %4129 = vmatprep.subr.bf16.mxu1 %v4683_v29  ;;  %v4751_v26 = vld [vmem:[#allocation2 + $0xae8] ss:$12 sps:$4 sm:$0xff]   ;;  %v4752_v29 = vld [vmem:[#allocation2 + $0xbb8] ss:$12 sps:$4 sm:$0xff]  }
 0x180   : > { %3117 = vmatprep.subr.bf16.mxu0 %v4682_v28  ;;  %v4755_v28 = vld [vmem:[#allocation2 + $0xbc0] ss:$12 sps:$4 sm:$0xff]  }
 0x182   : > { %4130 = vmatpush3.bf16.msra.mxu1 %v4684_v32  ;;  %v4759_v32 = vld [vmem:[#allocation2 + $0xbd4] ss:$12 sps:$4 sm:$0xff]  }
 0x183   : > { %3118 = vmatpush1.bf16.msra.mxu0 %v4680_v31  ;;  %4137 = vmatprep.subr.bf16.mxu1 %v4690_v39  ;;  %v4756_v31 = vld [vmem:[#allocation2 + $0xb00] ss:$12 sps:$4 sm:$0xff]  }
 0x184   : > { %3128 = vmatprep.subr.bf16.mxu0 %v4689_v35  ;;  %v4760_v35 = vld [vmem:[#allocation2 + $0xbd8] ss:$12 sps:$4 sm:$0xff]  }
 0x185   : > { %3402 = vmatmul.mubr.bf16.vlgmr.msra.gmra.mrb[24].mxu1 %v5040_v34  ;;  %v4704_v34 = vld [vmem:[#allocation2 + $0xacc] ss:$12 sps:$4 sm:$0xff]  }
 0x186   : > { %3120 = vmatmul.mubr.bf16.vlgmr.msra.gmra.mrb[0].mxu0 %v5057_v16  ;;  %4138 = vmatpush3.bf16.msra.mxu1 %v4691_v42 }
 0x187   : > { %3129 = vmatpush1.bf16.msra.mxu0 %v4687_v30  ;;  %4139 = vmatprep.subr.bf16.mxu1 %v4695_v44  ;;  %v4761_v44 = vld [vmem:[#allocation2 + $0xb18] ss:$12 sps:$4 sm:$0xff]  }
 0x188   : > { %3130 = vmatprep.subr.bf16.mxu0 %v4694_v43  ;;  %3441 = vmatprep.mubr.bf16.mxu1 %v5047_v41  ;;  %v4707_v41 = vld [vmem:[#allocation2 + $0xae0] ss:$12 sps:$4 sm:$0xff]   ;;  %v4757_v43 = vld [vmem:[#allocation2 + $0xbd0] ss:$12 sps:$4 sm:$0xff]  }
 0x189   : > { %3160 = vmatprep.mubr.bf16.mxu0 %v5064_v45 }
 0x18a   : > { %4140 = vmatpush3.bf16.msra.mxu1 %v4696_v17  ;;  %v4765_v17 = vld [vmem:[#allocation2 + $0xbf0] ss:$12 sps:$4 sm:$0xff]  }
 0x18b   : > { %3131 = vmatpush1.bf16.msra.mxu0 %v4692_v38  ;;  %4141 = vmatprep.subr.bf16.mxu1 %v4700_v46  ;;  %v4764_v38 = vld [vmem:[#allocation2 + $0xbec] ss:$12 sps:$4 sm:$0xff]   ;;  %v4766_v46 = vld [vmem:[#allocation2 + $0xb30] ss:$12 sps:$4 sm:$0xff]  }
 0x18c   : > { %3132 = vmatprep.subr.bf16.mxu0 %v4699_v53  ;;  %v4762_v53 = vld [vmem:[#allocation2 + $0xbe8] ss:$12 sps:$4 sm:$0xff]  }
 0x18e   : > { %4142 = vmatpush3.bf16.msra.mxu1 %v4701_v49  ;;  %v722_v49 = vlaneseq }
 0x18f   : > { %3133 = vmatpush1.bf16.msra.mxu0 %v4697_v47  ;;  %4143 = vmatprep.subr.bf16.mxu1 %v4705_v50  ;;  %v3613_v47 = vcombine.low %v5060_v40, %v5060_v40 }
 0x190   : > { %3134 = vmatprep.subr.bf16.mxu0 %v4704_v34  ;;  %v723_v34 = vshrl.u32 %v722_v49, 7 }
 0x192   : > { %4144 = vmatpush3.bf16.msra.mxu1 %v4706_v48  ;;  %v732_v50 = vsub.s32 2, %v723_v34 }
 0x193   : > { %3135 = vmatpush1.bf16.msra.mxu0 %v4702_v51  ;;  %4145 = vmatprep.subr.bf16.mxu1 %v4710_v54  ;;  %v720_v51 = vld [vmem:[#allocation4] sm:$0x7] }
 0x194   : > { %3136 = vmatprep.subr.bf16.mxu0 %v4709_v52  ;;  %v733_v48 = vrot.slane %v720_v51, %v732_v50 }
 0x196   : > { %4146 = vmatpush3.bf16.msra.mxu1 %v4711_v55 }
 0x197   : > { %3137 = vmatpush1.bf16.msra.mxu0 %v4707_v41  ;;  %4147 = vmatprep.subr.bf16.mxu1 %v4715_v57 }
 0x198   : > { %3138 = vmatprep.subr.bf16.mxu0 %v4714_v56  ;;  %v5070_v62 = vpop.f32.mrb[0].mxu1 }
 0x199   : > { %v5072_v63 = vpop.f32.mrb[1].mxu1 }
 0x19a   : > { %v2920_v0 = vpop.f32.mrb[2].mxu1  ;;  %4148 = vmatpush3.bf16.msra.mxu1 %v4716_v59 }
 0x19b   : > { %3139 = vmatpush1.bf16.msra.mxu0 %v4712_v58  ;;  %v2921_v3 = vpop.f32.mrb[3].mxu1  ;;  %4149 = vmatprep.subr.bf16.mxu1 %v4720_v61 }
 0x19c   : > { %3140 = vmatprep.subr.bf16.mxu0 %v4719_v60 }
 0x19e   : > { %4150 = vmatpush3.bf16.msra.mxu1 %v4721_v2 }
 0x19f   : > { %3141 = vmatpush1.bf16.msra.mxu0 %v4717_v1  ;;  %4151 = vmatprep.subr.bf16.mxu1 %v4725_v4 }
 0x1a0   : > { %3142 = vmatprep.subr.bf16.mxu0 %v4724_v6 }
 0x1a2   : > { %4152 = vmatpush3.bf16.msra.mxu1 %v4726_v8 }
 0x1a3   : > { %3143 = vmatpush1.bf16.msra.mxu0 %v4722_v5  ;;  %4159 = vmatprep.subr.bf16.mxu1 %v4730_v36 }
 0x1a4   : > { %3144 = vmatprep.subr.bf16.mxu0 %v4729_v9 }
 0x1a5   : > { %3442 = vmatmul.mubr.bf16.vlgmr.msra.gmra.mrb[28].mxu1 %v5057_v16 }
 0x1a6   : > { %4160 = vmatpush3.bf16.msra.mxu1 %v4731_v7  ;;  %3481 = vmatprep.mubr.bf16.mxu1 %v5064_v45 }
 0x1a7   : > { %3145 = vmatpush1.bf16.msra.mxu0 %v4727_v10  ;;  %4161 = vmatprep.subr.bf16.mxu1 %v4735_v12 }
 0x1a8   : > { %3146 = vmatprep.subr.bf16.mxu0 %v4734_v11 }
 0x1aa   : > { %4162 = vmatpush3.bf16.msra.mxu1 %v4736_v37 }
 0x1ab   : > { %3147 = vmatpush1.bf16.msra.mxu0 %v4732_v13  ;;  %4163 = vmatprep.subr.bf16.mxu1 %v4740_v14 }
 0x1ac   : > { %3148 = vmatprep.subr.bf16.mxu0 %v4739_v25 }
 0x1ae   : > { %4164 = vmatpush3.bf16.msra.mxu1 %v4741_v18 }
 0x1af   : > { %3149 = vmatpush1.bf16.msra.mxu0 %v4737_v15  ;;  %4165 = vmatprep.subr.bf16.mxu1 %v4745_v19 }
 0x1b0   : > { %3150 = vmatprep.subr.bf16.mxu0 %v4744_v33 }
 0x1b2   : > { %4166 = vmatpush3.bf16.msra.mxu1 %v4746_v21 }
 0x1b3   : > { %3151 = vmatpush1.bf16.msra.mxu0 %v4742_v20  ;;  %4167 = vmatprep.subr.bf16.mxu1 %v4750_v23 }
 0x1b4   : > { %3152 = vmatprep.subr.bf16.mxu0 %v4749_v22 }
 0x1b6   : > { %4168 = vmatpush3.bf16.msra.mxu1 %v4751_v26  ;;  %v728_v26 = vsub.s32 1, %v723_v34 }
 0x1b7   : > { %3153 = vmatpush1.bf16.msra.mxu0 %v4747_v24  ;;  %4169 = vmatprep.subr.bf16.mxu1 %v4755_v28  ;;  %v724_v24 = vsub.s32 0, %v723_v34 }
 0x1b8   : > { %3154 = vmatprep.subr.bf16.mxu0 %v4754_v27  ;;  %v4021_v39 = vpop.f32.mrb[4].mxu1  ;;  %v729_v28 = vrot.slane %v720_v51, %v728_v26 }
 0x1b9   : > { %v4022_v16 = vpop.f32.mrb[5].mxu1  ;;  %v725_v27 = vrot.slane %v720_v51, %v724_v24 }
 0x1ba   : > { %v4023_v30 = vadd.f32 %v4022_v16, %v4021_v39  ;;  %v4024_v42 = vpop.f32.mrb[6].mxu1  ;;  %4170 = vmatpush3.bf16.msra.mxu1 %v4756_v31  ;;  %v4183_v31 = vadd.f32 %v5072_v63, %v729_v28 }
 0x1bb   : > { %3155 = vmatpush1.bf16.msra.mxu0 %v4752_v29  ;;  %v4025_v45 = vpop.f32.mrb[7].mxu1  ;;  %4171 = vmatprep.subr.bf16.mxu1 %v4760_v35  ;;  %v4181_v29 = vadd.f32 %v5070_v62, %v725_v27 }
 0x1bc   : > { %3156 = vmatprep.subr.bf16.mxu0 %v4759_v32  ;;  %v3204_v41 = vadd.f32 %v4023_v30, %v733_v48 }
 0x1be   : > { %4172 = vmatpush3.bf16.msra.mxu1 %v4761_v44 }
 0x1bf   : > { %3157 = vmatpush1.bf16.msra.mxu0 %v4757_v43  ;;  %4173 = vmatprep.subr.bf16.mxu1 %v4765_v17 }
 0x1c0   : > { %3158 = vmatprep.subr.bf16.mxu0 %v4764_v38 }
 0x1c2   : > { %4174 = vmatpush3.bf16.msra.mxu1 %v4766_v46 }
 0x1c3   : > { %3159 = vmatpush1.bf16.msra.mxu0 %v4762_v53 }
 0x1c5   : > { %3482 = vmatmul.mubr.bf16.vlgmr.msra.gmra.mrb[32].mxu1 %v3613_v47 }
 0x1c6   : > { %3161 = vmatmul.mubr.bf16.vlgmr.msra.gmra.mrb[0].mxu0 %v3613_v47 }
 0x1d8   : > { %v4043_v52 = vpop.f32.mrb[8].mxu1 }
 0x1d9   : > { %v4044_v54 = vpop.f32.mrb[9].mxu1 }
 0x1da   : > { %v4045_v55 = vadd.f32 %v4044_v54, %v4043_v52  ;;  %v4046_v56 = vpop.f32.mrb[10].mxu1 }
 0x1db   : > { %v4047_v57 = vpop.f32.mrb[11].mxu1 }
 0x1dc   : > { %v3244_v58 = vadd.f32 %v4045_v55, %v3204_v41 }
 0x1f8   : > { %v4065_v59 = vpop.f32.mrb[12].mxu1 }
 0x1f9   : > { %v4066_v60 = vpop.f32.mrb[13].mxu1 }
 0x1fa   : > { %v4067_v61 = vadd.f32 %v4066_v60, %v4065_v59  ;;  %v4068_v40 = vpop.f32.mrb[14].mxu1 }
 0x1fb   : > { %v4069_v0 = vpop.f32.mrb[15].mxu1 }
 0x1fc   : > { %v3284_v1 = vadd.f32 %v4067_v61, %v3244_v58 }
 0x218   : > { %v4087_v2 = vpop.f32.mrb[16].mxu1 }
 0x219   : > { %v4088_v3 = vpop.f32.mrb[17].mxu1 }
 0x21a   : > { %v4089_v6 = vadd.f32 %v4088_v3, %v4087_v2  ;;  %v4090_v4 = vpop.f32.mrb[18].mxu1 }
 0x21b   : > { %v4091_v5 = vpop.f32.mrb[19].mxu1 }
 0x21c   : > { %v3324_v8 = vadd.f32 %v4089_v6, %v3284_v1 }
 0x238   : > { %v4109_v9 = vpop.f32.mrb[20].mxu1 }
 0x239   : > { %v4110_v36 = vpop.f32.mrb[21].mxu1 }
 0x23a   : > { %v4111_v10 = vadd.f32 %v4110_v36, %v4109_v9  ;;  %v4112_v7 = vpop.f32.mrb[22].mxu1 }
 0x23b   : > { %v4113_v11 = vpop.f32.mrb[23].mxu1 }
 0x23c   : > { %v3364_v12 = vadd.f32 %v4111_v10, %v3324_v8 }
 0x258   : > { %v4131_v13 = vpop.f32.mrb[24].mxu1 }
 0x259   : > { %v4132_v37 = vpop.f32.mrb[25].mxu1 }
 0x25a   : > { %v4133_v25 = vadd.f32 %v4132_v37, %v4131_v13  ;;  %v4134_v14 = vpop.f32.mrb[26].mxu1 }
 0x25b   : > { %v4135_v15 = vpop.f32.mrb[27].mxu1 }
 0x25c   : > { %v3404_v18 = vadd.f32 %v4133_v25, %v3364_v12 }
 0x278   : > { %v4153_v33 = vpop.f32.mrb[28].mxu1 }
 0x279   : > { %v4154_v19 = vpop.f32.mrb[29].mxu1 }
 0x27a   : > { %v4155_v20 = vadd.f32 %v4154_v19, %v4153_v33  ;;  %v4156_v21 = vpop.f32.mrb[30].mxu1 }
 0x27b   : > { %v4157_v22 = vpop.f32.mrb[31].mxu1 }
 0x27c   : > { %v3444_v23 = vadd.f32 %v4155_v20, %v3404_v18 }
 0x298   : > { %v4175_v35 = vpop.f32.mrb[32].mxu1 }
 0x299   : > { %v3162_v32 = vpop.f32.mrb[0].mxu0  ;;  %v4176_v30 = vpop.f32.mrb[33].mxu1 }
 0x29a   : > { %v4182_v39 = vadd.f32 %v4181_v29, %v3162_v32  ;;  %v3164_v16 = vpop.f32.mrb[1].mxu0  ;;  %v4177_v43 = vadd.f32 %v4176_v30, %v4175_v35  ;;  %v4178_v45 = vpop.f32.mrb[34].mxu1 }
 0x29b   : > { %v4184_v42 = vadd.f32 %v4183_v31, %v3164_v16  ;;  %v3166_v44 = vpop.f32.mrb[2].mxu0  ;;  %v4179_v53 = vpop.f32.mrb[35].mxu1 }
 0x29c   : > { %v3999_v38 = vmul.f32 -1.442695, %v4182_v39  ;;  %v3167_v17 = vpop.f32.mrb[3].mxu0  ;;  %v3484_v47 = vadd.f32 %v4177_v43, %v3444_v23 }
 0x29d   : > { %v4000_v46 = vmul.f32 -1.442695, %v4184_v42 }
 0x29e   : > { %4769 = vpow2.f32 %v3999_v38  ;;  %v4001_v62 = vmul.f32 -1.442695, %v3484_v47 }
 0x29f   : > { %4771 = vpow2.f32 %v4000_v46 }
 0x2a0   : > { %4773 = vpow2.f32 %v4001_v62 }
 0x2a8   : > { %v4770_v63 = vpop.eup %4769 }
 0x2a9   : > { %v4772_v49 = vpop.eup %4771  ;;  %v3498_v34 = vadd.f32 1.0, %v4770_v63 }
 0x2aa   : > { %v3499_v50 = vadd.f32 1.0, %v4772_v49  ;;  %v4774_v51 = vpop.eup %4773 }
 0x2ab   : > { %4775 = vrcp.f32 %v3498_v34  ;;  %v3500_v48 = vadd.f32 1.0, %v4774_v51 }
 0x2ac   : > { %4777 = vrcp.f32 %v3499_v50 }
 0x2ad   : > { %4779 = vrcp.f32 %v3500_v48 }
 0x2b5   : > { %v4776_v52 = vpop.eup %4775 }
 0x2b6   : > { %v4778_v54 = vpop.eup %4777  ;;  %3507 = vst [vmem:[%s198_s25] sm:$0xff] %v4776_v52 }
 0x2b7   : > { %3508 = vst [vmem:[%s198_s25 + $0x8] sm:$0xff] %v4778_v54  ;;  %v4780_v41 = vpop.eup %4779 }
 0x2b8   : > { %3509 = vst [vmem:[%s198_s25 + $0x10] sm:$0xff] %v4780_v41 }
 0x2b9 PF: > { %s15_s12 = sadd.s32 1, %s4851_s12  }
 0x2ba   : > { %p12_p9 = scmp.ge.s32.totalorder %s15_s12, 4  }
 0x2bc   :  { %14 = sbr.rel (!%p12_p9) target bundleno = 2 (0x2), region = 71 }
 0x2c3   :  { %3531 = vsyncpa [#allocation3], 1 }
 0x2c4   :  { %3533 = vsyncpa [#allocation3 + $0x1], 1 }
 0x2c5   :  { %3534 = vsyncpa [#allocation5], 1 }

// kernel: mccnn_forward.3
= control target key start
LH: loop header
LB: loop body
LE: loop exit
PB: predicated region body
PF: predicated region fallthrough
CT: control target
= control target key end

     0   :  { %s15744_s0 = inlined_call_operand.vmem [shape: f32[2,8,1280], index: 0, kind: input, shape index: {}]   ;;  %s15745_s1 = inlined_call_operand.vmem [shape: f32[8,8], index: 1, kind: input, shape index: {}]   ;;  %s15746_s2 = inlined_call_operand.vmem [shape: f32[8,640], index: 2, kind: input, shape index: {}]   ;;  %s15747_s3 = inlined_call_operand.vmem [shape: f32[32,8,8], index: 3, kind: input, shape index: {}]   ;;  %s15748_s4 = inlined_call_operand.vmem [shape: f32[568,256], index: 4, kind: input, shape index: {}]   ;;  %s15749_s5 = inlined_call_operand.vmem [shape: f32[8,128], index: 5, kind: input, shape index: {}]   ;;  %s15750_s6 = inlined_call_operand.vmem [shape: f32[16,8,8], index: 6, kind: input, shape index: {}]   ;;  %s15751_s7 = inlined_call_operand.vmem [shape: f32[56,256], index: 7, kind: input, shape index: {}]   ;;  %s15752_s8 = inlined_call_operand.vmem [shape: f32[8,128], index: 8, kind: input, shape index: {}]   ;;  %s15753_s9 = inlined_call_operand.vmem [shape: f32[8,128,128], index: 9, kind: input, shape index: {}]   ;;  %s15754_s10 = inlined_call_operand.vmem [shape: f32[1,128], index: 10, kind: input, shape index: {}]   ;;  %s15755_s11 = inlined_call_operand.vmem [shape: f32[128,128], index: 11, kind: input, shape index: {}]   ;;  %s15756_s12 = inlined_call_operand.vmem [shape: f32[1,128], index: 12, kind: input, shape index: {}]   ;;  %s15757_s13 = inlined_call_operand.hbm [shape: f32[2,1,128], index: 13, kind: output, shape index: {}]  }
   0x1   :  { %15824 = sst [smem:[#allocation16_spill]] %s15744_s0 }
   0x2   :  { %15825 = sst [smem:[#allocation17_spill]] %s15745_s1 }
   0x3   :  { %15826 = sst [smem:[#allocation18_spill]] %s15746_s2 }
   0x4   :  { %15827 = sst [smem:[#allocation19_spill]] %s15754_s10 }
   0x5   :  { %15828 = sst [smem:[#allocation20_spill]] %s15756_s12 }
   0x6   :  { %15829 = sst [smem:[#allocation21_spill]] %s15757_s13 }
   0x7   :  { %18 = vsyncpa [#allocation5], 0 }
   0x8   :  { %20 = vsyncpa [#allocation5 + $0x1], 0  ;;  %s13147_s25 = smov 0   ;;  %s13149_s26 = smov 0  }
   0x9   :  { %s13151_s27 = smov 0   ;;  %s13153_s28 = smov 0  }
   0xa LB: > { %15830 = sst [smem:[#allocation7_spill]] %s13028_s25  ;;  %s13168_s29 = sadd.s32 4294967295, %s13040_s28   ;;  %s13040_s28 = sphi %s13153_s28, %s15882_s28   ;;  %s13036_s27 = sphi %s13151_s27, %s15885_s27   ;;  %s13032_s26 = sphi %s13149_s26, %s15884_s26   ;;  %s13028_s25 = sphi %s13147_s25, %s15883_s25  }
   0xb   : > { %15831 = sst [smem:[#allocation8_spill]] %s13032_s26  ;;  %s11187_s30 = sadd.s32 4294967294, %s13040_s28  }
   0xc   : > { %15832 = sst [smem:[#allocation9_spill]] %s13036_s27  ;;  %s13172_s14 = sadd.s32 1, %s13040_s28  }
   0xd   : > { %15833 = sst [smem:[#allocation10_spill]] %s13040_s28  ;;  %s311_s15 = sadd.s32 1, %s13036_s27 }
   0xe   : > { %15834 = sst [smem:[#allocation11_spill]] %s13168_s29  ;;  %s308_s16 = ssub.s32 %s13040_s28, %s13172_s14 }
   0xf   : > { %15835 = sst [smem:[#allocation12_spill]] %s13172_s14  ;;  %p321_p0 = scmp.ne.s32.totalorder %s13036_s27, %s13032_s26 }
  0x10   : > { %p309_p1 = scmp.eq.s32.totalorder %s308_s16, 0  ;;  %p322_p2 = scmp.eq.s32.totalorder %s13168_s29, 1 }
  0x11   : > { %p327_p3 = scmp.ne.s32.totalorder %s13032_s26, %s13028_s25  ;;  %p328_p4 = scmp.eq.s32.totalorder %s11187_s30, 1 }
  0x12   : > { %s13183_s17 = scalar_select %p309_p1, %s13036_s27, %s311_s15  }
  0x13   : > { %p13185_p5 = por %p322_p2, %p321_p0  ;;  %p13189_p6 = por %p328_p4, %p327_p3 }
  0x14   : > { %15836 = sst [smem:[#allocation13_spill]] %s13183_s17  ;;  %p11190_p7 = scmp.ge.s32.totalorder %s13040_s28, 1 }
  0x15   : > { %s15837_s18 = scalar_select %p13185_p5, 1, 0 }
  0x16   : > { %s15839_s19 = scalar_select %p13189_p6, 1, 0 }
  0x17   : > { %15838 = sst [smem:[#allocation14_spill]] %s15837_s18  ;;  %p390_p8 = scmp.lt.s32.totalorder %s13040_s28, 3 }
  0x18   : > { %15840 = sst [smem:[#allocation15_spill]] %s15839_s19 }
  0x19   : > { %p391_p9 = pnand %p11190_p7, %p390_p8 }
  0x1a   : > { %p433_p10 = scmp.lt.s32.totalorder (!%p391_p9), %s13168_s29, 1  ;;  %v13042_v0 = vmov (!%p391_p9), 0.0   ;;  %s15841_s0 = sld [smem:[#allocation16_spill]] (!%p391_p9)  ;;  %vm449_vm0 = vcmask (!%p391_p9), 64512   ;;  %vm881_vm1 = vcmask (!%p391_p9), 1039360   ;;  %vm13061_vm2 = vmmov (!%p391_p9), 0  }
  0x1b   : > { %394 = sbr.rel (%p391_p9) target bundleno = 2521 (0x9d9), region = 72  ;;  %517 = vmatprep.mubr.f32.mxu0 (!%p391_p9), %v13042_v0  ;;  %588 = vmatprep.mubr.f32.mxu1 (!%p391_p9), %v13042_v0  ;;  %s15842_s1 = sld [smem:[#allocation17_spill]] (!%p391_p9)  ;;  %vm1333_vm3 = vcmask (!%p391_p9), 1031168   ;;  %vm1575_vm4 = vcmask (!%p391_p9), 1022976   ;;  %vm1817_vm5 = vcmask (!%p391_p9), 1014784   ;;  %vm2059_vm6 = vcmask (!%p391_p9), 1006592  }
  0x1c   : > { %s15843_s2 = sld [smem:[#allocation18_spill]] (!%p391_p9)  ;;  %s15768_s30 = smov (!%p391_p9), 120   ;;  %vm2301_vm7 = vcmask (!%p391_p9), 998400   ;;  %vm2543_vm8 = vcmask (!%p391_p9), 990208   ;;  %vm2785_vm9 = vcmask (!%p391_p9), 982016   ;;  %vm3027_vm10 = vcmask (!%p391_p9), 973824  }
  0x1d   : > { %s15772_s15 = smov (!%p391_p9), 127   ;;  %s15758_s16 = smov (!%p391_p9), 119   ;;  %vm3269_vm11 = vcmask (!%p391_p9), 965632   ;;  %vm3511_vm12 = vcmask (!%p391_p9), 957440   ;;  %vm3753_vm13 = vcmask (!%p391_p9), 949248   ;;  %vm3995_vm14 = vcmask (!%p391_p9), 941056  }
  0x1e   : > { %s15762_s23 = smov (!%p391_p9), 125   ;;  %s15766_s22 = smov (!%p391_p9), 123   ;;  %vm4237_vm15 = vcmask (!%p391_p9), 932864  }
  0x1f   : > { %s15854_s27 = smov (!%p391_p9), 115   ;;  %s15797_s17 = smov (!%p391_p9), 109  }
  0x20   : > { %s15855_s14 = smov (!%p391_p9), 114   ;;  %s15856_s25 = smov (!%p391_p9), 113  }
  0x21   : > { %v438_v1 = vld [vmem:[%s15842_s1] sm:$0xff] (!%p391_p9)  ;;  %s15851_s1 = smov (!%p391_p9), 118   ;;  %s15857_s28 = smov (!%p391_p9), 112  }
  0x22   : > { %s434_s20 = scalar_select %p433_p10, %s13168_s29, 1  ;;  %v814_v18 = vld [vmem:[%s15843_s2 + $0x8] sm:$0xff]  ;;  %v813_v21 = vld [vmem:[%s15843_s2] sm:$0xff]  ;;  %v815_v27 = vld [vmem:[%s15843_s2 + $0x10] sm:$0xff] }
  0x23   : > { %v817_v43 = vld [vmem:[%s15843_s2 + $0x20] sm:$0xff]  ;;  %v816_v46 = vld [vmem:[%s15843_s2 + $0x18] sm:$0xff]  ;;  %s15789_s2 = smov 111   ;;  %s15859_s13 = smov 107  }
  0x24   : > { %s12872_s21 = smul.u32 80, %s434_s20  ;;  %s15773_s20 = smov 126  }
  0x25   : > { %s15807_s12 = smov 106   ;;  %s15860_s18 = smov 110  }
  0x26   : > { %s437_s24 = scalar_lea.vmem %s15841_s0, %s12872_s21  ;;  %s15764_s21 = smov 124  }
  0x27   : > { %v440_v2 = vld [vmem:[%s437_s24 + $0x8] sm:$0xff]  ;;  %v442_v3 = vld [vmem:[%s437_s24 + $0x18] sm:$0xff]  ;;  %v439_v4 = vld [vmem:[%s437_s24] sm:$0xff]  ;;  %s15850_s0 = smov 120   ;;  %s15812_s10 = smov 105  }
  0x28   : > { %453 = vmatprep.subr.mxu0 %v440_v2  ;;  %524 = vmatprep.subr.mxu1 %v442_v3  ;;  %v441_v5 = vld [vmem:[%s437_s24 + $0x10] sm:$0xff]  ;;  %v444_v6 = vld [vmem:[%s437_s24 + $0x28] sm:$0xff]  ;;  %v446_v7 = vld [vmem:[%s437_s24 + $0x38] sm:$0xff]  ;;  %s15862_s29 = smov 108   ;;  %s15814_s19 = smov 103  }
  0x29   : > { %454 = vmatpush1.msra.mxu0 %v439_v4  ;;  %525 = vmatpush1.msra.mxu1 %v441_v5  ;;  %v443_v8 = vld [vmem:[%s437_s24 + $0x20] sm:$0xff]  ;;  %v445_v9 = vld [vmem:[%s437_s24 + $0x30] sm:$0xff]  ;;  %v448_v10 = vld [vmem:[%s437_s24 + $0x48] sm:$0xff]  ;;  %s15869_s26 = smov 100  }
  0x2a   : > { %11192 = vmatmul.mubr.msk.f32.vlgmr.msra.gmra.mrb[0].mxu0 %vm449_vm0, %v438_v1  ;;  %11193 = vmatmul.mubr.msk.f32.vlgmr.msra.gmra.mrb[0].mxu1 %vm449_vm0, %v438_v1  ;;  %v447_v11 = vld [vmem:[%s437_s24 + $0x40] sm:$0xff]  ;;  %s15770_s24 = smov 121  }
  0x2b   : > { %595 = vmatprep.subr.mxu0 %v444_v6  ;;  %666 = vmatprep.subr.mxu1 %v446_v7 }
  0x2c   : > { %596 = vmatpush1.msra.mxu0 %v443_v8  ;;  %659 = vmatprep.mubr.f32.mxu0 %v13042_v0 }
  0x2d   : > { %667 = vmatpush1.msra.mxu1 %v445_v9  ;;  %730 = vmatprep.mubr.f32.mxu1 %v13042_v0 }
  0x2e   : > { %11194 = vmatmul.mubr.msk.f32.vlgmr.msra.gmra.mrb[2].mxu0 %vm449_vm0, %v438_v1  ;;  %11195 = vmatmul.mubr.msk.f32.vlgmr.msra.gmra.mrb[2].mxu1 %vm449_vm0, %v438_v1 }
  0x2f   : > { %737 = vmatprep.subr.mxu0 %v448_v10  ;;  %801 = vmatprep.mubr.f32.mxu0 %v13042_v0 }
  0x30   : > { %738 = vmatpush1.msra.mxu0 %v447_v11  ;;  %958 = vmatprep.mubr.f32.mxu1 %v13042_v0  ;;  %v13417_v11 = vld [vmem:[%s15747_s3 + $0x8] sm:$0xff] }
  0x32   : > { %11196 = vmatmul.mubr.msk.f32.vlgmr.msra.gmra.mrb[4].mxu0 %vm449_vm0, %v438_v1 }
  0x33   : > { %1029 = vmatprep.mubr.f32.mxu0 %v13042_v0 }
  0xfd   : > { %v590_v12 = vpop.f32.mrb[0].mxu1  ;;  %v519_v13 = vpop.f32.mrb[0].mxu0 }
  0xfe   : > { %v592_v14 = vpop.f32.mrb[1].mxu1  ;;  %v521_v15 = vpop.f32.mrb[1].mxu0 }
 0x101   : > { %v661_v16 = vpop.f32.mrb[2].mxu0  ;;  %v732_v17 = vpop.f32.mrb[2].mxu1 }
 0x102   : > { %v809_v19 = vmax.f32 %v521_v15, %v732_v17  ;;  %v663_v20 = vpop.f32.mrb[3].mxu0  ;;  %v734_v22 = vpop.f32.mrb[3].mxu1 }
 0x103   : > { %v808_v23 = vmax.f32 %v519_v13, %v663_v20  ;;  %v810_v24 = vmax.f32 %v590_v12, %v734_v22 }
 0x104   : > { %v819_v25 = vadd.f32 %v814_v18, %v809_v19 }
 0x105   : > { %v818_v26 = vadd.f32 %v813_v21, %v808_v23  ;;  %v803_v28 = vpop.f32.mrb[4].mxu0  ;;  %v820_v34 = vadd.f32 %v815_v27, %v810_v24  ;;  %v13461_v21 = vld [vmem:[%s15747_s3] sm:$0xff] }
 0x106   : > { %v11198_v29 = vmul.f32 -1.442695, %v819_v25  ;;  %v811_v30 = vmax.f32 %v592_v14, %v803_v28  ;;  %v805_v31 = vpop.f32.mrb[5].mxu0  ;;  %v13497_v28 = vld [vmem:[%s15747_s3 + $0x10] sm:$0xff] }
 0x107   : > { %v812_v32 = vmax.f32 %v661_v16, %v805_v31  ;;  %v11197_v33 = vmul.f32 -1.442695, %v818_v26  ;;  %v11199_v35 = vmul.f32 -1.442695, %v820_v34 }
 0x108   : > { %12946 = vpow2.f32 %v11198_v29  ;;  %v821_v48 = vadd.f32 %v816_v46, %v811_v30 }
 0x109   : > { %12948 = vpow2.f32 %v11197_v33  ;;  %v822_v45 = vadd.f32 %v817_v43, %v812_v32 }
 0x10a   : > { %12950 = vpow2.f32 %v11199_v35  ;;  %v11200_v50 = vmul.f32 -1.442695, %v821_v48 }
 0x10b   : > { %v11201_v49 = vmul.f32 -1.442695, %v822_v45 }
 0x112   : > { %v12947_v36 = vpop.eup %12946 }
 0x113   : > { %v839_v37 = vadd.f32 1.0, %v12947_v36  ;;  %v12949_v38 = vpop.eup %12948 }
 0x114   : > { %v838_v39 = vadd.f32 1.0, %v12949_v38  ;;  %v12951_v40 = vpop.eup %12950 }
 0x115   : > { %12952 = vrcp.f32 %v839_v37  ;;  %v840_v41 = vadd.f32 1.0, %v12951_v40  ;;  %v13532_v37 = vld [vmem:[%s15747_s3 + $0x18] sm:$0xff] }
 0x116   : > { %12954 = vrcp.f32 %v838_v39 }
 0x117   : > { %12956 = vrcp.f32 %v840_v41 }
 0x118   : > { %12958 = vpow2.f32 %v11201_v49 }
 0x119   : > { %12960 = vpow2.f32 %v11200_v50  ;;  %v13574_v50 = vld [vmem:[%s15747_s3 + $0x20] sm:$0xff] }
 0x11f   : > { %v13224_v42 = vpop.eup %12952 }
 0x120   : > { %2777 = vrot.lane.b32.xlu1 %v13224_v42, %s15768_s30  ;;  %873 = vrot.lane.b32.xlu0 %v13224_v42, %s15772_s15  ;;  %v13237_v44 = vpop.eup %12954 }
 0x121   : > { %v13246_v47 = vpop.eup %12956 }
 0x122   : > { %v12959_v51 = vpop.eup %12958 }
 0x123   : > { %v842_v52 = vadd.f32 1.0, %v12959_v51  ;;  %v12961_v53 = vpop.eup %12960 }
 0x124   : > { %3019 = vrot.lane.b32.xlu1 %v13224_v42, %s15758_s16  ;;  %1325 = vrot.lane.b32.xlu0 %v13224_v42, %s15773_s20  ;;  %s15760_s16 = smov 122   ;;  %v841_v54 = vadd.f32 1.0, %v12961_v53 }
 0x125   : > { %12962 = vrcp.f32 %v842_v52 }
 0x126   : > { %12964 = vrcp.f32 %v841_v54 }
 0x128   : > { %1567 = vrot.lane.b32.xlu0 %v13224_v42, %s15762_s23  ;;  %871 = vrot.lane.b32.xlu1 %v13237_v44, %s15772_s15 }
 0x12c   : > { %1809 = vrot.lane.b32.xlu0 %v13224_v42, %s15764_s21  ;;  %1327 = vrot.lane.b32.xlu1 %v13246_v47, %s15773_s20 }
 0x12f   : > { %v13280_v55 = vpop.eup %12962 }
 0x130   : > { %2051 = vrot.lane.b32.xlu0 %v13224_v42, %s15766_s22  ;;  %1569 = vrot.lane.b32.xlu1 %v13246_v47, %s15762_s23  ;;  %v13286_v56 = vpop.eup %12964 }
 0x134   : > { %2293 = vrot.lane.b32.xlu0 %v13224_v42, %s15760_s16  ;;  %1811 = vrot.lane.b32.xlu1 %v13246_v47, %s15764_s21 }
 0x138   : > { %2535 = vrot.lane.b32.xlu0 %v13224_v42, %s15770_s24  ;;  %2053 = vrot.lane.b32.xlu1 %v13246_v47, %s15766_s22 }
 0x13c   : > { %875 = vrot.lane.b32.xlu0 %v13246_v47, %s15772_s15  ;;  %2295 = vrot.lane.b32.xlu1 %v13246_v47, %s15760_s16  ;;  %s15844_s16 = smov 119  }
 0x140   : > { %1323 = vrot.lane.b32.xlu0 %v13237_v44, %s15773_s20  ;;  %2537 = vrot.lane.b32.xlu1 %v13246_v47, %s15770_s24 }
 0x144   : > { %1565 = vrot.lane.b32.xlu0 %v13237_v44, %s15762_s23  ;;  %2775 = vrot.lane.b32.xlu1 %v13237_v44, %s15768_s30  ;;  %s15845_s23 = smov 122  }
 0x148   : > { %1807 = vrot.lane.b32.xlu0 %v13237_v44, %s15764_s21  ;;  %3017 = vrot.lane.b32.xlu1 %v13237_v44, %s15844_s16  ;;  %s15774_s21 = smov 118  }
 0x14c   : > { %2049 = vrot.lane.b32.xlu0 %v13237_v44, %s15766_s22  ;;  %879 = vrot.lane.b32.xlu1 %v13280_v55, %s15772_s15  ;;  %s15776_s22 = smov 117  }
 0x150   : > { %2291 = vrot.lane.b32.xlu0 %v13237_v44, %s15845_s23  ;;  %1329 = vrot.lane.b32.xlu1 %v13286_v56, %s15773_s20 }
 0x154   : > { %2533 = vrot.lane.b32.xlu0 %v13237_v44, %s15770_s24  ;;  %3263 = vrot.lane.b32.xlu1 %v13246_v47, %s15774_s21  ;;  %s15847_s24 = smov 124  }
 0x158   : > { %2779 = vrot.lane.b32.xlu0 %v13246_v47, %s15768_s30  ;;  %3503 = vrot.lane.b32.xlu1 %v13224_v42, %s15776_s22  ;;  %s15846_s30 = smov 125  }
 0x15c   : > { %3021 = vrot.lane.b32.xlu0 %v13246_v47, %s15844_s16  ;;  %1331 = vrot.lane.b32.xlu1 %v13280_v55, %s15773_s20  ;;  %s15848_s20 = smov 123  }
 0x160   : > { %877 = vrot.lane.b32.xlu0 %v13286_v56, %s15772_s15  ;;  %3501 = vrot.lane.b32.xlu1 %v13237_v44, %s15776_s22  ;;  %s15778_s15 = smov 116  }
 0x164   : > { %3261 = vrot.lane.b32.xlu0 %v13224_v42, %s15774_s21  ;;  %1573 = vrot.lane.b32.xlu1 %v13280_v55, %s15846_s30 }
 0x168   : > { %3259 = vrot.lane.b32.xlu0 %v13237_v44, %s15774_s21  ;;  %1813 = vrot.lane.b32.xlu1 %v13286_v56, %s15847_s24  ;;  %s15780_s21 = smov 115  }
 0x16c   : > { %1571 = vrot.lane.b32.xlu0 %v13286_v56, %s15846_s30  ;;  %1815 = vrot.lane.b32.xlu1 %v13280_v55, %s15847_s24 }
 0x170   : > { %3505 = vrot.lane.b32.xlu0 %v13246_v47, %s15776_s22  ;;  %3747 = vrot.lane.b32.xlu1 %v13246_v47, %s15778_s15  ;;  %s15782_s22 = smov 114  }
 0x174   : > { %3745 = vrot.lane.b32.xlu0 %v13224_v42, %s15778_s15  ;;  %2057 = vrot.lane.b32.xlu1 %v13280_v55, %s15848_s20 }
 0x178   : > { %3743 = vrot.lane.b32.xlu0 %v13237_v44, %s15778_s15  ;;  %3987 = vrot.lane.b32.xlu1 %v13224_v42, %s15780_s21  ;;  %s15849_s15 = smov 121  }
 0x17c   : > { %2055 = vrot.lane.b32.xlu0 %v13286_v56, %s15848_s20  ;;  %2299 = vrot.lane.b32.xlu1 %v13280_v55, %s15845_s23 }
 0x180   : > { %3989 = vrot.lane.b32.xlu0 %v13246_v47, %s15780_s21  ;;  %3985 = vrot.lane.b32.xlu1 %v13237_v44, %s15780_s21  ;;  %s15784_s21 = smov 113  }
 0x184   : > { %4229 = vrot.lane.b32.xlu0 %v13224_v42, %s15782_s22  ;;  %2541 = vrot.lane.b32.xlu1 %v13280_v55, %s15849_s15 }
 0x188   : > { %4227 = vrot.lane.b32.xlu0 %v13237_v44, %s15782_s22  ;;  %2297 = vrot.lane.b32.xlu1 %v13286_v56, %s15845_s23 }
 0x18c   : > { %2783 = vrot.lane.b32.xlu0 %v13280_v55, %s15850_s0  ;;  %4231 = vrot.lane.b32.xlu1 %v13246_v47, %s15782_s22  ;;  %s15786_s22 = smov 112  }
 0x190   : > { %2539 = vrot.lane.b32.xlu0 %v13286_v56, %s15849_s15  ;;  %4471 = vrot.lane.b32.xlu1 %v13224_v42, %s15784_s21 }
 0x192   : > { %v13356_v57 = vpop.permute.xlu1 %2777  ;;  %v874_v58 = vpop.permute.xlu0 %873 }
 0x194   : > { %3025 = vrot.lane.b32.xlu0 %v13280_v55, %s15844_s16  ;;  %4469 = vrot.lane.b32.xlu1 %v13237_v44, %s15784_s21 }
 0x196   : > { %v13362_v59 = vpop.permute.xlu1 %3019  ;;  %v13364_v60 = vpop.permute.xlu0 %1325 }
 0x198   : > { %4473 = vrot.lane.b32.xlu0 %v13246_v47, %s15784_s21  ;;  %2781 = vrot.lane.b32.xlu1 %v13286_v56, %s15850_s0  ;;  %s15852_s21 = smov 117  }
 0x19a   : > { %v13370_v61 = vpop.permute.xlu0 %1567  ;;  %v872_v62 = vpop.permute.xlu1 %871 }
 0x19b   : > { %v882_v12 = vsel %vm881_vm1, %v872_v62, %v874_v58 }
 0x19c   : > { %4713 = vrot.lane.b32.xlu0 %v13224_v42, %s15786_s22  ;;  %3267 = vrot.lane.b32.xlu1 %v13280_v55, %s15851_s1 }
 0x19e   : > { %v13376_v63 = vpop.permute.xlu0 %1809  ;;  %v13378_v1 = vpop.permute.xlu1 %1327 }
 0x19f   : > { %v1335_v24 = vsel %vm1333_vm3, %v13364_v60, %v13378_v1 }
 0x1a0   : > { %4711 = vrot.lane.b32.xlu0 %v13237_v44, %s15786_s22  ;;  %4715 = vrot.lane.b32.xlu1 %v13246_v47, %s15786_s22  ;;  %s15853_s22 = smov 116  }
 0x1a2   : > { %v13384_v2 = vpop.permute.xlu0 %2051  ;;  %v13386_v3 = vpop.permute.xlu1 %1569 }
 0x1a3   : > { %v1577_v33 = vsel %vm1575_vm4, %v13370_v61, %v13386_v3 }
 0x1a4   : > { %3509 = vrot.lane.b32.xlu0 %v13280_v55, %s15852_s21  ;;  %4955 = vrot.lane.b32.xlu1 %v13224_v42, %s15789_s2 }
 0x1a6   : > { %v13392_v4 = vpop.permute.xlu0 %2293  ;;  %v13394_v5 = vpop.permute.xlu1 %1811 }
 0x1a7   : > { %v1819_v45 = vsel %vm1817_vm5, %v13376_v63, %v13394_v5 }
 0x1a8   : > { %3023 = vrot.lane.b32.xlu0 %v13286_v56, %s15844_s16  ;;  %4953 = vrot.lane.b32.xlu1 %v13237_v44, %s15789_s2 }
 0x1aa   : > { %v13400_v6 = vpop.permute.xlu0 %2535  ;;  %v13402_v7 = vpop.permute.xlu1 %2053 }
 0x1ac   : > { %4957 = vrot.lane.b32.xlu0 %v13246_v47, %s15789_s2  ;;  %3751 = vrot.lane.b32.xlu1 %v13280_v55, %s15853_s22  ;;  %s15793_s2 = smov 110  }
 0x1ae   : > { %v13408_v8 = vpop.permute.xlu0 %875  ;;  %v13410_v9 = vpop.permute.xlu1 %2295 }
 0x1af   : > { %v883_v10 = vsel %vm881_vm1, %v874_v58, %v13408_v8  ;;  %v2061_v58 = vsel %vm2059_vm6, %v13384_v2, %v13402_v7 }
 0x1b0   : > { %894 = vmatprep.subr.mxu1 %v883_v10  ;;  %5197 = vrot.lane.b32.xlu0 %v13224_v42, %s15793_s2 }
 0x1b1   : > { %3265 = vrot.lane.b32.xlu1 %v13286_v56, %s15851_s1  ;;  %895 = vmatpush1.msra.mxu1 %v882_v12 }
 0x1b2   : > { %v1324_v13 = vpop.permute.xlu0 %1323  ;;  %v13424_v14 = vpop.permute.xlu1 %2537  ;;  %11203 = vmatmul.mubr.msk.f32.vlgmr.msra.gmra.mrb[4].mxu1 %vm449_vm0, %v13417_v11  ;;  %11729 = vmatprep.subr.mxu1 %v13042_v0 }
 0x1b3   : > { %11731 = vmatprep.mubr.msk.f32.mxu1 %vm13061_vm2, %v13042_v0  ;;  %v1334_v27 = vsel %vm1333_vm3, %v1324_v13, %v13364_v60 }
 0x1b4   : > { %3993 = vrot.lane.b32.xlu0 %v13280_v55, %s15854_s27 }
 0x1b5   : > { %5199 = vrot.lane.b32.xlu1 %v13246_v47, %s15793_s2 }
 0x1b6   : > { %v1566_v15 = vpop.permute.xlu0 %1565  ;;  %v13435_v16 = vpop.permute.xlu1 %2775 }
 0x1b7   : > { %v1576_v34 = vsel %vm1575_vm4, %v1566_v15, %v13370_v61  ;;  %v13652_v15 = vld [vmem:[%s15747_s3 + $0x30] sm:$0xff] }
 0x1b8   : > { %5195 = vrot.lane.b32.xlu0 %v13237_v44, %s15793_s2  ;;  %s15800_s2 = smov 108  }
 0x1b9   : > { %5439 = vrot.lane.b32.xlu1 %v13224_v42, %s15797_s17 }
 0x1ba   : > { %v13441_v17 = vpop.permute.xlu0 %1807  ;;  %v13443_v18 = vpop.permute.xlu1 %3017 }
 0x1bb   : > { %v1818_v49 = vsel %vm1817_vm5, %v13441_v17, %v13376_v63  ;;  %v13612_v63 = vld [vmem:[%s15747_s3 + $0x28] sm:$0xff] }
 0x1bc   : > { %3507 = vrot.lane.b32.xlu0 %v13286_v56, %s15852_s21 }
 0x1bd   : > { %4235 = vrot.lane.b32.xlu1 %v13280_v55, %s15855_s14 }
 0x1be   : > { %v13449_v19 = vpop.permute.xlu0 %2049  ;;  %v880_v20 = vpop.permute.xlu1 %879 }
 0x1bf   : > { %11730 = vmatpush3.msra.mxu1 %v880_v20  ;;  %v2060_v62 = vsel %vm2059_vm6, %v13449_v19, %v13384_v2 }
 0x1c0   : > { %5441 = vrot.lane.b32.xlu0 %v13246_v47, %s15797_s17  ;;  %11732 = vmatmul.mubr.msk.f32.vlgmr.msra.gmra.mrb[6].mxu1 %vm449_vm0, %v13417_v11 }
 0x1c1   : > { %5437 = vrot.lane.b32.xlu1 %v13237_v44, %s15797_s17  ;;  %1109 = vmatprep.subr.mxu1 %v13224_v42  ;;  %s15802_s17 = smov 107  }
 0x1c2   : > { %1110 = vmatpush1.msra.mxu1 %v13237_v44  ;;  %v13464_v22 = vpop.permute.xlu0 %2291  ;;  %v13466_v23 = vpop.permute.xlu1 %1329  ;;  %1173 = vmatprep.mubr.f32.mxu1 %v13042_v0 }
 0x1c3   : > { %11734 = vmatprep.subr.mxu1 %v13042_v0  ;;  %v1336_v53 = vsel %vm1333_vm3, %v13378_v1, %v13466_v23  ;;  %v2302_v13 = vsel %vm2301_vm7, %v13464_v22, %v13392_v4 }
 0x1c4   : > { %4477 = vrot.lane.b32.xlu0 %v13280_v55, %s15856_s25  ;;  %11206 = vmatmul.mubr.msk.f32.vlgmr.msra.gmra.mrb[4].mxu1 %vm449_vm0, %v13461_v21 }
 0x1c5   : > { %3749 = vrot.lane.b32.xlu1 %v13286_v56, %s15853_s22  ;;  %11735 = vmatpush3.msra.mxu1 %v13280_v55 }
 0x1c6   : > { %1346 = vmatprep.subr.mxu1 %v1335_v24  ;;  %v13480_v25 = vpop.permute.xlu0 %2533  ;;  %v13482_v26 = vpop.permute.xlu1 %3263  ;;  %11736 = vmatprep.mubr.msk.f32.mxu1 %vm13061_vm2, %v13042_v0  ;;  %v13690_v24 = vld [vmem:[%s15747_s3 + $0x38] sm:$0xff] }
 0x1c8   : > { %5681 = vrot.lane.b32.xlu0 %v13224_v42, %s15800_s2  ;;  %11737 = vmatmul.mubr.msk.f32.vlgmr.msra.gmra.mrb[6].mxu1 %vm449_vm0, %v13461_v21 }
 0x1c9   : > { %5683 = vrot.lane.b32.xlu1 %v13246_v47, %s15800_s2  ;;  %1347 = vmatpush1.msra.mxu1 %v1334_v27 }
 0x1ca   : > { %v13499_v29 = vpop.permute.xlu0 %2779  ;;  %v13501_v30 = vpop.permute.xlu1 %3503  ;;  %1410 = vmatprep.mubr.f32.mxu1 %v13042_v0  ;;  %11739 = vmatprep.subr.mxu1 %v13042_v0 }
 0x1cc   : > { %5679 = vrot.lane.b32.xlu0 %v13237_v44, %s15800_s2  ;;  %11210 = vmatmul.mubr.msk.f32.vlgmr.msra.gmra.mrb[4].mxu1 %vm449_vm0, %v13497_v28  ;;  %s15810_s2 = smov 104  }
 0x1cd   : > { %4719 = vrot.lane.b32.xlu1 %v13280_v55, %s15857_s28  ;;  %11741 = vmatprep.mubr.msk.f32.mxu1 %vm13061_vm2, %v13042_v0 }
 0x1ce   : > { %v13513_v31 = vpop.permute.xlu0 %3021  ;;  %v1332_v32 = vpop.permute.xlu1 %1331 }
 0x1cf   : > { %11740 = vmatpush3.msra.mxu1 %v1332_v32  ;;  %v1337_v43 = vsel %vm1333_vm3, %v13466_v23, %v1332_v32  ;;  %v2544_v23 = vsel %vm2543_vm8, %v13480_v25, %v13400_v6  ;;  %v2786_v32 = vsel %vm2785_vm9, %v13435_v16, %v13356_v57  ;;  %vm4721_vm3 = vcmask 916480  }
 0x1d0   : > { %3991 = vrot.lane.b32.xlu0 %v13286_v56, %s15854_s27  ;;  %11742 = vmatmul.mubr.msk.f32.vlgmr.msra.gmra.mrb[6].mxu1 %vm449_vm0, %v13497_v28 }
 0x1d1   : > { %5923 = vrot.lane.b32.xlu1 %v13224_v42, %s15802_s17  ;;  %1588 = vmatprep.subr.mxu1 %v1577_v33  ;;  %s15858_s17 = smov 111  }
 0x1d2   : > { %1589 = vmatpush1.msra.mxu1 %v1576_v34  ;;  %v878_v35 = vpop.permute.xlu0 %877  ;;  %v13526_v36 = vpop.permute.xlu1 %3501  ;;  %1652 = vmatprep.mubr.f32.mxu1 %v13042_v0 }
 0x1d3   : > { %v885_v38 = vsel %vm881_vm1, %v878_v35, %v880_v20  ;;  %v884_v39 = vsel %vm881_vm1, %v13408_v8, %v878_v35  ;;  %11744 = vmatprep.subr.mxu1 %v13042_v0  ;;  %v13727_v35 = vld [vmem:[%s15747_s3 + $0x40] sm:$0xff]  ;;  %vm4479_vm1 = vcmask 924672  }
 0x1d4   : > { %4961 = vrot.lane.b32.xlu0 %v13280_v55, %s15858_s17  ;;  %965 = vmatprep.subr.mxu0 %v885_v38  ;;  %v3029_v38 = vsel %vm3027_vm10, %v13362_v59, %v13513_v31 }
 0x1d5   : > { %5921 = vrot.lane.b32.xlu1 %v13237_v44, %s15859_s13  ;;  %11214 = vmatmul.mubr.msk.f32.vlgmr.msra.gmra.mrb[4].mxu1 %vm449_vm0, %v13532_v37 }
 0x1d6   : > { %966 = vmatpush1.msra.mxu0 %v884_v39  ;;  %v13544_v40 = vpop.permute.xlu0 %3261  ;;  %v1574_v41 = vpop.permute.xlu1 %1573  ;;  %11746 = vmatprep.mubr.msk.f32.mxu1 %vm13061_vm2, %v13042_v0  ;;  %v3028_v39 = vsel %vm3027_vm10, %v13443_v18, %v13362_v59 }
 0x1d7   : > { %11204 = vmatmul.mubr.msk.f32.vlgmr.msra.gmra.mrb[6].mxu0 %vm449_vm0, %v13417_v11  ;;  %1180 = vmatprep.subr.mxu0 %v13286_v56 }
 0x1d8   : > { %1181 = vmatpush1.msra.mxu0 %v13246_v47  ;;  %11745 = vmatpush3.msra.mxu1 %v1574_v41 }
 0x1d9   : > { %5925 = vrot.lane.b32.xlu0 %v13246_v47, %s15859_s13  ;;  %4233 = vrot.lane.b32.xlu1 %v13286_v56, %s15855_s14 }
 0x1da   : > { %1417 = vmatprep.subr.mxu0 %v1337_v43  ;;  %11747 = vmatmul.mubr.msk.f32.vlgmr.msra.gmra.mrb[6].mxu1 %vm449_vm0, %v13532_v37  ;;  %v13563_v46 = vpop.permute.xlu0 %3259  ;;  %v13565_v48 = vpop.permute.xlu1 %1813 }
 0x1db   : > { %1830 = vmatprep.subr.mxu1 %v1819_v45  ;;  %1894 = vmatprep.mubr.f32.mxu1 %v13042_v0  ;;  %v1820_v19 = vsel %vm1817_vm5, %v13394_v5, %v13565_v48  ;;  %v2545_v5 = vsel %vm2543_vm8, %v13400_v6, %v13424_v14  ;;  %v13764_v45 = vld [vmem:[%s15747_s3 + $0x48] sm:$0xff] }
 0x1dc   : > { %1831 = vmatpush1.msra.mxu1 %v1818_v49  ;;  %1244 = vmatprep.mubr.f32.mxu0 %v13042_v0  ;;  %v3271_v49 = vsel %vm3269_vm11, %v13544_v40, %v13482_v26 }
 0x1dd   : > { %6165 = vrot.lane.b32.xlu0 %v13224_v42, %s15807_s12  ;;  %5203 = vrot.lane.b32.xlu1 %v13280_v55, %s15860_s18 }
 0x1de   : > { %11218 = vmatmul.mubr.msk.f32.vlgmr.msra.gmra.mrb[4].mxu1 %vm449_vm0, %v13574_v50  ;;  %v1572_v51 = vpop.permute.xlu0 %1571  ;;  %11749 = vmatprep.subr.mxu1 %v13042_v0  ;;  %v1816_v52 = vpop.permute.xlu1 %1815 }
 0x1df   : > { %11207 = vmatmul.mubr.msk.f32.vlgmr.msra.gmra.mrb[6].mxu0 %vm449_vm0, %v13461_v21  ;;  %11750 = vmatpush3.msra.mxu1 %v1816_v52  ;;  %v1579_v54 = vsel %vm1575_vm4, %v1572_v51, %v1574_v41  ;;  %v1578_v8 = vsel %vm1575_vm4, %v13386_v3, %v1572_v51  ;;  %v1821_v10 = vsel %vm1817_vm5, %v13565_v48, %v1816_v52  ;;  %vm4963_vm4 = vcmask 908288  }
 0x1e0   : > { %1418 = vmatpush1.msra.mxu0 %v1336_v53  ;;  %11751 = vmatprep.mubr.msk.f32.mxu1 %vm13061_vm2, %v13042_v0  ;;  %v2303_v3 = vsel %vm2301_vm7, %v13392_v4, %v13410_v9  ;;  %v13804_v53 = vld [vmem:[%s15747_s3 + $0x50] sm:$0xff]  ;;  %vm5205_vm5 = vcmask 900096  }
 0x1e1   : > { %6163 = vrot.lane.b32.xlu0 %v13237_v44, %s15807_s12  ;;  %6167 = vrot.lane.b32.xlu1 %v13246_v47, %s15807_s12  ;;  %s15861_s12 = smov 109  }
 0x1e2   : > { %1659 = vmatprep.subr.mxu0 %v1579_v54  ;;  %11752 = vmatmul.mubr.msk.f32.vlgmr.msra.gmra.mrb[6].mxu1 %vm449_vm0, %v13574_v50  ;;  %v13601_v60 = vpop.permute.xlu0 %3505  ;;  %v13603_v61 = vpop.permute.xlu1 %3747 }
 0x1e3   : > { %2072 = vmatprep.subr.mxu1 %v2061_v58  ;;  %2136 = vmatprep.mubr.f32.mxu1 %v13042_v0  ;;  %v3513_v58 = vsel %vm3511_vm12, %v13501_v30, %v13601_v60 }
 0x1e4   : > { %2073 = vmatpush1.msra.mxu1 %v2060_v62  ;;  %1481 = vmatprep.mubr.f32.mxu0 %v13042_v0  ;;  %v3512_v62 = vsel %vm3511_vm12, %v13526_v36, %v13501_v30 }
 0x1e5   : > { %5445 = vrot.lane.b32.xlu0 %v13280_v55, %s15861_s12  ;;  %6407 = vrot.lane.b32.xlu1 %v13224_v42, %s15812_s10 }
 0x1e6   : > { %11222 = vmatmul.mubr.msk.f32.vlgmr.msra.gmra.mrb[4].mxu1 %vm449_vm0, %v13612_v63  ;;  %v13621_v1 = vpop.permute.xlu0 %3745  ;;  %11754 = vmatprep.subr.mxu1 %v13042_v0  ;;  %v2058_v2 = vpop.permute.xlu1 %2057 }
 0x1e7   : > { %11211 = vmatmul.mubr.msk.f32.vlgmr.msra.gmra.mrb[6].mxu0 %vm449_vm0, %v13497_v28  ;;  %11755 = vmatpush3.msra.mxu1 %v2058_v2  ;;  %v2787_v28 = vsel %vm2785_vm9, %v13356_v57, %v13499_v29 }
 0x1e8   : > { %1660 = vmatpush1.msra.mxu0 %v1578_v8  ;;  %11756 = vmatprep.mubr.msk.f32.mxu1 %vm13061_vm2, %v13042_v0  ;;  %v3755_v8 = vsel %vm3753_vm13, %v13621_v1, %v13603_v61 }
 0x1e9   : > { %1901 = vmatprep.subr.mxu0 %v1821_v10  ;;  %4475 = vrot.lane.b32.xlu0 %v13286_v56, %s15856_s25 }
 0x1ea   : > { %6405 = vrot.lane.b32.xlu1 %v13237_v44, %s15812_s10  ;;  %11757 = vmatmul.mubr.msk.f32.vlgmr.msra.gmra.mrb[6].mxu1 %vm449_vm0, %v13612_v63  ;;  %v13641_v11 = vpop.permute.xlu0 %3743  ;;  %v13643_v12 = vpop.permute.xlu1 %3987 }
 0x1eb   : > { %2314 = vmatprep.subr.mxu1 %v2303_v3  ;;  %2378 = vmatprep.mubr.f32.mxu1 %v13042_v0  ;;  %v3754_v10 = vsel %vm3753_vm13, %v13641_v11, %v13621_v1 }
 0x1ec   : > { %2315 = vmatpush1.msra.mxu1 %v2302_v13  ;;  %1723 = vmatprep.mubr.f32.mxu0 %v13042_v0 }
 0x1ed   : > { %6409 = vrot.lane.b32.xlu0 %v13246_v47, %s15812_s10  ;;  %11759 = vmatprep.subr.mxu1 %v13042_v0  ;;  %s15863_s10 = smov 106  }
 0x1ee   : > { %5687 = vrot.lane.b32.xlu1 %v13280_v55, %s15862_s29  ;;  %11226 = vmatmul.mubr.msk.f32.vlgmr.msra.gmra.mrb[4].mxu1 %vm449_vm0, %v13652_v15  ;;  %v2056_v4 = vpop.permute.xlu0 %2055  ;;  %v2300_v17 = vpop.permute.xlu1 %2299 }
 0x1ef   : > { %11215 = vmatmul.mubr.msk.f32.vlgmr.msra.gmra.mrb[6].mxu0 %vm449_vm0, %v13532_v37  ;;  %11760 = vmatpush3.msra.mxu1 %v2300_v17  ;;  %v2063_v20 = vsel %vm2059_vm6, %v2056_v4, %v2058_v2  ;;  %v2062_v27 = vsel %vm2059_vm6, %v13402_v7, %v2056_v4  ;;  %v13845_v2 = vld [vmem:[%s15747_s3 + $0x58] sm:$0xff]  ;;  %v13885_v4 = vld [vmem:[%s15747_s3 + $0x60] sm:$0xff]  ;;  %vm5447_vm6 = vcmask 891904  }
 0x1f0   : > { %1902 = vmatpush1.msra.mxu0 %v1820_v19  ;;  %11761 = vmatprep.mubr.msk.f32.mxu1 %vm13061_vm2, %v13042_v0 }
 0x1f1   : > { %6649 = vrot.lane.b32.xlu0 %v13224_v42, %s15810_s2  ;;  %2143 = vmatprep.subr.mxu0 %v2063_v20 }
 0x1f2   : > { %4717 = vrot.lane.b32.xlu1 %v13286_v56, %s15857_s28  ;;  %11762 = vmatmul.mubr.msk.f32.vlgmr.msra.gmra.mrb[6].mxu1 %vm449_vm0, %v13652_v15  ;;  %v13679_v21 = vpop.permute.xlu0 %3989  ;;  %v13681_v22 = vpop.permute.xlu1 %3985  ;;  %s15864_s28 = smov 105  }
 0x1f3   : > { %2556 = vmatprep.subr.mxu1 %v2545_v5  ;;  %2620 = vmatprep.mubr.f32.mxu1 %v13042_v0  ;;  %v3996_v19 = vsel %vm3995_vm14, %v13681_v22, %v13643_v12 }
 0x1f4   : > { %2557 = vmatpush1.msra.mxu1 %v2544_v23  ;;  %1965 = vmatprep.mubr.f32.mxu0 %v13042_v0  ;;  %v13924_v23 = vld [vmem:[%s15747_s3 + $0x68] sm:$0xff] }
 0x1f5   : > { %5929 = vrot.lane.b32.xlu0 %v13280_v55, %s15859_s13  ;;  %11764 = vmatprep.subr.mxu1 %v13042_v0 }
 0x1f6   : > { %6651 = vrot.lane.b32.xlu1 %v13246_v47, %s15810_s2  ;;  %11230 = vmatmul.mubr.msk.f32.vlgmr.msra.gmra.mrb[4].mxu1 %vm449_vm0, %v13690_v24  ;;  %v13700_v6 = vpop.permute.xlu0 %4229  ;;  %v2542_v25 = vpop.permute.xlu1 %2541 }
 0x1f7   : > { %11219 = vmatmul.mubr.msk.f32.vlgmr.msra.gmra.mrb[6].mxu0 %vm449_vm0, %v13574_v50  ;;  %11765 = vmatpush3.msra.mxu1 %v2542_v25  ;;  %v3270_v50 = vsel %vm3269_vm11, %v13563_v46, %v13544_v40 }
 0x1f8   : > { %2144 = vmatpush1.msra.mxu0 %v2062_v27  ;;  %11766 = vmatprep.mubr.msk.f32.mxu1 %vm13061_vm2, %v13042_v0 }
 0x1f9   : > { %6647 = vrot.lane.b32.xlu0 %v13237_v44, %s15810_s2  ;;  %2798 = vmatprep.subr.mxu1 %v2787_v28 }
 0x1fa   : > { %6891 = vrot.lane.b32.xlu1 %v13224_v42, %s15814_s19  ;;  %11767 = vmatmul.mubr.msk.f32.vlgmr.msra.gmra.mrb[6].mxu1 %vm449_vm0, %v13690_v24  ;;  %v13720_v7 = vpop.permute.xlu0 %4227  ;;  %v2298_v33 = vpop.permute.xlu1 %2297 }
 0x1fb   : > { %2799 = vmatpush1.msra.mxu1 %v2786_v32  ;;  %2862 = vmatprep.mubr.f32.mxu1 %v13042_v0  ;;  %v2305_v34 = vsel %vm2301_vm7, %v2298_v33, %v2300_v17  ;;  %v2304_v37 = vsel %vm2301_vm7, %v13410_v9, %v2298_v33  ;;  %v4238_v27 = vsel %vm4237_vm15, %v13720_v7, %v13700_v6  ;;  %v13966_v33 = vld [vmem:[%s15747_s3 + $0x70] sm:$0xff]  ;;  %vm5689_vm7 = vcmask 883712  }
 0x1fc   : > { %2385 = vmatprep.subr.mxu0 %v2305_v34  ;;  %2207 = vmatprep.mubr.f32.mxu0 %v13042_v0 }
 0x1fd   : > { %4959 = vrot.lane.b32.xlu0 %v13286_v56, %s15858_s17  ;;  %11769 = vmatprep.subr.mxu1 %v13042_v0  ;;  %s15818_s17 = smov 101  }
 0x1fe   : > { %6171 = vrot.lane.b32.xlu1 %v13280_v55, %s15863_s10  ;;  %11234 = vmatmul.mubr.msk.f32.vlgmr.msra.gmra.mrb[4].mxu1 %vm449_vm0, %v13727_v35  ;;  %v2784_v57 = vpop.permute.xlu0 %2783  ;;  %v13737_v16 = vpop.permute.xlu1 %4231 }
 0x1ff   : > { %11223 = vmatmul.mubr.msk.f32.vlgmr.msra.gmra.mrb[6].mxu0 %vm449_vm0, %v13612_v63  ;;  %11770 = vmatpush3.msra.mxu1 %v2784_v57 }
 0x200   : > { %2386 = vmatpush1.msra.mxu0 %v2304_v37  ;;  %11771 = vmatprep.mubr.msk.f32.mxu1 %vm13061_vm2, %v13042_v0 }
 0x201   : > { %6893 = vrot.lane.b32.xlu0 %v13246_v47, %s15814_s19  ;;  %3040 = vmatprep.subr.mxu1 %v3029_v38 }
 0x202   : > { %6889 = vrot.lane.b32.xlu1 %v13237_v44, %s15814_s19  ;;  %11772 = vmatmul.mubr.msk.f32.vlgmr.msra.gmra.mrb[6].mxu1 %vm449_vm0, %v13727_v35  ;;  %v2540_v9 = vpop.permute.xlu0 %2539  ;;  %v13757_v41 = vpop.permute.xlu1 %4471  ;;  %s15865_s19 = smov 104  }
 0x203   : > { %3041 = vmatpush1.msra.mxu1 %v3028_v39  ;;  %3104 = vmatprep.mubr.f32.mxu1 %v13042_v0  ;;  %v2547_v43 = vsel %vm2543_vm8, %v2540_v9, %v2542_v25  ;;  %v2546_v48 = vsel %vm2543_vm8, %v13424_v14, %v2540_v9  ;;  %v4239_v25 = vsel %vm4237_vm15, %v13700_v6, %v13737_v16  ;;  %v14004_v39 = vld [vmem:[%s15747_s3 + $0x78] sm:$0xff]  ;;  %vm5931_vm8 = vcmask 875520  }
 0x204   : > { %2627 = vmatprep.subr.mxu0 %v2547_v43  ;;  %2449 = vmatprep.mubr.f32.mxu0 %v13042_v0 }
 0x205   : > { %6413 = vrot.lane.b32.xlu0 %v13280_v55, %s15864_s28  ;;  %11774 = vmatprep.subr.mxu1 %v13042_v0 }
 0x206   : > { %5201 = vrot.lane.b32.xlu1 %v13286_v56, %s15860_s18  ;;  %11238 = vmatmul.mubr.msk.f32.vlgmr.msra.gmra.mrb[4].mxu1 %vm449_vm0, %v13764_v45  ;;  %v13774_v59 = vpop.permute.xlu0 %3025  ;;  %v13776_v18 = vpop.permute.xlu1 %4469  ;;  %s15816_s18 = smov 102  }
 0x207   : > { %11227 = vmatmul.mubr.msk.f32.vlgmr.msra.gmra.mrb[6].mxu0 %vm449_vm0, %v13652_v15  ;;  %11775 = vmatpush3.msra.mxu1 %v13774_v59  ;;  %v4480_v37 = vsel %vm4479_vm1, %v13776_v18, %v13757_v41 }
 0x208   : > { %2628 = vmatpush1.msra.mxu0 %v2546_v48  ;;  %11776 = vmatprep.mubr.msk.f32.mxu1 %vm13061_vm2, %v13042_v0 }
 0x209   : > { %7133 = vrot.lane.b32.xlu0 %v13224_v42, %s15816_s18  ;;  %3282 = vmatprep.subr.mxu1 %v3271_v49  ;;  %v14045_v49 = vld [vmem:[%s15747_s3 + $0x80] sm:$0xff] }
 0x20a   : > { %7135 = vrot.lane.b32.xlu1 %v13246_v47, %s15816_s18  ;;  %11777 = vmatmul.mubr.msk.f32.vlgmr.msra.gmra.mrb[6].mxu1 %vm449_vm0, %v13764_v45  ;;  %v13797_v14 = vpop.permute.xlu0 %4473  ;;  %v2782_v51 = vpop.permute.xlu1 %2781 }
 0x20b   : > { %3283 = vmatpush1.msra.mxu1 %v3270_v50  ;;  %3346 = vmatprep.mubr.f32.mxu1 %v13042_v0  ;;  %v2789_v52 = vsel %vm2785_vm9, %v2782_v51, %v2784_v57  ;;  %v2788_v54 = vsel %vm2785_vm9, %v13499_v29, %v2782_v51  ;;  %v4481_v57 = vsel %vm4479_vm1, %v13757_v41, %v13797_v14  ;;  %vm6173_vm9 = vcmask 867328  }
 0x20c   : > { %2869 = vmatprep.subr.mxu0 %v2789_v52  ;;  %2691 = vmatprep.mubr.f32.mxu0 %v13042_v0 }
 0x20d   : > { %7131 = vrot.lane.b32.xlu0 %v13237_v44, %s15816_s18  ;;  %11779 = vmatprep.subr.mxu1 %v13042_v0  ;;  %s15866_s18 = smov 103  }
 0x20e   : > { %6655 = vrot.lane.b32.xlu1 %v13280_v55, %s15865_s19  ;;  %11242 = vmatmul.mubr.msk.f32.vlgmr.msra.gmra.mrb[4].mxu1 %vm449_vm0, %v13804_v53  ;;  %v13814_v40 = vpop.permute.xlu0 %4713  ;;  %v13816_v46 = vpop.permute.xlu1 %3267 }
 0x20f   : > { %11231 = vmatmul.mubr.msk.f32.vlgmr.msra.gmra.mrb[6].mxu0 %vm449_vm0, %v13690_v24  ;;  %11780 = vmatpush3.msra.mxu1 %v13816_v46 }
 0x210   : > { %2870 = vmatpush1.msra.mxu0 %v2788_v54  ;;  %11781 = vmatprep.mubr.msk.f32.mxu1 %vm13061_vm2, %v13042_v0  ;;  %v14087_v54 = vld [vmem:[%s15747_s3 + $0x88] sm:$0xff] }
 0x211   : > { %5443 = vrot.lane.b32.xlu0 %v13286_v56, %s15861_s12  ;;  %3524 = vmatprep.subr.mxu1 %v3513_v58  ;;  %s13072_s12 = smov 99  }
 0x212   : > { %7375 = vrot.lane.b32.xlu1 %v13224_v42, %s15818_s17  ;;  %11782 = vmatmul.mubr.msk.f32.vlgmr.msra.gmra.mrb[6].mxu1 %vm449_vm0, %v13804_v53  ;;  %v13837_v29 = vpop.permute.xlu0 %4711  ;;  %v13839_v63 = vpop.permute.xlu1 %4715 }
 0x213   : > { %3525 = vmatpush1.msra.mxu1 %v3512_v62  ;;  %3588 = vmatprep.mubr.f32.mxu1 %v13042_v0  ;;  %v4723_v43 = vsel %vm4721_vm3, %v13814_v40, %v13839_v63  ;;  %v4722_v18 = vsel %vm4721_vm3, %v13837_v29, %v13814_v40 }
 0x214   : > { %11784 = vmatprep.subr.mxu1 %v13042_v0  ;;  %2933 = vmatprep.mubr.f32.mxu0 %v13042_v0 }
 0x215   : > { %6897 = vrot.lane.b32.xlu0 %v13280_v55, %s15866_s18 }
 0x216   : > { %7373 = vrot.lane.b32.xlu1 %v13237_v44, %s15818_s17  ;;  %11246 = vmatmul.mubr.msk.f32.vlgmr.msra.gmra.mrb[4].mxu1 %vm449_vm0, %v13845_v2  ;;  %v13855_v30 = vpop.permute.xlu0 %3509  ;;  %v13857_v36 = vpop.permute.xlu1 %4955 }
 0x217   : > { %11785 = vmatpush3.msra.mxu1 %v13855_v30  ;;  %11786 = vmatprep.mubr.msk.f32.mxu1 %vm13061_vm2, %v13042_v0 }
 0x218   : > { %3766 = vmatprep.subr.mxu1 %v3755_v8  ;;  %11235 = vmatmul.mubr.msk.f32.vlgmr.msra.gmra.mrb[6].mxu0 %vm449_vm0, %v13727_v35 }
 0x219   : > { %7377 = vrot.lane.b32.xlu0 %v13246_v47, %s15818_s17  ;;  %3175 = vmatprep.mubr.f32.mxu0 %v13042_v0  ;;  %s15867_s17 = smov 102  }
 0x21a   : > { %5685 = vrot.lane.b32.xlu1 %v13286_v56, %s15862_s29  ;;  %11787 = vmatmul.mubr.msk.f32.vlgmr.msra.gmra.mrb[6].mxu1 %vm449_vm0, %v13845_v2  ;;  %v3024_v3 = vpop.permute.xlu0 %3023  ;;  %v13877_v13 = vpop.permute.xlu1 %4953  ;;  %s15820_s29 = smov 100  }
 0x21b   : > { %3767 = vmatpush1.msra.mxu1 %v3754_v10  ;;  %3830 = vmatprep.mubr.f32.mxu1 %v13042_v0  ;;  %v3031_v15 = vsel %vm3027_vm10, %v3024_v3, %v13774_v59  ;;  %v3030_v1 = vsel %vm3027_vm10, %v13513_v31, %v3024_v3  ;;  %v3997_v31 = vsel %vm3995_vm14, %v13643_v12, %v13679_v21  ;;  %vm6415_vm10 = vcmask 859136  }
 0x21c   : > { %3111 = vmatprep.subr.mxu0 %v3031_v15  ;;  %11789 = vmatprep.subr.mxu1 %v13042_v0 }
 0x21d   : > { %7617 = vrot.lane.b32.xlu0 %v13224_v42, %s15820_s29  ;;  %3112 = vmatpush1.msra.mxu0 %v3030_v1  ;;  %v14164_v1 = vld [vmem:[%s15747_s3 + $0x98] sm:$0xff] }
 0x21e   : > { %7139 = vrot.lane.b32.xlu1 %v13280_v55, %s15867_s17  ;;  %11250 = vmatmul.mubr.msk.f32.vlgmr.msra.gmra.mrb[4].mxu1 %vm449_vm0, %v13885_v4  ;;  %v13896_v11 = vpop.permute.xlu0 %4957  ;;  %v13898_v17 = vpop.permute.xlu1 %3751 }
 0x21f   : > { %11790 = vmatpush3.msra.mxu1 %v13898_v17  ;;  %11791 = vmatprep.mubr.msk.f32.mxu1 %vm13061_vm2, %v13042_v0  ;;  %v4965_v52 = vsel %vm4963_vm4, %v13857_v36, %v13896_v11 }
 0x220   : > { %4008 = vmatprep.subr.mxu1 %v3997_v31  ;;  %11239 = vmatmul.mubr.msk.f32.vlgmr.msra.gmra.mrb[6].mxu0 %vm449_vm0, %v13764_v45 }
 0x221   : > { %7615 = vrot.lane.b32.xlu0 %v13237_v44, %s15820_s29  ;;  %3417 = vmatprep.mubr.f32.mxu0 %v13042_v0 }
 0x222   : > { %7619 = vrot.lane.b32.xlu1 %v13246_v47, %s15820_s29  ;;  %11792 = vmatmul.mubr.msk.f32.vlgmr.msra.gmra.mrb[6].mxu1 %vm449_vm0, %v13885_v4  ;;  %v13918_v20 = vpop.permute.xlu0 %5197  ;;  %s15868_s29 = smov 101  }
 0x223   : > { %4009 = vmatpush1.msra.mxu1 %v3996_v19  ;;  %v3266_v5 = vpop.permute.xlu1 %3265  ;;  %4072 = vmatprep.mubr.f32.mxu1 %v13042_v0 }
 0x224   : > { %v3272_v12 = vsel %vm3269_vm11, %v13482_v26, %v3266_v5  ;;  %v3273_v22 = vsel %vm3269_vm11, %v3266_v5, %v13816_v46  ;;  %11794 = vmatprep.subr.mxu1 %v13042_v0  ;;  %vm6657_vm11 = vcmask 850944  }
 0x225   : > { %7381 = vrot.lane.b32.xlu0 %v13280_v55, %s15868_s29  ;;  %3353 = vmatprep.subr.mxu0 %v3273_v22 }
 0x226   : > { %7623 = vrot.lane.b32.xlu1 %v13280_v55, %s15869_s26  ;;  %11254 = vmatmul.mubr.msk.f32.vlgmr.msra.gmra.mrb[4].mxu1 %vm449_vm0, %v13924_v23  ;;  %v13937_v24 = vpop.permute.xlu0 %3993 }
 0x227   : > { %3354 = vmatpush1.msra.mxu0 %v3272_v12  ;;  %v13939_v26 = vpop.permute.xlu1 %5199  ;;  %11795 = vmatpush3.msra.mxu1 %v13937_v24 }
 0x228   : > { %11796 = vmatprep.mubr.msk.f32.mxu1 %vm13061_vm2, %v13042_v0  ;;  %4250 = vmatprep.subr.mxu1 %v4239_v25  ;;  %v5207_v58 = vsel %vm5205_vm5, %v13918_v20, %v13939_v26 }
 0x229   : > { %5927 = vrot.lane.b32.xlu0 %v13286_v56, %s15859_s13  ;;  %11243 = vmatmul.mubr.msk.f32.vlgmr.msra.gmra.mrb[6].mxu0 %vm449_vm0, %v13804_v53 }
 0x22a   : > { %7859 = vrot.lane.b32.xlu1 %v13224_v42, %s13072_s12  ;;  %11797 = vmatmul.mubr.msk.f32.vlgmr.msra.gmra.mrb[6].mxu1 %vm449_vm0, %v13924_v23  ;;  %v13958_v28 = vpop.permute.xlu0 %5195 }
 0x22b   : > { %4251 = vmatpush1.msra.mxu1 %v4238_v27  ;;  %v13960_v32 = vpop.permute.xlu1 %5439  ;;  %4314 = vmatprep.mubr.f32.mxu1 %v13042_v0  ;;  %v5206_v62 = vsel %vm5205_vm5, %v13958_v28, %v13918_v20  ;;  %v14191_v20 = vld [vmem:[%s15747_s3 + $0xa0] sm:$0xff]  ;;  %v14222_v28 = vld [vmem:[%s15747_s3 + $0xa8] sm:$0xff] }
 0x22c   : > { %11799 = vmatprep.subr.mxu1 %v13042_v0  ;;  %3659 = vmatprep.mubr.f32.mxu0 %v13042_v0 }
 0x22d   : > { %7861 = vrot.lane.b32.xlu0 %v13246_v47, %s13072_s12 }
 0x22e   : > { %7857 = vrot.lane.b32.xlu1 %v13237_v44, %s13072_s12  ;;  %11258 = vmatmul.mubr.msk.f32.vlgmr.msra.gmra.mrb[4].mxu1 %vm449_vm0, %v13966_v33  ;;  %v3508_v6 = vpop.permute.xlu0 %3507 }
 0x22f   : > { %v13976_v7 = vpop.permute.xlu1 %4235  ;;  %11801 = vmatprep.mubr.msk.f32.mxu1 %vm13061_vm2, %v13042_v0  ;;  %v3515_v34 = vsel %vm3511_vm12, %v3508_v6, %v13855_v30  ;;  %v3514_v35 = vsel %vm3511_vm12, %v13601_v60, %v3508_v6  ;;  %v14124_v30 = vld [vmem:[%s15747_s3 + $0x90] sm:$0xff]  ;;  %vm6899_vm12 = vcmask 842752  }
 0x230   : > { %11800 = vmatpush3.msra.mxu1 %v13976_v7  ;;  %3595 = vmatprep.subr.mxu0 %v3515_v34 }
 0x231   : > { %7865 = vrot.lane.b32.xlu0 %v13280_v55, %s13072_s12  ;;  %4492 = vmatprep.subr.mxu1 %v4481_v57 }
 0x232   : > { %6169 = vrot.lane.b32.xlu1 %v13286_v56, %s15863_s10  ;;  %11802 = vmatmul.mubr.msk.f32.vlgmr.msra.gmra.mrb[6].mxu1 %vm449_vm0, %v13966_v33  ;;  %v13997_v60 = vpop.permute.xlu0 %5441  ;;  %s15823_s10 = smov 98  }
 0x233   : > { %3596 = vmatpush1.msra.mxu0 %v3514_v35  ;;  %4493 = vmatpush1.msra.mxu1 %v4480_v37  ;;  %v13999_v38 = vpop.permute.xlu1 %5437  ;;  %v5449_v3 = vsel %vm5447_vm6, %v13960_v32, %v13997_v60  ;;  %v14252_v37 = vld [vmem:[%s15747_s3 + $0xb0] sm:$0xff] }
 0x234   : > { %4556 = vmatprep.mubr.f32.mxu1 %v13042_v0  ;;  %11804 = vmatprep.subr.mxu1 %v13042_v0 }
 0x235   : > { %8101 = vrot.lane.b32.xlu0 %v13224_v42, %s15823_s10  ;;  %11247 = vmatmul.mubr.msk.f32.vlgmr.msra.gmra.mrb[6].mxu0 %vm449_vm0, %v13845_v2 }
 0x236   : > { %8103 = vrot.lane.b32.xlu1 %v13246_v47, %s15823_s10  ;;  %11262 = vmatmul.mubr.msk.f32.vlgmr.msra.gmra.mrb[4].mxu1 %vm449_vm0, %v14004_v39  ;;  %v14016_v9 = vpop.permute.xlu0 %4477 }
 0x237   : > { %v3750_v41 = vpop.permute.xlu1 %3749  ;;  %11805 = vmatpush3.msra.mxu1 %v14016_v9  ;;  %11806 = vmatprep.mubr.msk.f32.mxu1 %vm13061_vm2, %v13042_v0 }
 0x238   : > { %v3756_v45 = vsel %vm3753_vm13, %v13603_v61, %v3750_v41  ;;  %v3757_v59 = vsel %vm3753_vm13, %v3750_v41, %v13898_v17  ;;  %4734 = vmatprep.subr.mxu1 %v4723_v43  ;;  %3901 = vmatprep.mubr.f32.mxu0 %v13042_v0  ;;  %vm7141_vm13 = vcmask 834560  }
 0x239   : > { %8099 = vrot.lane.b32.xlu0 %v13237_v44, %s15823_s10  ;;  %3837 = vmatprep.subr.mxu0 %v3757_v59 }
 0x23a   : > { %8107 = vrot.lane.b32.xlu1 %v13280_v55, %s15823_s10  ;;  %11807 = vmatmul.mubr.msk.f32.vlgmr.msra.gmra.mrb[6].mxu1 %vm449_vm0, %v14004_v39  ;;  %v14038_v61 = vpop.permute.xlu0 %5681  ;;  %s13074_s10 = smov 97  }
 0x23b   : > { %3838 = vmatpush1.msra.mxu0 %v3756_v45  ;;  %4735 = vmatpush1.msra.mxu1 %v4722_v18  ;;  %v14040_v48 = vpop.permute.xlu1 %5683  ;;  %v14278_v18 = vld [vmem:[%s15747_s3 + $0xb8] sm:$0xff] }
 0x23c   : > { %4798 = vmatprep.mubr.f32.mxu1 %v13042_v0  ;;  %11809 = vmatprep.subr.mxu1 %v13042_v0  ;;  %v5691_v31 = vsel %vm5689_vm7, %v14038_v61, %v14040_v48 }
 0x23d   : > { %6411 = vrot.lane.b32.xlu0 %v13286_v56, %s15864_s28  ;;  %11251 = vmatmul.mubr.msk.f32.vlgmr.msra.gmra.mrb[6].mxu0 %vm449_vm0, %v13885_v4  ;;  %s15877_s28 = sld [smem:[#allocation20_spill]] }
 0x23e   : > { %8343 = vrot.lane.b32.xlu1 %v13224_v42, %s13074_s10  ;;  %11266 = vmatmul.mubr.msk.f32.vlgmr.msra.gmra.mrb[4].mxu1 %vm449_vm0, %v14045_v49  ;;  %v14057_v50 = vpop.permute.xlu0 %5679  ;;  %v4964_v42 = vsel %vm4963_vm4, %v13877_v13, %v13857_v36  ;;  %v5448_v13 = vsel %vm5447_vm6, %v13999_v38, %v13960_v32 }
 0x23f   : > { %v14059_v51 = vpop.permute.xlu1 %4719  ;;  %11811 = vmatprep.mubr.msk.f32.mxu1 %vm13061_vm2, %v13042_v0  ;;  %4143 = vmatprep.mubr.f32.mxu0 %v13042_v0 }
 0x240   : > { %11810 = vmatpush3.msra.mxu1 %v14059_v51 }
 0x241   : > { %8345 = vrot.lane.b32.xlu0 %v13246_v47, %s13074_s10  ;;  %4976 = vmatprep.subr.mxu1 %v4965_v52 }
 0x242   : > { %8341 = vrot.lane.b32.xlu1 %v13237_v44, %s13074_s10  ;;  %11812 = vmatmul.mubr.msk.f32.vlgmr.msra.gmra.mrb[6].mxu1 %vm449_vm0, %v14045_v49  ;;  %v3992_v53 = vpop.permute.xlu0 %3991 }
 0x243   : > { %4977 = vmatpush1.msra.mxu1 %v4964_v42  ;;  %v3998_v40 = vsel %vm3995_vm14, %v13679_v21, %v3992_v53  ;;  %v14079_v46 = vpop.permute.xlu1 %5923  ;;  %5040 = vmatprep.mubr.f32.mxu1 %v13042_v0  ;;  %v3999_v47 = vsel %vm3995_vm14, %v3992_v53, %v13937_v24  ;;  %vm7383_vm14 = vcmask 826368  }
 0x244   : > { %4079 = vmatprep.subr.mxu0 %v3999_v47  ;;  %11814 = vmatprep.subr.mxu1 %v13042_v0 }
 0x245   : > { %6653 = vrot.lane.b32.xlu0 %v13286_v56, %s15865_s19  ;;  %4080 = vmatpush1.msra.mxu0 %v3998_v40 }
 0x246   : > { %6895 = vrot.lane.b32.xlu1 %v13286_v56, %s15866_s18  ;;  %11270 = vmatmul.mubr.msk.f32.vlgmr.msra.gmra.mrb[4].mxu1 %vm449_vm0, %v14087_v54  ;;  %v14096_v44 = vpop.permute.xlu0 %4961 }
 0x247   : > { %v14098_v21 = vpop.permute.xlu1 %5921  ;;  %11815 = vmatpush3.msra.mxu1 %v14096_v44  ;;  %11816 = vmatprep.mubr.msk.f32.mxu1 %vm13061_vm2, %v13042_v0 }
 0x248   : > { %5218 = vmatprep.subr.mxu1 %v5207_v58  ;;  %11255 = vmatmul.mubr.msk.f32.vlgmr.msra.gmra.mrb[6].mxu0 %vm449_vm0, %v13924_v23  ;;  %v5932_v25 = vsel %vm5931_vm8, %v14098_v21, %v14079_v46 }
 0x249   : > { %7137 = vrot.lane.b32.xlu0 %v13286_v56, %s15867_s17  ;;  %4385 = vmatprep.mubr.f32.mxu0 %v13042_v0 }
 0x24a   : > { %7379 = vrot.lane.b32.xlu1 %v13286_v56, %s15868_s29  ;;  %11817 = vmatmul.mubr.msk.f32.vlgmr.msra.gmra.mrb[6].mxu1 %vm449_vm0, %v14087_v54  ;;  %s15878_s29 = sld [smem:[#allocation21_spill]] }
 0x24b   : > { %5219 = vmatpush1.msra.mxu1 %v5206_v62  ;;  %v14118_v29 = vpop.permute.xlu0 %5925  ;;  %v4234_v2 = vpop.permute.xlu1 %4233  ;;  %5282 = vmatprep.mubr.f32.mxu1 %v13042_v0  ;;  %v14329_v62 = vld [vmem:[%s15747_s3 + $0xc8] sm:$0xff] }
 0x24c   : > { %v4240_v36 = vsel %vm4237_vm15, %v13737_v16, %v4234_v2  ;;  %v4241_v8 = vsel %vm4237_vm15, %v4234_v2, %v13976_v7  ;;  %11819 = vmatprep.subr.mxu1 %v13042_v0  ;;  %v5933_v24 = vsel %vm5931_vm8, %v14079_v46, %v14118_v29  ;;  %v14304_v46 = vld [vmem:[%s15747_s3 + $0xc0] sm:$0xff]  ;;  %vm7625_vm15 = vcmask 818176  }
 0x24d   : > { %7621 = vrot.lane.b32.xlu0 %v13286_v56, %s15869_s26  ;;  %4321 = vmatprep.subr.mxu0 %v4241_v8  ;;  %s15870_s26 = smov 98  }
 0x24e   : > { %7863 = vrot.lane.b32.xlu1 %v13286_v56, %s13072_s12  ;;  %11274 = vmatmul.mubr.msk.f32.vlgmr.msra.gmra.mrb[4].mxu1 %vm449_vm0, %v14124_v30  ;;  %s15871_s12 = smov 126  }
 0x24f   : > { %4322 = vmatpush1.msra.mxu0 %v4240_v36  ;;  %v14137_v10 = vpop.permute.xlu0 %6165  ;;  %v14139_v16 = vpop.permute.xlu1 %5203  ;;  %11821 = vmatprep.mubr.msk.f32.mxu1 %vm13061_vm2, %v13042_v0 }
 0x250   : > { %11820 = vmatpush3.msra.mxu1 %v14139_v16  ;;  %11259 = vmatmul.mubr.msk.f32.vlgmr.msra.gmra.mrb[6].mxu0 %vm449_vm0, %v13966_v33 }
 0x251   : > { %8105 = vrot.lane.b32.xlu0 %v13286_v56, %s15870_s26  ;;  %5460 = vmatprep.subr.mxu1 %v5449_v3 }
 0x252   : > { %8347 = vrot.lane.b32.xlu1 %v13286_v56, %s13074_s10  ;;  %11822 = vmatmul.mubr.msk.f32.vlgmr.msra.gmra.mrb[6].mxu1 %vm449_vm0, %v14124_v30 }
 0x253   : > { %5461 = vmatpush1.msra.mxu1 %v5448_v13  ;;  %v6164_v15 = vpop.permute.xlu0 %6163  ;;  %v14158_v4 = vpop.permute.xlu1 %6167  ;;  %5524 = vmatprep.mubr.f32.mxu1 %v13042_v0  ;;  %v14357_v13 = vld [vmem:[%s15747_s3 + $0xd0] sm:$0xff] }
 0x254   : > { %11824 = vmatprep.subr.mxu1 %v13042_v0  ;;  %4627 = vmatprep.mubr.f32.mxu0 %v13042_v0  ;;  %v6174_v35 = vsel %vm6173_vm9, %v6164_v15, %v14137_v10 }
 0x255   : > { %8349 = vrot.lane.b32.xlu0 %v13280_v55, %s13074_s10  ;;  %v5690_v55 = vsel %vm5689_vm7, %v14057_v50, %v14038_v61  ;;  %s15872_s10 = smov 127  }
 0x256   : > { %11278 = vmatmul.mubr.msk.f32.vlgmr.msra.gmra.mrb[4].mxu1 %vm449_vm0, %v14164_v1 }
 0x257   : > { %v14172_v56 = vpop.permute.xlu0 %5445  ;;  %v14174_v17 = vpop.permute.xlu1 %6407  ;;  %11826 = vmatprep.mubr.msk.f32.mxu1 %vm13061_vm2, %v13042_v0 }
 0x258   : > { %11825 = vmatpush3.msra.mxu1 %v14172_v56 }
 0x259   : > { %5702 = vmatprep.subr.mxu1 %v5691_v31 }
 0x25a   : > { %11827 = vmatmul.mubr.msk.f32.vlgmr.msra.gmra.mrb[6].mxu1 %vm449_vm0, %v14164_v1 }
 0x25b   : > { %5703 = vmatpush1.msra.mxu1 %v5690_v55  ;;  %v4476_v19 = vpop.permute.xlu0 %4475  ;;  %5766 = vmatprep.mubr.f32.mxu1 %v13042_v0 }
 0x25c   : > { %v4482_v5 = vsel %vm4479_vm1, %v13797_v14, %v4476_v19  ;;  %v6406_v23 = vpop.permute.xlu1 %6405  ;;  %v4483_v12 = vsel %vm4479_vm1, %v4476_v19, %v14016_v9  ;;  %11829 = vmatprep.subr.mxu1 %v13042_v0  ;;  %vm7867_vm1 = vcmask 809984  }
 0x25d   : > { %4563 = vmatprep.subr.mxu0 %v4483_v12  ;;  %v6416_v59 = vsel %vm6415_vm10, %v6406_v23, %v14174_v17 }
 0x25e   : > { %11282 = vmatmul.mubr.msk.f32.vlgmr.msra.gmra.mrb[4].mxu1 %vm449_vm0, %v14191_v20  ;;  %4564 = vmatpush1.msra.mxu0 %v4482_v5 }
 0x25f   : > { %v14200_v22 = vpop.permute.xlu0 %6409  ;;  %11831 = vmatprep.mubr.msk.f32.mxu1 %vm13061_vm2, %v13042_v0  ;;  %11263 = vmatmul.mubr.msk.f32.vlgmr.msra.gmra.mrb[6].mxu0 %vm449_vm0, %v14004_v39 }
 0x260   : > { %v14206_v14 = vpop.permute.xlu1 %5687  ;;  %4869 = vmatprep.mubr.f32.mxu0 %v13042_v0  ;;  %v6417_v45 = vsel %vm6415_vm10, %v14174_v17, %v14200_v22 }
 0x261   : > { %11830 = vmatpush3.msra.mxu1 %v14206_v14 }
 0x262   : > { %11832 = vmatmul.mubr.msk.f32.vlgmr.msra.gmra.mrb[6].mxu1 %vm449_vm0, %v14191_v20  ;;  %5944 = vmatprep.subr.mxu1 %v5933_v24 }
 0x263   : > { %5945 = vmatpush1.msra.mxu1 %v5932_v25  ;;  %v6650_v27 = vpop.permute.xlu0 %6649  ;;  %6008 = vmatprep.mubr.f32.mxu1 %v13042_v0 }
 0x264   : > { %v4718_v32 = vpop.permute.xlu1 %4717  ;;  %11834 = vmatprep.subr.mxu1 %v13042_v0 }
 0x265   : > { %v4724_v33 = vsel %vm4721_vm3, %v13839_v63, %v4718_v32  ;;  %v4725_v6 = vsel %vm4721_vm3, %v4718_v32, %v14059_v51  ;;  %v6175_v63 = vsel %vm6173_vm9, %v14137_v10, %v14158_v4  ;;  %vm8109_vm3 = vcmask 801792  }
 0x266   : > { %4805 = vmatprep.subr.mxu0 %v4725_v6  ;;  %11286 = vmatmul.mubr.msk.f32.vlgmr.msra.gmra.mrb[4].mxu1 %vm449_vm0, %v14222_v28 }
 0x267   : > { %4806 = vmatpush1.msra.mxu0 %v4724_v33  ;;  %v14231_v7 = vpop.permute.xlu0 %5929  ;;  %11836 = vmatprep.mubr.msk.f32.mxu1 %vm13061_vm2, %v13042_v0 }
 0x268   : > { %v14235_v34 = vpop.permute.xlu1 %6651  ;;  %11835 = vmatpush3.msra.mxu1 %v14231_v7  ;;  %11267 = vmatmul.mubr.msk.f32.vlgmr.msra.gmra.mrb[6].mxu0 %vm449_vm0, %v14045_v49 }
 0x269   : > { %6186 = vmatprep.subr.mxu1 %v6175_v63  ;;  %5111 = vmatprep.mubr.f32.mxu0 %v13042_v0  ;;  %v6659_v51 = vsel %vm6657_vm11, %v6650_v27, %v14235_v34 }
 0x26a   : > { %11837 = vmatmul.mubr.msk.f32.vlgmr.msra.gmra.mrb[6].mxu1 %vm449_vm0, %v14222_v28 }
 0x26b   : > { %6187 = vmatpush1.msra.mxu1 %v6174_v35  ;;  %v6648_v57 = vpop.permute.xlu0 %6647  ;;  %6250 = vmatprep.mubr.f32.mxu1 %v13042_v0 }
 0x26c   : > { %v6892_v38 = vpop.permute.xlu1 %6891  ;;  %11839 = vmatprep.subr.mxu1 %v13042_v0  ;;  %v6658_v53 = vsel %vm6657_vm11, %v6648_v57, %v6650_v27  ;;  %v14406_v27 = vld [vmem:[%s15747_s3 + $0xe0] sm:$0xff] }
 0x26e   : > { %11290 = vmatmul.mubr.msk.f32.vlgmr.msra.gmra.mrb[4].mxu1 %vm449_vm0, %v14252_v37 }
 0x26f   : > { %v4960_v39 = vpop.permute.xlu0 %4959  ;;  %11841 = vmatprep.mubr.msk.f32.mxu1 %vm13061_vm2, %v13042_v0 }
 0x270   : > { %v4966_v9 = vsel %vm4963_vm4, %v13896_v11, %v4960_v39  ;;  %v14261_v41 = vpop.permute.xlu1 %6171  ;;  %v4967_v43 = vsel %vm4963_vm4, %v4960_v39, %v14096_v44  ;;  %vm8351_vm4 = vcmask 793600  }
 0x271   : > { %11840 = vmatpush3.msra.mxu1 %v14261_v41  ;;  %5047 = vmatprep.subr.mxu0 %v4967_v43 }
 0x272   : > { %11842 = vmatmul.mubr.msk.f32.vlgmr.msra.gmra.mrb[6].mxu1 %vm449_vm0, %v14252_v37  ;;  %6428 = vmatprep.subr.mxu1 %v6417_v45 }
 0x273   : > { %5048 = vmatpush1.msra.mxu0 %v4966_v9  ;;  %6429 = vmatpush1.msra.mxu1 %v6416_v59  ;;  %v14273_v11 = vpop.permute.xlu0 %6893  ;;  %v14459_v59 = vld [vmem:[%s15747_s3 + $0xf0] sm:$0xff] }
 0x274   : > { %v6890_v61 = vpop.permute.xlu1 %6889  ;;  %6492 = vmatprep.mubr.f32.mxu1 %v13042_v0  ;;  %11844 = vmatprep.subr.mxu1 %v13042_v0  ;;  %v6901_v44 = vsel %vm6899_vm12, %v6892_v38, %v14273_v11 }
 0x275   : > { %11271 = vmatmul.mubr.msk.f32.vlgmr.msra.gmra.mrb[6].mxu0 %vm449_vm0, %v14087_v54  ;;  %v6900_v21 = vsel %vm6899_vm12, %v6890_v61, %v6892_v38  ;;  %v14434_v38 = vld [vmem:[%s15747_s3 + $0xe8] sm:$0xff] }
 0x276   : > { %11294 = vmatmul.mubr.msk.f32.vlgmr.msra.gmra.mrb[4].mxu1 %vm449_vm0, %v14278_v18  ;;  %5353 = vmatprep.mubr.f32.mxu0 %v13042_v0 }
 0x277   : > { %v14287_v49 = vpop.permute.xlu0 %6413  ;;  %11846 = vmatprep.mubr.msk.f32.mxu1 %vm13061_vm2, %v13042_v0 }
 0x278   : > { %v5202_v50 = vpop.permute.xlu1 %5201  ;;  %11845 = vmatpush3.msra.mxu1 %v14287_v49 }
 0x279   : > { %v5208_v52 = vsel %vm5205_vm5, %v13939_v26, %v5202_v50  ;;  %v5209_v42 = vsel %vm5205_vm5, %v5202_v50, %v14139_v16  ;;  %6670 = vmatprep.subr.mxu1 %v6659_v51  ;;  %vm8723_vm5 = vcmask 457728  }
 0x27a   : > { %5289 = vmatprep.subr.mxu0 %v5209_v42  ;;  %11847 = vmatmul.mubr.msk.f32.vlgmr.msra.gmra.mrb[6].mxu1 %vm449_vm0, %v14278_v18 }
 0x27b   : > { %5290 = vmatpush1.msra.mxu0 %v5208_v52  ;;  %6671 = vmatpush1.msra.mxu1 %v6658_v53  ;;  %v7134_v40 = vpop.permute.xlu0 %7133 }
 0x27c   : > { %v14306_v47 = vpop.permute.xlu1 %7135  ;;  %6734 = vmatprep.mubr.f32.mxu1 %v13042_v0  ;;  %11849 = vmatprep.subr.mxu1 %v13042_v0 }
 0x27d   : > { %11275 = vmatmul.mubr.msk.f32.vlgmr.msra.gmra.mrb[6].mxu0 %vm449_vm0, %v14124_v30  ;;  %v7143_v10 = vsel %vm7141_vm13, %v7134_v40, %v14306_v47 }
 0x27e   : > { %11298 = vmatmul.mubr.msk.f32.vlgmr.msra.gmra.mrb[4].mxu1 %vm449_vm0, %v14304_v46  ;;  %5595 = vmatprep.mubr.f32.mxu0 %v13042_v0 }
 0x27f   : > { %v7132_v26 = vpop.permute.xlu0 %7131  ;;  %11851 = vmatprep.mubr.msk.f32.mxu1 %vm13061_vm2, %v13042_v0 }
 0x280   : > { %v14317_v54 = vpop.permute.xlu1 %6655  ;;  %v7142_v16 = vsel %vm7141_vm13, %v7132_v26, %v7134_v40 }
 0x281   : > { %11850 = vmatpush3.msra.mxu1 %v14317_v54 }
 0x282   : > { %11852 = vmatmul.mubr.msk.f32.vlgmr.msra.gmra.mrb[6].mxu1 %vm449_vm0, %v14304_v46  ;;  %6912 = vmatprep.subr.mxu1 %v6901_v44 }
 0x283   : > { %6913 = vmatpush1.msra.mxu1 %v6900_v21  ;;  %v5444_v58 = vpop.permute.xlu0 %5443  ;;  %6976 = vmatprep.mubr.f32.mxu1 %v13042_v0 }
 0x284   : > { %v5450_v2 = vsel %vm5447_vm6, %v13997_v60, %v5444_v58  ;;  %v7376_v30 = vpop.permute.xlu1 %7375  ;;  %v5451_v36 = vsel %vm5447_vm6, %v5444_v58, %v14172_v56  ;;  %11854 = vmatprep.subr.mxu1 %v13042_v0 }
 0x285   : > { %5531 = vmatprep.subr.mxu0 %v5451_v36 }
 0x286   : > { %11302 = vmatmul.mubr.msk.f32.vlgmr.msra.gmra.mrb[4].mxu1 %vm449_vm0, %v14329_v62  ;;  %5532 = vmatpush1.msra.mxu0 %v5450_v2 }
 0x287   : > { %v14338_v8 = vpop.permute.xlu0 %6897  ;;  %11856 = vmatprep.mubr.msk.f32.mxu1 %vm13061_vm2, %v13042_v0  ;;  %11279 = vmatmul.mubr.msk.f32.vlgmr.msra.gmra.mrb[6].mxu0 %vm449_vm0, %v14164_v1 }
 0x288   : > { %v7374_v60 = vpop.permute.xlu1 %7373  ;;  %11855 = vmatpush3.msra.mxu1 %v14338_v8  ;;  %5837 = vmatprep.mubr.f32.mxu0 %v13042_v0 }
 0x289   : > { %7154 = vmatprep.subr.mxu1 %v7143_v10  ;;  %v7384_v55 = vsel %vm7383_vm14, %v7374_v60, %v7376_v30 }
 0x28a   : > { %11857 = vmatmul.mubr.msk.f32.vlgmr.msra.gmra.mrb[6].mxu1 %vm449_vm0, %v14329_v62 }
 0x28b   : > { %7155 = vmatpush1.msra.mxu1 %v7142_v16  ;;  %v14351_v3 = vpop.permute.xlu0 %7377  ;;  %7218 = vmatprep.mubr.f32.mxu1 %v13042_v0 }
 0x28c   : > { %v5686_v15 = vpop.permute.xlu1 %5685  ;;  %11859 = vmatprep.subr.mxu1 %v13042_v0 }
 0x28d   : > { %v5692_v1 = vsel %vm5689_vm7, %v14040_v48, %v5686_v15  ;;  %v5693_v56 = vsel %vm5689_vm7, %v5686_v15, %v14206_v14  ;;  %v7385_v48 = vsel %vm7383_vm14, %v7376_v30, %v14351_v3 }
 0x28e   : > { %5773 = vmatprep.subr.mxu0 %v5693_v56  ;;  %11306 = vmatmul.mubr.msk.f32.vlgmr.msra.gmra.mrb[4].mxu1 %vm449_vm0, %v14357_v13 }
 0x28f   : > { %5774 = vmatpush1.msra.mxu0 %v5692_v1  ;;  %v7618_v17 = vpop.permute.xlu0 %7617  ;;  %11861 = vmatprep.mubr.msk.f32.mxu1 %vm13061_vm2, %v13042_v0 }
 0x290   : > { %v14368_v31 = vpop.permute.xlu1 %7139  ;;  %11283 = vmatmul.mubr.msk.f32.vlgmr.msra.gmra.mrb[6].mxu0 %vm449_vm0, %v14191_v20  ;;  %v14383_v20 = vld [vmem:[%s15747_s3 + $0xd8] sm:$0xff] }
 0x291   : > { %11860 = vmatpush3.msra.mxu1 %v14368_v31  ;;  %6079 = vmatprep.mubr.f32.mxu0 %v13042_v0 }
 0x292   : > { %11862 = vmatmul.mubr.msk.f32.vlgmr.msra.gmra.mrb[6].mxu1 %vm449_vm0, %v14357_v13  ;;  %7396 = vmatprep.subr.mxu1 %v7385_v48  ;;  %v8582_v48 = vld [vmem:[%s15748_s4 + $0x8] sm:$0xff] }
 0x293   : > { %7397 = vmatpush1.msra.mxu1 %v7384_v55  ;;  %v7616_v19 = vpop.permute.xlu0 %7615  ;;  %7460 = vmatprep.mubr.f32.mxu1 %v13042_v0  ;;  %v8584_v55 = vld [vmem:[%s15748_s4 + $0x18] sm:$0xff] }
 0x294   : > { %v14385_v5 = vpop.permute.xlu1 %7619  ;;  %11864 = vmatprep.subr.mxu1 %v13042_v0  ;;  %v7626_v24 = vsel %vm7625_vm15, %v7616_v19, %v7618_v17  ;;  %v12284_v19 = vpack.c.bf16 %v8584_v55, %v8582_v48  ;;  %v8621_v55 = vld [vmem:[%s15748_s4 + $0x140] sm:$0xff] }
 0x295   : > { %v7627_v14 = vsel %vm7625_vm15, %v7618_v17, %v14385_v5 }
 0x296   : > { %11310 = vmatmul.mubr.msk.f32.vlgmr.msra.gmra.mrb[4].mxu1 %vm449_vm0, %v14383_v20 }
 0x297   : > { %v14390_v23 = vpop.permute.xlu0 %7381  ;;  %11866 = vmatprep.mubr.msk.f32.mxu1 %vm13061_vm2, %v13042_v0 }
 0x298   : > { %v14394_v12 = vpop.permute.xlu1 %7623  ;;  %11865 = vmatpush3.msra.mxu1 %v14390_v23 }
 0x299   : > { %7638 = vmatprep.subr.mxu1 %v7627_v14  ;;  %v8588_v14 = vld [vmem:[%s15748_s4 + $0x38] sm:$0xff] }
 0x29a   : > { %11867 = vmatmul.mubr.msk.f32.vlgmr.msra.gmra.mrb[6].mxu1 %vm449_vm0, %v14383_v20 }
 0x29b   : > { %7639 = vmatpush1.msra.mxu1 %v7626_v24  ;;  %v5928_v25 = vpop.permute.xlu0 %5927  ;;  %7702 = vmatprep.mubr.f32.mxu1 %v13042_v0 }
 0x29c   : > { %v5934_v32 = vsel %vm5931_vm8, %v14118_v29, %v5928_v25  ;;  %v7860_v33 = vpop.permute.xlu1 %7859  ;;  %11869 = vmatprep.subr.mxu1 %v13042_v0  ;;  %v5935_v6 = vsel %vm5931_vm8, %v5928_v25, %v14231_v7 }
 0x29d   : > { %6015 = vmatprep.subr.mxu0 %v5935_v6  ;;  %v8592_v6 = vld [vmem:[%s15748_s4 + $0x58] sm:$0xff] }
 0x29e   : > { %11314 = vmatmul.mubr.msk.f32.vlgmr.msra.gmra.mrb[4].mxu1 %vm449_vm0, %v14406_v27  ;;  %6016 = vmatpush1.msra.mxu0 %v5934_v32  ;;  %v8587_v32 = vld [vmem:[%s15748_s4 + $0x30] sm:$0xff] }
 0x29f   : > { %11870 = vmatpush3.msra.mxu1 %v14394_v12  ;;  %v14416_v63 = vpop.permute.xlu0 %7861  ;;  %11871 = vmatprep.mubr.msk.f32.mxu1 %vm13061_vm2, %v13042_v0 }
 0x2a0   : > { %v7858_v29 = vpop.permute.xlu1 %7857  ;;  %v7869_v35 = vsel %vm7867_vm1, %v7860_v33, %v14416_v63  ;;  %11287 = vmatmul.mubr.msk.f32.vlgmr.msra.gmra.mrb[6].mxu0 %vm449_vm0, %v14222_v28 }
 0x2a1   : > { %v7868_v7 = vsel %vm7867_vm1, %v7858_v29, %v7860_v33  ;;  %7880 = vmatprep.subr.mxu1 %v7869_v35  ;;  %6321 = vmatprep.mubr.f32.mxu0 %v13042_v0  ;;  %v8590_v33 = vld [vmem:[%s15748_s4 + $0x48] sm:$0xff]  ;;  %v8589_v35 = vld [vmem:[%s15748_s4 + $0x40] sm:$0xff] }
 0x2a2   : > { %11872 = vmatmul.mubr.msk.f32.vlgmr.msra.gmra.mrb[6].mxu1 %vm449_vm0, %v14406_v27  ;;  %v12292_v29 = vpack.c.bf16 %v8592_v6, %v8590_v33  ;;  %v8629_v6 = vld [vmem:[%s15748_s4 + $0x180] sm:$0xff] }
 0x2a3   : > { %7881 = vmatpush1.msra.mxu1 %v7868_v7  ;;  %v14428_v57 = vpop.permute.xlu0 %7865  ;;  %7944 = vmatprep.mubr.f32.mxu1 %v13042_v0  ;;  %v8591_v7 = vld [vmem:[%s15748_s4 + $0x50] sm:$0xff] }
 0x2a4   : > { %v6170_v39 = vpop.permute.xlu1 %6169  ;;  %11874 = vmatprep.subr.mxu1 %v13042_v0 }
 0x2a5   : > { %v6176_v28 = vsel %vm6173_vm9, %v14158_v4, %v6170_v39  ;;  %v6177_v9 = vsel %vm6173_vm9, %v6170_v39, %v14261_v41  ;;  %v12294_v39 = vpack.c.bf16 %v8591_v7, %v8589_v35  ;;  %v8636_v35 = vld [vmem:[%s15748_s4 + $0x1b8] sm:$0xff] }
 0x2a6   : > { %6257 = vmatprep.subr.mxu0 %v6177_v9  ;;  %11318 = vmatmul.mubr.msk.f32.vlgmr.msra.gmra.mrb[4].mxu1 %vm449_vm0, %v14434_v38  ;;  %v8593_v9 = vld [vmem:[%s15748_s4 + $0x60] sm:$0xff] }
 0x2a7   : > { %11875 = vmatpush3.msra.mxu1 %v14428_v57  ;;  %6258 = vmatpush1.msra.mxu0 %v6176_v28  ;;  %v8102_v43 = vpop.permute.xlu0 %8101 }
 0x2a8   : > { %v14444_v45 = vpop.permute.xlu1 %8103  ;;  %11876 = vmatprep.mubr.msk.f32.mxu1 %vm13061_vm2, %v13042_v0  ;;  %11291 = vmatmul.mubr.msk.f32.vlgmr.msra.gmra.mrb[6].mxu0 %vm449_vm0, %v14252_v37 }
 0x2a9   : > { %v8111_v4 = vsel %vm8109_vm3, %v8102_v43, %v14444_v45  ;;  %6563 = vmatprep.mubr.f32.mxu0 %v13042_v0 }
 0x2aa   : > { %8122 = vmatprep.subr.mxu1 %v8111_v4  ;;  %11877 = vmatmul.mubr.msk.f32.vlgmr.msra.gmra.mrb[6].mxu1 %vm449_vm0, %v14434_v38  ;;  %v8600_v4 = vld [vmem:[%s15748_s4 + $0x98] sm:$0xff] }
 0x2ab   : > { %v8100_v41 = vpop.permute.xlu0 %8099  ;;  %8186 = vmatprep.mubr.f32.mxu1 %v13042_v0 }
 0x2ac   : > { %v8110_v61 = vsel %vm8109_vm3, %v8100_v41, %v8102_v43  ;;  %v14462_v37 = vpop.permute.xlu1 %8107  ;;  %v8595_v43 = vld [vmem:[%s15748_s4 + $0x70] sm:$0xff] }
 0x2ad   : > { %8123 = vmatpush1.msra.mxu1 %v8110_v61  ;;  %v12298_v41 = vpack.c.bf16 %v8595_v43, %v8593_v9  ;;  %v8597_v61 = vld [vmem:[%s15748_s4 + $0x80] sm:$0xff]  ;;  %v8640_v9 = vld [vmem:[%s15748_s4 + $0x1d8] sm:$0xff] }
 0x2ae   : > { %11879 = vmatprep.subr.mxu1 %v13042_v0  ;;  %11322 = vmatmul.mubr.msk.f32.vlgmr.msra.gmra.mrb[4].mxu1 %vm449_vm0, %v14459_v59 }
 0x2af   : > { %v6412_v50 = vpop.permute.xlu0 %6411  ;;  %11880 = vmatpush3.msra.mxu1 %v14462_v37  ;;  %11881 = vmatprep.mubr.msk.f32.mxu1 %vm13061_vm2, %v13042_v0 }
 0x2b0   : > { %v6418_v51 = vsel %vm6415_vm10, %v14200_v22, %v6412_v50  ;;  %v8344_v52 = vpop.permute.xlu1 %8343  ;;  %v6419_v42 = vsel %vm6415_vm10, %v6412_v50, %v14287_v49  ;;  %v14486_v49 = vld [vmem:[%s15747_s3 + $0xf8] sm:$0xff]  ;;  %v8602_v50 = vld [vmem:[%s15748_s4 + $0xa8] sm:$0xff] }
 0x2b1   : > { %6499 = vmatprep.subr.mxu0 %v6419_v42 }
 0x2b2   : > { %6500 = vmatpush1.msra.mxu0 %v6418_v51  ;;  %11882 = vmatmul.mubr.msk.f32.vlgmr.msra.gmra.mrb[6].mxu1 %vm449_vm0, %v14459_v59  ;;  %v8604_v51 = vld [vmem:[%s15748_s4 + $0xb8] sm:$0xff] }
 0x2b3   : > { %v14476_v53 = vpop.permute.xlu0 %8345  ;;  %11295 = vmatmul.mubr.msk.f32.vlgmr.msra.gmra.mrb[6].mxu0 %vm449_vm0, %v14278_v18  ;;  %8428 = vmatprep.mubr.f32.mxu1 %v13042_v0  ;;  %v12304_v42 = vpack.c.bf16 %v8604_v51, %v8602_v50  ;;  %v8641_v51 = vld [vmem:[%s15748_s4 + $0x1e0] sm:$0xff] }
 0x2b4   : > { %v8342_v40 = vpop.permute.xlu1 %8341  ;;  %v8353_v22 = vsel %vm8351_vm4, %v8344_v52, %v14476_v53  ;;  %6805 = vmatprep.mubr.f32.mxu0 %v13042_v0 }
 0x2b5   : > { %v8352_v26 = vsel %vm8351_vm4, %v8342_v40, %v8344_v52  ;;  %8364 = vmatprep.subr.mxu1 %v8353_v22  ;;  %v8603_v40 = vld [vmem:[%s15748_s4 + $0xb0] sm:$0xff]  ;;  %v8606_v22 = vld [vmem:[%s15748_s4 + $0xc8] sm:$0xff] }
 0x2b6   : > { %8365 = vmatpush1.msra.mxu1 %v8352_v26 }
 0x2b7   : > { %v6654_v44 = vpop.permute.xlu0 %6653  ;;  %11326 = vmatmul.mubr.msk.f32.vlgmr.msra.gmra.mrb[4].mxu1 %vm449_vm0, %v14486_v49  ;;  %11884 = vmatprep.subr.mxu1 %v13042_v0 }
 0x2b8   : > { %v6660_v18 = vsel %vm6657_vm11, %v14235_v34, %v6654_v44  ;;  %v6896_v21 = vpop.permute.xlu1 %6895  ;;  %v6661_v58 = vsel %vm6657_vm11, %v6654_v44, %v14317_v54  ;;  %11886 = vmatprep.mubr.msk.f32.mxu1 %vm13061_vm2, %v13042_v0 }
 0x2b9   : > { %6741 = vmatprep.subr.mxu0 %v6661_v58  ;;  %v6903_v2 = vsel %vm6899_vm12, %v6896_v21, %v14338_v8  ;;  %v6902_v30 = vsel %vm6899_vm12, %v14273_v11, %v6896_v21  ;;  %v8607_v21 = vld [vmem:[%s15748_s4 + $0xd0] sm:$0xff]  ;;  %v8610_v58 = vld [vmem:[%s15748_s4 + $0xe8] sm:$0xff] }
 0x2ba   : > { %6742 = vmatpush1.msra.mxu0 %v6660_v18  ;;  %v8605_v18 = vld [vmem:[%s15748_s4 + $0xc0] sm:$0xff] }
 0x2bb   : > { %v7138_v36 = vpop.permute.xlu0 %7137  ;;  %11299 = vmatmul.mubr.msk.f32.vlgmr.msra.gmra.mrb[6].mxu0 %vm449_vm0, %v14304_v46  ;;  %6983 = vmatprep.subr.mxu0 %v6903_v2  ;;  %v8612_v2 = vld [vmem:[%s15748_s4 + $0xf8] sm:$0xff] }
 0x2bc   : > { %6984 = vmatpush1.msra.mxu0 %v6902_v30  ;;  %v7145_v34 = vsel %vm7141_vm13, %v7138_v36, %v14368_v31  ;;  %7047 = vmatprep.mubr.f32.mxu0 %v13042_v0  ;;  %v7380_v60 = vpop.permute.xlu1 %7379  ;;  %v7144_v8 = vsel %vm7141_vm13, %v14306_v47, %v7138_v36  ;;  %v12310_v30 = vpack.c.bf16 %v8607_v21, %v8605_v18  ;;  %v8652_v18 = vld [vmem:[%s15748_s4 + $0x238] sm:$0xff] }
 0x2bd   : > { %7225 = vmatprep.subr.mxu0 %v7145_v34  ;;  %v7387_v11 = vsel %vm7383_vm14, %v7380_v60, %v14390_v23  ;;  %v7386_v47 = vsel %vm7383_vm14, %v14351_v3, %v7380_v60  ;;  %v8583_v23 = vld [vmem:[%s15748_s4 + $0x10] sm:$0xff]  ;;  %v12312_v36 = vpack.c.bf16 %v8612_v2, %v8610_v58  ;;  %v8609_v34 = vld [vmem:[%s15748_s4 + $0xe0] sm:$0xff]  ;;  %v8614_v60 = vld [vmem:[%s15748_s4 + $0x108] sm:$0xff] }
 0x2bf   : > { %v7622_v54 = vpop.permute.xlu0 %7621 }
 0x2c0   : > { %v7864_v16 = vpop.permute.xlu1 %7863  ;;  %v7628_v15 = vsel %vm7625_vm15, %v14385_v5, %v7622_v54  ;;  %v8581_v5 = vld [vmem:[%s15748_s4] sm:$0xff] }
 0x2c1   : > { %v7871_v3 = vsel %vm7867_vm1, %v7864_v16, %v14428_v57  ;;  %v12286_v24 = vpack.c.bf16 %v8583_v23, %v8581_v5  ;;  %v8594_v57 = vld [vmem:[%s15748_s4 + $0x68] sm:$0xff]  ;;  %v8628_v5 = vld [vmem:[%s15748_s4 + $0x178] sm:$0xff] }
 0x2c3   : > { %v8106_v10 = vpop.permute.xlu0 %8105  ;;  %11303 = vmatmul.mubr.msk.f32.vlgmr.msra.gmra.mrb[6].mxu0 %vm449_vm0, %v14329_v62  ;;  %v7629_v62 = vsel %vm7625_vm15, %v7622_v54, %v14394_v12  ;;  %v8586_v12 = vld [vmem:[%s15748_s4 + $0x28] sm:$0xff]  ;;  %v8611_v54 = vld [vmem:[%s15748_s4 + $0xf0] sm:$0xff] }
 0x2c4   : > { %7226 = vmatpush1.msra.mxu0 %v7144_v8  ;;  %7289 = vmatprep.mubr.f32.mxu0 %v13042_v0  ;;  %v8113_v1 = vsel %vm8109_vm3, %v8106_v10, %v14462_v37  ;;  %v8112_v56 = vsel %vm8109_vm3, %v14444_v45, %v8106_v10  ;;  %v8348_v17 = vpop.permute.xlu1 %8347  ;;  %v12288_v25 = vpack.c.bf16 %v8588_v14, %v8586_v12  ;;  %v8598_v45 = vld [vmem:[%s15748_s4 + $0x88] sm:$0xff]  ;;  %v8599_v37 = vld [vmem:[%s15748_s4 + $0x90] sm:$0xff]  ;;  %v8616_v8 = vld [vmem:[%s15748_s4 + $0x118] sm:$0xff] }
 0x2c5   : > { %7467 = vmatprep.subr.mxu0 %v7387_v11  ;;  %v12302_v52 = vpack.c.bf16 %v8599_v37, %v8597_v61  ;;  %v12314_v10 = vpack.c.bf16 %v8611_v54, %v8609_v34  ;;  %v12316_v11 = vpack.c.bf16 %v8616_v8, %v8614_v60  ;;  %v8625_v14 = vld [vmem:[%s15748_s4 + $0x160] sm:$0xff]  ;;  %v8644_v61 = vld [vmem:[%s15748_s4 + $0x1f8] sm:$0xff]  ;;  %v8651_v34 = vld [vmem:[%s15748_s4 + $0x230] sm:$0xff] }
 0x2c6   : > { %v8654_v54 = vld [vmem:[%s15748_s4 + $0x248] sm:$0xff]  ;;  %v8656_v60 = vld [vmem:[%s15748_s4 + $0x258] sm:$0xff] }
 0x2c7   : > { %v8350_v46 = vpop.permute.xlu0 %8349 }
 0x2c8   : > { %11885 = vmatpush3.msra.mxu1 %v8350_v46  ;;  %v8355_v31 = vsel %vm8351_vm4, %v8348_v17, %v8350_v46  ;;  %v8613_v46 = vld [vmem:[%s15748_s4 + $0x100] sm:$0xff] }
 0x2c9   : > { %11887 = vmatmul.mubr.msk.f32.vlgmr.msra.gmra.mrb[6].mxu1 %vm449_vm0, %v14486_v49  ;;  %11889 = vmatprep.subr.mxu1 %v13042_v0 }
 0x2ca   : > { %11891 = vmatprep.mubr.msk.f32.mxu1 %vm13061_vm2, %v13042_v0 }
 0x2cb   : > { %11307 = vmatmul.mubr.msk.f32.vlgmr.msra.gmra.mrb[6].mxu0 %vm449_vm0, %v14357_v13  ;;  %v7870_v13 = vsel %vm7867_vm1, %v14416_v63, %v7864_v16  ;;  %v8620_v16 = vld [vmem:[%s15748_s4 + $0x138] sm:$0xff] }
 0x2cc   : > { %7468 = vmatpush1.msra.mxu0 %v7386_v47  ;;  %7531 = vmatprep.mubr.f32.mxu0 %v13042_v0  ;;  %v8615_v47 = vld [vmem:[%s15748_s4 + $0x110] sm:$0xff] }
 0x2cd   : > { %7709 = vmatprep.subr.mxu0 %v7629_v62  ;;  %v8618_v62 = vld [vmem:[%s15748_s4 + $0x128] sm:$0xff] }
 0x2d3   : > { %11311 = vmatmul.mubr.msk.f32.vlgmr.msra.gmra.mrb[6].mxu0 %vm449_vm0, %v14383_v20  ;;  %v8354_v20 = vsel %vm8351_vm4, %v14476_v53, %v8348_v17  ;;  %v8601_v53 = vld [vmem:[%s15748_s4 + $0xa0] sm:$0xff]  ;;  %v8624_v17 = vld [vmem:[%s15748_s4 + $0x158] sm:$0xff] }
 0x2d4   : > { %7710 = vmatpush1.msra.mxu0 %v7628_v15  ;;  %7773 = vmatprep.mubr.f32.mxu0 %v13042_v0  ;;  %v12306_v26 = vpack.c.bf16 %v8603_v40, %v8601_v53  ;;  %v12318_v15 = vpack.c.bf16 %v8615_v47, %v8613_v46  ;;  %v8648_v53 = vld [vmem:[%s15748_s4 + $0x218] sm:$0xff]  ;;  %v8655_v46 = vld [vmem:[%s15748_s4 + $0x250] sm:$0xff]  ;;  %v8658_v47 = vld [vmem:[%s15748_s4 + $0x268] sm:$0xff] }
 0x2d5   : > { %7951 = vmatprep.subr.mxu0 %v7871_v3  ;;  %v12320_v3 = vpack.c.bf16 %v8620_v16, %v8618_v62  ;;  %v8660_v62 = vld [vmem:[%s15748_s4 + $0x278] sm:$0xff] }
 0x2db   : > { %11315 = vmatmul.mubr.msk.f32.vlgmr.msra.gmra.mrb[6].mxu0 %vm449_vm0, %v14406_v27  ;;  %v8585_v27 = vld [vmem:[%s15748_s4 + $0x20] sm:$0xff] }
 0x2dc   : > { %7952 = vmatpush1.msra.mxu0 %v7870_v13  ;;  %8015 = vmatprep.mubr.f32.mxu0 %v13042_v0  ;;  %v12290_v63 = vpack.c.bf16 %v8587_v32, %v8585_v27  ;;  %v8617_v13 = vld [vmem:[%s15748_s4 + $0x120] sm:$0xff]  ;;  %v8632_v27 = vld [vmem:[%s15748_s4 + $0x198] sm:$0xff] }
 0x2dd   : > { %8193 = vmatprep.subr.mxu0 %v8113_v1  ;;  %v8619_v1 = vld [vmem:[%s15748_s4 + $0x130] sm:$0xff] }
 0x2e3   : > { %11319 = vmatmul.mubr.msk.f32.vlgmr.msra.gmra.mrb[6].mxu0 %vm449_vm0, %v14434_v38  ;;  %v8596_v38 = vld [vmem:[%s15748_s4 + $0x78] sm:$0xff] }
 0x2e4   : > { %8194 = vmatpush1.msra.mxu0 %v8112_v56  ;;  %8257 = vmatprep.mubr.f32.mxu0 %v13042_v0  ;;  %v12296_v28 = vpack.c.bf16 %v8596_v38, %v8594_v57  ;;  %v8622_v56 = vld [vmem:[%s15748_s4 + $0x148] sm:$0xff]  ;;  %v8633_v38 = vld [vmem:[%s15748_s4 + $0x1a0] sm:$0xff] }
 0x2e5   : > { %8435 = vmatprep.subr.mxu0 %v8355_v31  ;;  %v12322_v31 = vpack.c.bf16 %v8619_v1, %v8617_v13  ;;  %v12324_v48 = vpack.c.bf16 %v8624_v17, %v8622_v56  ;;  %v8659_v13 = vld [vmem:[%s15748_s4 + $0x270] sm:$0xff]  ;;  %v8662_v1 = vld [vmem:[%s15748_s4 + $0x288] sm:$0xff]  ;;  %v8664_v56 = vld [vmem:[%s15748_s4 + $0x298] sm:$0xff] }
 0x2eb   : > { %11323 = vmatmul.mubr.msk.f32.vlgmr.msra.gmra.mrb[6].mxu0 %vm449_vm0, %v14459_v59  ;;  %v12300_v59 = vpack.c.bf16 %v8600_v4, %v8598_v45  ;;  %v8637_v4 = vld [vmem:[%s15748_s4 + $0x1c0] sm:$0xff] }
 0x2ec   : > { %8436 = vmatpush1.msra.mxu0 %v8354_v20  ;;  %8499 = vmatprep.mubr.f32.mxu0 %v13042_v0  ;;  %v8626_v20 = vld [vmem:[%s15748_s4 + $0x168] sm:$0xff] }
 0x2ed   : > { %12285 = vmatprep.subr.bf16.mxu0 %v12284_v19  ;;  %v8623_v19 = vld [vmem:[%s15748_s4 + $0x150] sm:$0xff]  ;;  %v12328_v12 = vpack.c.bf16 %v8628_v5, %v8626_v20  ;;  %v8668_v20 = vld [vmem:[%s15748_s4 + $0x2b8] sm:$0xff] }
 0x2ee   : > { %v12326_v23 = vpack.c.bf16 %v8623_v19, %v8621_v55  ;;  %v8663_v55 = vld [vmem:[%s15748_s4 + $0x290] sm:$0xff]  ;;  %v8666_v19 = vld [vmem:[%s15748_s4 + $0x2a8] sm:$0xff] }
 0x2f3   : > { %11327 = vmatmul.mubr.msk.f32.vlgmr.msra.gmra.mrb[6].mxu0 %vm449_vm0, %v14486_v49  ;;  %v8608_v49 = vld [vmem:[%s15748_s4 + $0xd8] sm:$0xff] }
 0x2f4   : > { %12287 = vmatpush1.bf16.msra.mxu0 %v12286_v24  ;;  %v12308_v44 = vpack.c.bf16 %v8608_v49, %v8606_v22  ;;  %v8627_v24 = vld [vmem:[%s15748_s4 + $0x170] sm:$0xff]  ;;  %v8645_v49 = vld [vmem:[%s15748_s4 + $0x200] sm:$0xff] }
 0x2f5   : > { %12289 = vmatprep.subr.bf16.mxu0 %v12288_v25  ;;  %v8630_v25 = vld [vmem:[%s15748_s4 + $0x188] sm:$0xff]  ;;  %v12330_v32 = vpack.c.bf16 %v8627_v24, %v8625_v14  ;;  %v8667_v14 = vld [vmem:[%s15748_s4 + $0x2b0] sm:$0xff] }
 0x2f6   : > { %v12332_v33 = vpack.c.bf16 %v8632_v27, %v8630_v25  ;;  %v8670_v25 = vld [vmem:[%s15748_s4 + $0x2c8] sm:$0xff]  ;;  %v8672_v27 = vld [vmem:[%s15748_s4 + $0x2d8] sm:$0xff] }
 0x2f8   : > { %12291 = vmatpush1.bf16.msra.mxu0 %v12290_v63  ;;  %v8631_v63 = vld [vmem:[%s15748_s4 + $0x190] sm:$0xff] }
 0x2f9   : > { %12293 = vmatprep.subr.bf16.mxu0 %v12292_v29  ;;  %v8634_v29 = vld [vmem:[%s15748_s4 + $0x1a8] sm:$0xff]  ;;  %v12334_v7 = vpack.c.bf16 %v8631_v63, %v8629_v6  ;;  %v12372_v6 = vpack.c.bf16 %v8672_v27, %v8670_v25  ;;  %v8669_v63 = vld [vmem:[%s15748_s4 + $0x2c0] sm:$0xff]  ;;  %v8712_v25 = vld [vmem:[%s15748_s4 + $0x418] sm:$0xff] }
 0x2fa   : > { %v12336_v57 = vpack.c.bf16 %v8636_v35, %v8634_v29  ;;  %v8671_v29 = vld [vmem:[%s15748_s4 + $0x2d0] sm:$0xff]  ;;  %v8674_v35 = vld [vmem:[%s15748_s4 + $0x2e8] sm:$0xff] }
 0x2fc   : > { %12295 = vmatpush1.bf16.msra.mxu0 %v12294_v39  ;;  %v8635_v39 = vld [vmem:[%s15748_s4 + $0x1b0] sm:$0xff] }
 0x2fd   : > { %12297 = vmatprep.subr.bf16.mxu0 %v12296_v28  ;;  %v8638_v28 = vld [vmem:[%s15748_s4 + $0x1c8] sm:$0xff]  ;;  %v12338_v43 = vpack.c.bf16 %v8635_v39, %v8633_v38  ;;  %v8673_v39 = vld [vmem:[%s15748_s4 + $0x2e0] sm:$0xff] }
 0x2fe   : > { %v12340_v45 = vpack.c.bf16 %v8640_v9, %v8638_v28  ;;  %v8675_v28 = vld [vmem:[%s15748_s4 + $0x2f0] sm:$0xff]  ;;  %v8678_v9 = vld [vmem:[%s15748_s4 + $0x308] sm:$0xff] }
 0x300   : > { %12299 = vmatpush1.bf16.msra.mxu0 %v12298_v41  ;;  %v8639_v41 = vld [vmem:[%s15748_s4 + $0x1d0] sm:$0xff] }
 0x301   : > { %12301 = vmatprep.subr.bf16.mxu0 %v12300_v59  ;;  %v8642_v59 = vld [vmem:[%s15748_s4 + $0x1e8] sm:$0xff]  ;;  %v12342_v37 = vpack.c.bf16 %v8639_v41, %v8637_v4  ;;  %v8677_v41 = vld [vmem:[%s15748_s4 + $0x300] sm:$0xff] }
 0x302   : > { %v12344_v50 = vpack.c.bf16 %v8644_v61, %v8642_v59  ;;  %v8679_v59 = vld [vmem:[%s15748_s4 + $0x310] sm:$0xff]  ;;  %v8682_v61 = vld [vmem:[%s15748_s4 + $0x328] sm:$0xff] }
 0x304   : > { %12303 = vmatpush1.bf16.msra.mxu0 %v12302_v52  ;;  %v8643_v52 = vld [vmem:[%s15748_s4 + $0x1f0] sm:$0xff] }
 0x305   : > { %12305 = vmatprep.subr.bf16.mxu0 %v12304_v42  ;;  %v8646_v42 = vld [vmem:[%s15748_s4 + $0x208] sm:$0xff]  ;;  %v12346_v40 = vpack.c.bf16 %v8643_v52, %v8641_v51  ;;  %v8681_v52 = vld [vmem:[%s15748_s4 + $0x320] sm:$0xff] }
 0x306   : > { %v12348_v22 = vpack.c.bf16 %v8648_v53, %v8646_v42  ;;  %v8683_v42 = vld [vmem:[%s15748_s4 + $0x330] sm:$0xff]  ;;  %v8686_v53 = vld [vmem:[%s15748_s4 + $0x348] sm:$0xff] }
 0x308   : > { %12307 = vmatpush1.bf16.msra.mxu0 %v12306_v26  ;;  %v8647_v26 = vld [vmem:[%s15748_s4 + $0x210] sm:$0xff] }
 0x309   : > { %12309 = vmatprep.subr.bf16.mxu0 %v12308_v44  ;;  %v8650_v44 = vld [vmem:[%s15748_s4 + $0x228] sm:$0xff]  ;;  %v12350_v58 = vpack.c.bf16 %v8647_v26, %v8645_v49  ;;  %v8685_v26 = vld [vmem:[%s15748_s4 + $0x340] sm:$0xff] }
 0x30c   : > { %12311 = vmatpush1.bf16.msra.mxu0 %v12310_v30  ;;  %v12352_v30 = vpack.c.bf16 %v8652_v18, %v8650_v44  ;;  %v8687_v44 = vld [vmem:[%s15748_s4 + $0x350] sm:$0xff]  ;;  %v8690_v18 = vld [vmem:[%s15748_s4 + $0x368] sm:$0xff] }
 0x30d   : > { %12313 = vmatprep.subr.bf16.mxu0 %v12312_v36  ;;  %v8649_v36 = vld [vmem:[%s15748_s4 + $0x220] sm:$0xff] }
 0x30e   : > { %v12354_v8 = vpack.c.bf16 %v8651_v34, %v8649_v36  ;;  %v8691_v36 = vld [vmem:[%s15748_s4 + $0x370] sm:$0xff]  ;;  %v8694_v34 = vld [vmem:[%s15748_s4 + $0x388] sm:$0xff] }
 0x310   : > { %12315 = vmatpush1.bf16.msra.mxu0 %v12314_v10  ;;  %v12356_v10 = vpack.c.bf16 %v8656_v60, %v8654_v54  ;;  %v8696_v54 = vld [vmem:[%s15748_s4 + $0x398] sm:$0xff] }
 0x311   : > { %12317 = vmatprep.subr.bf16.mxu0 %v12316_v11  ;;  %v8653_v11 = vld [vmem:[%s15748_s4 + $0x240] sm:$0xff] }
 0x312   : > { %v12358_v16 = vpack.c.bf16 %v8655_v46, %v8653_v11  ;;  %v8695_v11 = vld [vmem:[%s15748_s4 + $0x390] sm:$0xff]  ;;  %v8698_v46 = vld [vmem:[%s15748_s4 + $0x3a8] sm:$0xff] }
 0x314   : > { %12319 = vmatpush1.bf16.msra.mxu0 %v12318_v15  ;;  %v12360_v15 = vpack.c.bf16 %v8660_v62, %v8658_v47  ;;  %v8700_v47 = vld [vmem:[%s15748_s4 + $0x3b8] sm:$0xff] }
 0x315   : > { %12321 = vmatprep.subr.bf16.mxu0 %v12320_v3  ;;  %v8657_v3 = vld [vmem:[%s15748_s4 + $0x260] sm:$0xff] }
 0x316   : > { %v12362_v17 = vpack.c.bf16 %v8659_v13, %v8657_v3  ;;  %v8699_v3 = vld [vmem:[%s15748_s4 + $0x3b0] sm:$0xff]  ;;  %v8702_v13 = vld [vmem:[%s15748_s4 + $0x3c8] sm:$0xff] }
 0x318   : > { %12323 = vmatpush1.bf16.msra.mxu0 %v12322_v31  ;;  %v12364_v31 = vpack.c.bf16 %v8664_v56, %v8662_v1  ;;  %v8704_v1 = vld [vmem:[%s15748_s4 + $0x3d8] sm:$0xff] }
 0x319   : > { %12325 = vmatprep.subr.bf16.mxu0 %v12324_v48  ;;  %v8661_v48 = vld [vmem:[%s15748_s4 + $0x280] sm:$0xff] }
 0x31a   : > { %v12366_v5 = vpack.c.bf16 %v8663_v55, %v8661_v48  ;;  %v8703_v48 = vld [vmem:[%s15748_s4 + $0x3d0] sm:$0xff]  ;;  %v8706_v55 = vld [vmem:[%s15748_s4 + $0x3e8] sm:$0xff] }
 0x31c   : > { %12327 = vmatpush1.bf16.msra.mxu0 %v12326_v23  ;;  %v12368_v23 = vpack.c.bf16 %v8668_v20, %v8666_v19  ;;  %v8708_v19 = vld [vmem:[%s15748_s4 + $0x3f8] sm:$0xff] }
 0x31d   : > { %12329 = vmatprep.subr.bf16.mxu0 %v12328_v12  ;;  %v8665_v12 = vld [vmem:[%s15748_s4 + $0x2a0] sm:$0xff] }
 0x320   : > { %12331 = vmatpush1.bf16.msra.mxu0 %v12330_v32 }
 0x321   : > { %12333 = vmatprep.subr.bf16.mxu0 %v12332_v33  ;;  %v12370_v33 = vpack.c.bf16 %v8667_v14, %v8665_v12  ;;  %v8707_v12 = vld [vmem:[%s15748_s4 + $0x3f0] sm:$0xff]  ;;  %v8710_v14 = vld [vmem:[%s15748_s4 + $0x408] sm:$0xff] }
 0x324   : > { %12335 = vmatpush1.bf16.msra.mxu0 %v12334_v7  ;;  %v8676_v7 = vld [vmem:[%s15748_s4 + $0x2f8] sm:$0xff] }
 0x325   : > { %12337 = vmatprep.subr.bf16.mxu0 %v12336_v57  ;;  %v12374_v57 = vpack.c.bf16 %v8671_v29, %v8669_v63  ;;  %v12376_v38 = vpack.c.bf16 %v8676_v7, %v8674_v35  ;;  %v8709_v63 = vld [vmem:[%s15748_s4 + $0x400] sm:$0xff]  ;;  %v8711_v29 = vld [vmem:[%s15748_s4 + $0x410] sm:$0xff]  ;;  %v8714_v35 = vld [vmem:[%s15748_s4 + $0x428] sm:$0xff] }
 0x326   : > { %v8716_v7 = vld [vmem:[%s15748_s4 + $0x438] sm:$0xff] }
 0x328   : > { %12339 = vmatpush1.bf16.msra.mxu0 %v12338_v43  ;;  %v8680_v43 = vld [vmem:[%s15748_s4 + $0x318] sm:$0xff] }
 0x329   : > { %12341 = vmatprep.subr.bf16.mxu0 %v12340_v45  ;;  %v12378_v45 = vpack.c.bf16 %v8675_v28, %v8673_v39  ;;  %v12380_v4 = vpack.c.bf16 %v8680_v43, %v8678_v9  ;;  %v8713_v39 = vld [vmem:[%s15748_s4 + $0x420] sm:$0xff]  ;;  %v8715_v28 = vld [vmem:[%s15748_s4 + $0x430] sm:$0xff]  ;;  %v8718_v9 = vld [vmem:[%s15748_s4 + $0x448] sm:$0xff] }
 0x32a   : > { %v8720_v43 = vld [vmem:[%s15748_s4 + $0x458] sm:$0xff] }
 0x32c   : > { %12343 = vmatpush1.bf16.msra.mxu0 %v12342_v37  ;;  %v8684_v37 = vld [vmem:[%s15748_s4 + $0x338] sm:$0xff] }
 0x32d   : > { %12345 = vmatprep.subr.bf16.mxu0 %v12344_v50  ;;  %v12382_v50 = vpack.c.bf16 %v8679_v59, %v8677_v41  ;;  %v12384_v51 = vpack.c.bf16 %v8684_v37, %v8682_v61  ;;  %v8717_v41 = vld [vmem:[%s15748_s4 + $0x440] sm:$0xff]  ;;  %v8719_v59 = vld [vmem:[%s15748_s4 + $0x450] sm:$0xff]  ;;  %v8722_v37 = vld [vmem:[%s15748_s4 + $0x468] sm:$0xff] }
 0x32e   : > { %v12422_v61 = vpack.c.bf16 %v8719_v59, %v8717_v41  ;;  %v11360_v41 = vld [vmem:[%s15750_s6 + $0x78] sm:$0xff]  ;;  %v10222_v59 = vld [vmem:[%s15751_s7 + $0x60] sm:$0xff] }
 0x330   : > { %12347 = vmatpush1.bf16.msra.mxu0 %v12346_v40  ;;  %v8688_v40 = vld [vmem:[%s15748_s4 + $0x358] sm:$0xff] }
 0x331   : > { %12349 = vmatprep.subr.bf16.mxu0 %v12348_v22  ;;  %v12386_v22 = vpack.c.bf16 %v8683_v42, %v8681_v52  ;;  %v12388_v49 = vpack.c.bf16 %v8688_v40, %v8686_v53  ;;  %v8941_v42 = vld [vmem:[%s15749_s5] sm:$0xff] }
 0x38a   : > { %v8430_v21 = vpop.f32.mrb[4].mxu1 }
 0x38b   : > { %v8432_v2 = vpop.f32.mrb[5].mxu1 }
 0x38c   : > { %8791 = vmatprep.mubr.f32.mxu0 %v8432_v2 }
 0x38d   : > { %8792 = vmatmul.mubr.f32.vlgmr.msra.gmra.mrb[8].mxu0 %v8430_v21  ;;  %v8692_v21 = vld [vmem:[%s15748_s4 + $0x378] sm:$0xff] }
 0x38e   : > { %12351 = vmatpush1.bf16.msra.mxu0 %v12350_v58  ;;  %v12390_v58 = vpack.c.bf16 %v8687_v44, %v8685_v26  ;;  %v12392_v2 = vpack.c.bf16 %v8692_v21, %v8690_v18  ;;  %v10213_v18 = vld [vmem:[%s15751_s7 + $0x18] sm:$0xff]  ;;  %v10210_v21 = vld [vmem:[%s15751_s7] sm:$0xff] }
 0x38f   : > { %12353 = vmatprep.subr.bf16.mxu0 %v12352_v30  ;;  %v8689_v30 = vld [vmem:[%s15748_s4 + $0x360] sm:$0xff] }
 0x390   : > { %v12394_v60 = vpack.c.bf16 %v8691_v36, %v8689_v30  ;;  %v10215_v30 = vld [vmem:[%s15751_s7 + $0x28] sm:$0xff]  ;;  %v10217_v36 = vld [vmem:[%s15751_s7 + $0x38] sm:$0xff] }
 0x392   : > { %12355 = vmatpush1.bf16.msra.mxu0 %v12354_v8  ;;  %v12396_v8 = vpack.c.bf16 %v8696_v54, %v8694_v34  ;;  %v12428_v54 = vpack.c.bf16 %v10217_v36, %v10215_v30  ;;  %v11384_v30 = vld [vmem:[%s15753_s9 + $0x120] sm:$0xff] }
 0x393   : > { %12357 = vmatprep.subr.bf16.mxu0 %v12356_v10  ;;  %v8693_v10 = vld [vmem:[%s15748_s4 + $0x380] sm:$0xff] }
 0x394   : > { %v12398_v62 = vpack.c.bf16 %v8695_v11, %v8693_v10  ;;  %v10219_v10 = vld [vmem:[%s15751_s7 + $0x48] sm:$0xff]  ;;  %v10221_v11 = vld [vmem:[%s15751_s7 + $0x58] sm:$0xff] }
 0x396   : > { %12359 = vmatpush1.bf16.msra.mxu0 %v12358_v16  ;;  %v12400_v16 = vpack.c.bf16 %v8700_v47, %v8698_v46  ;;  %v11331_v46 = vld [vmem:[%s15750_s6 + $0x8] sm:$0xff] }
 0x397   : > { %12361 = vmatprep.subr.bf16.mxu0 %v12360_v15  ;;  %v8697_v15 = vld [vmem:[%s15748_s4 + $0x3a0] sm:$0xff] }
 0x398   : > { %v12402_v56 = vpack.c.bf16 %v8699_v3, %v8697_v15  ;;  %v10218_v15 = vld [vmem:[%s15751_s7 + $0x40] sm:$0xff]  ;;  %v10220_v3 = vld [vmem:[%s15751_s7 + $0x50] sm:$0xff] }
 0x39a   : > { %12363 = vmatpush1.bf16.msra.mxu0 %v12362_v17  ;;  %v12404_v17 = vpack.c.bf16 %v8704_v1, %v8702_v13  ;;  %v12434_v13 = vpack.c.bf16 %v10220_v3, %v10218_v15  ;;  %v10223_v1 = vld [vmem:[%s15751_s7 + $0x68] sm:$0xff]  ;;  %v11388_v15 = vld [vmem:[%s15753_s9 + $0x140] sm:$0xff] }
 0x39b   : > { %12365 = vmatprep.subr.bf16.mxu0 %v12364_v31  ;;  %v8701_v31 = vld [vmem:[%s15748_s4 + $0x3c0] sm:$0xff] }
 0x39c   : > { %v14818_v24 = vpop.f32.mrb[6].mxu1  ;;  %v12406_v20 = vpack.c.bf16 %v8703_v48, %v8701_v31  ;;  %v11334_v31 = vld [vmem:[%s15750_s6 + $0x10] sm:$0xff] }
 0x39d   : > { %v11888_v32 = vpop.f32.mrb[7].mxu1 }
 0x39e   : > { %12367 = vmatpush1.bf16.msra.mxu0 %v12366_v5  ;;  %v12408_v5 = vpack.c.bf16 %v8708_v19, %v8706_v55  ;;  %v11336_v55 = vld [vmem:[%s15750_s6 + $0x18] sm:$0xff] }
 0x39f   : > { %12369 = vmatprep.subr.bf16.mxu0 %v12368_v23  ;;  %v8705_v23 = vld [vmem:[%s15748_s4 + $0x3e0] sm:$0xff] }
 0x3a0   : > { %v12410_v32 = vpack.c.bf16 %v8707_v12, %v8705_v23  ;;  %v11340_v23 = vld [vmem:[%s15750_s6 + $0x28] sm:$0xff] }
 0x3a2   : > { %12371 = vmatpush1.bf16.msra.mxu0 %v12370_v33 }
 0x3a3   : > { %12373 = vmatprep.subr.bf16.mxu0 %v12372_v6  ;;  %v12412_v6 = vpack.c.bf16 %v8712_v25, %v8710_v14  ;;  %v11342_v14 = vld [vmem:[%s15750_s6 + $0x30] sm:$0xff] }
 0x3a6   : > { %12375 = vmatpush1.bf16.msra.mxu0 %v12374_v57  ;;  %v12414_v57 = vpack.c.bf16 %v8711_v29, %v8709_v63  ;;  %v11348_v63 = vld [vmem:[%s15750_s6 + $0x48] sm:$0xff] }
 0x3a7   : > { %12377 = vmatprep.subr.bf16.mxu0 %v12376_v38  ;;  %v12416_v38 = vpack.c.bf16 %v8716_v7, %v8714_v35  ;;  %v11350_v35 = vld [vmem:[%s15750_s6 + $0x50] sm:$0xff] }
 0x3aa   : > { %12379 = vmatpush1.bf16.msra.mxu0 %v12378_v45  ;;  %v12418_v45 = vpack.c.bf16 %v8715_v28, %v8713_v39  ;;  %v11354_v39 = vld [vmem:[%s15750_s6 + $0x60] sm:$0xff] }
 0x3ab   : > { %12381 = vmatprep.subr.bf16.mxu0 %v12380_v4  ;;  %v12420_v4 = vpack.c.bf16 %v8720_v43, %v8718_v9  ;;  %v11356_v9 = vld [vmem:[%s15750_s6 + $0x68] sm:$0xff] }
 0x3ae   : > { %12383 = vmatpush1.bf16.msra.mxu0 %v12382_v50  ;;  %v8721_v50 = vld [vmem:[%s15748_s4 + $0x460] sm:$0xff] }
 0x3af   : > { %12385 = vmatprep.subr.bf16.mxu0 %v12384_v51 }
 0x3b2   : > { %12387 = vmatpush1.bf16.msra.mxu0 %v12386_v22 }
 0x3b3   : > { %12389 = vmatprep.subr.bf16.mxu0 %v12388_v49 }
 0x3b6   : > { %12391 = vmatpush1.bf16.msra.mxu0 %v12390_v58 }
 0x3b7   : > { %12393 = vmatprep.subr.bf16.mxu0 %v12392_v2  ;;  %v10212_v2 = vld [vmem:[%s15751_s7 + $0x10] sm:$0xff] }
 0x3b8   : > { %v12426_v34 = vpack.c.bf16 %v10212_v2, %v10210_v21  ;;  %v11369_v2 = vld [vmem:[%s15753_s9 + $0xa8] sm:$0xff] }
 0x3ba   : > { %12395 = vmatpush1.bf16.msra.mxu0 %v12394_v60  ;;  %v10214_v60 = vld [vmem:[%s15751_s7 + $0x20] sm:$0xff] }
 0x3bb   : > { %12397 = vmatprep.subr.bf16.mxu0 %v12396_v8  ;;  %v10216_v8 = vld [vmem:[%s15751_s7 + $0x30] sm:$0xff] }
 0x3be   : > { %12399 = vmatpush1.bf16.msra.mxu0 %v12398_v62  ;;  %v12430_v62 = vpack.c.bf16 %v10216_v8, %v10214_v60  ;;  %v11370_v60 = vld [vmem:[%s15753_s9 + $0xb0] sm:$0xff]  ;;  %v11371_v8 = vld [vmem:[%s15753_s9 + $0xb8] sm:$0xff] }
 0x3bf   : > { %12401 = vmatprep.subr.bf16.mxu0 %v12400_v16  ;;  %v12432_v16 = vpack.c.bf16 %v10221_v11, %v10219_v10  ;;  %v11386_v10 = vld [vmem:[%s15753_s9 + $0x130] sm:$0xff]  ;;  %v12446_v11 = vpack.c.bf16 %v11371_v8, %v11370_v60  ;;  %v11419_v60 = vld [vmem:[%s15753_s9 + $0x238] sm:$0xff] }
 0x3c2   : > { %12403 = vmatpush1.bf16.msra.mxu0 %v12402_v56  ;;  %v8950_v56 = vld [vmem:[%s15750_s6] sm:$0xff] }
 0x3c3   : > { %12405 = vmatprep.subr.bf16.mxu0 %v12404_v17 }
 0x3c6   : > { %12407 = vmatpush1.bf16.msra.mxu0 %v12406_v20  ;;  %v8501_v27 = vpop.f32.mrb[6].mxu0  ;;  %v11338_v20 = vld [vmem:[%s15750_s6 + $0x20] sm:$0xff] }
 0x3c7   : > { %v8503_v33 = vpop.f32.mrb[7].mxu0  ;;  %12409 = vmatprep.subr.bf16.mxu0 %v12408_v5 }
 0x3c8   : > { %8862 = vmatprep.mubr.f32.mxu0 %v8503_v33  ;;  %v11346_v33 = vld [vmem:[%s15750_s6 + $0x40] sm:$0xff] }
 0x3ca   : > { %12411 = vmatpush1.bf16.msra.mxu0 %v12410_v32 }
 0x3cb   : > { %12413 = vmatprep.subr.bf16.mxu0 %v12412_v6 }
 0x3cd   : > { %8863 = vmatmul.mubr.f32.vlgmr.msra.gmra.mrb[8].mxu0 %v8501_v27  ;;  %v11344_v27 = vld [vmem:[%s15750_s6 + $0x38] sm:$0xff] }
 0x3ce   : > { %12415 = vmatpush1.bf16.msra.mxu0 %v12414_v57  ;;  %8933 = vmatprep.mubr.f32.mxu0 %v13042_v0  ;;  %v11352_v57 = vld [vmem:[%s15750_s6 + $0x58] sm:$0xff] }
 0x3cf   : > { %12417 = vmatprep.subr.bf16.mxu0 %v12416_v38 }
 0x3d2   : > { %12419 = vmatpush1.bf16.msra.mxu0 %v12418_v45  ;;  %v11358_v45 = vld [vmem:[%s15750_s6 + $0x70] sm:$0xff] }
 0x3d3   : > { %12421 = vmatprep.subr.bf16.mxu0 %v12420_v4 }
 0x3d6   : > { %12423 = vmatpush1.bf16.msra.mxu0 %v12422_v61 }
 0x3d7   : > { %8881 = vmatprep.subr.mxu0 %v8722_v37 }
 0x3da   : > { %8882 = vmatpush1.msra.mxu0 %v8721_v50  ;;  %v11364_v50 = vld [vmem:[%s15753_s9 + $0x80] sm:$0xff] }
 0x3db   : > { %11329 = vmatmul.mubr.msk.f32.vlgmr.msra.gmra.mrb[8].mxu0 %vm8723_vm5, %v14818_v24  ;;  %v10211_v24 = vld [vmem:[%s15751_s7 + $0x8] sm:$0xff] }
 0x3dc   : > { %10291 = vmatprep.mubr.f32.mxu0 %v13042_v0  ;;  %v12424_v58 = vpack.c.bf16 %v10213_v18, %v10211_v24  ;;  %v11383_v18 = vld [vmem:[%s15753_s9 + $0x118] sm:$0xff] }
 0x3de   : > { %12425 = vmatprep.subr.bf16.mxu0 %v12424_v58  ;;  %v11368_v58 = vld [vmem:[%s15753_s9 + $0xa0] sm:$0xff] }
 0x3df   : > { %12427 = vmatpush1.bf16.msra.mxu0 %v12426_v34  ;;  %v12443_v36 = vpack.c.bf16 %v11369_v2, %v11368_v58  ;;  %v11385_v34 = vld [vmem:[%s15753_s9 + $0x128] sm:$0xff] }
 0x3e0   : > { %12429 = vmatprep.subr.bf16.mxu0 %v12428_v54  ;;  %v12491_v54 = vpack.c.bf16 %v11385_v34, %v11384_v30  ;;  %v11417_v58 = vld [vmem:[%s15753_s9 + $0x228] sm:$0xff]  ;;  %v10314_v34 = vld [vmem:[%s15753_s9 + $0x38] sm:$0xff] }
 0x3e3   : > { %12431 = vmatpush1.bf16.msra.mxu0 %v12430_v62  ;;  %v11372_v62 = vld [vmem:[%s15753_s9 + $0xc0] sm:$0xff] }
 0x3e4   : > { %12433 = vmatprep.subr.bf16.mxu0 %v12432_v16  ;;  %v11373_v16 = vld [vmem:[%s15753_s9 + $0xc8] sm:$0xff] }
 0x3e5   : > { %v12449_v3 = vpack.c.bf16 %v11373_v16, %v11372_v62  ;;  %v11421_v62 = vld [vmem:[%s15753_s9 + $0x248] sm:$0xff] }
 0x3e7   : > { %12435 = vmatpush1.bf16.msra.mxu0 %v12434_v13  ;;  %v11389_v13 = vld [vmem:[%s15753_s9 + $0x148] sm:$0xff] }
 0x3e8   : > { %10239 = vmatprep.subr.mxu0 %v10223_v1  ;;  %v12497_v1 = vpack.c.bf16 %v11389_v13, %v11388_v15  ;;  %v10318_v13 = vld [vmem:[%s15753_s9 + $0x58] sm:$0xff] }
 0x3eb   : > { %10240 = vmatpush1.msra.mxu0 %v10222_v59  ;;  %v11413_v59 = vld [vmem:[%s15753_s9 + $0x208] sm:$0xff] }
 0x4ae   : > { %v8935_v51 = vpop.f32.mrb[8].mxu0 }
 0x4af   : > { %v8937_v52 = vpop.f32.mrb[9].mxu0 }
 0x4b0   : > { %v8940_v53 = vmax.f32 %v8935_v51, %v8937_v52  ;;  %v11365_v51 = vld [vmem:[%s15753_s9 + $0x88] sm:$0xff]  ;;  %v11380_v52 = vld [vmem:[%s15753_s9 + $0x100] sm:$0xff] }
 0x4b2   : > { %v8942_v40 = vadd.f32 %v8941_v42, %v8940_v53  ;;  %v12437_v42 = vpack.c.bf16 %v11365_v51, %v11364_v50  ;;  %v11381_v53 = vld [vmem:[%s15753_s9 + $0x108] sm:$0xff]  ;;  %v10309_v51 = vld [vmem:[%s15753_s9 + $0x10] sm:$0xff] }
 0x4b4   : > { %v11330_v22 = vmul.f32 -1.442695, %v8942_v40  ;;  %v13075_v40 = vmov 0.0|0.0  }
 0x4b5   : > { %12436 = vmatprep.subr.bf16.mxu0 %v13075_v40 }
 0x4b6   : > { %12966 = vpow2.f32 %v11330_v22  ;;  %v12485_v22 = vpack.c.bf16 %v11381_v53, %v11380_v52  ;;  %v10310_v53 = vld [vmem:[%s15753_s9 + $0x18] sm:$0xff] }
 0x4c0   : > { %v12967_v49 = vpop.eup %12966 }
 0x4c1   : > { %v8946_v26 = vadd.f32 1.0, %v12967_v49  ;;  %v11366_v49 = vld [vmem:[%s15753_s9 + $0x90] sm:$0xff] }
 0x4c3   : > { %12968 = vrcp.f32 %v8946_v26  ;;  %v11367_v26 = vld [vmem:[%s15753_s9 + $0x98] sm:$0xff] }
 0x4c4   : > { %v12440_v24 = vpack.c.bf16 %v11367_v26, %v11366_v49  ;;  %v11415_v49 = vld [vmem:[%s15753_s9 + $0x218] sm:$0xff]  ;;  %v12464_v26 = vpack.c.bf16 %v10310_v53, %v10309_v51 }
 0x4c5   : > { %v11403_v53 = vld [vmem:[%s15753_s9 + $0x1b8] sm:$0xff] }
 0x4cd   : > { %v12969_v44 = vpop.eup %12968 }
 0x4ce   : > { %9106 = vrot.lane.b32.xlu0 %v12969_v44, %s15871_s12  ;;  %8955 = vrot.lane.b32.xlu1 %v12969_v44, %s15872_s10 }
 0x4d2   : > { %9264 = vrot.lane.b32.xlu0 %v12969_v44, %s15847_s24  ;;  %9185 = vrot.lane.b32.xlu1 %v12969_v44, %s15846_s30 }
 0x4d6   : > { %9422 = vrot.lane.b32.xlu0 %v12969_v44, %s15845_s23  ;;  %9343 = vrot.lane.b32.xlu1 %v12969_v44, %s15848_s20  ;;  %s15873_s23 = sld [smem:[#allocation8_spill]]  ;;  %s13076_s20 = smov [#allocation4]  }
 0x4da   : > { %9580 = vrot.lane.b32.xlu0 %v12969_v44, %s15850_s0  ;;  %9501 = vrot.lane.b32.xlu1 %v12969_v44, %s15849_s15  ;;  %s12982_s0 = sshll.u32 %s13076_s20, 4  ;;  %s12983_s0 = int_to_ptr.vmem [resolvable:$false] %s12982_s0 }
 0x4db   : > { %s12984_s15 = scalar_lea.vmem %s12983_s0, 32 }
 0x4dc   : > { %s431_s24 = sand.u32 1, %s15873_s23  }
 0x4dd   : > { %s432_s19 = scalar_lea.vmem [#allocation4], %s431_s24  ;;  %s11120_s10 = scalar_lea.sflag [#allocation5], %s431_s24 }
 0x4de   : > { %9738 = vrot.lane.b32.xlu0 %v12969_v44, %s15851_s1  ;;  %9659 = vrot.lane.b32.xlu1 %v12969_v44, %s15844_s16  ;;  %s15875_s16 = sld [smem:[#allocation19_spill]]  ;;  %s11132_s18 = sshll.u32 %s432_s19, 4  ;;  %s15704_s18 = int_to_ptr.vmem [resolvable:$true] %s11132_s18 }
 0x4df   : > { %s12978_s30 = scalar_lea.vmem %s15704_s18, 16  ;;  %p12985_p0 = scmp.lt.s32.totalorder %s15704_s18, %s12983_s0 }
 0x4e0   : > { %p12979_p11 = scmp.ne.s32.totalorder %s15704_s18, %s12978_s30  ;;  %p12986_p1 = scmp.lt.s32.totalorder %s12984_s15, %s12978_s30 }
 0x4e2   : > { %9896 = vrot.lane.b32.xlu0 %v12969_v44, %s15853_s22  ;;  %9817 = vrot.lane.b32.xlu1 %v12969_v44, %s15852_s21  ;;  %s15874_s21 = sld [smem:[#allocation11_spill]]  ;;  %p12980_p12 = pnand %p12979_p11, %p13185_p5 }
 0x4e3   : > { %p12987_p2 = por %p12986_p1, %p12985_p0 }
 0x4e4   : > { %p12981_p13 = pneg %p12980_p12 }
 0x4e6   : > { %10054 = vrot.lane.b32.xlu0 %v12969_v44, %s15855_s14  ;;  %9975 = vrot.lane.b32.xlu1 %v12969_v44, %s15854_s27  ;;  %p12988_p3 = pnand %p12987_p2, %p12981_p13 }
 0x4e8   : > { %s11477_s13 = sshll.u32 %s15874_s21, 4 }
 0x4e9   : > { %s15702_s12 = scalar_lea.hbm %s15878_s29, %s11477_s13 }
 0x4ea   : > { %10133 = vrot.lane.b32.xlu1 %v12969_v44, %s15856_s25 }
 0x540   : > { %v8956_v47 = vpop.permute.xlu1 %8955  ;;  %v9107_v17 = vpop.permute.xlu0 %9106 }
 0x541   : > { %11890 = vmatpush3.msra.mxu1 %v8956_v47 }
 0x542   : > { %11892 = vmatmul.mubr.msk.f32.vlgmr.msra.gmra.mrb[8].mxu1 %vm449_vm0, %v11331_v46  ;;  %11894 = vmatprep.subr.mxu1 %v13042_v0  ;;  %v11387_v46 = vld [vmem:[%s15753_s9 + $0x138] sm:$0xff] }
 0x543   : > { %11895 = vmatpush3.msra.mxu1 %v12969_v44  ;;  %11896 = vmatprep.mubr.msk.f32.mxu1 %vm13061_vm2, %v13042_v0  ;;  %v11382_v44 = vld [vmem:[%s15753_s9 + $0x110] sm:$0xff]  ;;  %v12494_v47 = vpack.c.bf16 %v11387_v46, %v11386_v10  ;;  %v10316_v46 = vld [vmem:[%s15753_s9 + $0x48] sm:$0xff] }
 0x544   : > { %11899 = vmatprep.subr.mxu1 %v13042_v0  ;;  %v9186_v48 = vpop.permute.xlu1 %9185  ;;  %v9265_v19 = vpop.permute.xlu0 %9264  ;;  %v12488_v21 = vpack.c.bf16 %v11383_v18, %v11382_v44  ;;  %v10312_v18 = vld [vmem:[%s15753_s9 + $0x28] sm:$0xff] }
 0x548   : > { %v9344_v5 = vpop.permute.xlu1 %9343  ;;  %v9423_v12 = vpop.permute.xlu0 %9422 }
 0x54a   : > { %11897 = vmatmul.mubr.msk.f32.vlgmr.msra.gmra.mrb[8].mxu1 %vm449_vm0, %v8950_v56  ;;  %v11374_v56 = vld [vmem:[%s15753_s9 + $0xd0] sm:$0xff] }
 0x54b   : > { %11900 = vmatpush3.msra.mxu1 %v9107_v17  ;;  %11901 = vmatprep.mubr.msk.f32.mxu1 %vm13061_vm2, %v13042_v0  ;;  %v11375_v17 = vld [vmem:[%s15753_s9 + $0xd8] sm:$0xff] }
 0x54c   : > { %11904 = vmatprep.subr.mxu1 %v13042_v0  ;;  %v9502_v25 = vpop.permute.xlu1 %9501  ;;  %v9581_v32 = vpop.permute.xlu0 %9580 }
 0x550   : > { %v9660_v6 = vpop.permute.xlu1 %9659  ;;  %v9739_v29 = vpop.permute.xlu0 %9738 }
 0x552   : > { %11902 = vmatmul.mubr.msk.f32.vlgmr.msra.gmra.mrb[8].mxu1 %vm449_vm0, %v11334_v31  ;;  %v11390_v31 = vld [vmem:[%s15753_s9 + $0x150] sm:$0xff] }
 0x553   : > { %11905 = vmatpush3.msra.mxu1 %v9186_v48  ;;  %11906 = vmatprep.mubr.msk.f32.mxu1 %vm13061_vm2, %v13042_v0  ;;  %v12452_v48 = vpack.c.bf16 %v11375_v17, %v11374_v56  ;;  %v11423_v56 = vld [vmem:[%s15753_s9 + $0x258] sm:$0xff] }
 0x554   : > { %11909 = vmatprep.subr.mxu1 %v13042_v0  ;;  %v9818_v7 = vpop.permute.xlu1 %9817  ;;  %v9897_v38 = vpop.permute.xlu0 %9896 }
 0x558   : > { %v9976_v28 = vpop.permute.xlu1 %9975  ;;  %v10055_v43 = vpop.permute.xlu0 %10054 }
 0x55a   : > { %11907 = vmatmul.mubr.msk.f32.vlgmr.msra.gmra.mrb[8].mxu1 %vm449_vm0, %v11336_v55  ;;  %v11391_v55 = vld [vmem:[%s15753_s9 + $0x158] sm:$0xff] }
 0x55b   : > { %11910 = vmatpush3.msra.mxu1 %v9265_v19  ;;  %11911 = vmatprep.mubr.msk.f32.mxu1 %vm13061_vm2, %v13042_v0  ;;  %v11376_v19 = vld [vmem:[%s15753_s9 + $0xe0] sm:$0xff] }
 0x55c   : > { %11914 = vmatprep.subr.mxu1 %v13042_v0  ;;  %v10134_v4 = vpop.permute.xlu1 %10133 }
 0x562   : > { %11912 = vmatmul.mubr.msk.f32.vlgmr.msra.gmra.mrb[8].mxu1 %vm449_vm0, %v11338_v20  ;;  %v11377_v20 = vld [vmem:[%s15753_s9 + $0xe8] sm:$0xff] }
 0x563   : > { %11915 = vmatpush3.msra.mxu1 %v9344_v5  ;;  %11916 = vmatprep.mubr.msk.f32.mxu1 %vm13061_vm2, %v13042_v0  ;;  %v12500_v5 = vpack.c.bf16 %v11391_v55, %v11390_v31  ;;  %v10320_v55 = vld [vmem:[%s15753_s9 + $0x68] sm:$0xff] }
 0x564   : > { %11919 = vmatprep.subr.mxu1 %v13042_v0 }
 0x56a   : > { %11917 = vmatmul.mubr.msk.f32.vlgmr.msra.gmra.mrb[8].mxu1 %vm449_vm0, %v11340_v23  ;;  %v11392_v23 = vld [vmem:[%s15753_s9 + $0x160] sm:$0xff] }
 0x56b   : > { %11920 = vmatpush3.msra.mxu1 %v9423_v12  ;;  %11921 = vmatprep.mubr.msk.f32.mxu1 %vm13061_vm2, %v13042_v0  ;;  %v11393_v12 = vld [vmem:[%s15753_s9 + $0x168] sm:$0xff] }
 0x56c   : > { %11924 = vmatprep.subr.mxu1 %v13042_v0 }
 0x572   : > { %11922 = vmatmul.mubr.msk.f32.vlgmr.msra.gmra.mrb[8].mxu1 %vm449_vm0, %v11342_v14  ;;  %v12455_v14 = vpack.c.bf16 %v11377_v20, %v11376_v19  ;;  %v11424_v19 = vld [vmem:[%s15753_s9 + $0x260] sm:$0xff]  ;;  %v11425_v20 = vld [vmem:[%s15753_s9 + $0x268] sm:$0xff] }
 0x573   : > { %11925 = vmatpush3.msra.mxu1 %v9502_v25  ;;  %11926 = vmatprep.mubr.msk.f32.mxu1 %vm13061_vm2, %v13042_v0  ;;  %v12503_v25 = vpack.c.bf16 %v11393_v12, %v11392_v23  ;;  %v12551_v23 = vpack.c.bf16 %v11425_v20, %v11424_v19  ;;  %v10321_v12 = vld [vmem:[%s15753_s9 + $0x70] sm:$0xff] }
 0x574   : > { %11929 = vmatprep.subr.mxu1 %v13042_v0 }
 0x57a   : > { %11927 = vmatmul.mubr.msk.f32.vlgmr.msra.gmra.mrb[8].mxu1 %vm449_vm0, %v11344_v27  ;;  %v11378_v27 = vld [vmem:[%s15753_s9 + $0xf0] sm:$0xff] }
 0x57b   : > { %11930 = vmatpush3.msra.mxu1 %v9581_v32  ;;  %11931 = vmatprep.mubr.msk.f32.mxu1 %vm13061_vm2, %v13042_v0  ;;  %v11379_v32 = vld [vmem:[%s15753_s9 + $0xf8] sm:$0xff] }
 0x57c   : > { %11934 = vmatprep.subr.mxu1 %v13042_v0 }
 0x582   : > { %11932 = vmatmul.mubr.msk.f32.vlgmr.msra.gmra.mrb[8].mxu1 %vm449_vm0, %v11346_v33  ;;  %v11394_v33 = vld [vmem:[%s15753_s9 + $0x170] sm:$0xff] }
 0x583   : > { %11935 = vmatpush3.msra.mxu1 %v9660_v6  ;;  %11936 = vmatprep.mubr.msk.f32.mxu1 %vm13061_vm2, %v13042_v0  ;;  %v11395_v6 = vld [vmem:[%s15753_s9 + $0x178] sm:$0xff] }
 0x584   : > { %11939 = vmatprep.subr.mxu1 %v13042_v0 }
 0x58a   : > { %11937 = vmatmul.mubr.msk.f32.vlgmr.msra.gmra.mrb[8].mxu1 %vm449_vm0, %v11348_v63  ;;  %v12458_v63 = vpack.c.bf16 %v11379_v32, %v11378_v27  ;;  %v11427_v27 = vld [vmem:[%s15753_s9 + $0x278] sm:$0xff] }
 0x58b   : > { %11940 = vmatpush3.msra.mxu1 %v9739_v29  ;;  %11941 = vmatprep.mubr.msk.f32.mxu1 %vm13061_vm2, %v13042_v0  ;;  %v12506_v29 = vpack.c.bf16 %v11395_v6, %v11394_v33  ;;  %v11396_v6 = vld [vmem:[%s15753_s9 + $0x180] sm:$0xff] }
 0x58c   : > { %11944 = vmatprep.subr.mxu1 %v13042_v0 }
 0x592   : > { %11942 = vmatmul.mubr.msk.f32.vlgmr.msra.gmra.mrb[8].mxu1 %vm449_vm0, %v11350_v35 }
 0x593   : > { %11945 = vmatpush3.msra.mxu1 %v9818_v7  ;;  %11946 = vmatprep.mubr.msk.f32.mxu1 %vm13061_vm2, %v13042_v0 }
 0x594   : > { %11949 = vmatprep.subr.mxu1 %v13042_v0 }
 0x59a   : > { %11947 = vmatmul.mubr.msk.f32.vlgmr.msra.gmra.mrb[8].mxu1 %vm449_vm0, %v11352_v57  ;;  %v10299_v57 = vld [vmem:[%s15752_s8] sm:$0xff] }
 0x59b   : > { %11950 = vmatpush3.msra.mxu1 %v9897_v38  ;;  %11951 = vmatprep.mubr.msk.f32.mxu1 %vm13061_vm2, %v13042_v0 }
 0x59c   : > { %11954 = vmatprep.subr.mxu1 %v13042_v0 }
 0x5a2   : > { %11952 = vmatmul.mubr.msk.f32.vlgmr.msra.gmra.mrb[8].mxu1 %vm449_vm0, %v11354_v39 }
 0x5a3   : > { %11955 = vmatpush3.msra.mxu1 %v9976_v28  ;;  %11956 = vmatprep.mubr.msk.f32.mxu1 %vm13061_vm2, %v13042_v0 }
 0x5a4   : > { %11959 = vmatprep.subr.mxu1 %v13042_v0 }
 0x5aa   : > { %11957 = vmatmul.mubr.msk.f32.vlgmr.msra.gmra.mrb[8].mxu1 %vm449_vm0, %v11356_v9 }
 0x5ab   : > { %11960 = vmatpush3.msra.mxu1 %v10055_v43  ;;  %11961 = vmatprep.mubr.msk.f32.mxu1 %vm13061_vm2, %v13042_v0 }
 0x5ac   : > { %11964 = vmatprep.subr.mxu1 %v13042_v0 }
 0x5b2   : > { %11962 = vmatmul.mubr.msk.f32.vlgmr.msra.gmra.mrb[8].mxu1 %vm449_vm0, %v11358_v45  ;;  %v10307_v45 = vld [vmem:[%s15753_s9] sm:$0xff] }
 0x5b3   : > { %11965 = vmatpush3.msra.mxu1 %v10134_v4  ;;  %11966 = vmatprep.mubr.msk.f32.mxu1 %vm13061_vm2, %v13042_v0  ;;  %v10308_v4 = vld [vmem:[%s15753_s9 + $0x8] sm:$0xff] }
 0x5b4   : > { %12484 = vmatprep.subr.bf16.mxu1 %v13075_v40 }
 0x5ba   : > { %11967 = vmatmul.mubr.msk.f32.vlgmr.msra.gmra.mrb[8].mxu1 %vm449_vm0, %v11360_v41  ;;  %v11412_v41 = vld [vmem:[%s15753_s9 + $0x200] sm:$0xff] }
 0x5bb   : > { %12071 = vmatprep.mubr.msk.f32.mxu1 %vm13061_vm2, %v13042_v0  ;;  %12486 = vmatpush3.bf16.msra.mxu1 %v12485_v22  ;;  %v12533_v50 = vpack.c.bf16 %v11413_v59, %v11412_v41  ;;  %v11414_v22 = vld [vmem:[%s15753_s9 + $0x210] sm:$0xff]  ;;  %v11400_v41 = vld [vmem:[%s15753_s9 + $0x1a0] sm:$0xff]  ;;  %v11401_v59 = vld [vmem:[%s15753_s9 + $0x1a8] sm:$0xff] }
 0x5bc   : > { %12487 = vmatprep.subr.bf16.mxu1 %v13075_v40  ;;  %v12536_v44 = vpack.c.bf16 %v11415_v49, %v11414_v22  ;;  %v12515_v51 = vpack.c.bf16 %v11401_v59, %v11400_v41  ;;  %v11450_v22 = vld [vmem:[%s15753_s9 + $0x330] sm:$0xff]  ;;  %v11451_v49 = vld [vmem:[%s15753_s9 + $0x338] sm:$0xff]  ;;  %v11460_v59 = vld [vmem:[%s15753_s9 + $0x380] sm:$0xff] }
 0x5bf   : > { %12489 = vmatpush3.bf16.msra.mxu1 %v12488_v21  ;;  %v11416_v21 = vld [vmem:[%s15753_s9 + $0x220] sm:$0xff] }
 0x5c0   : > { %12490 = vmatprep.subr.bf16.mxu1 %v13075_v40  ;;  %v12539_v30 = vpack.c.bf16 %v11417_v58, %v11416_v21  ;;  %v11452_v21 = vld [vmem:[%s15753_s9 + $0x340] sm:$0xff]  ;;  %v11453_v58 = vld [vmem:[%s15753_s9 + $0x348] sm:$0xff] }
 0x5c3   : > { %12492 = vmatpush3.bf16.msra.mxu1 %v12491_v54  ;;  %v11418_v54 = vld [vmem:[%s15753_s9 + $0x230] sm:$0xff] }
 0x5c4   : > { %12493 = vmatprep.subr.bf16.mxu1 %v13075_v40  ;;  %v12542_v10 = vpack.c.bf16 %v11419_v60, %v11418_v54  ;;  %v11454_v54 = vld [vmem:[%s15753_s9 + $0x350] sm:$0xff]  ;;  %v11455_v60 = vld [vmem:[%s15753_s9 + $0x358] sm:$0xff] }
 0x5c7   : > { %12495 = vmatpush3.bf16.msra.mxu1 %v12494_v47  ;;  %v11420_v47 = vld [vmem:[%s15753_s9 + $0x240] sm:$0xff] }
 0x5c8   : > { %12496 = vmatprep.subr.bf16.mxu1 %v13075_v40  ;;  %v12545_v15 = vpack.c.bf16 %v11421_v62, %v11420_v47  ;;  %v11456_v47 = vld [vmem:[%s15753_s9 + $0x360] sm:$0xff]  ;;  %v11457_v62 = vld [vmem:[%s15753_s9 + $0x368] sm:$0xff] }
 0x5cb   : > { %12498 = vmatpush3.bf16.msra.mxu1 %v12497_v1  ;;  %v11422_v1 = vld [vmem:[%s15753_s9 + $0x250] sm:$0xff] }
 0x5cc   : > { %12499 = vmatprep.subr.bf16.mxu1 %v13075_v40  ;;  %v12548_v31 = vpack.c.bf16 %v11423_v56, %v11422_v1  ;;  %v11458_v1 = vld [vmem:[%s15753_s9 + $0x370] sm:$0xff]  ;;  %v11459_v56 = vld [vmem:[%s15753_s9 + $0x378] sm:$0xff] }
 0x5cf   : > { %12501 = vmatpush3.bf16.msra.mxu1 %v12500_v5 }
 0x5d0   : > { %12502 = vmatprep.subr.bf16.mxu1 %v13075_v40 }
 0x5d3   : > { %12504 = vmatpush3.bf16.msra.mxu1 %v12503_v25  ;;  %v11426_v25 = vld [vmem:[%s15753_s9 + $0x270] sm:$0xff] }
 0x5d4   : > { %12505 = vmatprep.subr.bf16.mxu1 %v13075_v40  ;;  %v12554_v33 = vpack.c.bf16 %v11427_v27, %v11426_v25  ;;  %v11432_v25 = vld [vmem:[%s15753_s9 + $0x2a0] sm:$0xff]  ;;  %v11433_v27 = vld [vmem:[%s15753_s9 + $0x2a8] sm:$0xff] }
 0x5d7   : > { %12507 = vmatpush3.bf16.msra.mxu1 %v12506_v29  ;;  %v11444_v29 = vld [vmem:[%s15753_s9 + $0x300] sm:$0xff] }
 0x5d8   : > { %12532 = vmatprep.subr.bf16.mxu1 %v13075_v40 }
 0x68d   : > { %v10205_v61 = vpop.f32.mrb[8].mxu1 }
 0x68e   : > { %v11968_v37 = vpop.f32.mrb[9].mxu1  ;;  %11362 = vmatmul.mubr.msk.f32.vlgmr.msra.gmra.mrb[10].mxu0 %vm8723_vm5, %v10205_v61 }
 0x68f   : > { %12001 = vmatprep.mubr.msk.f32.mxu0 %vm13061_vm2, %v13042_v0  ;;  %12438 = vmatpush3.bf16.msra.mxu0 %v12437_v42  ;;  %v12461_v37 = vpack.c.bf16 %v10308_v4, %v10307_v45 }
 0x690   : > { %12439 = vmatprep.subr.bf16.mxu0 %v13075_v40 }
 0x693   : > { %12441 = vmatpush3.bf16.msra.mxu0 %v12440_v24  ;;  %v10311_v24 = vld [vmem:[%s15753_s9 + $0x20] sm:$0xff] }
 0x694   : > { %12442 = vmatprep.subr.bf16.mxu0 %v13075_v40  ;;  %v12467_v2 = vpack.c.bf16 %v10312_v18, %v10311_v24  ;;  %v11404_v24 = vld [vmem:[%s15753_s9 + $0x1c0] sm:$0xff]  ;;  %v11405_v18 = vld [vmem:[%s15753_s9 + $0x1c8] sm:$0xff] }
 0x697   : > { %12444 = vmatpush3.bf16.msra.mxu0 %v12443_v36  ;;  %v10313_v36 = vld [vmem:[%s15753_s9 + $0x30] sm:$0xff] }
 0x698   : > { %12445 = vmatprep.subr.bf16.mxu0 %v13075_v40  ;;  %v12470_v8 = vpack.c.bf16 %v10314_v34, %v10313_v36  ;;  %v11406_v36 = vld [vmem:[%s15753_s9 + $0x1d0] sm:$0xff]  ;;  %v11407_v34 = vld [vmem:[%s15753_s9 + $0x1d8] sm:$0xff] }
 0x69b   : > { %12447 = vmatpush3.bf16.msra.mxu0 %v12446_v11  ;;  %v10315_v11 = vld [vmem:[%s15753_s9 + $0x40] sm:$0xff] }
 0x69c   : > { %12448 = vmatprep.subr.bf16.mxu0 %v13075_v40  ;;  %v12473_v16 = vpack.c.bf16 %v10316_v46, %v10315_v11  ;;  %v11408_v11 = vld [vmem:[%s15753_s9 + $0x1e0] sm:$0xff]  ;;  %v11409_v46 = vld [vmem:[%s15753_s9 + $0x1e8] sm:$0xff] }
 0x69f   : > { %12450 = vmatpush3.bf16.msra.mxu0 %v12449_v3  ;;  %v10317_v3 = vld [vmem:[%s15753_s9 + $0x50] sm:$0xff] }
 0x6a0   : > { %12451 = vmatprep.subr.bf16.mxu0 %v13075_v40  ;;  %v12476_v17 = vpack.c.bf16 %v10318_v13, %v10317_v3  ;;  %v11410_v3 = vld [vmem:[%s15753_s9 + $0x1f0] sm:$0xff]  ;;  %v11411_v13 = vld [vmem:[%s15753_s9 + $0x1f8] sm:$0xff] }
 0x6a3   : > { %12453 = vmatpush3.bf16.msra.mxu0 %v12452_v48  ;;  %v10319_v48 = vld [vmem:[%s15753_s9 + $0x60] sm:$0xff] }
 0x6a4   : > { %12454 = vmatprep.subr.bf16.mxu0 %v13075_v40  ;;  %v12479_v5 = vpack.c.bf16 %v10320_v55, %v10319_v48  ;;  %v11428_v48 = vld [vmem:[%s15753_s9 + $0x280] sm:$0xff]  ;;  %v11429_v55 = vld [vmem:[%s15753_s9 + $0x288] sm:$0xff] }
 0x6a5   : > { %v12557_v19 = vpack.c.bf16 %v11429_v55, %v11428_v48  ;;  %v11036_v48 = vld [vmem:[%s15755_s11 + $0x28] sm:$0xff] }
 0x6a7   : > { %12456 = vmatpush3.bf16.msra.mxu0 %v12455_v14  ;;  %v10322_v14 = vld [vmem:[%s15753_s9 + $0x78] sm:$0xff] }
 0x6a8   : > { %12457 = vmatprep.subr.bf16.mxu0 %v13075_v40  ;;  %v12482_v32 = vpack.c.bf16 %v10322_v14, %v10321_v12  ;;  %v11431_v12 = vld [vmem:[%s15753_s9 + $0x298] sm:$0xff] }
 0x6ab   : > { %12459 = vmatpush3.bf16.msra.mxu0 %v12458_v63  ;;  %v11397_v63 = vld [vmem:[%s15753_s9 + $0x188] sm:$0xff] }
 0x6ac   : > { %12460 = vmatprep.subr.bf16.mxu0 %v13075_v40 }
 0x761   : > { %v10293_v35 = vpop.f32.mrb[10].mxu0 }
 0x762   : > { %v10295_v7 = vpop.f32.mrb[11].mxu0 }
 0x763   : > { %v10298_v38 = vmax.f32 %v10293_v35, %v10295_v7  ;;  %v11445_v35 = vld [vmem:[%s15753_s9 + $0x308] sm:$0xff]  ;;  %v12509_v7 = vpack.c.bf16 %v11397_v63, %v11396_v6  ;;  %v11435_v6 = vld [vmem:[%s15753_s9 + $0x2b8] sm:$0xff] }
 0x765   : > { %v10300_v39 = vadd.f32 %v10299_v57, %v10298_v38  ;;  %v12581_v57 = vpack.c.bf16 %v11445_v35, %v11444_v29  ;;  %v11398_v38 = vld [vmem:[%s15753_s9 + $0x190] sm:$0xff]  ;;  %v11436_v29 = vld [vmem:[%s15753_s9 + $0x2c0] sm:$0xff]  ;;  %v11437_v35 = vld [vmem:[%s15753_s9 + $0x2c8] sm:$0xff] }
 0x767   : > { %v11363_v28 = vmul.f32 -1.442695, %v10300_v39 }
 0x769   : > { %12970 = vpow2.f32 %v11363_v28  ;;  %v11399_v28 = vld [vmem:[%s15753_s9 + $0x198] sm:$0xff] }
 0x76a   : > { %v12512_v45 = vpack.c.bf16 %v11399_v28, %v11398_v38  ;;  %v11439_v38 = vld [vmem:[%s15753_s9 + $0x2d8] sm:$0xff]  ;;  %v11440_v28 = vld [vmem:[%s15753_s9 + $0x2e0] sm:$0xff] }
 0x773   : > { %v12971_v9 = vpop.eup %12970 }
 0x774   : > { %v10304_v43 = vadd.f32 1.0, %v12971_v9  ;;  %v11446_v9 = vld [vmem:[%s15753_s9 + $0x310] sm:$0xff] }
 0x776   : > { %12972 = vrcp.f32 %v10304_v43  ;;  %v11447_v43 = vld [vmem:[%s15753_s9 + $0x318] sm:$0xff] }
 0x777   : > { %v12584_v4 = vpack.c.bf16 %v11447_v43, %v11446_v9  ;;  %v11441_v9 = vld [vmem:[%s15753_s9 + $0x2e8] sm:$0xff] }
 0x778   : > { %v12575_v43 = vpack.c.bf16 %v11441_v9, %v11440_v28 }
 0x780   : > { %v15289_v61 = vpop.eup %12972 }
 0x781   : > { %v10341_v52 = vrot.slane %v15289_v61, 1  ;;  %v10500_v42 = vrot.slane %v15289_v61, 2  ;;  %v10680_v39 = vrot.slane %v15289_v61, 4  ;;  %v10590_v20 = vrot.slane %v15289_v61, 3 }
 0x783   : > { %12002 = vmatmul.mubr.f32.vlgmr.msra.gmra.mrb[12].mxu0 %v10341_v52  ;;  %12072 = vmatmul.mubr.f32.vlgmr.msra.gmra.mrb[10].mxu1 %v10500_v42  ;;  %v11402_v42 = vld [vmem:[%s15753_s9 + $0x1b0] sm:$0xff] }
 0x784   : > { %12462 = vmatpush3.bf16.msra.mxu0 %v12461_v37  ;;  %12534 = vmatpush3.bf16.msra.mxu1 %v12533_v50  ;;  %v11448_v37 = vld [vmem:[%s15753_s9 + $0x320] sm:$0xff]  ;;  %v11449_v50 = vld [vmem:[%s15753_s9 + $0x328] sm:$0xff] }
 0x785   : > { %12463 = vmatprep.subr.bf16.mxu0 %v13075_v40  ;;  %12535 = vmatprep.subr.bf16.mxu1 %v13075_v40  ;;  %v12587_v52 = vpack.c.bf16 %v11449_v50, %v11448_v37  ;;  %v11461_v37 = vld [vmem:[%s15753_s9 + $0x388] sm:$0xff] }
 0x786   : > { %12036 = vmatprep.mubr.msk.f32.mxu0 %vm13061_vm2, %v13042_v0  ;;  %12141 = vmatprep.mubr.msk.f32.mxu1 %vm13061_vm2, %v13042_v0  ;;  %v12605_v50 = vpack.c.bf16 %v11461_v37, %v11460_v59 }
 0x788   : > { %12465 = vmatpush3.bf16.msra.mxu0 %v12464_v26  ;;  %12537 = vmatpush3.bf16.msra.mxu1 %v12536_v44  ;;  %v12518_v26 = vpack.c.bf16 %v11403_v53, %v11402_v42  ;;  %v12590_v44 = vpack.c.bf16 %v11451_v49, %v11450_v22  ;;  %v11463_v42 = vld [vmem:[%s15753_s9 + $0x398] sm:$0xff]  ;;  %v11464_v22 = vld [vmem:[%s15753_s9 + $0x3a0] sm:$0xff]  ;;  %v11465_v49 = vld [vmem:[%s15753_s9 + $0x3a8] sm:$0xff] }
 0x789   : > { %12466 = vmatprep.subr.bf16.mxu0 %v13075_v40  ;;  %12538 = vmatprep.subr.bf16.mxu1 %v13075_v40 }
 0x78c   : > { %12468 = vmatpush3.bf16.msra.mxu0 %v12467_v2  ;;  %12540 = vmatpush3.bf16.msra.mxu1 %v12539_v30  ;;  %v12521_v2 = vpack.c.bf16 %v11405_v18, %v11404_v24  ;;  %v12593_v30 = vpack.c.bf16 %v11453_v58, %v11452_v21  ;;  %v11468_v18 = vld [vmem:[%s15753_s9 + $0x3c0] sm:$0xff]  ;;  %v11469_v21 = vld [vmem:[%s15753_s9 + $0x3c8] sm:$0xff] }
 0x78d   : > { %12469 = vmatprep.subr.bf16.mxu0 %v13075_v40  ;;  %12541 = vmatprep.subr.bf16.mxu1 %v13075_v40  ;;  %v12617_v58 = vpack.c.bf16 %v11469_v21, %v11468_v18 }
 0x790   : > { %12471 = vmatpush3.bf16.msra.mxu0 %v12470_v8  ;;  %12543 = vmatpush3.bf16.msra.mxu1 %v12542_v10  ;;  %v12524_v8 = vpack.c.bf16 %v11407_v34, %v11406_v36  ;;  %v12596_v10 = vpack.c.bf16 %v11455_v60, %v11454_v54  ;;  %v11472_v34 = vld [vmem:[%s15753_s9 + $0x3e0] sm:$0xff]  ;;  %v11473_v54 = vld [vmem:[%s15753_s9 + $0x3e8] sm:$0xff] }
 0x791   : > { %12472 = vmatprep.subr.bf16.mxu0 %v13075_v40  ;;  %12544 = vmatprep.subr.bf16.mxu1 %v13075_v40  ;;  %v12623_v60 = vpack.c.bf16 %v11473_v54, %v11472_v34 }
 0x794   : > { %12474 = vmatpush3.bf16.msra.mxu0 %v12473_v16  ;;  %12546 = vmatpush3.bf16.msra.mxu1 %v12545_v15  ;;  %v12527_v16 = vpack.c.bf16 %v11409_v46, %v11408_v11  ;;  %v12599_v15 = vpack.c.bf16 %v11457_v62, %v11456_v47  ;;  %v10950_v46 = vrot.slane %v15289_v61, 7  ;;  %v11031_v47 = vld [vmem:[%s15755_s11] sm:$0xff]  ;;  %v11032_v62 = vld [vmem:[%s15755_s11 + $0x8] sm:$0xff] }
 0x795   : > { %12475 = vmatprep.subr.bf16.mxu0 %v13075_v40  ;;  %12547 = vmatprep.subr.bf16.mxu1 %v13075_v40 }
 0x798   : > { %12477 = vmatpush3.bf16.msra.mxu0 %v12476_v17  ;;  %12549 = vmatpush3.bf16.msra.mxu1 %v12548_v31  ;;  %v12530_v17 = vpack.c.bf16 %v11411_v13, %v11410_v3  ;;  %v12602_v31 = vpack.c.bf16 %v11459_v56, %v11458_v1  ;;  %v11034_v56 = vld [vmem:[%s15755_s11 + $0x18] sm:$0xff] }
 0x799   : > { %12478 = vmatprep.subr.bf16.mxu0 %v13075_v40  ;;  %12550 = vmatprep.subr.bf16.mxu1 %v13075_v40 }
 0x79c   : > { %12480 = vmatpush3.bf16.msra.mxu0 %v12479_v5  ;;  %12552 = vmatpush3.bf16.msra.mxu1 %v12551_v23  ;;  %v10860_v5 = vrot.slane %v15289_v61, 6  ;;  %v11430_v23 = vld [vmem:[%s15753_s9 + $0x290] sm:$0xff] }
 0x79d   : > { %12481 = vmatprep.subr.bf16.mxu0 %v13075_v40  ;;  %12553 = vmatprep.subr.bf16.mxu1 %v13075_v40  ;;  %v12560_v14 = vpack.c.bf16 %v11431_v12, %v11430_v23  ;;  %v11039_v23 = vld [vmem:[%s15755_s11 + $0x40] sm:$0xff]  ;;  %v11040_v12 = vld [vmem:[%s15755_s11 + $0x48] sm:$0xff] }
 0x7a0   : > { %12483 = vmatpush3.bf16.msra.mxu0 %v12482_v32  ;;  %12555 = vmatpush3.bf16.msra.mxu1 %v12554_v33  ;;  %v12563_v32 = vpack.c.bf16 %v11433_v27, %v11432_v25  ;;  %v11434_v33 = vld [vmem:[%s15753_s9 + $0x2b0] sm:$0xff]  ;;  %v11042_v27 = vld [vmem:[%s15755_s11 + $0x58] sm:$0xff] }
 0x7a1   : > { %12508 = vmatprep.subr.bf16.mxu0 %v13075_v40  ;;  %12580 = vmatprep.subr.bf16.mxu1 %v13075_v40  ;;  %v12566_v63 = vpack.c.bf16 %v11435_v6, %v11434_v33  ;;  %v11041_v25 = vld [vmem:[%s15755_s11 + $0x50] sm:$0xff]  ;;  %v11043_v33 = vld [vmem:[%s15755_s11 + $0x60] sm:$0xff]  ;;  %v11044_v6 = vld [vmem:[%s15755_s11 + $0x68] sm:$0xff] }
 0x7a3   : > { %12037 = vmatmul.mubr.f32.vlgmr.msra.gmra.mrb[14].mxu0 %v15289_v61  ;;  %12142 = vmatmul.mubr.f32.vlgmr.msra.gmra.mrb[12].mxu1 %v10680_v39 }
 0x7a4   : > { %12510 = vmatpush3.bf16.msra.mxu0 %v12509_v7  ;;  %12582 = vmatpush3.bf16.msra.mxu1 %v12581_v57  ;;  %v12569_v7 = vpack.c.bf16 %v11437_v35, %v11436_v29  ;;  %v11438_v57 = vld [vmem:[%s15753_s9 + $0x2d0] sm:$0xff]  ;;  %v11046_v35 = vld [vmem:[%s15755_s11 + $0x78] sm:$0xff] }
 0x7a5   : > { %12511 = vmatprep.subr.bf16.mxu0 %v13075_v40  ;;  %12583 = vmatprep.subr.bf16.mxu1 %v13075_v40  ;;  %v12572_v39 = vpack.c.bf16 %v11439_v38, %v11438_v57  ;;  %v11045_v29 = vld [vmem:[%s15755_s11 + $0x70] sm:$0xff] }
 0x7a6   : > { %12106 = vmatprep.mubr.msk.f32.mxu0 %vm13061_vm2, %v13042_v0  ;;  %12211 = vmatprep.mubr.msk.f32.mxu1 %vm13061_vm2, %v13042_v0 }
 0x7a8   : > { %12513 = vmatpush3.bf16.msra.mxu0 %v12512_v45  ;;  %12585 = vmatpush3.bf16.msra.mxu1 %v12584_v4  ;;  %v11442_v45 = vld [vmem:[%s15753_s9 + $0x2f0] sm:$0xff]  ;;  %v11443_v4 = vld [vmem:[%s15753_s9 + $0x2f8] sm:$0xff] }
 0x7a9   : > { %12514 = vmatprep.subr.bf16.mxu0 %v13075_v40  ;;  %12586 = vmatprep.subr.bf16.mxu1 %v13075_v40  ;;  %v12578_v41 = vpack.c.bf16 %v11443_v4, %v11442_v45 }
 0x7ac   : > { %12516 = vmatpush3.bf16.msra.mxu0 %v12515_v51  ;;  %12588 = vmatpush3.bf16.msra.mxu1 %v12587_v52  ;;  %v10770_v51 = vrot.slane %v15289_v61, 5  ;;  %v11462_v52 = vld [vmem:[%s15753_s9 + $0x390] sm:$0xff] }
 0x7ad   : > { %12517 = vmatprep.subr.bf16.mxu0 %v13075_v40  ;;  %12589 = vmatprep.subr.bf16.mxu1 %v13075_v40  ;;  %v12608_v53 = vpack.c.bf16 %v11463_v42, %v11462_v52  ;;  %v11033_v61 = vld [vmem:[%s15755_s11 + $0x10] sm:$0xff] }
 0x7b0   : > { %12519 = vmatpush3.bf16.msra.mxu0 %v12518_v26  ;;  %12591 = vmatpush3.bf16.msra.mxu1 %v12590_v44  ;;  %v12611_v26 = vpack.c.bf16 %v11465_v49, %v11464_v22  ;;  %v11466_v44 = vld [vmem:[%s15753_s9 + $0x3b0] sm:$0xff]  ;;  %v11023_v22 = vld [vmem:[%s15875_s16] sm:$0x1] }
 0x7b1   : > { %12520 = vmatprep.subr.bf16.mxu0 %v13075_v40  ;;  %12592 = vmatprep.subr.bf16.mxu1 %v13075_v40 }
 0x7b4   : > { %12522 = vmatpush3.bf16.msra.mxu0 %v12521_v2  ;;  %12594 = vmatpush3.bf16.msra.mxu1 %v12593_v30  ;;  %v11470_v2 = vld [vmem:[%s15753_s9 + $0x3d0] sm:$0xff]  ;;  %v11471_v30 = vld [vmem:[%s15753_s9 + $0x3d8] sm:$0xff] }
 0x7b5   : > { %12523 = vmatprep.subr.bf16.mxu0 %v13075_v40  ;;  %12595 = vmatprep.subr.bf16.mxu1 %v13075_v40  ;;  %v12620_v36 = vpack.c.bf16 %v11471_v30, %v11470_v2 }
 0x7b8   : > { %12525 = vmatpush3.bf16.msra.mxu0 %v12524_v8  ;;  %12597 = vmatpush3.bf16.msra.mxu1 %v12596_v10  ;;  %v11474_v8 = vld [vmem:[%s15753_s9 + $0x3f0] sm:$0xff]  ;;  %v11475_v10 = vld [vmem:[%s15753_s9 + $0x3f8] sm:$0xff] }
 0x7b9   : > { %12526 = vmatprep.subr.bf16.mxu0 %v13075_v40  ;;  %12598 = vmatprep.subr.bf16.mxu1 %v13075_v40  ;;  %v12626_v11 = vpack.c.bf16 %v11475_v10, %v11474_v8 }
 0x7bc   : > { %12528 = vmatpush3.bf16.msra.mxu0 %v12527_v16  ;;  %12600 = vmatpush3.bf16.msra.mxu1 %v12599_v15  ;;  %v12629_v16 = vpack.c.bf16 %v11032_v62, %v11031_v47 }
 0x7bd   : > { %12529 = vmatprep.subr.bf16.mxu0 %v13075_v40  ;;  %12601 = vmatprep.subr.bf16.mxu1 %v13075_v40 }
 0x7c0   : > { %12531 = vmatpush3.bf16.msra.mxu0 %v12530_v17  ;;  %12603 = vmatpush3.bf16.msra.mxu1 %v12602_v31  ;;  %v12632_v17 = vpack.c.bf16 %v11034_v56, %v11033_v61  ;;  %v11035_v31 = vld [vmem:[%s15755_s11 + $0x20] sm:$0xff] }
 0x7c1   : > { %12556 = vmatprep.subr.bf16.mxu0 %v13075_v40  ;;  %12628 = vmatprep.subr.bf16.mxu1 %v13075_v40  ;;  %v12635_v55 = vpack.c.bf16 %v11036_v48, %v11035_v31 }
 0x7c3   : > { %12107 = vmatmul.mubr.f32.vlgmr.msra.gmra.mrb[16].mxu0 %v10590_v20  ;;  %12212 = vmatmul.mubr.f32.vlgmr.msra.gmra.mrb[14].mxu1 %v10860_v5  ;;  %v11038_v20 = vld [vmem:[%s15755_s11 + $0x38] sm:$0xff] }
 0x7c4   : > { %12558 = vmatpush3.bf16.msra.mxu0 %v12557_v19  ;;  %12176 = vmatprep.mubr.msk.f32.mxu0 %vm13061_vm2, %v13042_v0  ;;  %v11037_v19 = vld [vmem:[%s15755_s11 + $0x30] sm:$0xff] }
 0x7c5   : > { %12559 = vmatprep.subr.bf16.mxu0 %v13075_v40  ;;  %12281 = vmatprep.mubr.msk.f32.mxu1 %vm13061_vm2, %v13042_v0  ;;  %v12638_v5 = vpack.c.bf16 %v11038_v20, %v11037_v19 }
 0x7c6   : > { %12630 = vmatpush3.bf16.msra.mxu1 %v12629_v16 }
 0x7c7   : > { %12631 = vmatprep.subr.bf16.mxu1 %v13075_v40 }
 0x7c8   : > { %12561 = vmatpush3.bf16.msra.mxu0 %v12560_v14  ;;  %v12641_v14 = vpack.c.bf16 %v11040_v12, %v11039_v23 }
 0x7c9   : > { %12562 = vmatprep.subr.bf16.mxu0 %v13075_v40 }
 0x7ca   : > { %12633 = vmatpush3.bf16.msra.mxu1 %v12632_v17 }
 0x7cb   : > { %12634 = vmatprep.subr.bf16.mxu1 %v13075_v40 }
 0x7cc   : > { %12564 = vmatpush3.bf16.msra.mxu0 %v12563_v32  ;;  %v12644_v32 = vpack.c.bf16 %v11042_v27, %v11041_v25 }
 0x7cd   : > { %12565 = vmatprep.subr.bf16.mxu0 %v13075_v40 }
 0x7ce   : > { %12636 = vmatpush3.bf16.msra.mxu1 %v12635_v55 }
 0x7cf   : > { %12637 = vmatprep.subr.bf16.mxu1 %v13075_v40 }
 0x7d0   : > { %12567 = vmatpush3.bf16.msra.mxu0 %v12566_v63  ;;  %v12647_v63 = vpack.c.bf16 %v11044_v6, %v11043_v33 }
 0x7d1   : > { %12568 = vmatprep.subr.bf16.mxu0 %v13075_v40 }
 0x7d2   : > { %12639 = vmatpush3.bf16.msra.mxu1 %v12638_v5 }
 0x7d3   : > { %12640 = vmatprep.subr.bf16.mxu1 %v13075_v40 }
 0x7d4   : > { %12570 = vmatpush3.bf16.msra.mxu0 %v12569_v7  ;;  %v12650_v7 = vpack.c.bf16 %v11046_v35, %v11045_v29 }
 0x7d5   : > { %12571 = vmatprep.subr.bf16.mxu0 %v13075_v40 }
 0x7d6   : > { %12642 = vmatpush3.bf16.msra.mxu1 %v12641_v14 }
 0x7d7   : > { %12643 = vmatprep.subr.bf16.mxu1 %v13075_v40 }
 0x7d8   : > { %12573 = vmatpush3.bf16.msra.mxu0 %v12572_v39 }
 0x7d9   : > { %12574 = vmatprep.subr.bf16.mxu0 %v13075_v40 }
 0x7da   : > { %12645 = vmatpush3.bf16.msra.mxu1 %v12644_v32 }
 0x7db   : > { %12646 = vmatprep.subr.bf16.mxu1 %v13075_v40 }
 0x7dc   : > { %12576 = vmatpush3.bf16.msra.mxu0 %v12575_v43 }
 0x7dd   : > { %12577 = vmatprep.subr.bf16.mxu0 %v13075_v40 }
 0x7de   : > { %12648 = vmatpush3.bf16.msra.mxu1 %v12647_v63 }
 0x7df   : > { %12649 = vmatprep.subr.bf16.mxu1 %v13075_v40 }
 0x7e0   : > { %12579 = vmatpush3.bf16.msra.mxu0 %v12578_v41 }
 0x7e1   : > { %12604 = vmatprep.subr.bf16.mxu0 %v13075_v40 }
 0x7e2   : > { %12651 = vmatpush3.bf16.msra.mxu1 %v12650_v7 }
 0x7e3   : > { %12177 = vmatmul.mubr.f32.vlgmr.msra.gmra.mrb[18].mxu0 %v10770_v51 }
 0x7e4   : > { %12606 = vmatpush3.bf16.msra.mxu0 %v12605_v50  ;;  %12246 = vmatprep.mubr.msk.f32.mxu0 %vm13061_vm2, %v13042_v0  ;;  %v11467_v0 = vld [vmem:[%s15753_s9 + $0x3b8] sm:$0xff] }
 0x7e5   : > { %12607 = vmatprep.subr.bf16.mxu0 %v13075_v40  ;;  %v12614_v24 = vpack.c.bf16 %v11467_v0, %v11466_v44 }
 0x7e8   : > { %12609 = vmatpush3.bf16.msra.mxu0 %v12608_v53 }
 0x7e9   : > { %12610 = vmatprep.subr.bf16.mxu0 %v13075_v40 }
 0x7ec   : > { %12612 = vmatpush3.bf16.msra.mxu0 %v12611_v26 }
 0x7ed   : > { %12613 = vmatprep.subr.bf16.mxu0 %v13075_v40 }
 0x7f0   : > { %12615 = vmatpush3.bf16.msra.mxu0 %v12614_v24 }
 0x7f1   : > { %12616 = vmatprep.subr.bf16.mxu0 %v13075_v40 }
 0x7f4   : > { %12618 = vmatpush3.bf16.msra.mxu0 %v12617_v58  ;;  %v11047_v58 = vld [vmem:[%s15877_s28] sm:$0x1] }
 0x7f5   : > { %12619 = vmatprep.subr.bf16.mxu0 %v13075_v40 }
 0x7f8   : > { %12621 = vmatpush3.bf16.msra.mxu0 %v12620_v36 }
 0x7f9   : > { %12622 = vmatprep.subr.bf16.mxu0 %v13075_v40 }
 0x7fc   : > { %12624 = vmatpush3.bf16.msra.mxu0 %v12623_v60 }
 0x7fd   : > { %12625 = vmatprep.subr.bf16.mxu0 %v13075_v40 }
 0x800   : > { %12627 = vmatpush3.bf16.msra.mxu0 %v12626_v11 }
 0x803   : > { %12247 = vmatmul.mubr.f32.vlgmr.msra.gmra.mrb[20].mxu0 %v10950_v46 }
 0x856   : > { %v10409_v15 = vpop.f32.mrb[12].mxu0  ;;  %v10568_v3 = vpop.f32.mrb[10].mxu1 }
 0x857   : > { %v12003_v13 = vpop.f32.mrb[13].mxu0  ;;  %v12073_v1 = vpop.f32.mrb[11].mxu1 }
 0x876   : > { %v10479_v57 = vpop.f32.mrb[14].mxu0  ;;  %v10748_v38 = vpop.f32.mrb[12].mxu1 }
 0x877   : > { %v10480_v39 = vadd.f32 %v10479_v57, %v10409_v15  ;;  %v12038_v28 = vpop.f32.mrb[15].mxu0  ;;  %v12143_v9 = vpop.f32.mrb[13].mxu1 }
 0x879   : > { %v10572_v43 = vadd.f32 %v10568_v3, %v10480_v39 }
 0x896   : > { %v10658_v45 = vpop.f32.mrb[16].mxu0  ;;  %v10928_v4 = vpop.f32.mrb[14].mxu1 }
 0x897   : > { %v10662_v41 = vadd.f32 %v10658_v45, %v10572_v43  ;;  %v12108_v59 = vpop.f32.mrb[17].mxu0  ;;  %v12213_v37 = vpop.f32.mrb[15].mxu1 }
 0x899   : > { %v10752_v50 = vadd.f32 %v10748_v38, %v10662_v41 }
 0x8b6   : > { %v10838_v51 = vpop.f32.mrb[18].mxu0 }
 0x8b7   : > { %v10842_v52 = vadd.f32 %v10838_v51, %v10752_v50  ;;  %v12178_v42 = vpop.f32.mrb[19].mxu0 }
 0x8b9   : > { %v10932_v53 = vadd.f32 %v10928_v4, %v10842_v52 }
 0x8d6   : > { %v11018_v40 = vpop.f32.mrb[20].mxu0 }
 0x8d7   : > { %v11022_v49 = vadd.f32 %v11018_v40, %v10932_v53  ;;  %v12248_v26 = vpop.f32.mrb[21].mxu0 }
 0x8d9   : > { %v11024_v44 = vadd.f32 %v11023_v22, %v11022_v49 }
 0x8db   : > { %v11476_v0 = vmul.f32 -1.442695, %v11024_v44 }
 0x8dd   : > { %12974 = vpow2.f32 %v11476_v0 }
 0x8e7   : > { %v12975_v24 = vpop.eup %12974 }
 0x8e8   : > { %v11028_v18 = vadd.f32 1.0, %v12975_v24 }
 0x8ea   : > { %12976 = vrcp.f32 %v11028_v18 }
 0x8f4   : > { %v12977_v21 = vpop.eup %12976 }
 0x8f5   : > { %12282 = vmatmul.mubr.f32.vlgmr.msra.gmra.mrb[16].mxu1 %v12977_v21 }
 0x9c8   : > { %v11114_v2 = vpop.f32.mrb[16].mxu1 }
 0x9c9   : > { %v11115_v30 = vadd.f32 %v11114_v2, %v11047_v58  ;;  %v12283_v36 = vpop.f32.mrb[17].mxu1 }
 0x9cb   : > { %11118 = vst [vmem:[%s432_s19] sm:$0x1] %v11115_v30 }
 0x9cc   : > { %12991 = shalt.err (!%p12988_p3)
}
 0x9cd   : > { %s12992_s1 = scalar_lea.hbm %s15702_s12, 16  ;;  %s12996_s22 = scalar_lea.hbm %s15878_s29, 32 }
 0x9ce   : > { %p12993_p4 = scmp.ne.s32.totalorder %s15702_s12, %s12992_s1  ;;  %p12997_p9 = scmp.lt.u32.totalorder %s15702_s12, %s15878_s29 }
 0x9cf   : > { %p12998_p10 = scmp.lt.u32.totalorder %s12996_s22, %s12992_s1  ;;  %p13000_p12 = scmp.lt.u32.totalorder %s12992_s1, %s15702_s12 }
 0x9d0   : > { %p12994_p7 = pnand %p12993_p4, %p13185_p5 }
 0x9d1   : > { %p12999_p11 = por %p12998_p10, %p12997_p9 }
 0x9d2   : > { %p12995_p8 = pneg %p12994_p7 }
 0x9d3   : > { %p13001_p13 = por %p13000_p12, %p12999_p11 }
 0x9d5   : > { %p13002_p0 = pnand %p13001_p13, %p12995_p8 }
 0x9d7   : > { %13005 = shalt.err (!%p13002_p0)
}
 0x9d8   : > { %12873 = dma.vmem_to_hbm [thread:$0]  (%p13185_p5), %s15704_s18, 16, %s15702_s12, %s11120_s10  }
 0x9d9 PF: > { %s15879_s24 = sld [smem:[#allocation10_spill]]  ;;  %s15880_s27 = sld [smem:[#allocation7_spill]] }
 0x9df   : > { %p12879_p1 = scmp.ge.s32.totalorder %s15879_s24, 2  ;;  %s11144_s28 = sand.u32 1, %s15880_s27  }
 0x9e0   : > { %s11145_s13 = scalar_lea.sflag [#allocation5], %s11144_s28 }
 0x9e1   : > { %p12876_p2 = pnand %p12879_p1, %p13189_p6 }
 0x9e3   : > { %13023 = dma.done.wait (!%p12876_p2), %s11145_s13, 16  }
 0x9e4   : > { %13025 = vsyncadd (!%p12876_p2), %s11145_s13, 4294967280  ;;  %s15882_s28 = sld [smem:[#allocation12_spill]]  ;;  %s15883_s25 = sld [smem:[#allocation8_spill]] }
 0x9e5   : > { %s15884_s26 = sld [smem:[#allocation9_spill]]  ;;  %s15885_s27 = sld [smem:[#allocation13_spill]] }
 0x9ea   : > { %p23_p3 = scmp.ge.s32.totalorder %s15882_s28, 4  }
 0x9ec   :  { %25 = sbr.rel (!%p23_p3) target bundleno = 10 (0xa), region = 160 }
 0x9f3   :  { %11149 = vsyncpa [#allocation5], 1 }
 0x9f4   :  { %11151 = vsyncpa [#allocation5 + $0x1], 1 }

</bundles_post_ra>
